<compile_context>
chip_gen: v6e
topology: v6e:2x2x1
jax: 0.10.0
libtpu: 0.0.40
codegen_flags: <defaults>
</compile_context>

<pallas_src>
import functools

import jax
import jax.numpy as jnp
from jax.experimental import pallas as pl
from jax.experimental.pallas import tpu as pltpu

LANE = 128          # padded hidden width (lanes) for every stack
GATES = 4 * LANE    # gate layout [i | f | g | o], each 128 lanes
SUBLANE = 8


# ----------------------------------------------------------------------------
# Fused kernel: everything VMEM-resident, in-kernel time loop.
# PyTorch gate order [i, f, g, o];  c' = f*c + i*g ; h' = o*tanh(c').
# ----------------------------------------------------------------------------
def _fused_lstm_kernel(xlen_ref, xy_ref,
                       wih_m_ref, whh_m_ref, b_m_ref,
                       wih_c_hbm, whh_c_hbm, b_c_hbm,
                       out_ref,
                       work_a, work_b, merged_out, xg_sc,
                       wih_c_vmem, whh_c_vmem, b_c_vmem, dma_sem):
    T, Bp, _ = xy_ref.shape
    xlen = xlen_ref[...]                       # (Bp, LANE) int32, lane-broadcast
    unroll = max(1, min(int(T), 8))            # partial unroll for larger T

    # Kick off the lstm_con weight DMAs so they overlap the merged recurrence.
    cp_w = pltpu.make_async_copy(wih_c_hbm, wih_c_vmem, dma_sem.at[0])
    cp_u = pltpu.make_async_copy(whh_c_hbm, whh_c_vmem, dma_sem.at[1])
    cp_b = pltpu.make_async_copy(b_c_hbm, b_c_vmem, dma_sem.at[2])
    cp_w.start()
    cp_u.start()
    cp_b.start()

    def run_layer(src_ref, dst_ref, wih, whh, bias, masked):
        # Hoisted input projection: one big bf16 MXU matmul for all timesteps.
        x_all = src_ref[...]                                        # (T, Bp, LANE)
        proj = jnp.dot(x_all.reshape(T * Bp, LANE).astype(jnp.bfloat16), wih,
                       preferred_element_type=jnp.float32)          # (T*Bp, GATES)
        xg_sc[...] = proj.reshape(T, Bp, GATES) + bias[None]        # + (1,1,GATES)

        def step(t, carry):
            h, c = carry                                            # f32 vreg carries
            gates = xg_sc[t] + jnp.dot(h.astype(jnp.bfloat16), whh,
                                       preferred_element_type=jnp.float32)
            i_g = jax.nn.sigmoid(gates[:, 0 * LANE:1 * LANE])
            f_g = jax.nn.sigmoid(gates[:, 1 * LANE:2 * LANE])
            g_g = jnp.tanh(gates[:, 2 * LANE:3 * LANE])
            o_g = jax.nn.sigmoid(gates[:, 3 * LANE:4 * LANE])
            c_cand = f_g * c + i_g * g_g
            h_cand = o_g * jnp.tanh(c_cand)
            if masked:
                m = t < xlen                                        # (Bp, LANE) bool
                c_new = jnp.where(m, c_cand, c)
                h_new = jnp.where(m, h_cand, h)
                dst_ref[t] = jnp.where(m, h_cand, 0.0)              # full 128 lanes
            else:
                c_new, h_new = c_cand, h_cand
                dst_ref[t] = h_cand
            return (h_new, c_new)

        zeros = jnp.zeros((Bp, LANE), jnp.float32)
        jax.lax.fori_loop(0, T, step, (zeros, zeros), unroll=unroll)

    def run_stack(in_ref, wih_ref, whh_ref, b_ref, masked, final_dst):
        num_layers = wih_ref.shape[0]
        src = in_ref
        for l in range(num_layers):
            if l == num_layers - 1:
                dst = final_dst
            else:
                dst = work_a if (l % 2 == 0) else work_b
            run_layer(src, dst, wih_ref[l], whh_ref[l], b_ref[l], masked)
            src = dst

    # Merged node+time stack (packed/masked).  Its final hidden slab IS
    # in_sec = concat(out_x, out_y): node units at lanes [0,100), time at 100.
    run_stack(xy_ref, wih_m_ref, whh_m_ref, b_m_ref, masked=True,
              final_dst=merged_out)

    # lstm_con weights must be resident before the con stack starts.
    cp_w.wait()
    cp_u.wait()
    cp_b.wait()

    # lstm_con (not packed): final layer writes the kernel output directly.
    run_stack(merged_out, wih_c_vmem, whh_c_vmem, b_c_vmem, masked=False,
              final_dst=out_ref)


# ----------------------------------------------------------------------------
# Parameter init (PyTorch-style uniform(-1/sqrt(H), 1/sqrt(H))) + padding into
# the fused-kernel layout.
# ----------------------------------------------------------------------------
def init_raw_lstm_params(key, input_size, hidden_size, num_layers):
    """Raw PyTorch layout per layer: (W_ih (4H,In), W_hh (4H,H), b_ih+b_hh (4H,))."""
    params = []
    bound = 1.0 / float(hidden_size) ** 0.5
    for layer in range(num_layers):
        in_l = input_size if layer == 0 else hidden_size
        key, k1, k2, k3, k4 = jax.random.split(key, 5)
        wih = jax.random.uniform(k1, (4 * hidden_size, in_l),
                                 minval=-bound, maxval=bound, dtype=jnp.float32)
        whh = jax.random.uniform(k2, (4 * hidden_size, hidden_size),
                                 minval=-bound, maxval=bound, dtype=jnp.float32)
        bih = jax.random.uniform(k3, (4 * hidden_size,),
                                 minval=-bound, maxval=bound, dtype=jnp.float32)
        bhh = jax.random.uniform(k4, (4 * hidden_size,),
                                 minval=-bound, maxval=bound, dtype=jnp.float32)
        params.append((wih, whh, bih + bhh))
    return params, key


def quantize_raw_bf16(raw_params):
    """Round-trip the matmul weights through bf16 (kernel uses bf16 MXU path)."""
    return [(wih.astype(jnp.bfloat16).astype(jnp.float32),
             whh.astype(jnp.bfloat16).astype(jnp.float32),
             b) for (wih, whh, b) in raw_params]


def pad_stack(raw_params, hid_offset):
    """Zero-pad one LSTM stack: bf16 (L,LANE,GATES) weights + f32 (L,1,GATES) bias.

    The H real hidden units occupy lanes [hid_offset, hid_offset+H) of each
    128-lane gate chunk; layer-0 input features occupy lanes [0, In).  All
    padding is exactly zero so padded h/c lanes stay zero through the recurrence.
    """
    H = raw_params[0][1].shape[1]
    assert hid_offset + H <= LANE
    wih_l, whh_l, b_l = [], [], []
    for l, (wih, whh, b) in enumerate(raw_params):
        in_l = wih.shape[1]
        in_off = 0 if l == 0 else hid_offset
        assert in_off + in_l <= LANE
        wih_p = jnp.zeros((LANE, GATES), jnp.float32)
        whh_p = jnp.zeros((LANE, GATES), jnp.float32)
        b_p = jnp.zeros((GATES,), jnp.float32)
        for g in range(4):
            col0 = g * LANE + hid_offset
            wih_p = wih_p.at[in_off:in_off + in_l, col0:col0 + H].set(
                wih[g * H:(g + 1) * H, :].T)
            whh_p = whh_p.at[hid_offset:hid_offset + H, col0:col0 + H].set(
                whh[g * H:(g + 1) * H, :].T)
            b_p = b_p.at[col0:col0 + H].set(b[g * H:(g + 1) * H])
        wih_l.append(wih_p)
        whh_l.append(whh_p)
        b_l.append(b_p[None, :])
    return (jnp.stack(wih_l).astype(jnp.bfloat16),
            jnp.stack(whh_l).astype(jnp.bfloat16),
            jnp.stack(b_l))                                  # (L,1,GATES) f32


def pad_merged_stack(raw_node, raw_time, input_size):
    """Block-diagonal merge of the node (H=100) and time (H=1) LSTM stacks.

    Hidden layout per 128-lane gate chunk: node at lanes [0,100), the single
    time unit at lane 100.  Layer-0 inputs: x features at lanes [0,input_size),
    the y feature at lane input_size.  Rows/cols of the two stacks are disjoint
    and all padding is zero, so one recurrence computes both stacks exactly and
    its output slab equals concat(out_x, out_y).
    """
    Hn = raw_node[0][1].shape[1]
    Ht = raw_time[0][1].shape[1]
    assert Hn + Ht <= LANE and input_size + 1 <= LANE
    num_layers = len(raw_node)
    assert len(raw_time) == num_layers
    wih_l, whh_l, b_l = [], [], []
    for l in range(num_layers):
        wn, un, bn = raw_node[l]
        wt, ut, bt = raw_time[l]
        in_n, in_t = wn.shape[1], wt.shape[1]
        t_in_off = input_size if l == 0 else Hn
        wih_p = jnp.zeros((LANE, GATES), jnp.float32)
        whh_p = jnp.zeros((LANE, GATES), jnp.float32)
        b_p = jnp.zeros((GATES,), jnp.float32)
        for g in range(4):
            cn = g * LANE            # node gate columns
            ct = g * LANE + Hn       # time gate columns
            wih_p = wih_p.at[0:in_n, cn:cn + Hn].set(wn[g * Hn:(g + 1) * Hn, :].T)
            wih_p = wih_p.at[t_in_off:t_in_off + in_t, ct:ct + Ht].set(
                wt[g * Ht:(g + 1) * Ht, :].T)
            whh_p = whh_p.at[0:Hn, cn:cn + Hn].set(un[g * Hn:(g + 1) * Hn, :].T)
            whh_p = whh_p.at[Hn:Hn + Ht, ct:ct + Ht].set(ut[g * Ht:(g + 1) * Ht, :].T)
            b_p = b_p.at[cn:cn + Hn].set(bn[g * Hn:(g + 1) * Hn])
            b_p = b_p.at[ct:ct + Ht].set(bt[g * Ht:(g + 1) * Ht])
        wih_l.append(wih_p)
        whh_l.append(whh_p)
        b_l.append(b_p[None, :])
    return (jnp.stack(wih_l).astype(jnp.bfloat16),
            jnp.stack(whh_l).astype(jnp.bfloat16),
            jnp.stack(b_l))                                  # (L,1,GATES) f32


# ----------------------------------------------------------------------------
# Model forward: wrapper does layout (pad / transpose), kernel does everything.
# ----------------------------------------------------------------------------
def model_forward_pallas(x, y, x_len, merged_params, con_params, hidden_con):
    B, T, input_size = x.shape
    Bp = ((B + SUBLANE - 1) // SUBLANE) * SUBLANE

    x_tm = jnp.transpose(x, (1, 0, 2)).astype(jnp.float32)          # (T, B, in)
    y_tm = jnp.transpose(y, (1, 0, 2)).astype(jnp.float32)          # (T, B, 1)
    # Single packed input slab: x at lanes [0,input_size), y at lane input_size.
    xy_pad = (jnp.zeros((T, Bp, LANE), jnp.float32)
              .at[:, :B, :input_size].set(x_tm)
              .at[:, :B, input_size:input_size + 1].set(y_tm))
    xlen_pad = jnp.zeros((Bp,), jnp.int32).at[:B].set(x_len.astype(jnp.int32))
    xlen_b = jnp.broadcast_to(xlen_pad[:, None], (Bp, LANE))

    wm, um, bm = merged_params
    wc, uc, bc = con_params

    vmem_spec = pl.BlockSpec(memory_space=pltpu.MemorySpace.VMEM)
    hbm_spec = pl.BlockSpec(memory_space=pl.ANY)    # con weights: manual async DMA

    out_pad = pl.pallas_call(
        _fused_lstm_kernel,
        out_shape=jax.ShapeDtypeStruct((T, Bp, LANE), jnp.float32),
        in_specs=[vmem_spec, vmem_spec,                 # xlen, xy slab
                  vmem_spec, vmem_spec, vmem_spec,      # merged node+time weights
                  hbm_spec, hbm_spec, hbm_spec],        # con weights (HBM, overlapped)
        out_specs=vmem_spec,
        scratch_shapes=[
            pltpu.VMEM((T, Bp, LANE), jnp.float32),     # work_a (ping-pong slab)
            pltpu.VMEM((T, Bp, LANE), jnp.float32),     # work_b (ping-pong slab)
            pltpu.VMEM((T, Bp, LANE), jnp.float32),     # merged_out == in_sec slab
            pltpu.VMEM((T, Bp, GATES), jnp.float32),    # hoisted input-gate slab
            pltpu.VMEM(wc.shape, jnp.bfloat16),         # con W_ih VMEM landing
            pltpu.VMEM(uc.shape, jnp.bfloat16),         # con W_hh VMEM landing
            pltpu.VMEM(bc.shape, jnp.float32),          # con bias VMEM landing
            pltpu.SemaphoreType.DMA((3,)),              # one sem per con-weight DMA
        ],
    )(xlen_b, xy_pad, wm, um, bm, wc, uc, bc)

    out = out_pad[:, :B, :hidden_con]                   # (T, B, input_size+1)
    return jnp.transpose(out, (1, 0, 2))                # (B, T, input_size+1)


# ----------------------------------------------------------------------------
# Pure-JAX reference (lax.scan) for validation, built from the raw params.
# ----------------------------------------------------------------------------
def _ref_lstm_layer(x_tm, mask_tm, wih_t, whh_t, b):
    T, B, _ = x_tm.shape
    H = whh_t.shape[0]

    def step(carry, inp):
        h, c = carry
        x_t, m = inp
        gates = x_t @ wih_t + h @ whh_t + b
        i_g = jax.nn.sigmoid(gates[:, 0:H])
        f_g = jax.nn.sigmoid(gates[:, H:2 * H])
        g_g = jnp.tanh(gates[:, 2 * H:3 * H])
        o_g = jax.nn.sigmoid(gates[:, 3 * H:4 * H])
        c_cand = f_g * c + i_g * g_g
        h_cand = o_g * jnp.tanh(c_cand)
        return (m * h_cand + (1 - m) * h, m * c_cand + (1 - m) * c), m * h_cand

    init = (jnp.zeros((B, H), jnp.float32), jnp.zeros((B, H), jnp.float32))
    _, outs = jax.lax.scan(step, init, (x_tm, mask_tm))
    return outs


def _ref_multilayer(x_tm, mask_tm, params):
    out = x_tm
    for (wih_t, whh_t, b) in params:
        out = _ref_lstm_layer(out, mask_tm, wih_t, whh_t, b)
    return out


def model_forward_ref(x, y, x_len, raw_node, raw_time, raw_con):
    to_ref = lambda raw: [(w.T, u.T, bb[None, :]) for (w, u, bb) in raw]
    B, T, _ = x.shape
    x_tm = jnp.transpose(x, (1, 0, 2)).astype(jnp.float32)
    y_tm = jnp.transpose(y, (1, 0, 2)).astype(jnp.float32)
    mask = (jnp.arange(T)[:, None] < x_len[None, :]).astype(jnp.float32)[:, :, None]
    ones_mask = jnp.ones((T, B, 1), jnp.float32)
    out_x = _ref_multilayer(x_tm, mask, to_ref(raw_node))
    out_y = _ref_multilayer(y_tm, mask, to_ref(raw_time))
    in_sec = jnp.concatenate([out_x, out_y], axis=-1)
    out = _ref_multilayer(in_sec, ones_mask, to_ref(raw_con))
    return jnp.transpose(out, (1, 0, 2))


if __name__ == "__main__":
    # Small, module-consistent shapes.
    B, T = 2, 8
    input_size = 4
    num_layers = 2
    num_keys = 10          # only used by the unused/broken fc_con; kept for fidelity

    hidden_node = 100
    hidden_time = 1
    hidden_con = input_size + 1

    key = jax.random.PRNGKey(0)
    key, kx, ky = jax.random.split(key, 3)
    x = jax.random.normal(kx, (B, T, input_size), dtype=jnp.float32)
    y = jax.random.normal(ky, (B, T, 1), dtype=jnp.float32)
    x_len = jnp.array([T, 5], dtype=jnp.int32)   # sorted descending (packing convention)

    raw_node, key = init_raw_lstm_params(key, input_size, hidden_node, num_layers)
    raw_time, key = init_raw_lstm_params(key, 1, hidden_time, num_layers)
    raw_con, key = init_raw_lstm_params(key, hidden_node + hidden_time,
                                        hidden_con, num_layers)

    # Kernel runs the MXU in bf16: round-trip the weights through bf16 once so
    # the pure-JAX reference and the kernel share identical parameters (the
    # remaining delta is only the in-kernel bf16 cast of the activations).
    raw_node = quantize_raw_bf16(raw_node)
    raw_time = quantize_raw_bf16(raw_time)
    raw_con = quantize_raw_bf16(raw_con)

    merged_params = pad_merged_stack(raw_node, raw_time, input_size)
    con_params = pad_stack(raw_con, hid_offset=0)

    fwd = jax.jit(functools.partial(model_forward_pallas,
                                    merged_params=merged_params,
                                    con_params=con_params,
                                    hidden_con=hidden_con))
    out = fwd(x, y, x_len)
    jax.block_until_ready(out)

    ref = model_forward_ref(x, y, x_len, raw_node, raw_time, raw_con)
    assert out.shape == (B, T, hidden_con), out.shape
    max_err = float(jnp.max(jnp.abs(out - ref)))
    assert jnp.allclose(out, ref, atol=2e-2, rtol=2e-2), \
        f"mismatch vs JAX reference (max abs err {max_err})"

    print("KERNEL_OK")
</pallas_src>

<mosaic_0001>
module attributes {stable_mosaic.version = 11 : i64} {
  func.func @_fused_lstm_kernel(%arg0: memref<8x128xi32, #tpu.memory_space<vmem>>, %arg1: memref<8x8x128xf32, #tpu.memory_space<vmem>>, %arg2: memref<2x128x512xbf16, #tpu.memory_space<vmem>>, %arg3: memref<2x128x512xbf16, #tpu.memory_space<vmem>>, %arg4: memref<2x1x512xf32, #tpu.memory_space<vmem>>, %arg5: memref<2x128x512xbf16, #tpu.memory_space<any>>, %arg6: memref<2x128x512xbf16, #tpu.memory_space<any>>, %arg7: memref<2x1x512xf32, #tpu.memory_space<any>>, %arg8: memref<8x8x128xf32, #tpu.memory_space<vmem>>, %arg9: memref<8x8x128xf32, #tpu.memory_space<vmem>>, %arg10: memref<8x8x128xf32, #tpu.memory_space<vmem>>, %arg11: memref<8x8x128xf32, #tpu.memory_space<vmem>>, %arg12: memref<8x8x512xf32, #tpu.memory_space<vmem>>, %arg13: memref<2x128x512xbf16, #tpu.memory_space<vmem>>, %arg14: memref<2x128x512xbf16, #tpu.memory_space<vmem>>, %arg15: memref<2x1x512xf32, #tpu.memory_space<vmem>>, %arg16: memref<3x!tpu.dma_semaphore, #tpu.memory_space<semaphore_mem>>) attributes {dimension_semantics = [], scalar_prefetch = 0 : i64, scratch_operands = 8 : i64, tpu.core_type = #tpu.core_type<tc>} {
    %c0 = arith.constant 0 : index
    %c0_0 = arith.constant 0 : index
    %0 = vector.load %arg0[%c0, %c0_0] : memref<8x128xi32, #tpu.memory_space<vmem>>, vector<8x128xi32>
    %c0_i32 = arith.constant 0 : i32
    %1 = tpu.memref_slice %arg16[%c0_i32] : memref<3x!tpu.dma_semaphore, #tpu.memory_space<semaphore_mem>> -> memref<1x!tpu.dma_semaphore, #tpu.memory_space<semaphore_mem>>
    %2 = tpu.memref_squeeze %1 : memref<1x!tpu.dma_semaphore, #tpu.memory_space<semaphore_mem>> -> memref<!tpu.dma_semaphore, #tpu.memory_space<semaphore_mem>>
    tpu.enqueue_dma source(%arg5 : memref<2x128x512xbf16, #tpu.memory_space<any>>) target(%arg13 : memref<2x128x512xbf16, #tpu.memory_space<vmem>>) target_semaphore(%2 : memref<!tpu.dma_semaphore, #tpu.memory_space<semaphore_mem>>)
    %c1_i32 = arith.constant 1 : i32
    %3 = tpu.memref_slice %arg16[%c1_i32] : memref<3x!tpu.dma_semaphore, #tpu.memory_space<semaphore_mem>> -> memref<1x!tpu.dma_semaphore, #tpu.memory_space<semaphore_mem>>
    %4 = tpu.memref_squeeze %3 : memref<1x!tpu.dma_semaphore, #tpu.memory_space<semaphore_mem>> -> memref<!tpu.dma_semaphore, #tpu.memory_space<semaphore_mem>>
    tpu.enqueue_dma source(%arg6 : memref<2x128x512xbf16, #tpu.memory_space<any>>) target(%arg14 : memref<2x128x512xbf16, #tpu.memory_space<vmem>>) target_semaphore(%4 : memref<!tpu.dma_semaphore, #tpu.memory_space<semaphore_mem>>)
    %c2_i32 = arith.constant 2 : i32
    %5 = tpu.memref_slice %arg16[%c2_i32] : memref<3x!tpu.dma_semaphore, #tpu.memory_space<semaphore_mem>> -> memref<1x!tpu.dma_semaphore, #tpu.memory_space<semaphore_mem>>
    %6 = tpu.memref_squeeze %5 : memref<1x!tpu.dma_semaphore, #tpu.memory_space<semaphore_mem>> -> memref<!tpu.dma_semaphore, #tpu.memory_space<semaphore_mem>>
    tpu.enqueue_dma source(%arg7 : memref<2x1x512xf32, #tpu.memory_space<any>>) target(%arg15 : memref<2x1x512xf32, #tpu.memory_space<vmem>>) target_semaphore(%6 : memref<!tpu.dma_semaphore, #tpu.memory_space<semaphore_mem>>)
    %c0_1 = arith.constant 0 : index
    %c0_2 = arith.constant 0 : index
    %c0_3 = arith.constant 0 : index
    %7 = vector.load %arg2[%c0_1, %c0_2, %c0_3] : memref<2x128x512xbf16, #tpu.memory_space<vmem>>, vector<1x128x512xbf16>
    %8 = vector.shape_cast %7 : vector<1x128x512xbf16> to vector<128x512xbf16>
    %c0_4 = arith.constant 0 : index
    %c0_5 = arith.constant 0 : index
    %c0_6 = arith.constant 0 : index
    %9 = vector.load %arg3[%c0_4, %c0_5, %c0_6] : memref<2x128x512xbf16, #tpu.memory_space<vmem>>, vector<1x128x512xbf16>
    %10 = vector.shape_cast %9 : vector<1x128x512xbf16> to vector<128x512xbf16>
    %c0_7 = arith.constant 0 : index
    %c0_8 = arith.constant 0 : index
    %c0_9 = arith.constant 0 : index
    %11 = vector.load %arg4[%c0_7, %c0_8, %c0_9] : memref<2x1x512xf32, #tpu.memory_space<vmem>>, vector<1x1x512xf32>
    %12 = vector.shape_cast %11 : vector<1x1x512xf32> to vector<1x512xf32>
    %c0_10 = arith.constant 0 : index
    %c0_11 = arith.constant 0 : index
    %c0_12 = arith.constant 0 : index
    %13 = vector.load %arg1[%c0_10, %c0_11, %c0_12] : memref<8x8x128xf32, #tpu.memory_space<vmem>>, vector<8x8x128xf32>
    %14 = vector.shape_cast %13 : vector<8x8x128xf32> to vector<64x128xf32>
    %15 = arith.truncf %14 : vector<64x128xf32> to vector<64x128xbf16>
    %cst = arith.constant dense<0.000000e+00> : vector<64x512xf32>
    %16 = tpu.matmul %15, %8, %cst {dimension_numbers = #tpu.dot_dimension_numbers<[1], [0], [0], [1], [0, 0, 1, 1], [], []>} : vector<64x128xbf16>, vector<128x512xbf16>, vector<64x512xf32> -> vector<64x512xf32>
    %17 = vector.shape_cast %16 : vector<64x512xf32> to vector<8x8x512xf32>
    %18 = vector.shape_cast %12 : vector<1x512xf32> to vector<1x1x512xf32>
    %19 = vector.broadcast %18 : vector<1x1x512xf32> to vector<8x8x512xf32>
    %20 = arith.addf %17, %19 : vector<8x8x512xf32>
    %c0_13 = arith.constant 0 : index
    %c0_14 = arith.constant 0 : index
    %c0_15 = arith.constant 0 : index
    %21 = vector.load %arg12[%c0_13, %c0_14, %c0_15] : memref<8x8x512xf32, #tpu.memory_space<vmem>>, vector<8x8x512xf32>
    tpu.vector_store %arg12[%c0_13, %c0_14, %c0_15], %20 {strides = array<i32>} : memref<8x8x512xf32, #tpu.memory_space<vmem>>, vector<8x8x512xf32>,
    %cst_16 = arith.constant 0.000000e+00 : f32
    %22 = vector.broadcast %cst_16 : f32 to vector<8x128xf32>
    %c0_i32_17 = arith.constant 0 : i32
    %23 = arith.index_cast %c0_i32_17 : i32 to index
    %c0_18 = arith.constant 0 : index
    %c0_19 = arith.constant 0 : index
    %24 = vector.load %arg12[%23, %c0_18, %c0_19] : memref<8x8x512xf32, #tpu.memory_space<vmem>>, vector<1x8x512xf32>
    %25 = vector.shape_cast %24 : vector<1x8x512xf32> to vector<8x512xf32>
    %26 = arith.truncf %22 : vector<8x128xf32> to vector<8x128xbf16>
    %cst_20 = arith.constant dense<0.000000e+00> : vector<8x512xf32>
    %27 = tpu.matmul %26, %10, %cst_20 {dimension_numbers = #tpu.dot_dimension_numbers<[1], [0], [0], [1], [0, 0, 1, 1], [], []>} : vector<8x128xbf16>, vector<128x512xbf16>, vector<8x512xf32> -> vector<8x512xf32>
    %28 = arith.addf %25, %27 : vector<8x512xf32>
    %29 = vector.extract_strided_slice %28 {offsets = [0, 0], sizes = [8, 128], strides = [1, 1]} : vector<8x512xf32> to vector<8x128xf32>
    %30 = arith.negf %29 : vector<8x128xf32>
    %31 = math.exp %30 : vector<8x128xf32>
    %cst_21 = arith.constant 1.000000e+00 : f32
    %32 = vector.broadcast %cst_21 : f32 to vector<8x128xf32>
    %33 = arith.addf %32, %31 : vector<8x128xf32>
    %34 = arith.divf %32, %33 : vector<8x128xf32>
    %35 = vector.extract_strided_slice %28 {offsets = [0, 128], sizes = [8, 128], strides = [1, 1]} : vector<8x512xf32> to vector<8x128xf32>
    %36 = arith.negf %35 : vector<8x128xf32>
    %37 = math.exp %36 : vector<8x128xf32>
    %cst_22 = arith.constant 1.000000e+00 : f32
    %38 = vector.broadcast %cst_22 : f32 to vector<8x128xf32>
    %39 = arith.addf %38, %37 : vector<8x128xf32>
    %40 = arith.divf %38, %39 : vector<8x128xf32>
    %41 = vector.extract_strided_slice %28 {offsets = [0, 256], sizes = [8, 128], strides = [1, 1]} : vector<8x512xf32> to vector<8x128xf32>
    %42 = math.tanh %41 : vector<8x128xf32>
    %43 = vector.extract_strided_slice %28 {offsets = [0, 384], sizes = [8, 128], strides = [1, 1]} : vector<8x512xf32> to vector<8x128xf32>
    %44 = arith.negf %43 : vector<8x128xf32>
    %45 = math.exp %44 : vector<8x128xf32>
    %cst_23 = arith.constant 1.000000e+00 : f32
    %46 = vector.broadcast %cst_23 : f32 to vector<8x128xf32>
    %47 = arith.addf %46, %45 : vector<8x128xf32>
    %48 = arith.divf %46, %47 : vector<8x128xf32>
    %49 = arith.mulf %40, %22 : vector<8x128xf32>
    %50 = arith.mulf %34, %42 : vector<8x128xf32>
    %51 = arith.addf %49, %50 : vector<8x128xf32>
    %52 = math.tanh %51 : vector<8x128xf32>
    %53 = arith.mulf %48, %52 : vector<8x128xf32>
    %54 = vector.broadcast %c0_i32_17 : i32 to vector<8x128xi32>
    %55 = arith.cmpi slt, %54, %0 : vector<8x128xi32>
    %56 = arith.select %55, %51, %22 : vector<8x128xi1>, vector<8x128xf32>
    %57 = arith.select %55, %53, %22 : vector<8x128xi1>, vector<8x128xf32>
    %cst_24 = arith.constant 0.000000e+00 : f32
    %58 = vector.broadcast %cst_24 : f32 to vector<8x128xf32>
    %59 = arith.select %55, %53, %58 : vector<8x128xi1>, vector<8x128xf32>
    %60 = arith.index_cast %c0_i32_17 : i32 to index
    %c0_25 = arith.constant 0 : index
    %c0_26 = arith.constant 0 : index
    %61 = vector.load %arg9[%60, %c0_25, %c0_26] : memref<8x8x128xf32, #tpu.memory_space<vmem>>, vector<1x8x128xf32>
    %62 = vector.shape_cast %61 : vector<1x8x128xf32> to vector<8x128xf32>
    %63 = vector.shape_cast %59 : vector<8x128xf32> to vector<1x8x128xf32>
    tpu.vector_store %arg9[%60, %c0_25, %c0_26], %63 {strides = array<i32>} : memref<8x8x128xf32, #tpu.memory_space<vmem>>, vector<1x8x128xf32>,
    %c1_i32_27 = arith.constant 1 : i32
    %64 = arith.index_cast %c1_i32_27 : i32 to index
    %c0_28 = arith.constant 0 : index
    %c0_29 = arith.constant 0 : index
    %65 = vector.load %arg12[%64, %c0_28, %c0_29] : memref<8x8x512xf32, #tpu.memory_space<vmem>>, vector<1x8x512xf32>
    %66 = vector.shape_cast %65 : vector<1x8x512xf32> to vector<8x512xf32>
    %67 = arith.truncf %57 : vector<8x128xf32> to vector<8x128xbf16>
    %cst_30 = arith.constant dense<0.000000e+00> : vector<8x512xf32>
    %68 = tpu.matmul %67, %10, %cst_30 {dimension_numbers = #tpu.dot_dimension_numbers<[1], [0], [0], [1], [0, 0, 1, 1], [], []>} : vector<8x128xbf16>, vector<128x512xbf16>, vector<8x512xf32> -> vector<8x512xf32>
    %69 = arith.addf %66, %68 : vector<8x512xf32>
    %70 = vector.extract_strided_slice %69 {offsets = [0, 0], sizes = [8, 128], strides = [1, 1]} : vector<8x512xf32> to vector<8x128xf32>
    %71 = arith.negf %70 : vector<8x128xf32>
    %72 = math.exp %71 : vector<8x128xf32>
    %cst_31 = arith.constant 1.000000e+00 : f32
    %73 = vector.broadcast %cst_31 : f32 to vector<8x128xf32>
    %74 = arith.addf %73, %72 : vector<8x128xf32>
    %75 = arith.divf %73, %74 : vector<8x128xf32>
    %76 = vector.extract_strided_slice %69 {offsets = [0, 128], sizes = [8, 128], strides = [1, 1]} : vector<8x512xf32> to vector<8x128xf32>
    %77 = arith.negf %76 : vector<8x128xf32>
    %78 = math.exp %77 : vector<8x128xf32>
    %cst_32 = arith.constant 1.000000e+00 : f32
    %79 = vector.broadcast %cst_32 : f32 to vector<8x128xf32>
    %80 = arith.addf %79, %78 : vector<8x128xf32>
    %81 = arith.divf %79, %80 : vector<8x128xf32>
    %82 = vector.extract_strided_slice %69 {offsets = [0, 256], sizes = [8, 128], strides = [1, 1]} : vector<8x512xf32> to vector<8x128xf32>
    %83 = math.tanh %82 : vector<8x128xf32>
    %84 = vector.extract_strided_slice %69 {offsets = [0, 384], sizes = [8, 128], strides = [1, 1]} : vector<8x512xf32> to vector<8x128xf32>
    %85 = arith.negf %84 : vector<8x128xf32>
    %86 = math.exp %85 : vector<8x128xf32>
    %cst_33 = arith.constant 1.000000e+00 : f32
    %87 = vector.broadcast %cst_33 : f32 to vector<8x128xf32>
    %88 = arith.addf %87, %86 : vector<8x128xf32>
    %89 = arith.divf %87, %88 : vector<8x128xf32>
    %90 = arith.mulf %81, %56 : vector<8x128xf32>
    %91 = arith.mulf %75, %83 : vector<8x128xf32>
    %92 = arith.addf %90, %91 : vector<8x128xf32>
    %93 = math.tanh %92 : vector<8x128xf32>
    %94 = arith.mulf %89, %93 : vector<8x128xf32>
    %95 = vector.broadcast %c1_i32_27 : i32 to vector<8x128xi32>
    %96 = arith.cmpi slt, %95, %0 : vector<8x128xi32>
    %97 = arith.select %96, %92, %56 : vector<8x128xi1>, vector<8x128xf32>
    %98 = arith.select %96, %94, %57 : vector<8x128xi1>, vector<8x128xf32>
    %cst_34 = arith.constant 0.000000e+00 : f32
    %99 = vector.broadcast %cst_34 : f32 to vector<8x128xf32>
    %100 = arith.select %96, %94, %99 : vector<8x128xi1>, vector<8x128xf32>
    %101 = arith.index_cast %c1_i32_27 : i32 to index
    %c0_35 = arith.constant 0 : index
    %c0_36 = arith.constant 0 : index
    %102 = vector.load %arg9[%101, %c0_35, %c0_36] : memref<8x8x128xf32, #tpu.memory_space<vmem>>, vector<1x8x128xf32>
    %103 = vector.shape_cast %102 : vector<1x8x128xf32> to vector<8x128xf32>
    %104 = vector.shape_cast %100 : vector<8x128xf32> to vector<1x8x128xf32>
    tpu.vector_store %arg9[%101, %c0_35, %c0_36], %104 {strides = array<i32>} : memref<8x8x128xf32, #tpu.memory_space<vmem>>, vector<1x8x128xf32>,
    %c2_i32_37 = arith.constant 2 : i32
    %105 = arith.index_cast %c2_i32_37 : i32 to index
    %c0_38 = arith.constant 0 : index
    %c0_39 = arith.constant 0 : index
    %106 = vector.load %arg12[%105, %c0_38, %c0_39] : memref<8x8x512xf32, #tpu.memory_space<vmem>>, vector<1x8x512xf32>
    %107 = vector.shape_cast %106 : vector<1x8x512xf32> to vector<8x512xf32>
    %108 = arith.truncf %98 : vector<8x128xf32> to vector<8x128xbf16>
    %cst_40 = arith.constant dense<0.000000e+00> : vector<8x512xf32>
    %109 = tpu.matmul %108, %10, %cst_40 {dimension_numbers = #tpu.dot_dimension_numbers<[1], [0], [0], [1], [0, 0, 1, 1], [], []>} : vector<8x128xbf16>, vector<128x512xbf16>, vector<8x512xf32> -> vector<8x512xf32>
    %110 = arith.addf %107, %109 : vector<8x512xf32>
    %111 = vector.extract_strided_slice %110 {offsets = [0, 0], sizes = [8, 128], strides = [1, 1]} : vector<8x512xf32> to vector<8x128xf32>
    %112 = arith.negf %111 : vector<8x128xf32>
    %113 = math.exp %112 : vector<8x128xf32>
    %cst_41 = arith.constant 1.000000e+00 : f32
    %114 = vector.broadcast %cst_41 : f32 to vector<8x128xf32>
    %115 = arith.addf %114, %113 : vector<8x128xf32>
    %116 = arith.divf %114, %115 : vector<8x128xf32>
    %117 = vector.extract_strided_slice %110 {offsets = [0, 128], sizes = [8, 128], strides = [1, 1]} : vector<8x512xf32> to vector<8x128xf32>
    %118 = arith.negf %117 : vector<8x128xf32>
    %119 = math.exp %118 : vector<8x128xf32>
    %cst_42 = arith.constant 1.000000e+00 : f32
    %120 = vector.broadcast %cst_42 : f32 to vector<8x128xf32>
    %121 = arith.addf %120, %119 : vector<8x128xf32>
    %122 = arith.divf %120, %121 : vector<8x128xf32>
    %123 = vector.extract_strided_slice %110 {offsets = [0, 256], sizes = [8, 128], strides = [1, 1]} : vector<8x512xf32> to vector<8x128xf32>
    %124 = math.tanh %123 : vector<8x128xf32>
    %125 = vector.extract_strided_slice %110 {offsets = [0, 384], sizes = [8, 128], strides = [1, 1]} : vector<8x512xf32> to vector<8x128xf32>
    %126 = arith.negf %125 : vector<8x128xf32>
    %127 = math.exp %126 : vector<8x128xf32>
    %cst_43 = arith.constant 1.000000e+00 : f32
    %128 = vector.broadcast %cst_43 : f32 to vector<8x128xf32>
    %129 = arith.addf %128, %127 : vector<8x128xf32>
    %130 = arith.divf %128, %129 : vector<8x128xf32>
    %131 = arith.mulf %122, %97 : vector<8x128xf32>
    %132 = arith.mulf %116, %124 : vector<8x128xf32>
    %133 = arith.addf %131, %132 : vector<8x128xf32>
    %134 = math.tanh %133 : vector<8x128xf32>
    %135 = arith.mulf %130, %134 : vector<8x128xf32>
    %136 = vector.broadcast %c2_i32_37 : i32 to vector<8x128xi32>
    %137 = arith.cmpi slt, %136, %0 : vector<8x128xi32>
    %138 = arith.select %137, %133, %97 : vector<8x128xi1>, vector<8x128xf32>
    %139 = arith.select %137, %135, %98 : vector<8x128xi1>, vector<8x128xf32>
    %cst_44 = arith.constant 0.000000e+00 : f32
    %140 = vector.broadcast %cst_44 : f32 to vector<8x128xf32>
    %141 = arith.select %137, %135, %140 : vector<8x128xi1>, vector<8x128xf32>
    %142 = arith.index_cast %c2_i32_37 : i32 to index
    %c0_45 = arith.constant 0 : index
    %c0_46 = arith.constant 0 : index
    %143 = vector.load %arg9[%142, %c0_45, %c0_46] : memref<8x8x128xf32, #tpu.memory_space<vmem>>, vector<1x8x128xf32>
    %144 = vector.shape_cast %143 : vector<1x8x128xf32> to vector<8x128xf32>
    %145 = vector.shape_cast %141 : vector<8x128xf32> to vector<1x8x128xf32>
    tpu.vector_store %arg9[%142, %c0_45, %c0_46], %145 {strides = array<i32>} : memref<8x8x128xf32, #tpu.memory_space<vmem>>, vector<1x8x128xf32>,
    %c3_i32 = arith.constant 3 : i32
    %146 = arith.index_cast %c3_i32 : i32 to index
    %c0_47 = arith.constant 0 : index
    %c0_48 = arith.constant 0 : index
    %147 = vector.load %arg12[%146, %c0_47, %c0_48] : memref<8x8x512xf32, #tpu.memory_space<vmem>>, vector<1x8x512xf32>
    %148 = vector.shape_cast %147 : vector<1x8x512xf32> to vector<8x512xf32>
    %149 = arith.truncf %139 : vector<8x128xf32> to vector<8x128xbf16>
    %cst_49 = arith.constant dense<0.000000e+00> : vector<8x512xf32>
    %150 = tpu.matmul %149, %10, %cst_49 {dimension_numbers = #tpu.dot_dimension_numbers<[1], [0], [0], [1], [0, 0, 1, 1], [], []>} : vector<8x128xbf16>, vector<128x512xbf16>, vector<8x512xf32> -> vector<8x512xf32>
    %151 = arith.addf %148, %150 : vector<8x512xf32>
    %152 = vector.extract_strided_slice %151 {offsets = [0, 0], sizes = [8, 128], strides = [1, 1]} : vector<8x512xf32> to vector<8x128xf32>
    %153 = arith.negf %152 : vector<8x128xf32>
    %154 = math.exp %153 : vector<8x128xf32>
    %cst_50 = arith.constant 1.000000e+00 : f32
    %155 = vector.broadcast %cst_50 : f32 to vector<8x128xf32>
    %156 = arith.addf %155, %154 : vector<8x128xf32>
    %157 = arith.divf %155, %156 : vector<8x128xf32>
    %158 = vector.extract_strided_slice %151 {offsets = [0, 128], sizes = [8, 128], strides = [1, 1]} : vector<8x512xf32> to vector<8x128xf32>
    %159 = arith.negf %158 : vector<8x128xf32>
    %160 = math.exp %159 : vector<8x128xf32>
    %cst_51 = arith.constant 1.000000e+00 : f32
    %161 = vector.broadcast %cst_51 : f32 to vector<8x128xf32>
    %162 = arith.addf %161, %160 : vector<8x128xf32>
    %163 = arith.divf %161, %162 : vector<8x128xf32>
    %164 = vector.extract_strided_slice %151 {offsets = [0, 256], sizes = [8, 128], strides = [1, 1]} : vector<8x512xf32> to vector<8x128xf32>
    %165 = math.tanh %164 : vector<8x128xf32>
    %166 = vector.extract_strided_slice %151 {offsets = [0, 384], sizes = [8, 128], strides = [1, 1]} : vector<8x512xf32> to vector<8x128xf32>
    %167 = arith.negf %166 : vector<8x128xf32>
    %168 = math.exp %167 : vector<8x128xf32>
    %cst_52 = arith.constant 1.000000e+00 : f32
    %169 = vector.broadcast %cst_52 : f32 to vector<8x128xf32>
    %170 = arith.addf %169, %168 : vector<8x128xf32>
    %171 = arith.divf %169, %170 : vector<8x128xf32>
    %172 = arith.mulf %163, %138 : vector<8x128xf32>
    %173 = arith.mulf %157, %165 : vector<8x128xf32>
    %174 = arith.addf %172, %173 : vector<8x128xf32>
    %175 = math.tanh %174 : vector<8x128xf32>
    %176 = arith.mulf %171, %175 : vector<8x128xf32>
    %177 = vector.broadcast %c3_i32 : i32 to vector<8x128xi32>
    %178 = arith.cmpi slt, %177, %0 : vector<8x128xi32>
    %179 = arith.select %178, %174, %138 : vector<8x128xi1>, vector<8x128xf32>
    %180 = arith.select %178, %176, %139 : vector<8x128xi1>, vector<8x128xf32>
    %cst_53 = arith.constant 0.000000e+00 : f32
    %181 = vector.broadcast %cst_53 : f32 to vector<8x128xf32>
    %182 = arith.select %178, %176, %181 : vector<8x128xi1>, vector<8x128xf32>
    %183 = arith.index_cast %c3_i32 : i32 to index
    %c0_54 = arith.constant 0 : index
    %c0_55 = arith.constant 0 : index
    %184 = vector.load %arg9[%183, %c0_54, %c0_55] : memref<8x8x128xf32, #tpu.memory_space<vmem>>, vector<1x8x128xf32>
    %185 = vector.shape_cast %184 : vector<1x8x128xf32> to vector<8x128xf32>
    %186 = vector.shape_cast %182 : vector<8x128xf32> to vector<1x8x128xf32>
    tpu.vector_store %arg9[%183, %c0_54, %c0_55], %186 {strides = array<i32>} : memref<8x8x128xf32, #tpu.memory_space<vmem>>, vector<1x8x128xf32>,
    %c4_i32 = arith.constant 4 : i32
    %187 = arith.index_cast %c4_i32 : i32 to index
    %c0_56 = arith.constant 0 : index
    %c0_57 = arith.constant 0 : index
    %188 = vector.load %arg12[%187, %c0_56, %c0_57] : memref<8x8x512xf32, #tpu.memory_space<vmem>>, vector<1x8x512xf32>
    %189 = vector.shape_cast %188 : vector<1x8x512xf32> to vector<8x512xf32>
    %190 = arith.truncf %180 : vector<8x128xf32> to vector<8x128xbf16>
    %cst_58 = arith.constant dense<0.000000e+00> : vector<8x512xf32>
    %191 = tpu.matmul %190, %10, %cst_58 {dimension_numbers = #tpu.dot_dimension_numbers<[1], [0], [0], [1], [0, 0, 1, 1], [], []>} : vector<8x128xbf16>, vector<128x512xbf16>, vector<8x512xf32> -> vector<8x512xf32>
    %192 = arith.addf %189, %191 : vector<8x512xf32>
    %193 = vector.extract_strided_slice %192 {offsets = [0, 0], sizes = [8, 128], strides = [1, 1]} : vector<8x512xf32> to vector<8x128xf32>
    %194 = arith.negf %193 : vector<8x128xf32>
    %195 = math.exp %194 : vector<8x128xf32>
    %cst_59 = arith.constant 1.000000e+00 : f32
    %196 = vector.broadcast %cst_59 : f32 to vector<8x128xf32>
    %197 = arith.addf %196, %195 : vector<8x128xf32>
    %198 = arith.divf %196, %197 : vector<8x128xf32>
    %199 = vector.extract_strided_slice %192 {offsets = [0, 128], sizes = [8, 128], strides = [1, 1]} : vector<8x512xf32> to vector<8x128xf32>
    %200 = arith.negf %199 : vector<8x128xf32>
    %201 = math.exp %200 : vector<8x128xf32>
    %cst_60 = arith.constant 1.000000e+00 : f32
    %202 = vector.broadcast %cst_60 : f32 to vector<8x128xf32>
    %203 = arith.addf %202, %201 : vector<8x128xf32>
    %204 = arith.divf %202, %203 : vector<8x128xf32>
    %205 = vector.extract_strided_slice %192 {offsets = [0, 256], sizes = [8, 128], strides = [1, 1]} : vector<8x512xf32> to vector<8x128xf32>
    %206 = math.tanh %205 : vector<8x128xf32>
    %207 = vector.extract_strided_slice %192 {offsets = [0, 384], sizes = [8, 128], strides = [1, 1]} : vector<8x512xf32> to vector<8x128xf32>
    %208 = arith.negf %207 : vector<8x128xf32>
    %209 = math.exp %208 : vector<8x128xf32>
    %cst_61 = arith.constant 1.000000e+00 : f32
    %210 = vector.broadcast %cst_61 : f32 to vector<8x128xf32>
    %211 = arith.addf %210, %209 : vector<8x128xf32>
    %212 = arith.divf %210, %211 : vector<8x128xf32>
    %213 = arith.mulf %204, %179 : vector<8x128xf32>
    %214 = arith.mulf %198, %206 : vector<8x128xf32>
    %215 = arith.addf %213, %214 : vector<8x128xf32>
    %216 = math.tanh %215 : vector<8x128xf32>
    %217 = arith.mulf %212, %216 : vector<8x128xf32>
    %218 = vector.broadcast %c4_i32 : i32 to vector<8x128xi32>
    %219 = arith.cmpi slt, %218, %0 : vector<8x128xi32>
    %220 = arith.select %219, %215, %179 : vector<8x128xi1>, vector<8x128xf32>
    %221 = arith.select %219, %217, %180 : vector<8x128xi1>, vector<8x128xf32>
    %cst_62 = arith.constant 0.000000e+00 : f32
    %222 = vector.broadcast %cst_62 : f32 to vector<8x128xf32>
    %223 = arith.select %219, %217, %222 : vector<8x128xi1>, vector<8x128xf32>
    %224 = arith.index_cast %c4_i32 : i32 to index
    %c0_63 = arith.constant 0 : index
    %c0_64 = arith.constant 0 : index
    %225 = vector.load %arg9[%224, %c0_63, %c0_64] : memref<8x8x128xf32, #tpu.memory_space<vmem>>, vector<1x8x128xf32>
    %226 = vector.shape_cast %225 : vector<1x8x128xf32> to vector<8x128xf32>
    %227 = vector.shape_cast %223 : vector<8x128xf32> to vector<1x8x128xf32>
    tpu.vector_store %arg9[%224, %c0_63, %c0_64], %227 {strides = array<i32>} : memref<8x8x128xf32, #tpu.memory_space<vmem>>, vector<1x8x128xf32>,
    %c5_i32 = arith.constant 5 : i32
    %228 = arith.index_cast %c5_i32 : i32 to index
    %c0_65 = arith.constant 0 : index
    %c0_66 = arith.constant 0 : index
    %229 = vector.load %arg12[%228, %c0_65, %c0_66] : memref<8x8x512xf32, #tpu.memory_space<vmem>>, vector<1x8x512xf32>
    %230 = vector.shape_cast %229 : vector<1x8x512xf32> to vector<8x512xf32>
    %231 = arith.truncf %221 : vector<8x128xf32> to vector<8x128xbf16>
    %cst_67 = arith.constant dense<0.000000e+00> : vector<8x512xf32>
    %232 = tpu.matmul %231, %10, %cst_67 {dimension_numbers = #tpu.dot_dimension_numbers<[1], [0], [0], [1], [0, 0, 1, 1], [], []>} : vector<8x128xbf16>, vector<128x512xbf16>, vector<8x512xf32> -> vector<8x512xf32>
    %233 = arith.addf %230, %232 : vector<8x512xf32>
    %234 = vector.extract_strided_slice %233 {offsets = [0, 0], sizes = [8, 128], strides = [1, 1]} : vector<8x512xf32> to vector<8x128xf32>
    %235 = arith.negf %234 : vector<8x128xf32>
    %236 = math.exp %235 : vector<8x128xf32>
    %cst_68 = arith.constant 1.000000e+00 : f32
    %237 = vector.broadcast %cst_68 : f32 to vector<8x128xf32>
    %238 = arith.addf %237, %236 : vector<8x128xf32>
    %239 = arith.divf %237, %238 : vector<8x128xf32>
    %240 = vector.extract_strided_slice %233 {offsets = [0, 128], sizes = [8, 128], strides = [1, 1]} : vector<8x512xf32> to vector<8x128xf32>
    %241 = arith.negf %240 : vector<8x128xf32>
    %242 = math.exp %241 : vector<8x128xf32>
    %cst_69 = arith.constant 1.000000e+00 : f32
    %243 = vector.broadcast %cst_69 : f32 to vector<8x128xf32>
    %244 = arith.addf %243, %242 : vector<8x128xf32>
    %245 = arith.divf %243, %244 : vector<8x128xf32>
    %246 = vector.extract_strided_slice %233 {offsets = [0, 256], sizes = [8, 128], strides = [1, 1]} : vector<8x512xf32> to vector<8x128xf32>
    %247 = math.tanh %246 : vector<8x128xf32>
    %248 = vector.extract_strided_slice %233 {offsets = [0, 384], sizes = [8, 128], strides = [1, 1]} : vector<8x512xf32> to vector<8x128xf32>
    %249 = arith.negf %248 : vector<8x128xf32>
    %250 = math.exp %249 : vector<8x128xf32>
    %cst_70 = arith.constant 1.000000e+00 : f32
    %251 = vector.broadcast %cst_70 : f32 to vector<8x128xf32>
    %252 = arith.addf %251, %250 : vector<8x128xf32>
    %253 = arith.divf %251, %252 : vector<8x128xf32>
    %254 = arith.mulf %245, %220 : vector<8x128xf32>
    %255 = arith.mulf %239, %247 : vector<8x128xf32>
    %256 = arith.addf %254, %255 : vector<8x128xf32>
    %257 = math.tanh %256 : vector<8x128xf32>
    %258 = arith.mulf %253, %257 : vector<8x128xf32>
    %259 = vector.broadcast %c5_i32 : i32 to vector<8x128xi32>
    %260 = arith.cmpi slt, %259, %0 : vector<8x128xi32>
    %261 = arith.select %260, %256, %220 : vector<8x128xi1>, vector<8x128xf32>
    %262 = arith.select %260, %258, %221 : vector<8x128xi1>, vector<8x128xf32>
    %cst_71 = arith.constant 0.000000e+00 : f32
    %263 = vector.broadcast %cst_71 : f32 to vector<8x128xf32>
    %264 = arith.select %260, %258, %263 : vector<8x128xi1>, vector<8x128xf32>
    %265 = arith.index_cast %c5_i32 : i32 to index
    %c0_72 = arith.constant 0 : index
    %c0_73 = arith.constant 0 : index
    %266 = vector.load %arg9[%265, %c0_72, %c0_73] : memref<8x8x128xf32, #tpu.memory_space<vmem>>, vector<1x8x128xf32>
    %267 = vector.shape_cast %266 : vector<1x8x128xf32> to vector<8x128xf32>
    %268 = vector.shape_cast %264 : vector<8x128xf32> to vector<1x8x128xf32>
    tpu.vector_store %arg9[%265, %c0_72, %c0_73], %268 {strides = array<i32>} : memref<8x8x128xf32, #tpu.memory_space<vmem>>, vector<1x8x128xf32>,
    %c6_i32 = arith.constant 6 : i32
    %269 = arith.index_cast %c6_i32 : i32 to index
    %c0_74 = arith.constant 0 : index
    %c0_75 = arith.constant 0 : index
    %270 = vector.load %arg12[%269, %c0_74, %c0_75] : memref<8x8x512xf32, #tpu.memory_space<vmem>>, vector<1x8x512xf32>
    %271 = vector.shape_cast %270 : vector<1x8x512xf32> to vector<8x512xf32>
    %272 = arith.truncf %262 : vector<8x128xf32> to vector<8x128xbf16>
    %cst_76 = arith.constant dense<0.000000e+00> : vector<8x512xf32>
    %273 = tpu.matmul %272, %10, %cst_76 {dimension_numbers = #tpu.dot_dimension_numbers<[1], [0], [0], [1], [0, 0, 1, 1], [], []>} : vector<8x128xbf16>, vector<128x512xbf16>, vector<8x512xf32> -> vector<8x512xf32>
    %274 = arith.addf %271, %273 : vector<8x512xf32>
    %275 = vector.extract_strided_slice %274 {offsets = [0, 0], sizes = [8, 128], strides = [1, 1]} : vector<8x512xf32> to vector<8x128xf32>
    %276 = arith.negf %275 : vector<8x128xf32>
    %277 = math.exp %276 : vector<8x128xf32>
    %cst_77 = arith.constant 1.000000e+00 : f32
    %278 = vector.broadcast %cst_77 : f32 to vector<8x128xf32>
    %279 = arith.addf %278, %277 : vector<8x128xf32>
    %280 = arith.divf %278, %279 : vector<8x128xf32>
    %281 = vector.extract_strided_slice %274 {offsets = [0, 128], sizes = [8, 128], strides = [1, 1]} : vector<8x512xf32> to vector<8x128xf32>
    %282 = arith.negf %281 : vector<8x128xf32>
    %283 = math.exp %282 : vector<8x128xf32>
    %cst_78 = arith.constant 1.000000e+00 : f32
    %284 = vector.broadcast %cst_78 : f32 to vector<8x128xf32>
    %285 = arith.addf %284, %283 : vector<8x128xf32>
    %286 = arith.divf %284, %285 : vector<8x128xf32>
    %287 = vector.extract_strided_slice %274 {offsets = [0, 256], sizes = [8, 128], strides = [1, 1]} : vector<8x512xf32> to vector<8x128xf32>
    %288 = math.tanh %287 : vector<8x128xf32>
    %289 = vector.extract_strided_slice %274 {offsets = [0, 384], sizes = [8, 128], strides = [1, 1]} : vector<8x512xf32> to vector<8x128xf32>
    %290 = arith.negf %289 : vector<8x128xf32>
    %291 = math.exp %290 : vector<8x128xf32>
    %cst_79 = arith.constant 1.000000e+00 : f32
    %292 = vector.broadcast %cst_79 : f32 to vector<8x128xf32>
    %293 = arith.addf %292, %291 : vector<8x128xf32>
    %294 = arith.divf %292, %293 : vector<8x128xf32>
    %295 = arith.mulf %286, %261 : vector<8x128xf32>
    %296 = arith.mulf %280, %288 : vector<8x128xf32>
    %297 = arith.addf %295, %296 : vector<8x128xf32>
    %298 = math.tanh %297 : vector<8x128xf32>
    %299 = arith.mulf %294, %298 : vector<8x128xf32>
    %300 = vector.broadcast %c6_i32 : i32 to vector<8x128xi32>
    %301 = arith.cmpi slt, %300, %0 : vector<8x128xi32>
    %302 = arith.select %301, %297, %261 : vector<8x128xi1>, vector<8x128xf32>
    %303 = arith.select %301, %299, %262 : vector<8x128xi1>, vector<8x128xf32>
    %cst_80 = arith.constant 0.000000e+00 : f32
    %304 = vector.broadcast %cst_80 : f32 to vector<8x128xf32>
    %305 = arith.select %301, %299, %304 : vector<8x128xi1>, vector<8x128xf32>
    %306 = arith.index_cast %c6_i32 : i32 to index
    %c0_81 = arith.constant 0 : index
    %c0_82 = arith.constant 0 : index
    %307 = vector.load %arg9[%306, %c0_81, %c0_82] : memref<8x8x128xf32, #tpu.memory_space<vmem>>, vector<1x8x128xf32>
    %308 = vector.shape_cast %307 : vector<1x8x128xf32> to vector<8x128xf32>
    %309 = vector.shape_cast %305 : vector<8x128xf32> to vector<1x8x128xf32>
    tpu.vector_store %arg9[%306, %c0_81, %c0_82], %309 {strides = array<i32>} : memref<8x8x128xf32, #tpu.memory_space<vmem>>, vector<1x8x128xf32>,
    %c7_i32 = arith.constant 7 : i32
    %310 = arith.index_cast %c7_i32 : i32 to index
    %c0_83 = arith.constant 0 : index
    %c0_84 = arith.constant 0 : index
    %311 = vector.load %arg12[%310, %c0_83, %c0_84] : memref<8x8x512xf32, #tpu.memory_space<vmem>>, vector<1x8x512xf32>
    %312 = vector.shape_cast %311 : vector<1x8x512xf32> to vector<8x512xf32>
    %313 = arith.truncf %303 : vector<8x128xf32> to vector<8x128xbf16>
    %cst_85 = arith.constant dense<0.000000e+00> : vector<8x512xf32>
    %314 = tpu.matmul %313, %10, %cst_85 {dimension_numbers = #tpu.dot_dimension_numbers<[1], [0], [0], [1], [0, 0, 1, 1], [], []>} : vector<8x128xbf16>, vector<128x512xbf16>, vector<8x512xf32> -> vector<8x512xf32>
    %315 = arith.addf %312, %314 : vector<8x512xf32>
    %316 = vector.extract_strided_slice %315 {offsets = [0, 0], sizes = [8, 128], strides = [1, 1]} : vector<8x512xf32> to vector<8x128xf32>
    %317 = arith.negf %316 : vector<8x128xf32>
    %318 = math.exp %317 : vector<8x128xf32>
    %cst_86 = arith.constant 1.000000e+00 : f32
    %319 = vector.broadcast %cst_86 : f32 to vector<8x128xf32>
    %320 = arith.addf %319, %318 : vector<8x128xf32>
    %321 = arith.divf %319, %320 : vector<8x128xf32>
    %322 = vector.extract_strided_slice %315 {offsets = [0, 128], sizes = [8, 128], strides = [1, 1]} : vector<8x512xf32> to vector<8x128xf32>
    %323 = arith.negf %322 : vector<8x128xf32>
    %324 = math.exp %323 : vector<8x128xf32>
    %cst_87 = arith.constant 1.000000e+00 : f32
    %325 = vector.broadcast %cst_87 : f32 to vector<8x128xf32>
    %326 = arith.addf %325, %324 : vector<8x128xf32>
    %327 = arith.divf %325, %326 : vector<8x128xf32>
    %328 = vector.extract_strided_slice %315 {offsets = [0, 256], sizes = [8, 128], strides = [1, 1]} : vector<8x512xf32> to vector<8x128xf32>
    %329 = math.tanh %328 : vector<8x128xf32>
    %330 = vector.extract_strided_slice %315 {offsets = [0, 384], sizes = [8, 128], strides = [1, 1]} : vector<8x512xf32> to vector<8x128xf32>
    %331 = arith.negf %330 : vector<8x128xf32>
    %332 = math.exp %331 : vector<8x128xf32>
    %cst_88 = arith.constant 1.000000e+00 : f32
    %333 = vector.broadcast %cst_88 : f32 to vector<8x128xf32>
    %334 = arith.addf %333, %332 : vector<8x128xf32>
    %335 = arith.divf %333, %334 : vector<8x128xf32>
    %336 = arith.mulf %327, %302 : vector<8x128xf32>
    %337 = arith.mulf %321, %329 : vector<8x128xf32>
    %338 = arith.addf %336, %337 : vector<8x128xf32>
    %339 = math.tanh %338 : vector<8x128xf32>
    %340 = arith.mulf %335, %339 : vector<8x128xf32>
    %341 = vector.broadcast %c7_i32 : i32 to vector<8x128xi32>
    %342 = arith.cmpi slt, %341, %0 : vector<8x128xi32>
    %343 = arith.select %342, %338, %302 : vector<8x128xi1>, vector<8x128xf32>
    %344 = arith.select %342, %340, %303 : vector<8x128xi1>, vector<8x128xf32>
    %cst_89 = arith.constant 0.000000e+00 : f32
    %345 = vector.broadcast %cst_89 : f32 to vector<8x128xf32>
    %346 = arith.select %342, %340, %345 : vector<8x128xi1>, vector<8x128xf32>
    %347 = arith.index_cast %c7_i32 : i32 to index
    %c0_90 = arith.constant 0 : index
    %c0_91 = arith.constant 0 : index
    %348 = vector.load %arg9[%347, %c0_90, %c0_91] : memref<8x8x128xf32, #tpu.memory_space<vmem>>, vector<1x8x128xf32>
    %349 = vector.shape_cast %348 : vector<1x8x128xf32> to vector<8x128xf32>
    %350 = vector.shape_cast %346 : vector<8x128xf32> to vector<1x8x128xf32>
    tpu.vector_store %arg9[%347, %c0_90, %c0_91], %350 {strides = array<i32>} : memref<8x8x128xf32, #tpu.memory_space<vmem>>, vector<1x8x128xf32>,
    %c8_i32 = arith.constant 8 : i32
    %c1 = arith.constant 1 : index
    %c0_92 = arith.constant 0 : index
    %c0_93 = arith.constant 0 : index
    %351 = vector.load %arg2[%c1, %c0_92, %c0_93] : memref<2x128x512xbf16, #tpu.memory_space<vmem>>, vector<1x128x512xbf16>
    %352 = vector.shape_cast %351 : vector<1x128x512xbf16> to vector<128x512xbf16>
    %c1_94 = arith.constant 1 : index
    %c0_95 = arith.constant 0 : index
    %c0_96 = arith.constant 0 : index
    %353 = vector.load %arg3[%c1_94, %c0_95, %c0_96] : memref<2x128x512xbf16, #tpu.memory_space<vmem>>, vector<1x128x512xbf16>
    %354 = vector.shape_cast %353 : vector<1x128x512xbf16> to vector<128x512xbf16>
    %c1_97 = arith.constant 1 : index
    %c0_98 = arith.constant 0 : index
    %c0_99 = arith.constant 0 : index
    %355 = vector.load %arg4[%c1_97, %c0_98, %c0_99] : memref<2x1x512xf32, #tpu.memory_space<vmem>>, vector<1x1x512xf32>
    %356 = vector.shape_cast %355 : vector<1x1x512xf32> to vector<1x512xf32>
    %c0_100 = arith.constant 0 : index
    %c0_101 = arith.constant 0 : index
    %c0_102 = arith.constant 0 : index
    %357 = vector.load %arg9[%c0_100, %c0_101, %c0_102] : memref<8x8x128xf32, #tpu.memory_space<vmem>>, vector<8x8x128xf32>
    %358 = vector.shape_cast %357 : vector<8x8x128xf32> to vector<64x128xf32>
    %359 = arith.truncf %358 : vector<64x128xf32> to vector<64x128xbf16>
    %cst_103 = arith.constant dense<0.000000e+00> : vector<64x512xf32>
    %360 = tpu.matmul %359, %352, %cst_103 {dimension_numbers = #tpu.dot_dimension_numbers<[1], [0], [0], [1], [0, 0, 1, 1], [], []>} : vector<64x128xbf16>, vector<128x512xbf16>, vector<64x512xf32> -> vector<64x512xf32>
    %361 = vector.shape_cast %360 : vector<64x512xf32> to vector<8x8x512xf32>
    %362 = vector.shape_cast %356 : vector<1x512xf32> to vector<1x1x512xf32>
    %363 = vector.broadcast %362 : vector<1x1x512xf32> to vector<8x8x512xf32>
    %364 = arith.addf %361, %363 : vector<8x8x512xf32>
    %c0_104 = arith.constant 0 : index
    %c0_105 = arith.constant 0 : index
    %c0_106 = arith.constant 0 : index
    %365 = vector.load %arg12[%c0_104, %c0_105, %c0_106] : memref<8x8x512xf32, #tpu.memory_space<vmem>>, vector<8x8x512xf32>
    tpu.vector_store %arg12[%c0_104, %c0_105, %c0_106], %364 {strides = array<i32>} : memref<8x8x512xf32, #tpu.memory_space<vmem>>, vector<8x8x512xf32>,
    %cst_107 = arith.constant 0.000000e+00 : f32
    %366 = vector.broadcast %cst_107 : f32 to vector<8x128xf32>
    %c0_i32_108 = arith.constant 0 : i32
    %367 = arith.index_cast %c0_i32_108 : i32 to index
    %c0_109 = arith.constant 0 : index
    %c0_110 = arith.constant 0 : index
    %368 = vector.load %arg12[%367, %c0_109, %c0_110] : memref<8x8x512xf32, #tpu.memory_space<vmem>>, vector<1x8x512xf32>
    %369 = vector.shape_cast %368 : vector<1x8x512xf32> to vector<8x512xf32>
    %370 = arith.truncf %366 : vector<8x128xf32> to vector<8x128xbf16>
    %cst_111 = arith.constant dense<0.000000e+00> : vector<8x512xf32>
    %371 = tpu.matmul %370, %354, %cst_111 {dimension_numbers = #tpu.dot_dimension_numbers<[1], [0], [0], [1], [0, 0, 1, 1], [], []>} : vector<8x128xbf16>, vector<128x512xbf16>, vector<8x512xf32> -> vector<8x512xf32>
    %372 = arith.addf %369, %371 : vector<8x512xf32>
    %373 = vector.extract_strided_slice %372 {offsets = [0, 0], sizes = [8, 128], strides = [1, 1]} : vector<8x512xf32> to vector<8x128xf32>
    %374 = arith.negf %373 : vector<8x128xf32>
    %375 = math.exp %374 : vector<8x128xf32>
    %cst_112 = arith.constant 1.000000e+00 : f32
    %376 = vector.broadcast %cst_112 : f32 to vector<8x128xf32>
    %377 = arith.addf %376, %375 : vector<8x128xf32>
    %378 = arith.divf %376, %377 : vector<8x128xf32>
    %379 = vector.extract_strided_slice %372 {offsets = [0, 128], sizes = [8, 128], strides = [1, 1]} : vector<8x512xf32> to vector<8x128xf32>
    %380 = arith.negf %379 : vector<8x128xf32>
    %381 = math.exp %380 : vector<8x128xf32>
    %cst_113 = arith.constant 1.000000e+00 : f32
    %382 = vector.broadcast %cst_113 : f32 to vector<8x128xf32>
    %383 = arith.addf %382, %381 : vector<8x128xf32>
    %384 = arith.divf %382, %383 : vector<8x128xf32>
    %385 = vector.extract_strided_slice %372 {offsets = [0, 256], sizes = [8, 128], strides = [1, 1]} : vector<8x512xf32> to vector<8x128xf32>
    %386 = math.tanh %385 : vector<8x128xf32>
    %387 = vector.extract_strided_slice %372 {offsets = [0, 384], sizes = [8, 128], strides = [1, 1]} : vector<8x512xf32> to vector<8x128xf32>
    %388 = arith.negf %387 : vector<8x128xf32>
    %389 = math.exp %388 : vector<8x128xf32>
    %cst_114 = arith.constant 1.000000e+00 : f32
    %390 = vector.broadcast %cst_114 : f32 to vector<8x128xf32>
    %391 = arith.addf %390, %389 : vector<8x128xf32>
    %392 = arith.divf %390, %391 : vector<8x128xf32>
    %393 = arith.mulf %384, %366 : vector<8x128xf32>
    %394 = arith.mulf %378, %386 : vector<8x128xf32>
    %395 = arith.addf %393, %394 : vector<8x128xf32>
    %396 = math.tanh %395 : vector<8x128xf32>
    %397 = arith.mulf %392, %396 : vector<8x128xf32>
    %398 = vector.broadcast %c0_i32_108 : i32 to vector<8x128xi32>
    %399 = arith.cmpi slt, %398, %0 : vector<8x128xi32>
    %400 = arith.select %399, %395, %366 : vector<8x128xi1>, vector<8x128xf32>
    %401 = arith.select %399, %397, %366 : vector<8x128xi1>, vector<8x128xf32>
    %cst_115 = arith.constant 0.000000e+00 : f32
    %402 = vector.broadcast %cst_115 : f32 to vector<8x128xf32>
    %403 = arith.select %399, %397, %402 : vector<8x128xi1>, vector<8x128xf32>
    %404 = arith.index_cast %c0_i32_108 : i32 to index
    %c0_116 = arith.constant 0 : index
    %c0_117 = arith.constant 0 : index
    %405 = vector.load %arg11[%404, %c0_116, %c0_117] : memref<8x8x128xf32, #tpu.memory_space<vmem>>, vector<1x8x128xf32>
    %406 = vector.shape_cast %405 : vector<1x8x128xf32> to vector<8x128xf32>
    %407 = vector.shape_cast %403 : vector<8x128xf32> to vector<1x8x128xf32>
    tpu.vector_store %arg11[%404, %c0_116, %c0_117], %407 {strides = array<i32>} : memref<8x8x128xf32, #tpu.memory_space<vmem>>, vector<1x8x128xf32>,
    %c1_i32_118 = arith.constant 1 : i32
    %408 = arith.index_cast %c1_i32_118 : i32 to index
    %c0_119 = arith.constant 0 : index
    %c0_120 = arith.constant 0 : index
    %409 = vector.load %arg12[%408, %c0_119, %c0_120] : memref<8x8x512xf32, #tpu.memory_space<vmem>>, vector<1x8x512xf32>
    %410 = vector.shape_cast %409 : vector<1x8x512xf32> to vector<8x512xf32>
    %411 = arith.truncf %401 : vector<8x128xf32> to vector<8x128xbf16>
    %cst_121 = arith.constant dense<0.000000e+00> : vector<8x512xf32>
    %412 = tpu.matmul %411, %354, %cst_121 {dimension_numbers = #tpu.dot_dimension_numbers<[1], [0], [0], [1], [0, 0, 1, 1], [], []>} : vector<8x128xbf16>, vector<128x512xbf16>, vector<8x512xf32> -> vector<8x512xf32>
    %413 = arith.addf %410, %412 : vector<8x512xf32>
    %414 = vector.extract_strided_slice %413 {offsets = [0, 0], sizes = [8, 128], strides = [1, 1]} : vector<8x512xf32> to vector<8x128xf32>
    %415 = arith.negf %414 : vector<8x128xf32>
    %416 = math.exp %415 : vector<8x128xf32>
    %cst_122 = arith.constant 1.000000e+00 : f32
    %417 = vector.broadcast %cst_122 : f32 to vector<8x128xf32>
    %418 = arith.addf %417, %416 : vector<8x128xf32>
    %419 = arith.divf %417, %418 : vector<8x128xf32>
    %420 = vector.extract_strided_slice %413 {offsets = [0, 128], sizes = [8, 128], strides = [1, 1]} : vector<8x512xf32> to vector<8x128xf32>
    %421 = arith.negf %420 : vector<8x128xf32>
    %422 = math.exp %421 : vector<8x128xf32>
    %cst_123 = arith.constant 1.000000e+00 : f32
    %423 = vector.broadcast %cst_123 : f32 to vector<8x128xf32>
    %424 = arith.addf %423, %422 : vector<8x128xf32>
    %425 = arith.divf %423, %424 : vector<8x128xf32>
    %426 = vector.extract_strided_slice %413 {offsets = [0, 256], sizes = [8, 128], strides = [1, 1]} : vector<8x512xf32> to vector<8x128xf32>
    %427 = math.tanh %426 : vector<8x128xf32>
    %428 = vector.extract_strided_slice %413 {offsets = [0, 384], sizes = [8, 128], strides = [1, 1]} : vector<8x512xf32> to vector<8x128xf32>
    %429 = arith.negf %428 : vector<8x128xf32>
    %430 = math.exp %429 : vector<8x128xf32>
    %cst_124 = arith.constant 1.000000e+00 : f32
    %431 = vector.broadcast %cst_124 : f32 to vector<8x128xf32>
    %432 = arith.addf %431, %430 : vector<8x128xf32>
    %433 = arith.divf %431, %432 : vector<8x128xf32>
    %434 = arith.mulf %425, %400 : vector<8x128xf32>
    %435 = arith.mulf %419, %427 : vector<8x128xf32>
    %436 = arith.addf %434, %435 : vector<8x128xf32>
    %437 = math.tanh %436 : vector<8x128xf32>
    %438 = arith.mulf %433, %437 : vector<8x128xf32>
    %439 = vector.broadcast %c1_i32_118 : i32 to vector<8x128xi32>
    %440 = arith.cmpi slt, %439, %0 : vector<8x128xi32>
    %441 = arith.select %440, %436, %400 : vector<8x128xi1>, vector<8x128xf32>
    %442 = arith.select %440, %438, %401 : vector<8x128xi1>, vector<8x128xf32>
    %cst_125 = arith.constant 0.000000e+00 : f32
    %443 = vector.broadcast %cst_125 : f32 to vector<8x128xf32>
    %444 = arith.select %440, %438, %443 : vector<8x128xi1>, vector<8x128xf32>
    %445 = arith.index_cast %c1_i32_118 : i32 to index
    %c0_126 = arith.constant 0 : index
    %c0_127 = arith.constant 0 : index
    %446 = vector.load %arg11[%445, %c0_126, %c0_127] : memref<8x8x128xf32, #tpu.memory_space<vmem>>, vector<1x8x128xf32>
    %447 = vector.shape_cast %446 : vector<1x8x128xf32> to vector<8x128xf32>
    %448 = vector.shape_cast %444 : vector<8x128xf32> to vector<1x8x128xf32>
    tpu.vector_store %arg11[%445, %c0_126, %c0_127], %448 {strides = array<i32>} : memref<8x8x128xf32, #tpu.memory_space<vmem>>, vector<1x8x128xf32>,
    %c2_i32_128 = arith.constant 2 : i32
    %449 = arith.index_cast %c2_i32_128 : i32 to index
    %c0_129 = arith.constant 0 : index
    %c0_130 = arith.constant 0 : index
    %450 = vector.load %arg12[%449, %c0_129, %c0_130] : memref<8x8x512xf32, #tpu.memory_space<vmem>>, vector<1x8x512xf32>
    %451 = vector.shape_cast %450 : vector<1x8x512xf32> to vector<8x512xf32>
    %452 = arith.truncf %442 : vector<8x128xf32> to vector<8x128xbf16>
    %cst_131 = arith.constant dense<0.000000e+00> : vector<8x512xf32>
    %453 = tpu.matmul %452, %354, %cst_131 {dimension_numbers = #tpu.dot_dimension_numbers<[1], [0], [0], [1], [0, 0, 1, 1], [], []>} : vector<8x128xbf16>, vector<128x512xbf16>, vector<8x512xf32> -> vector<8x512xf32>
    %454 = arith.addf %451, %453 : vector<8x512xf32>
    %455 = vector.extract_strided_slice %454 {offsets = [0, 0], sizes = [8, 128], strides = [1, 1]} : vector<8x512xf32> to vector<8x128xf32>
    %456 = arith.negf %455 : vector<8x128xf32>
    %457 = math.exp %456 : vector<8x128xf32>
    %cst_132 = arith.constant 1.000000e+00 : f32
    %458 = vector.broadcast %cst_132 : f32 to vector<8x128xf32>
    %459 = arith.addf %458, %457 : vector<8x128xf32>
    %460 = arith.divf %458, %459 : vector<8x128xf32>
    %461 = vector.extract_strided_slice %454 {offsets = [0, 128], sizes = [8, 128], strides = [1, 1]} : vector<8x512xf32> to vector<8x128xf32>
    %462 = arith.negf %461 : vector<8x128xf32>
    %463 = math.exp %462 : vector<8x128xf32>
    %cst_133 = arith.constant 1.000000e+00 : f32
    %464 = vector.broadcast %cst_133 : f32 to vector<8x128xf32>
    %465 = arith.addf %464, %463 : vector<8x128xf32>
    %466 = arith.divf %464, %465 : vector<8x128xf32>
    %467 = vector.extract_strided_slice %454 {offsets = [0, 256], sizes = [8, 128], strides = [1, 1]} : vector<8x512xf32> to vector<8x128xf32>
    %468 = math.tanh %467 : vector<8x128xf32>
    %469 = vector.extract_strided_slice %454 {offsets = [0, 384], sizes = [8, 128], strides = [1, 1]} : vector<8x512xf32> to vector<8x128xf32>
    %470 = arith.negf %469 : vector<8x128xf32>
    %471 = math.exp %470 : vector<8x128xf32>
    %cst_134 = arith.constant 1.000000e+00 : f32
    %472 = vector.broadcast %cst_134 : f32 to vector<8x128xf32>
    %473 = arith.addf %472, %471 : vector<8x128xf32>
    %474 = arith.divf %472, %473 : vector<8x128xf32>
    %475 = arith.mulf %466, %441 : vector<8x128xf32>
    %476 = arith.mulf %460, %468 : vector<8x128xf32>
    %477 = arith.addf %475, %476 : vector<8x128xf32>
    %478 = math.tanh %477 : vector<8x128xf32>
    %479 = arith.mulf %474, %478 : vector<8x128xf32>
    %480 = vector.broadcast %c2_i32_128 : i32 to vector<8x128xi32>
    %481 = arith.cmpi slt, %480, %0 : vector<8x128xi32>
    %482 = arith.select %481, %477, %441 : vector<8x128xi1>, vector<8x128xf32>
    %483 = arith.select %481, %479, %442 : vector<8x128xi1>, vector<8x128xf32>
    %cst_135 = arith.constant 0.000000e+00 : f32
    %484 = vector.broadcast %cst_135 : f32 to vector<8x128xf32>
    %485 = arith.select %481, %479, %484 : vector<8x128xi1>, vector<8x128xf32>
    %486 = arith.index_cast %c2_i32_128 : i32 to index
    %c0_136 = arith.constant 0 : index
    %c0_137 = arith.constant 0 : index
    %487 = vector.load %arg11[%486, %c0_136, %c0_137] : memref<8x8x128xf32, #tpu.memory_space<vmem>>, vector<1x8x128xf32>
    %488 = vector.shape_cast %487 : vector<1x8x128xf32> to vector<8x128xf32>
    %489 = vector.shape_cast %485 : vector<8x128xf32> to vector<1x8x128xf32>
    tpu.vector_store %arg11[%486, %c0_136, %c0_137], %489 {strides = array<i32>} : memref<8x8x128xf32, #tpu.memory_space<vmem>>, vector<1x8x128xf32>,
    %c3_i32_138 = arith.constant 3 : i32
    %490 = arith.index_cast %c3_i32_138 : i32 to index
    %c0_139 = arith.constant 0 : index
    %c0_140 = arith.constant 0 : index
    %491 = vector.load %arg12[%490, %c0_139, %c0_140] : memref<8x8x512xf32, #tpu.memory_space<vmem>>, vector<1x8x512xf32>
    %492 = vector.shape_cast %491 : vector<1x8x512xf32> to vector<8x512xf32>
    %493 = arith.truncf %483 : vector<8x128xf32> to vector<8x128xbf16>
    %cst_141 = arith.constant dense<0.000000e+00> : vector<8x512xf32>
    %494 = tpu.matmul %493, %354, %cst_141 {dimension_numbers = #tpu.dot_dimension_numbers<[1], [0], [0], [1], [0, 0, 1, 1], [], []>} : vector<8x128xbf16>, vector<128x512xbf16>, vector<8x512xf32> -> vector<8x512xf32>
    %495 = arith.addf %492, %494 : vector<8x512xf32>
    %496 = vector.extract_strided_slice %495 {offsets = [0, 0], sizes = [8, 128], strides = [1, 1]} : vector<8x512xf32> to vector<8x128xf32>
    %497 = arith.negf %496 : vector<8x128xf32>
    %498 = math.exp %497 : vector<8x128xf32>
    %cst_142 = arith.constant 1.000000e+00 : f32
    %499 = vector.broadcast %cst_142 : f32 to vector<8x128xf32>
    %500 = arith.addf %499, %498 : vector<8x128xf32>
    %501 = arith.divf %499, %500 : vector<8x128xf32>
    %502 = vector.extract_strided_slice %495 {offsets = [0, 128], sizes = [8, 128], strides = [1, 1]} : vector<8x512xf32> to vector<8x128xf32>
    %503 = arith.negf %502 : vector<8x128xf32>
    %504 = math.exp %503 : vector<8x128xf32>
    %cst_143 = arith.constant 1.000000e+00 : f32
    %505 = vector.broadcast %cst_143 : f32 to vector<8x128xf32>
    %506 = arith.addf %505, %504 : vector<8x128xf32>
    %507 = arith.divf %505, %506 : vector<8x128xf32>
    %508 = vector.extract_strided_slice %495 {offsets = [0, 256], sizes = [8, 128], strides = [1, 1]} : vector<8x512xf32> to vector<8x128xf32>
    %509 = math.tanh %508 : vector<8x128xf32>
    %510 = vector.extract_strided_slice %495 {offsets = [0, 384], sizes = [8, 128], strides = [1, 1]} : vector<8x512xf32> to vector<8x128xf32>
    %511 = arith.negf %510 : vector<8x128xf32>
    %512 = math.exp %511 : vector<8x128xf32>
    %cst_144 = arith.constant 1.000000e+00 : f32
    %513 = vector.broadcast %cst_144 : f32 to vector<8x128xf32>
    %514 = arith.addf %513, %512 : vector<8x128xf32>
    %515 = arith.divf %513, %514 : vector<8x128xf32>
    %516 = arith.mulf %507, %482 : vector<8x128xf32>
    %517 = arith.mulf %501, %509 : vector<8x128xf32>
    %518 = arith.addf %516, %517 : vector<8x128xf32>
    %519 = math.tanh %518 : vector<8x128xf32>
    %520 = arith.mulf %515, %519 : vector<8x128xf32>
    %521 = vector.broadcast %c3_i32_138 : i32 to vector<8x128xi32>
    %522 = arith.cmpi slt, %521, %0 : vector<8x128xi32>
    %523 = arith.select %522, %518, %482 : vector<8x128xi1>, vector<8x128xf32>
    %524 = arith.select %522, %520, %483 : vector<8x128xi1>, vector<8x128xf32>
    %cst_145 = arith.constant 0.000000e+00 : f32
    %525 = vector.broadcast %cst_145 : f32 to vector<8x128xf32>
    %526 = arith.select %522, %520, %525 : vector<8x128xi1>, vector<8x128xf32>
    %527 = arith.index_cast %c3_i32_138 : i32 to index
    %c0_146 = arith.constant 0 : index
    %c0_147 = arith.constant 0 : index
    %528 = vector.load %arg11[%527, %c0_146, %c0_147] : memref<8x8x128xf32, #tpu.memory_space<vmem>>, vector<1x8x128xf32>
    %529 = vector.shape_cast %528 : vector<1x8x128xf32> to vector<8x128xf32>
    %530 = vector.shape_cast %526 : vector<8x128xf32> to vector<1x8x128xf32>
    tpu.vector_store %arg11[%527, %c0_146, %c0_147], %530 {strides = array<i32>} : memref<8x8x128xf32, #tpu.memory_space<vmem>>, vector<1x8x128xf32>,
    %c4_i32_148 = arith.constant 4 : i32
    %531 = arith.index_cast %c4_i32_148 : i32 to index
    %c0_149 = arith.constant 0 : index
    %c0_150 = arith.constant 0 : index
    %532 = vector.load %arg12[%531, %c0_149, %c0_150] : memref<8x8x512xf32, #tpu.memory_space<vmem>>, vector<1x8x512xf32>
    %533 = vector.shape_cast %532 : vector<1x8x512xf32> to vector<8x512xf32>
    %534 = arith.truncf %524 : vector<8x128xf32> to vector<8x128xbf16>
    %cst_151 = arith.constant dense<0.000000e+00> : vector<8x512xf32>
    %535 = tpu.matmul %534, %354, %cst_151 {dimension_numbers = #tpu.dot_dimension_numbers<[1], [0], [0], [1], [0, 0, 1, 1], [], []>} : vector<8x128xbf16>, vector<128x512xbf16>, vector<8x512xf32> -> vector<8x512xf32>
    %536 = arith.addf %533, %535 : vector<8x512xf32>
    %537 = vector.extract_strided_slice %536 {offsets = [0, 0], sizes = [8, 128], strides = [1, 1]} : vector<8x512xf32> to vector<8x128xf32>
    %538 = arith.negf %537 : vector<8x128xf32>
    %539 = math.exp %538 : vector<8x128xf32>
    %cst_152 = arith.constant 1.000000e+00 : f32
    %540 = vector.broadcast %cst_152 : f32 to vector<8x128xf32>
    %541 = arith.addf %540, %539 : vector<8x128xf32>
    %542 = arith.divf %540, %541 : vector<8x128xf32>
    %543 = vector.extract_strided_slice %536 {offsets = [0, 128], sizes = [8, 128], strides = [1, 1]} : vector<8x512xf32> to vector<8x128xf32>
    %544 = arith.negf %543 : vector<8x128xf32>
    %545 = math.exp %544 : vector<8x128xf32>
    %cst_153 = arith.constant 1.000000e+00 : f32
    %546 = vector.broadcast %cst_153 : f32 to vector<8x128xf32>
    %547 = arith.addf %546, %545 : vector<8x128xf32>
    %548 = arith.divf %546, %547 : vector<8x128xf32>
    %549 = vector.extract_strided_slice %536 {offsets = [0, 256], sizes = [8, 128], strides = [1, 1]} : vector<8x512xf32> to vector<8x128xf32>
    %550 = math.tanh %549 : vector<8x128xf32>
    %551 = vector.extract_strided_slice %536 {offsets = [0, 384], sizes = [8, 128], strides = [1, 1]} : vector<8x512xf32> to vector<8x128xf32>
    %552 = arith.negf %551 : vector<8x128xf32>
    %553 = math.exp %552 : vector<8x128xf32>
    %cst_154 = arith.constant 1.000000e+00 : f32
    %554 = vector.broadcast %cst_154 : f32 to vector<8x128xf32>
    %555 = arith.addf %554, %553 : vector<8x128xf32>
    %556 = arith.divf %554, %555 : vector<8x128xf32>
    %557 = arith.mulf %548, %523 : vector<8x128xf32>
    %558 = arith.mulf %542, %550 : vector<8x128xf32>
    %559 = arith.addf %557, %558 : vector<8x128xf32>
    %560 = math.tanh %559 : vector<8x128xf32>
    %561 = arith.mulf %556, %560 : vector<8x128xf32>
    %562 = vector.broadcast %c4_i32_148 : i32 to vector<8x128xi32>
    %563 = arith.cmpi slt, %562, %0 : vector<8x128xi32>
    %564 = arith.select %563, %559, %523 : vector<8x128xi1>, vector<8x128xf32>
    %565 = arith.select %563, %561, %524 : vector<8x128xi1>, vector<8x128xf32>
    %cst_155 = arith.constant 0.000000e+00 : f32
    %566 = vector.broadcast %cst_155 : f32 to vector<8x128xf32>
    %567 = arith.select %563, %561, %566 : vector<8x128xi1>, vector<8x128xf32>
    %568 = arith.index_cast %c4_i32_148 : i32 to index
    %c0_156 = arith.constant 0 : index
    %c0_157 = arith.constant 0 : index
    %569 = vector.load %arg11[%568, %c0_156, %c0_157] : memref<8x8x128xf32, #tpu.memory_space<vmem>>, vector<1x8x128xf32>
    %570 = vector.shape_cast %569 : vector<1x8x128xf32> to vector<8x128xf32>
    %571 = vector.shape_cast %567 : vector<8x128xf32> to vector<1x8x128xf32>
    tpu.vector_store %arg11[%568, %c0_156, %c0_157], %571 {strides = array<i32>} : memref<8x8x128xf32, #tpu.memory_space<vmem>>, vector<1x8x128xf32>,
    %c5_i32_158 = arith.constant 5 : i32
    %572 = arith.index_cast %c5_i32_158 : i32 to index
    %c0_159 = arith.constant 0 : index
    %c0_160 = arith.constant 0 : index
    %573 = vector.load %arg12[%572, %c0_159, %c0_160] : memref<8x8x512xf32, #tpu.memory_space<vmem>>, vector<1x8x512xf32>
    %574 = vector.shape_cast %573 : vector<1x8x512xf32> to vector<8x512xf32>
    %575 = arith.truncf %565 : vector<8x128xf32> to vector<8x128xbf16>
    %cst_161 = arith.constant dense<0.000000e+00> : vector<8x512xf32>
    %576 = tpu.matmul %575, %354, %cst_161 {dimension_numbers = #tpu.dot_dimension_numbers<[1], [0], [0], [1], [0, 0, 1, 1], [], []>} : vector<8x128xbf16>, vector<128x512xbf16>, vector<8x512xf32> -> vector<8x512xf32>
    %577 = arith.addf %574, %576 : vector<8x512xf32>
    %578 = vector.extract_strided_slice %577 {offsets = [0, 0], sizes = [8, 128], strides = [1, 1]} : vector<8x512xf32> to vector<8x128xf32>
    %579 = arith.negf %578 : vector<8x128xf32>
    %580 = math.exp %579 : vector<8x128xf32>
    %cst_162 = arith.constant 1.000000e+00 : f32
    %581 = vector.broadcast %cst_162 : f32 to vector<8x128xf32>
    %582 = arith.addf %581, %580 : vector<8x128xf32>
    %583 = arith.divf %581, %582 : vector<8x128xf32>
    %584 = vector.extract_strided_slice %577 {offsets = [0, 128], sizes = [8, 128], strides = [1, 1]} : vector<8x512xf32> to vector<8x128xf32>
    %585 = arith.negf %584 : vector<8x128xf32>
    %586 = math.exp %585 : vector<8x128xf32>
    %cst_163 = arith.constant 1.000000e+00 : f32
    %587 = vector.broadcast %cst_163 : f32 to vector<8x128xf32>
    %588 = arith.addf %587, %586 : vector<8x128xf32>
    %589 = arith.divf %587, %588 : vector<8x128xf32>
    %590 = vector.extract_strided_slice %577 {offsets = [0, 256], sizes = [8, 128], strides = [1, 1]} : vector<8x512xf32> to vector<8x128xf32>
    %591 = math.tanh %590 : vector<8x128xf32>
    %592 = vector.extract_strided_slice %577 {offsets = [0, 384], sizes = [8, 128], strides = [1, 1]} : vector<8x512xf32> to vector<8x128xf32>
    %593 = arith.negf %592 : vector<8x128xf32>
    %594 = math.exp %593 : vector<8x128xf32>
    %cst_164 = arith.constant 1.000000e+00 : f32
    %595 = vector.broadcast %cst_164 : f32 to vector<8x128xf32>
    %596 = arith.addf %595, %594 : vector<8x128xf32>
    %597 = arith.divf %595, %596 : vector<8x128xf32>
    %598 = arith.mulf %589, %564 : vector<8x128xf32>
    %599 = arith.mulf %583, %591 : vector<8x128xf32>
    %600 = arith.addf %598, %599 : vector<8x128xf32>
    %601 = math.tanh %600 : vector<8x128xf32>
    %602 = arith.mulf %597, %601 : vector<8x128xf32>
    %603 = vector.broadcast %c5_i32_158 : i32 to vector<8x128xi32>
    %604 = arith.cmpi slt, %603, %0 : vector<8x128xi32>
    %605 = arith.select %604, %600, %564 : vector<8x128xi1>, vector<8x128xf32>
    %606 = arith.select %604, %602, %565 : vector<8x128xi1>, vector<8x128xf32>
    %cst_165 = arith.constant 0.000000e+00 : f32
    %607 = vector.broadcast %cst_165 : f32 to vector<8x128xf32>
    %608 = arith.select %604, %602, %607 : vector<8x128xi1>, vector<8x128xf32>
    %609 = arith.index_cast %c5_i32_158 : i32 to index
    %c0_166 = arith.constant 0 : index
    %c0_167 = arith.constant 0 : index
    %610 = vector.load %arg11[%609, %c0_166, %c0_167] : memref<8x8x128xf32, #tpu.memory_space<vmem>>, vector<1x8x128xf32>
    %611 = vector.shape_cast %610 : vector<1x8x128xf32> to vector<8x128xf32>
    %612 = vector.shape_cast %608 : vector<8x128xf32> to vector<1x8x128xf32>
    tpu.vector_store %arg11[%609, %c0_166, %c0_167], %612 {strides = array<i32>} : memref<8x8x128xf32, #tpu.memory_space<vmem>>, vector<1x8x128xf32>,
    %c6_i32_168 = arith.constant 6 : i32
    %613 = arith.index_cast %c6_i32_168 : i32 to index
    %c0_169 = arith.constant 0 : index
    %c0_170 = arith.constant 0 : index
    %614 = vector.load %arg12[%613, %c0_169, %c0_170] : memref<8x8x512xf32, #tpu.memory_space<vmem>>, vector<1x8x512xf32>
    %615 = vector.shape_cast %614 : vector<1x8x512xf32> to vector<8x512xf32>
    %616 = arith.truncf %606 : vector<8x128xf32> to vector<8x128xbf16>
    %cst_171 = arith.constant dense<0.000000e+00> : vector<8x512xf32>
    %617 = tpu.matmul %616, %354, %cst_171 {dimension_numbers = #tpu.dot_dimension_numbers<[1], [0], [0], [1], [0, 0, 1, 1], [], []>} : vector<8x128xbf16>, vector<128x512xbf16>, vector<8x512xf32> -> vector<8x512xf32>
    %618 = arith.addf %615, %617 : vector<8x512xf32>
    %619 = vector.extract_strided_slice %618 {offsets = [0, 0], sizes = [8, 128], strides = [1, 1]} : vector<8x512xf32> to vector<8x128xf32>
    %620 = arith.negf %619 : vector<8x128xf32>
    %621 = math.exp %620 : vector<8x128xf32>
    %cst_172 = arith.constant 1.000000e+00 : f32
    %622 = vector.broadcast %cst_172 : f32 to vector<8x128xf32>
    %623 = arith.addf %622, %621 : vector<8x128xf32>
    %624 = arith.divf %622, %623 : vector<8x128xf32>
    %625 = vector.extract_strided_slice %618 {offsets = [0, 128], sizes = [8, 128], strides = [1, 1]} : vector<8x512xf32> to vector<8x128xf32>
    %626 = arith.negf %625 : vector<8x128xf32>
    %627 = math.exp %626 : vector<8x128xf32>
    %cst_173 = arith.constant 1.000000e+00 : f32
    %628 = vector.broadcast %cst_173 : f32 to vector<8x128xf32>
    %629 = arith.addf %628, %627 : vector<8x128xf32>
    %630 = arith.divf %628, %629 : vector<8x128xf32>
    %631 = vector.extract_strided_slice %618 {offsets = [0, 256], sizes = [8, 128], strides = [1, 1]} : vector<8x512xf32> to vector<8x128xf32>
    %632 = math.tanh %631 : vector<8x128xf32>
    %633 = vector.extract_strided_slice %618 {offsets = [0, 384], sizes = [8, 128], strides = [1, 1]} : vector<8x512xf32> to vector<8x128xf32>
    %634 = arith.negf %633 : vector<8x128xf32>
    %635 = math.exp %634 : vector<8x128xf32>
    %cst_174 = arith.constant 1.000000e+00 : f32
    %636 = vector.broadcast %cst_174 : f32 to vector<8x128xf32>
    %637 = arith.addf %636, %635 : vector<8x128xf32>
    %638 = arith.divf %636, %637 : vector<8x128xf32>
    %639 = arith.mulf %630, %605 : vector<8x128xf32>
    %640 = arith.mulf %624, %632 : vector<8x128xf32>
    %641 = arith.addf %639, %640 : vector<8x128xf32>
    %642 = math.tanh %641 : vector<8x128xf32>
    %643 = arith.mulf %638, %642 : vector<8x128xf32>
    %644 = vector.broadcast %c6_i32_168 : i32 to vector<8x128xi32>
    %645 = arith.cmpi slt, %644, %0 : vector<8x128xi32>
    %646 = arith.select %645, %641, %605 : vector<8x128xi1>, vector<8x128xf32>
    %647 = arith.select %645, %643, %606 : vector<8x128xi1>, vector<8x128xf32>
    %cst_175 = arith.constant 0.000000e+00 : f32
    %648 = vector.broadcast %cst_175 : f32 to vector<8x128xf32>
    %649 = arith.select %645, %643, %648 : vector<8x128xi1>, vector<8x128xf32>
    %650 = arith.index_cast %c6_i32_168 : i32 to index
    %c0_176 = arith.constant 0 : index
    %c0_177 = arith.constant 0 : index
    %651 = vector.load %arg11[%650, %c0_176, %c0_177] : memref<8x8x128xf32, #tpu.memory_space<vmem>>, vector<1x8x128xf32>
    %652 = vector.shape_cast %651 : vector<1x8x128xf32> to vector<8x128xf32>
    %653 = vector.shape_cast %649 : vector<8x128xf32> to vector<1x8x128xf32>
    tpu.vector_store %arg11[%650, %c0_176, %c0_177], %653 {strides = array<i32>} : memref<8x8x128xf32, #tpu.memory_space<vmem>>, vector<1x8x128xf32>,
    %c7_i32_178 = arith.constant 7 : i32
    %654 = arith.index_cast %c7_i32_178 : i32 to index
    %c0_179 = arith.constant 0 : index
    %c0_180 = arith.constant 0 : index
    %655 = vector.load %arg12[%654, %c0_179, %c0_180] : memref<8x8x512xf32, #tpu.memory_space<vmem>>, vector<1x8x512xf32>
    %656 = vector.shape_cast %655 : vector<1x8x512xf32> to vector<8x512xf32>
    %657 = arith.truncf %647 : vector<8x128xf32> to vector<8x128xbf16>
    %cst_181 = arith.constant dense<0.000000e+00> : vector<8x512xf32>
    %658 = tpu.matmul %657, %354, %cst_181 {dimension_numbers = #tpu.dot_dimension_numbers<[1], [0], [0], [1], [0, 0, 1, 1], [], []>} : vector<8x128xbf16>, vector<128x512xbf16>, vector<8x512xf32> -> vector<8x512xf32>
    %659 = arith.addf %656, %658 : vector<8x512xf32>
    %660 = vector.extract_strided_slice %659 {offsets = [0, 0], sizes = [8, 128], strides = [1, 1]} : vector<8x512xf32> to vector<8x128xf32>
    %661 = arith.negf %660 : vector<8x128xf32>
    %662 = math.exp %661 : vector<8x128xf32>
    %cst_182 = arith.constant 1.000000e+00 : f32
    %663 = vector.broadcast %cst_182 : f32 to vector<8x128xf32>
    %664 = arith.addf %663, %662 : vector<8x128xf32>
    %665 = arith.divf %663, %664 : vector<8x128xf32>
    %666 = vector.extract_strided_slice %659 {offsets = [0, 128], sizes = [8, 128], strides = [1, 1]} : vector<8x512xf32> to vector<8x128xf32>
    %667 = arith.negf %666 : vector<8x128xf32>
    %668 = math.exp %667 : vector<8x128xf32>
    %cst_183 = arith.constant 1.000000e+00 : f32
    %669 = vector.broadcast %cst_183 : f32 to vector<8x128xf32>
    %670 = arith.addf %669, %668 : vector<8x128xf32>
    %671 = arith.divf %669, %670 : vector<8x128xf32>
    %672 = vector.extract_strided_slice %659 {offsets = [0, 256], sizes = [8, 128], strides = [1, 1]} : vector<8x512xf32> to vector<8x128xf32>
    %673 = math.tanh %672 : vector<8x128xf32>
    %674 = vector.extract_strided_slice %659 {offsets = [0, 384], sizes = [8, 128], strides = [1, 1]} : vector<8x512xf32> to vector<8x128xf32>
    %675 = arith.negf %674 : vector<8x128xf32>
    %676 = math.exp %675 : vector<8x128xf32>
    %cst_184 = arith.constant 1.000000e+00 : f32
    %677 = vector.broadcast %cst_184 : f32 to vector<8x128xf32>
    %678 = arith.addf %677, %676 : vector<8x128xf32>
    %679 = arith.divf %677, %678 : vector<8x128xf32>
    %680 = arith.mulf %671, %646 : vector<8x128xf32>
    %681 = arith.mulf %665, %673 : vector<8x128xf32>
    %682 = arith.addf %680, %681 : vector<8x128xf32>
    %683 = math.tanh %682 : vector<8x128xf32>
    %684 = arith.mulf %679, %683 : vector<8x128xf32>
    %685 = vector.broadcast %c7_i32_178 : i32 to vector<8x128xi32>
    %686 = arith.cmpi slt, %685, %0 : vector<8x128xi32>
    %687 = arith.select %686, %682, %646 : vector<8x128xi1>, vector<8x128xf32>
    %688 = arith.select %686, %684, %647 : vector<8x128xi1>, vector<8x128xf32>
    %cst_185 = arith.constant 0.000000e+00 : f32
    %689 = vector.broadcast %cst_185 : f32 to vector<8x128xf32>
    %690 = arith.select %686, %684, %689 : vector<8x128xi1>, vector<8x128xf32>
    %691 = arith.index_cast %c7_i32_178 : i32 to index
    %c0_186 = arith.constant 0 : index
    %c0_187 = arith.constant 0 : index
    %692 = vector.load %arg11[%691, %c0_186, %c0_187] : memref<8x8x128xf32, #tpu.memory_space<vmem>>, vector<1x8x128xf32>
    %693 = vector.shape_cast %692 : vector<1x8x128xf32> to vector<8x128xf32>
    %694 = vector.shape_cast %690 : vector<8x128xf32> to vector<1x8x128xf32>
    tpu.vector_store %arg11[%691, %c0_186, %c0_187], %694 {strides = array<i32>} : memref<8x8x128xf32, #tpu.memory_space<vmem>>, vector<1x8x128xf32>,
    %c8_i32_188 = arith.constant 8 : i32
    %c0_i32_189 = arith.constant 0 : i32
    %695 = tpu.memref_slice %arg16[%c0_i32_189] : memref<3x!tpu.dma_semaphore, #tpu.memory_space<semaphore_mem>> -> memref<1x!tpu.dma_semaphore, #tpu.memory_space<semaphore_mem>>
    %696 = tpu.memref_squeeze %695 : memref<1x!tpu.dma_semaphore, #tpu.memory_space<semaphore_mem>> -> memref<!tpu.dma_semaphore, #tpu.memory_space<semaphore_mem>>
    tpu.wait_dma2 semaphore(%696 : memref<!tpu.dma_semaphore, #tpu.memory_space<semaphore_mem>>) src(%arg5 : memref<2x128x512xbf16, #tpu.memory_space<any>>) dst(%arg13 : memref<2x128x512xbf16, #tpu.memory_space<vmem>>)
    %c1_i32_190 = arith.constant 1 : i32
    %697 = tpu.memref_slice %arg16[%c1_i32_190] : memref<3x!tpu.dma_semaphore, #tpu.memory_space<semaphore_mem>> -> memref<1x!tpu.dma_semaphore, #tpu.memory_space<semaphore_mem>>
    %698 = tpu.memref_squeeze %697 : memref<1x!tpu.dma_semaphore, #tpu.memory_space<semaphore_mem>> -> memref<!tpu.dma_semaphore, #tpu.memory_space<semaphore_mem>>
    tpu.wait_dma2 semaphore(%698 : memref<!tpu.dma_semaphore, #tpu.memory_space<semaphore_mem>>) src(%arg6 : memref<2x128x512xbf16, #tpu.memory_space<any>>) dst(%arg14 : memref<2x128x512xbf16, #tpu.memory_space<vmem>>)
    %c2_i32_191 = arith.constant 2 : i32
    %699 = tpu.memref_slice %arg16[%c2_i32_191] : memref<3x!tpu.dma_semaphore, #tpu.memory_space<semaphore_mem>> -> memref<1x!tpu.dma_semaphore, #tpu.memory_space<semaphore_mem>>
    %700 = tpu.memref_squeeze %699 : memref<1x!tpu.dma_semaphore, #tpu.memory_space<semaphore_mem>> -> memref<!tpu.dma_semaphore, #tpu.memory_space<semaphore_mem>>
    tpu.wait_dma2 semaphore(%700 : memref<!tpu.dma_semaphore, #tpu.memory_space<semaphore_mem>>) src(%arg7 : memref<2x1x512xf32, #tpu.memory_space<any>>) dst(%arg15 : memref<2x1x512xf32, #tpu.memory_space<vmem>>)
    %c0_192 = arith.constant 0 : index
    %c0_193 = arith.constant 0 : index
    %c0_194 = arith.constant 0 : index
    %701 = vector.load %arg13[%c0_192, %c0_193, %c0_194] : memref<2x128x512xbf16, #tpu.memory_space<vmem>>, vector<1x128x512xbf16>
    %702 = vector.shape_cast %701 : vector<1x128x512xbf16> to vector<128x512xbf16>
    %c0_195 = arith.constant 0 : index
    %c0_196 = arith.constant 0 : index
    %c0_197 = arith.constant 0 : index
    %703 = vector.load %arg14[%c0_195, %c0_196, %c0_197] : memref<2x128x512xbf16, #tpu.memory_space<vmem>>, vector<1x128x512xbf16>
    %704 = vector.shape_cast %703 : vector<1x128x512xbf16> to vector<128x512xbf16>
    %c0_198 = arith.constant 0 : index
    %c0_199 = arith.constant 0 : index
    %c0_200 = arith.constant 0 : index
    %705 = vector.load %arg15[%c0_198, %c0_199, %c0_200] : memref<2x1x512xf32, #tpu.memory_space<vmem>>, vector<1x1x512xf32>
    %706 = vector.shape_cast %705 : vector<1x1x512xf32> to vector<1x512xf32>
    %c0_201 = arith.constant 0 : index
    %c0_202 = arith.constant 0 : index
    %c0_203 = arith.constant 0 : index
    %707 = vector.load %arg11[%c0_201, %c0_202, %c0_203] : memref<8x8x128xf32, #tpu.memory_space<vmem>>, vector<8x8x128xf32>
    %708 = vector.shape_cast %707 : vector<8x8x128xf32> to vector<64x128xf32>
    %709 = arith.truncf %708 : vector<64x128xf32> to vector<64x128xbf16>
    %cst_204 = arith.constant dense<0.000000e+00> : vector<64x512xf32>
    %710 = tpu.matmul %709, %702, %cst_204 {dimension_numbers = #tpu.dot_dimension_numbers<[1], [0], [0], [1], [0, 0, 1, 1], [], []>} : vector<64x128xbf16>, vector<128x512xbf16>, vector<64x512xf32> -> vector<64x512xf32>
    %711 = vector.shape_cast %710 : vector<64x512xf32> to vector<8x8x512xf32>
    %712 = vector.shape_cast %706 : vector<1x512xf32> to vector<1x1x512xf32>
    %713 = vector.broadcast %712 : vector<1x1x512xf32> to vector<8x8x512xf32>
    %714 = arith.addf %711, %713 : vector<8x8x512xf32>
    %c0_205 = arith.constant 0 : index
    %c0_206 = arith.constant 0 : index
    %c0_207 = arith.constant 0 : index
    %715 = vector.load %arg12[%c0_205, %c0_206, %c0_207] : memref<8x8x512xf32, #tpu.memory_space<vmem>>, vector<8x8x512xf32>
    tpu.vector_store %arg12[%c0_205, %c0_206, %c0_207], %714 {strides = array<i32>} : memref<8x8x512xf32, #tpu.memory_space<vmem>>, vector<8x8x512xf32>,
    %cst_208 = arith.constant 0.000000e+00 : f32
    %716 = vector.broadcast %cst_208 : f32 to vector<8x128xf32>
    %c0_i32_209 = arith.constant 0 : i32
    %717 = arith.index_cast %c0_i32_209 : i32 to index
    %c0_210 = arith.constant 0 : index
    %c0_211 = arith.constant 0 : index
    %718 = vector.load %arg12[%717, %c0_210, %c0_211] : memref<8x8x512xf32, #tpu.memory_space<vmem>>, vector<1x8x512xf32>
    %719 = vector.shape_cast %718 : vector<1x8x512xf32> to vector<8x512xf32>
    %720 = arith.truncf %716 : vector<8x128xf32> to vector<8x128xbf16>
    %cst_212 = arith.constant dense<0.000000e+00> : vector<8x512xf32>
    %721 = tpu.matmul %720, %704, %cst_212 {dimension_numbers = #tpu.dot_dimension_numbers<[1], [0], [0], [1], [0, 0, 1, 1], [], []>} : vector<8x128xbf16>, vector<128x512xbf16>, vector<8x512xf32> -> vector<8x512xf32>
    %722 = arith.addf %719, %721 : vector<8x512xf32>
    %723 = vector.extract_strided_slice %722 {offsets = [0, 0], sizes = [8, 128], strides = [1, 1]} : vector<8x512xf32> to vector<8x128xf32>
    %724 = arith.negf %723 : vector<8x128xf32>
    %725 = math.exp %724 : vector<8x128xf32>
    %cst_213 = arith.constant 1.000000e+00 : f32
    %726 = vector.broadcast %cst_213 : f32 to vector<8x128xf32>
    %727 = arith.addf %726, %725 : vector<8x128xf32>
    %728 = arith.divf %726, %727 : vector<8x128xf32>
    %729 = vector.extract_strided_slice %722 {offsets = [0, 128], sizes = [8, 128], strides = [1, 1]} : vector<8x512xf32> to vector<8x128xf32>
    %730 = arith.negf %729 : vector<8x128xf32>
    %731 = math.exp %730 : vector<8x128xf32>
    %cst_214 = arith.constant 1.000000e+00 : f32
    %732 = vector.broadcast %cst_214 : f32 to vector<8x128xf32>
    %733 = arith.addf %732, %731 : vector<8x128xf32>
    %734 = arith.divf %732, %733 : vector<8x128xf32>
    %735 = vector.extract_strided_slice %722 {offsets = [0, 256], sizes = [8, 128], strides = [1, 1]} : vector<8x512xf32> to vector<8x128xf32>
    %736 = math.tanh %735 : vector<8x128xf32>
    %737 = vector.extract_strided_slice %722 {offsets = [0, 384], sizes = [8, 128], strides = [1, 1]} : vector<8x512xf32> to vector<8x128xf32>
    %738 = arith.negf %737 : vector<8x128xf32>
    %739 = math.exp %738 : vector<8x128xf32>
    %cst_215 = arith.constant 1.000000e+00 : f32
    %740 = vector.broadcast %cst_215 : f32 to vector<8x128xf32>
    %741 = arith.addf %740, %739 : vector<8x128xf32>
    %742 = arith.divf %740, %741 : vector<8x128xf32>
    %743 = arith.mulf %734, %716 : vector<8x128xf32>
    %744 = arith.mulf %728, %736 : vector<8x128xf32>
    %745 = arith.addf %743, %744 : vector<8x128xf32>
    %746 = math.tanh %745 : vector<8x128xf32>
    %747 = arith.mulf %742, %746 : vector<8x128xf32>
    %748 = arith.index_cast %c0_i32_209 : i32 to index
    %c0_216 = arith.constant 0 : index
    %c0_217 = arith.constant 0 : index
    %749 = vector.load %arg9[%748, %c0_216, %c0_217] : memref<8x8x128xf32, #tpu.memory_space<vmem>>, vector<1x8x128xf32>
    %750 = vector.shape_cast %749 : vector<1x8x128xf32> to vector<8x128xf32>
    %751 = vector.shape_cast %747 : vector<8x128xf32> to vector<1x8x128xf32>
    tpu.vector_store %arg9[%748, %c0_216, %c0_217], %751 {strides = array<i32>} : memref<8x8x128xf32, #tpu.memory_space<vmem>>, vector<1x8x128xf32>,
    %c1_i32_218 = arith.constant 1 : i32
    %752 = arith.index_cast %c1_i32_218 : i32 to index
    %c0_219 = arith.constant 0 : index
    %c0_220 = arith.constant 0 : index
    %753 = vector.load %arg12[%752, %c0_219, %c0_220] : memref<8x8x512xf32, #tpu.memory_space<vmem>>, vector<1x8x512xf32>
    %754 = vector.shape_cast %753 : vector<1x8x512xf32> to vector<8x512xf32>
    %755 = arith.truncf %747 : vector<8x128xf32> to vector<8x128xbf16>
    %cst_221 = arith.constant dense<0.000000e+00> : vector<8x512xf32>
    %756 = tpu.matmul %755, %704, %cst_221 {dimension_numbers = #tpu.dot_dimension_numbers<[1], [0], [0], [1], [0, 0, 1, 1], [], []>} : vector<8x128xbf16>, vector<128x512xbf16>, vector<8x512xf32> -> vector<8x512xf32>
    %757 = arith.addf %754, %756 : vector<8x512xf32>
    %758 = vector.extract_strided_slice %757 {offsets = [0, 0], sizes = [8, 128], strides = [1, 1]} : vector<8x512xf32> to vector<8x128xf32>
    %759 = arith.negf %758 : vector<8x128xf32>
    %760 = math.exp %759 : vector<8x128xf32>
    %cst_222 = arith.constant 1.000000e+00 : f32
    %761 = vector.broadcast %cst_222 : f32 to vector<8x128xf32>
    %762 = arith.addf %761, %760 : vector<8x128xf32>
    %763 = arith.divf %761, %762 : vector<8x128xf32>
    %764 = vector.extract_strided_slice %757 {offsets = [0, 128], sizes = [8, 128], strides = [1, 1]} : vector<8x512xf32> to vector<8x128xf32>
    %765 = arith.negf %764 : vector<8x128xf32>
    %766 = math.exp %765 : vector<8x128xf32>
    %cst_223 = arith.constant 1.000000e+00 : f32
    %767 = vector.broadcast %cst_223 : f32 to vector<8x128xf32>
    %768 = arith.addf %767, %766 : vector<8x128xf32>
    %769 = arith.divf %767, %768 : vector<8x128xf32>
    %770 = vector.extract_strided_slice %757 {offsets = [0, 256], sizes = [8, 128], strides = [1, 1]} : vector<8x512xf32> to vector<8x128xf32>
    %771 = math.tanh %770 : vector<8x128xf32>
    %772 = vector.extract_strided_slice %757 {offsets = [0, 384], sizes = [8, 128], strides = [1, 1]} : vector<8x512xf32> to vector<8x128xf32>
    %773 = arith.negf %772 : vector<8x128xf32>
    %774 = math.exp %773 : vector<8x128xf32>
    %cst_224 = arith.constant 1.000000e+00 : f32
    %775 = vector.broadcast %cst_224 : f32 to vector<8x128xf32>
    %776 = arith.addf %775, %774 : vector<8x128xf32>
    %777 = arith.divf %775, %776 : vector<8x128xf32>
    %778 = arith.mulf %769, %745 : vector<8x128xf32>
    %779 = arith.mulf %763, %771 : vector<8x128xf32>
    %780 = arith.addf %778, %779 : vector<8x128xf32>
    %781 = math.tanh %780 : vector<8x128xf32>
    %782 = arith.mulf %777, %781 : vector<8x128xf32>
    %783 = arith.index_cast %c1_i32_218 : i32 to index
    %c0_225 = arith.constant 0 : index
    %c0_226 = arith.constant 0 : index
    %784 = vector.load %arg9[%783, %c0_225, %c0_226] : memref<8x8x128xf32, #tpu.memory_space<vmem>>, vector<1x8x128xf32>
    %785 = vector.shape_cast %784 : vector<1x8x128xf32> to vector<8x128xf32>
    %786 = vector.shape_cast %782 : vector<8x128xf32> to vector<1x8x128xf32>
    tpu.vector_store %arg9[%783, %c0_225, %c0_226], %786 {strides = array<i32>} : memref<8x8x128xf32, #tpu.memory_space<vmem>>, vector<1x8x128xf32>,
    %c2_i32_227 = arith.constant 2 : i32
    %787 = arith.index_cast %c2_i32_227 : i32 to index
    %c0_228 = arith.constant 0 : index
    %c0_229 = arith.constant 0 : index
    %788 = vector.load %arg12[%787, %c0_228, %c0_229] : memref<8x8x512xf32, #tpu.memory_space<vmem>>, vector<1x8x512xf32>
    %789 = vector.shape_cast %788 : vector<1x8x512xf32> to vector<8x512xf32>
    %790 = arith.truncf %782 : vector<8x128xf32> to vector<8x128xbf16>
    %cst_230 = arith.constant dense<0.000000e+00> : vector<8x512xf32>
    %791 = tpu.matmul %790, %704, %cst_230 {dimension_numbers = #tpu.dot_dimension_numbers<[1], [0], [0], [1], [0, 0, 1, 1], [], []>} : vector<8x128xbf16>, vector<128x512xbf16>, vector<8x512xf32> -> vector<8x512xf32>
    %792 = arith.addf %789, %791 : vector<8x512xf32>
    %793 = vector.extract_strided_slice %792 {offsets = [0, 0], sizes = [8, 128], strides = [1, 1]} : vector<8x512xf32> to vector<8x128xf32>
    %794 = arith.negf %793 : vector<8x128xf32>
    %795 = math.exp %794 : vector<8x128xf32>
    %cst_231 = arith.constant 1.000000e+00 : f32
    %796 = vector.broadcast %cst_231 : f32 to vector<8x128xf32>
    %797 = arith.addf %796, %795 : vector<8x128xf32>
    %798 = arith.divf %796, %797 : vector<8x128xf32>
    %799 = vector.extract_strided_slice %792 {offsets = [0, 128], sizes = [8, 128], strides = [1, 1]} : vector<8x512xf32> to vector<8x128xf32>
    %800 = arith.negf %799 : vector<8x128xf32>
    %801 = math.exp %800 : vector<8x128xf32>
    %cst_232 = arith.constant 1.000000e+00 : f32
    %802 = vector.broadcast %cst_232 : f32 to vector<8x128xf32>
    %803 = arith.addf %802, %801 : vector<8x128xf32>
    %804 = arith.divf %802, %803 : vector<8x128xf32>
    %805 = vector.extract_strided_slice %792 {offsets = [0, 256], sizes = [8, 128], strides = [1, 1]} : vector<8x512xf32> to vector<8x128xf32>
    %806 = math.tanh %805 : vector<8x128xf32>
    %807 = vector.extract_strided_slice %792 {offsets = [0, 384], sizes = [8, 128], strides = [1, 1]} : vector<8x512xf32> to vector<8x128xf32>
    %808 = arith.negf %807 : vector<8x128xf32>
    %809 = math.exp %808 : vector<8x128xf32>
    %cst_233 = arith.constant 1.000000e+00 : f32
    %810 = vector.broadcast %cst_233 : f32 to vector<8x128xf32>
    %811 = arith.addf %810, %809 : vector<8x128xf32>
    %812 = arith.divf %810, %811 : vector<8x128xf32>
    %813 = arith.mulf %804, %780 : vector<8x128xf32>
    %814 = arith.mulf %798, %806 : vector<8x128xf32>
    %815 = arith.addf %813, %814 : vector<8x128xf32>
    %816 = math.tanh %815 : vector<8x128xf32>
    %817 = arith.mulf %812, %816 : vector<8x128xf32>
    %818 = arith.index_cast %c2_i32_227 : i32 to index
    %c0_234 = arith.constant 0 : index
    %c0_235 = arith.constant 0 : index
    %819 = vector.load %arg9[%818, %c0_234, %c0_235] : memref<8x8x128xf32, #tpu.memory_space<vmem>>, vector<1x8x128xf32>
    %820 = vector.shape_cast %819 : vector<1x8x128xf32> to vector<8x128xf32>
    %821 = vector.shape_cast %817 : vector<8x128xf32> to vector<1x8x128xf32>
    tpu.vector_store %arg9[%818, %c0_234, %c0_235], %821 {strides = array<i32>} : memref<8x8x128xf32, #tpu.memory_space<vmem>>, vector<1x8x128xf32>,
    %c3_i32_236 = arith.constant 3 : i32
    %822 = arith.index_cast %c3_i32_236 : i32 to index
    %c0_237 = arith.constant 0 : index
    %c0_238 = arith.constant 0 : index
    %823 = vector.load %arg12[%822, %c0_237, %c0_238] : memref<8x8x512xf32, #tpu.memory_space<vmem>>, vector<1x8x512xf32>
    %824 = vector.shape_cast %823 : vector<1x8x512xf32> to vector<8x512xf32>
    %825 = arith.truncf %817 : vector<8x128xf32> to vector<8x128xbf16>
    %cst_239 = arith.constant dense<0.000000e+00> : vector<8x512xf32>
    %826 = tpu.matmul %825, %704, %cst_239 {dimension_numbers = #tpu.dot_dimension_numbers<[1], [0], [0], [1], [0, 0, 1, 1], [], []>} : vector<8x128xbf16>, vector<128x512xbf16>, vector<8x512xf32> -> vector<8x512xf32>
    %827 = arith.addf %824, %826 : vector<8x512xf32>
    %828 = vector.extract_strided_slice %827 {offsets = [0, 0], sizes = [8, 128], strides = [1, 1]} : vector<8x512xf32> to vector<8x128xf32>
    %829 = arith.negf %828 : vector<8x128xf32>
    %830 = math.exp %829 : vector<8x128xf32>
    %cst_240 = arith.constant 1.000000e+00 : f32
    %831 = vector.broadcast %cst_240 : f32 to vector<8x128xf32>
    %832 = arith.addf %831, %830 : vector<8x128xf32>
    %833 = arith.divf %831, %832 : vector<8x128xf32>
    %834 = vector.extract_strided_slice %827 {offsets = [0, 128], sizes = [8, 128], strides = [1, 1]} : vector<8x512xf32> to vector<8x128xf32>
    %835 = arith.negf %834 : vector<8x128xf32>
    %836 = math.exp %835 : vector<8x128xf32>
    %cst_241 = arith.constant 1.000000e+00 : f32
    %837 = vector.broadcast %cst_241 : f32 to vector<8x128xf32>
    %838 = arith.addf %837, %836 : vector<8x128xf32>
    %839 = arith.divf %837, %838 : vector<8x128xf32>
    %840 = vector.extract_strided_slice %827 {offsets = [0, 256], sizes = [8, 128], strides = [1, 1]} : vector<8x512xf32> to vector<8x128xf32>
    %841 = math.tanh %840 : vector<8x128xf32>
    %842 = vector.extract_strided_slice %827 {offsets = [0, 384], sizes = [8, 128], strides = [1, 1]} : vector<8x512xf32> to vector<8x128xf32>
    %843 = arith.negf %842 : vector<8x128xf32>
    %844 = math.exp %843 : vector<8x128xf32>
    %cst_242 = arith.constant 1.000000e+00 : f32
    %845 = vector.broadcast %cst_242 : f32 to vector<8x128xf32>
    %846 = arith.addf %845, %844 : vector<8x128xf32>
    %847 = arith.divf %845, %846 : vector<8x128xf32>
    %848 = arith.mulf %839, %815 : vector<8x128xf32>
    %849 = arith.mulf %833, %841 : vector<8x128xf32>
    %850 = arith.addf %848, %849 : vector<8x128xf32>
    %851 = math.tanh %850 : vector<8x128xf32>
    %852 = arith.mulf %847, %851 : vector<8x128xf32>
    %853 = arith.index_cast %c3_i32_236 : i32 to index
    %c0_243 = arith.constant 0 : index
    %c0_244 = arith.constant 0 : index
    %854 = vector.load %arg9[%853, %c0_243, %c0_244] : memref<8x8x128xf32, #tpu.memory_space<vmem>>, vector<1x8x128xf32>
    %855 = vector.shape_cast %854 : vector<1x8x128xf32> to vector<8x128xf32>
    %856 = vector.shape_cast %852 : vector<8x128xf32> to vector<1x8x128xf32>
    tpu.vector_store %arg9[%853, %c0_243, %c0_244], %856 {strides = array<i32>} : memref<8x8x128xf32, #tpu.memory_space<vmem>>, vector<1x8x128xf32>,
    %c4_i32_245 = arith.constant 4 : i32
    %857 = arith.index_cast %c4_i32_245 : i32 to index
    %c0_246 = arith.constant 0 : index
    %c0_247 = arith.constant 0 : index
    %858 = vector.load %arg12[%857, %c0_246, %c0_247] : memref<8x8x512xf32, #tpu.memory_space<vmem>>, vector<1x8x512xf32>
    %859 = vector.shape_cast %858 : vector<1x8x512xf32> to vector<8x512xf32>
    %860 = arith.truncf %852 : vector<8x128xf32> to vector<8x128xbf16>
    %cst_248 = arith.constant dense<0.000000e+00> : vector<8x512xf32>
    %861 = tpu.matmul %860, %704, %cst_248 {dimension_numbers = #tpu.dot_dimension_numbers<[1], [0], [0], [1], [0, 0, 1, 1], [], []>} : vector<8x128xbf16>, vector<128x512xbf16>, vector<8x512xf32> -> vector<8x512xf32>
    %862 = arith.addf %859, %861 : vector<8x512xf32>
    %863 = vector.extract_strided_slice %862 {offsets = [0, 0], sizes = [8, 128], strides = [1, 1]} : vector<8x512xf32> to vector<8x128xf32>
    %864 = arith.negf %863 : vector<8x128xf32>
    %865 = math.exp %864 : vector<8x128xf32>
    %cst_249 = arith.constant 1.000000e+00 : f32
    %866 = vector.broadcast %cst_249 : f32 to vector<8x128xf32>
    %867 = arith.addf %866, %865 : vector<8x128xf32>
    %868 = arith.divf %866, %867 : vector<8x128xf32>
    %869 = vector.extract_strided_slice %862 {offsets = [0, 128], sizes = [8, 128], strides = [1, 1]} : vector<8x512xf32> to vector<8x128xf32>
    %870 = arith.negf %869 : vector<8x128xf32>
    %871 = math.exp %870 : vector<8x128xf32>
    %cst_250 = arith.constant 1.000000e+00 : f32
    %872 = vector.broadcast %cst_250 : f32 to vector<8x128xf32>
    %873 = arith.addf %872, %871 : vector<8x128xf32>
    %874 = arith.divf %872, %873 : vector<8x128xf32>
    %875 = vector.extract_strided_slice %862 {offsets = [0, 256], sizes = [8, 128], strides = [1, 1]} : vector<8x512xf32> to vector<8x128xf32>
    %876 = math.tanh %875 : vector<8x128xf32>
    %877 = vector.extract_strided_slice %862 {offsets = [0, 384], sizes = [8, 128], strides = [1, 1]} : vector<8x512xf32> to vector<8x128xf32>
    %878 = arith.negf %877 : vector<8x128xf32>
    %879 = math.exp %878 : vector<8x128xf32>
    %cst_251 = arith.constant 1.000000e+00 : f32
    %880 = vector.broadcast %cst_251 : f32 to vector<8x128xf32>
    %881 = arith.addf %880, %879 : vector<8x128xf32>
    %882 = arith.divf %880, %881 : vector<8x128xf32>
    %883 = arith.mulf %874, %850 : vector<8x128xf32>
    %884 = arith.mulf %868, %876 : vector<8x128xf32>
    %885 = arith.addf %883, %884 : vector<8x128xf32>
    %886 = math.tanh %885 : vector<8x128xf32>
    %887 = arith.mulf %882, %886 : vector<8x128xf32>
    %888 = arith.index_cast %c4_i32_245 : i32 to index
    %c0_252 = arith.constant 0 : index
    %c0_253 = arith.constant 0 : index
    %889 = vector.load %arg9[%888, %c0_252, %c0_253] : memref<8x8x128xf32, #tpu.memory_space<vmem>>, vector<1x8x128xf32>
    %890 = vector.shape_cast %889 : vector<1x8x128xf32> to vector<8x128xf32>
    %891 = vector.shape_cast %887 : vector<8x128xf32> to vector<1x8x128xf32>
    tpu.vector_store %arg9[%888, %c0_252, %c0_253], %891 {strides = array<i32>} : memref<8x8x128xf32, #tpu.memory_space<vmem>>, vector<1x8x128xf32>,
    %c5_i32_254 = arith.constant 5 : i32
    %892 = arith.index_cast %c5_i32_254 : i32 to index
    %c0_255 = arith.constant 0 : index
    %c0_256 = arith.constant 0 : index
    %893 = vector.load %arg12[%892, %c0_255, %c0_256] : memref<8x8x512xf32, #tpu.memory_space<vmem>>, vector<1x8x512xf32>
    %894 = vector.shape_cast %893 : vector<1x8x512xf32> to vector<8x512xf32>
    %895 = arith.truncf %887 : vector<8x128xf32> to vector<8x128xbf16>
    %cst_257 = arith.constant dense<0.000000e+00> : vector<8x512xf32>
    %896 = tpu.matmul %895, %704, %cst_257 {dimension_numbers = #tpu.dot_dimension_numbers<[1], [0], [0], [1], [0, 0, 1, 1], [], []>} : vector<8x128xbf16>, vector<128x512xbf16>, vector<8x512xf32> -> vector<8x512xf32>
    %897 = arith.addf %894, %896 : vector<8x512xf32>
    %898 = vector.extract_strided_slice %897 {offsets = [0, 0], sizes = [8, 128], strides = [1, 1]} : vector<8x512xf32> to vector<8x128xf32>
    %899 = arith.negf %898 : vector<8x128xf32>
    %900 = math.exp %899 : vector<8x128xf32>
    %cst_258 = arith.constant 1.000000e+00 : f32
    %901 = vector.broadcast %cst_258 : f32 to vector<8x128xf32>
    %902 = arith.addf %901, %900 : vector<8x128xf32>
    %903 = arith.divf %901, %902 : vector<8x128xf32>
    %904 = vector.extract_strided_slice %897 {offsets = [0, 128], sizes = [8, 128], strides = [1, 1]} : vector<8x512xf32> to vector<8x128xf32>
    %905 = arith.negf %904 : vector<8x128xf32>
    %906 = math.exp %905 : vector<8x128xf32>
    %cst_259 = arith.constant 1.000000e+00 : f32
    %907 = vector.broadcast %cst_259 : f32 to vector<8x128xf32>
    %908 = arith.addf %907, %906 : vector<8x128xf32>
    %909 = arith.divf %907, %908 : vector<8x128xf32>
    %910 = vector.extract_strided_slice %897 {offsets = [0, 256], sizes = [8, 128], strides = [1, 1]} : vector<8x512xf32> to vector<8x128xf32>
    %911 = math.tanh %910 : vector<8x128xf32>
    %912 = vector.extract_strided_slice %897 {offsets = [0, 384], sizes = [8, 128], strides = [1, 1]} : vector<8x512xf32> to vector<8x128xf32>
    %913 = arith.negf %912 : vector<8x128xf32>
    %914 = math.exp %913 : vector<8x128xf32>
    %cst_260 = arith.constant 1.000000e+00 : f32
    %915 = vector.broadcast %cst_260 : f32 to vector<8x128xf32>
    %916 = arith.addf %915, %914 : vector<8x128xf32>
    %917 = arith.divf %915, %916 : vector<8x128xf32>
    %918 = arith.mulf %909, %885 : vector<8x128xf32>
    %919 = arith.mulf %903, %911 : vector<8x128xf32>
    %920 = arith.addf %918, %919 : vector<8x128xf32>
    %921 = math.tanh %920 : vector<8x128xf32>
    %922 = arith.mulf %917, %921 : vector<8x128xf32>
    %923 = arith.index_cast %c5_i32_254 : i32 to index
    %c0_261 = arith.constant 0 : index
    %c0_262 = arith.constant 0 : index
    %924 = vector.load %arg9[%923, %c0_261, %c0_262] : memref<8x8x128xf32, #tpu.memory_space<vmem>>, vector<1x8x128xf32>
    %925 = vector.shape_cast %924 : vector<1x8x128xf32> to vector<8x128xf32>
    %926 = vector.shape_cast %922 : vector<8x128xf32> to vector<1x8x128xf32>
    tpu.vector_store %arg9[%923, %c0_261, %c0_262], %926 {strides = array<i32>} : memref<8x8x128xf32, #tpu.memory_space<vmem>>, vector<1x8x128xf32>,
    %c6_i32_263 = arith.constant 6 : i32
    %927 = arith.index_cast %c6_i32_263 : i32 to index
    %c0_264 = arith.constant 0 : index
    %c0_265 = arith.constant 0 : index
    %928 = vector.load %arg12[%927, %c0_264, %c0_265] : memref<8x8x512xf32, #tpu.memory_space<vmem>>, vector<1x8x512xf32>
    %929 = vector.shape_cast %928 : vector<1x8x512xf32> to vector<8x512xf32>
    %930 = arith.truncf %922 : vector<8x128xf32> to vector<8x128xbf16>
    %cst_266 = arith.constant dense<0.000000e+00> : vector<8x512xf32>
    %931 = tpu.matmul %930, %704, %cst_266 {dimension_numbers = #tpu.dot_dimension_numbers<[1], [0], [0], [1], [0, 0, 1, 1], [], []>} : vector<8x128xbf16>, vector<128x512xbf16>, vector<8x512xf32> -> vector<8x512xf32>
    %932 = arith.addf %929, %931 : vector<8x512xf32>
    %933 = vector.extract_strided_slice %932 {offsets = [0, 0], sizes = [8, 128], strides = [1, 1]} : vector<8x512xf32> to vector<8x128xf32>
    %934 = arith.negf %933 : vector<8x128xf32>
    %935 = math.exp %934 : vector<8x128xf32>
    %cst_267 = arith.constant 1.000000e+00 : f32
    %936 = vector.broadcast %cst_267 : f32 to vector<8x128xf32>
    %937 = arith.addf %936, %935 : vector<8x128xf32>
    %938 = arith.divf %936, %937 : vector<8x128xf32>
    %939 = vector.extract_strided_slice %932 {offsets = [0, 128], sizes = [8, 128], strides = [1, 1]} : vector<8x512xf32> to vector<8x128xf32>
    %940 = arith.negf %939 : vector<8x128xf32>
    %941 = math.exp %940 : vector<8x128xf32>
    %cst_268 = arith.constant 1.000000e+00 : f32
    %942 = vector.broadcast %cst_268 : f32 to vector<8x128xf32>
    %943 = arith.addf %942, %941 : vector<8x128xf32>
    %944 = arith.divf %942, %943 : vector<8x128xf32>
    %945 = vector.extract_strided_slice %932 {offsets = [0, 256], sizes = [8, 128], strides = [1, 1]} : vector<8x512xf32> to vector<8x128xf32>
    %946 = math.tanh %945 : vector<8x128xf32>
    %947 = vector.extract_strided_slice %932 {offsets = [0, 384], sizes = [8, 128], strides = [1, 1]} : vector<8x512xf32> to vector<8x128xf32>
    %948 = arith.negf %947 : vector<8x128xf32>
    %949 = math.exp %948 : vector<8x128xf32>
    %cst_269 = arith.constant 1.000000e+00 : f32
    %950 = vector.broadcast %cst_269 : f32 to vector<8x128xf32>
    %951 = arith.addf %950, %949 : vector<8x128xf32>
    %952 = arith.divf %950, %951 : vector<8x128xf32>
    %953 = arith.mulf %944, %920 : vector<8x128xf32>
    %954 = arith.mulf %938, %946 : vector<8x128xf32>
    %955 = arith.addf %953, %954 : vector<8x128xf32>
    %956 = math.tanh %955 : vector<8x128xf32>
    %957 = arith.mulf %952, %956 : vector<8x128xf32>
    %958 = arith.index_cast %c6_i32_263 : i32 to index
    %c0_270 = arith.constant 0 : index
    %c0_271 = arith.constant 0 : index
    %959 = vector.load %arg9[%958, %c0_270, %c0_271] : memref<8x8x128xf32, #tpu.memory_space<vmem>>, vector<1x8x128xf32>
    %960 = vector.shape_cast %959 : vector<1x8x128xf32> to vector<8x128xf32>
    %961 = vector.shape_cast %957 : vector<8x128xf32> to vector<1x8x128xf32>
    tpu.vector_store %arg9[%958, %c0_270, %c0_271], %961 {strides = array<i32>} : memref<8x8x128xf32, #tpu.memory_space<vmem>>, vector<1x8x128xf32>,
    %c7_i32_272 = arith.constant 7 : i32
    %962 = arith.index_cast %c7_i32_272 : i32 to index
    %c0_273 = arith.constant 0 : index
    %c0_274 = arith.constant 0 : index
    %963 = vector.load %arg12[%962, %c0_273, %c0_274] : memref<8x8x512xf32, #tpu.memory_space<vmem>>, vector<1x8x512xf32>
    %964 = vector.shape_cast %963 : vector<1x8x512xf32> to vector<8x512xf32>
    %965 = arith.truncf %957 : vector<8x128xf32> to vector<8x128xbf16>
    %cst_275 = arith.constant dense<0.000000e+00> : vector<8x512xf32>
    %966 = tpu.matmul %965, %704, %cst_275 {dimension_numbers = #tpu.dot_dimension_numbers<[1], [0], [0], [1], [0, 0, 1, 1], [], []>} : vector<8x128xbf16>, vector<128x512xbf16>, vector<8x512xf32> -> vector<8x512xf32>
    %967 = arith.addf %964, %966 : vector<8x512xf32>
    %968 = vector.extract_strided_slice %967 {offsets = [0, 0], sizes = [8, 128], strides = [1, 1]} : vector<8x512xf32> to vector<8x128xf32>
    %969 = arith.negf %968 : vector<8x128xf32>
    %970 = math.exp %969 : vector<8x128xf32>
    %cst_276 = arith.constant 1.000000e+00 : f32
    %971 = vector.broadcast %cst_276 : f32 to vector<8x128xf32>
    %972 = arith.addf %971, %970 : vector<8x128xf32>
    %973 = arith.divf %971, %972 : vector<8x128xf32>
    %974 = vector.extract_strided_slice %967 {offsets = [0, 128], sizes = [8, 128], strides = [1, 1]} : vector<8x512xf32> to vector<8x128xf32>
    %975 = arith.negf %974 : vector<8x128xf32>
    %976 = math.exp %975 : vector<8x128xf32>
    %cst_277 = arith.constant 1.000000e+00 : f32
    %977 = vector.broadcast %cst_277 : f32 to vector<8x128xf32>
    %978 = arith.addf %977, %976 : vector<8x128xf32>
    %979 = arith.divf %977, %978 : vector<8x128xf32>
    %980 = vector.extract_strided_slice %967 {offsets = [0, 256], sizes = [8, 128], strides = [1, 1]} : vector<8x512xf32> to vector<8x128xf32>
    %981 = math.tanh %980 : vector<8x128xf32>
    %982 = vector.extract_strided_slice %967 {offsets = [0, 384], sizes = [8, 128], strides = [1, 1]} : vector<8x512xf32> to vector<8x128xf32>
    %983 = arith.negf %982 : vector<8x128xf32>
    %984 = math.exp %983 : vector<8x128xf32>
    %cst_278 = arith.constant 1.000000e+00 : f32
    %985 = vector.broadcast %cst_278 : f32 to vector<8x128xf32>
    %986 = arith.addf %985, %984 : vector<8x128xf32>
    %987 = arith.divf %985, %986 : vector<8x128xf32>
    %988 = arith.mulf %979, %955 : vector<8x128xf32>
    %989 = arith.mulf %973, %981 : vector<8x128xf32>
    %990 = arith.addf %988, %989 : vector<8x128xf32>
    %991 = math.tanh %990 : vector<8x128xf32>
    %992 = arith.mulf %987, %991 : vector<8x128xf32>
    %993 = arith.index_cast %c7_i32_272 : i32 to index
    %c0_279 = arith.constant 0 : index
    %c0_280 = arith.constant 0 : index
    %994 = vector.load %arg9[%993, %c0_279, %c0_280] : memref<8x8x128xf32, #tpu.memory_space<vmem>>, vector<1x8x128xf32>
    %995 = vector.shape_cast %994 : vector<1x8x128xf32> to vector<8x128xf32>
    %996 = vector.shape_cast %992 : vector<8x128xf32> to vector<1x8x128xf32>
    tpu.vector_store %arg9[%993, %c0_279, %c0_280], %996 {strides = array<i32>} : memref<8x8x128xf32, #tpu.memory_space<vmem>>, vector<1x8x128xf32>,
    %c8_i32_281 = arith.constant 8 : i32
    %c1_282 = arith.constant 1 : index
    %c0_283 = arith.constant 0 : index
    %c0_284 = arith.constant 0 : index
    %997 = vector.load %arg13[%c1_282, %c0_283, %c0_284] : memref<2x128x512xbf16, #tpu.memory_space<vmem>>, vector<1x128x512xbf16>
    %998 = vector.shape_cast %997 : vector<1x128x512xbf16> to vector<128x512xbf16>
    %c1_285 = arith.constant 1 : index
    %c0_286 = arith.constant 0 : index
    %c0_287 = arith.constant 0 : index
    %999 = vector.load %arg14[%c1_285, %c0_286, %c0_287] : memref<2x128x512xbf16, #tpu.memory_space<vmem>>, vector<1x128x512xbf16>
    %1000 = vector.shape_cast %999 : vector<1x128x512xbf16> to vector<128x512xbf16>
    %c1_288 = arith.constant 1 : index
    %c0_289 = arith.constant 0 : index
    %c0_290 = arith.constant 0 : index
    %1001 = vector.load %arg15[%c1_288, %c0_289, %c0_290] : memref<2x1x512xf32, #tpu.memory_space<vmem>>, vector<1x1x512xf32>
    %1002 = vector.shape_cast %1001 : vector<1x1x512xf32> to vector<1x512xf32>
    %c0_291 = arith.constant 0 : index
    %c0_292 = arith.constant 0 : index
    %c0_293 = arith.constant 0 : index
    %1003 = vector.load %arg9[%c0_291, %c0_292, %c0_293] : memref<8x8x128xf32, #tpu.memory_space<vmem>>, vector<8x8x128xf32>
    %1004 = vector.shape_cast %1003 : vector<8x8x128xf32> to vector<64x128xf32>
    %1005 = arith.truncf %1004 : vector<64x128xf32> to vector<64x128xbf16>
    %cst_294 = arith.constant dense<0.000000e+00> : vector<64x512xf32>
    %1006 = tpu.matmul %1005, %998, %cst_294 {dimension_numbers = #tpu.dot_dimension_numbers<[1], [0], [0], [1], [0, 0, 1, 1], [], []>} : vector<64x128xbf16>, vector<128x512xbf16>, vector<64x512xf32> -> vector<64x512xf32>
    %1007 = vector.shape_cast %1006 : vector<64x512xf32> to vector<8x8x512xf32>
    %1008 = vector.shape_cast %1002 : vector<1x512xf32> to vector<1x1x512xf32>
    %1009 = vector.broadcast %1008 : vector<1x1x512xf32> to vector<8x8x512xf32>
    %1010 = arith.addf %1007, %1009 : vector<8x8x512xf32>
    %c0_295 = arith.constant 0 : index
    %c0_296 = arith.constant 0 : index
    %c0_297 = arith.constant 0 : index
    %1011 = vector.load %arg12[%c0_295, %c0_296, %c0_297] : memref<8x8x512xf32, #tpu.memory_space<vmem>>, vector<8x8x512xf32>
    tpu.vector_store %arg12[%c0_295, %c0_296, %c0_297], %1010 {strides = array<i32>} : memref<8x8x512xf32, #tpu.memory_space<vmem>>, vector<8x8x512xf32>,
    %cst_298 = arith.constant 0.000000e+00 : f32
    %1012 = vector.broadcast %cst_298 : f32 to vector<8x128xf32>
    %c0_i32_299 = arith.constant 0 : i32
    %1013 = arith.index_cast %c0_i32_299 : i32 to index
    %c0_300 = arith.constant 0 : index
    %c0_301 = arith.constant 0 : index
    %1014 = vector.load %arg12[%1013, %c0_300, %c0_301] : memref<8x8x512xf32, #tpu.memory_space<vmem>>, vector<1x8x512xf32>
    %1015 = vector.shape_cast %1014 : vector<1x8x512xf32> to vector<8x512xf32>
    %1016 = arith.truncf %1012 : vector<8x128xf32> to vector<8x128xbf16>
    %cst_302 = arith.constant dense<0.000000e+00> : vector<8x512xf32>
    %1017 = tpu.matmul %1016, %1000, %cst_302 {dimension_numbers = #tpu.dot_dimension_numbers<[1], [0], [0], [1], [0, 0, 1, 1], [], []>} : vector<8x128xbf16>, vector<128x512xbf16>, vector<8x512xf32> -> vector<8x512xf32>
    %1018 = arith.addf %1015, %1017 : vector<8x512xf32>
    %1019 = vector.extract_strided_slice %1018 {offsets = [0, 0], sizes = [8, 128], strides = [1, 1]} : vector<8x512xf32> to vector<8x128xf32>
    %1020 = arith.negf %1019 : vector<8x128xf32>
    %1021 = math.exp %1020 : vector<8x128xf32>
    %cst_303 = arith.constant 1.000000e+00 : f32
    %1022 = vector.broadcast %cst_303 : f32 to vector<8x128xf32>
    %1023 = arith.addf %1022, %1021 : vector<8x128xf32>
    %1024 = arith.divf %1022, %1023 : vector<8x128xf32>
    %1025 = vector.extract_strided_slice %1018 {offsets = [0, 128], sizes = [8, 128], strides = [1, 1]} : vector<8x512xf32> to vector<8x128xf32>
    %1026 = arith.negf %1025 : vector<8x128xf32>
    %1027 = math.exp %1026 : vector<8x128xf32>
    %cst_304 = arith.constant 1.000000e+00 : f32
    %1028 = vector.broadcast %cst_304 : f32 to vector<8x128xf32>
    %1029 = arith.addf %1028, %1027 : vector<8x128xf32>
    %1030 = arith.divf %1028, %1029 : vector<8x128xf32>
    %1031 = vector.extract_strided_slice %1018 {offsets = [0, 256], sizes = [8, 128], strides = [1, 1]} : vector<8x512xf32> to vector<8x128xf32>
    %1032 = math.tanh %1031 : vector<8x128xf32>
    %1033 = vector.extract_strided_slice %1018 {offsets = [0, 384], sizes = [8, 128], strides = [1, 1]} : vector<8x512xf32> to vector<8x128xf32>
    %1034 = arith.negf %1033 : vector<8x128xf32>
    %1035 = math.exp %1034 : vector<8x128xf32>
    %cst_305 = arith.constant 1.000000e+00 : f32
    %1036 = vector.broadcast %cst_305 : f32 to vector<8x128xf32>
    %1037 = arith.addf %1036, %1035 : vector<8x128xf32>
    %1038 = arith.divf %1036, %1037 : vector<8x128xf32>
    %1039 = arith.mulf %1030, %1012 : vector<8x128xf32>
    %1040 = arith.mulf %1024, %1032 : vector<8x128xf32>
    %1041 = arith.addf %1039, %1040 : vector<8x128xf32>
    %1042 = math.tanh %1041 : vector<8x128xf32>
    %1043 = arith.mulf %1038, %1042 : vector<8x128xf32>
    %1044 = arith.index_cast %c0_i32_299 : i32 to index
    %c0_306 = arith.constant 0 : index
    %c0_307 = arith.constant 0 : index
    %1045 = vector.load %arg8[%1044, %c0_306, %c0_307] : memref<8x8x128xf32, #tpu.memory_space<vmem>>, vector<1x8x128xf32>
    %1046 = vector.shape_cast %1045 : vector<1x8x128xf32> to vector<8x128xf32>
    %1047 = vector.shape_cast %1043 : vector<8x128xf32> to vector<1x8x128xf32>
    tpu.vector_store %arg8[%1044, %c0_306, %c0_307], %1047 {strides = array<i32>} : memref<8x8x128xf32, #tpu.memory_space<vmem>>, vector<1x8x128xf32>,
    %c1_i32_308 = arith.constant 1 : i32
    %1048 = arith.index_cast %c1_i32_308 : i32 to index
    %c0_309 = arith.constant 0 : index
    %c0_310 = arith.constant 0 : index
    %1049 = vector.load %arg12[%1048, %c0_309, %c0_310] : memref<8x8x512xf32, #tpu.memory_space<vmem>>, vector<1x8x512xf32>
    %1050 = vector.shape_cast %1049 : vector<1x8x512xf32> to vector<8x512xf32>
    %1051 = arith.truncf %1043 : vector<8x128xf32> to vector<8x128xbf16>
    %cst_311 = arith.constant dense<0.000000e+00> : vector<8x512xf32>
    %1052 = tpu.matmul %1051, %1000, %cst_311 {dimension_numbers = #tpu.dot_dimension_numbers<[1], [0], [0], [1], [0, 0, 1, 1], [], []>} : vector<8x128xbf16>, vector<128x512xbf16>, vector<8x512xf32> -> vector<8x512xf32>
    %1053 = arith.addf %1050, %1052 : vector<8x512xf32>
    %1054 = vector.extract_strided_slice %1053 {offsets = [0, 0], sizes = [8, 128], strides = [1, 1]} : vector<8x512xf32> to vector<8x128xf32>
    %1055 = arith.negf %1054 : vector<8x128xf32>
    %1056 = math.exp %1055 : vector<8x128xf32>
    %cst_312 = arith.constant 1.000000e+00 : f32
    %1057 = vector.broadcast %cst_312 : f32 to vector<8x128xf32>
    %1058 = arith.addf %1057, %1056 : vector<8x128xf32>
    %1059 = arith.divf %1057, %1058 : vector<8x128xf32>
    %1060 = vector.extract_strided_slice %1053 {offsets = [0, 128], sizes = [8, 128], strides = [1, 1]} : vector<8x512xf32> to vector<8x128xf32>
    %1061 = arith.negf %1060 : vector<8x128xf32>
    %1062 = math.exp %1061 : vector<8x128xf32>
    %cst_313 = arith.constant 1.000000e+00 : f32
    %1063 = vector.broadcast %cst_313 : f32 to vector<8x128xf32>
    %1064 = arith.addf %1063, %1062 : vector<8x128xf32>
    %1065 = arith.divf %1063, %1064 : vector<8x128xf32>
    %1066 = vector.extract_strided_slice %1053 {offsets = [0, 256], sizes = [8, 128], strides = [1, 1]} : vector<8x512xf32> to vector<8x128xf32>
    %1067 = math.tanh %1066 : vector<8x128xf32>
    %1068 = vector.extract_strided_slice %1053 {offsets = [0, 384], sizes = [8, 128], strides = [1, 1]} : vector<8x512xf32> to vector<8x128xf32>
    %1069 = arith.negf %1068 : vector<8x128xf32>
    %1070 = math.exp %1069 : vector<8x128xf32>
    %cst_314 = arith.constant 1.000000e+00 : f32
    %1071 = vector.broadcast %cst_314 : f32 to vector<8x128xf32>
    %1072 = arith.addf %1071, %1070 : vector<8x128xf32>
    %1073 = arith.divf %1071, %1072 : vector<8x128xf32>
    %1074 = arith.mulf %1065, %1041 : vector<8x128xf32>
    %1075 = arith.mulf %1059, %1067 : vector<8x128xf32>
    %1076 = arith.addf %1074, %1075 : vector<8x128xf32>
    %1077 = math.tanh %1076 : vector<8x128xf32>
    %1078 = arith.mulf %1073, %1077 : vector<8x128xf32>
    %1079 = arith.index_cast %c1_i32_308 : i32 to index
    %c0_315 = arith.constant 0 : index
    %c0_316 = arith.constant 0 : index
    %1080 = vector.load %arg8[%1079, %c0_315, %c0_316] : memref<8x8x128xf32, #tpu.memory_space<vmem>>, vector<1x8x128xf32>
    %1081 = vector.shape_cast %1080 : vector<1x8x128xf32> to vector<8x128xf32>
    %1082 = vector.shape_cast %1078 : vector<8x128xf32> to vector<1x8x128xf32>
    tpu.vector_store %arg8[%1079, %c0_315, %c0_316], %1082 {strides = array<i32>} : memref<8x8x128xf32, #tpu.memory_space<vmem>>, vector<1x8x128xf32>,
    %c2_i32_317 = arith.constant 2 : i32
    %1083 = arith.index_cast %c2_i32_317 : i32 to index
    %c0_318 = arith.constant 0 : index
    %c0_319 = arith.constant 0 : index
    %1084 = vector.load %arg12[%1083, %c0_318, %c0_319] : memref<8x8x512xf32, #tpu.memory_space<vmem>>, vector<1x8x512xf32>
    %1085 = vector.shape_cast %1084 : vector<1x8x512xf32> to vector<8x512xf32>
    %1086 = arith.truncf %1078 : vector<8x128xf32> to vector<8x128xbf16>
    %cst_320 = arith.constant dense<0.000000e+00> : vector<8x512xf32>
    %1087 = tpu.matmul %1086, %1000, %cst_320 {dimension_numbers = #tpu.dot_dimension_numbers<[1], [0], [0], [1], [0, 0, 1, 1], [], []>} : vector<8x128xbf16>, vector<128x512xbf16>, vector<8x512xf32> -> vector<8x512xf32>
    %1088 = arith.addf %1085, %1087 : vector<8x512xf32>
    %1089 = vector.extract_strided_slice %1088 {offsets = [0, 0], sizes = [8, 128], strides = [1, 1]} : vector<8x512xf32> to vector<8x128xf32>
    %1090 = arith.negf %1089 : vector<8x128xf32>
    %1091 = math.exp %1090 : vector<8x128xf32>
    %cst_321 = arith.constant 1.000000e+00 : f32
    %1092 = vector.broadcast %cst_321 : f32 to vector<8x128xf32>
    %1093 = arith.addf %1092, %1091 : vector<8x128xf32>
    %1094 = arith.divf %1092, %1093 : vector<8x128xf32>
    %1095 = vector.extract_strided_slice %1088 {offsets = [0, 128], sizes = [8, 128], strides = [1, 1]} : vector<8x512xf32> to vector<8x128xf32>
    %1096 = arith.negf %1095 : vector<8x128xf32>
    %1097 = math.exp %1096 : vector<8x128xf32>
    %cst_322 = arith.constant 1.000000e+00 : f32
    %1098 = vector.broadcast %cst_322 : f32 to vector<8x128xf32>
    %1099 = arith.addf %1098, %1097 : vector<8x128xf32>
    %1100 = arith.divf %1098, %1099 : vector<8x128xf32>
    %1101 = vector.extract_strided_slice %1088 {offsets = [0, 256], sizes = [8, 128], strides = [1, 1]} : vector<8x512xf32> to vector<8x128xf32>
    %1102 = math.tanh %1101 : vector<8x128xf32>
    %1103 = vector.extract_strided_slice %1088 {offsets = [0, 384], sizes = [8, 128], strides = [1, 1]} : vector<8x512xf32> to vector<8x128xf32>
    %1104 = arith.negf %1103 : vector<8x128xf32>
    %1105 = math.exp %1104 : vector<8x128xf32>
    %cst_323 = arith.constant 1.000000e+00 : f32
    %1106 = vector.broadcast %cst_323 : f32 to vector<8x128xf32>
    %1107 = arith.addf %1106, %1105 : vector<8x128xf32>
    %1108 = arith.divf %1106, %1107 : vector<8x128xf32>
    %1109 = arith.mulf %1100, %1076 : vector<8x128xf32>
    %1110 = arith.mulf %1094, %1102 : vector<8x128xf32>
    %1111 = arith.addf %1109, %1110 : vector<8x128xf32>
    %1112 = math.tanh %1111 : vector<8x128xf32>
    %1113 = arith.mulf %1108, %1112 : vector<8x128xf32>
    %1114 = arith.index_cast %c2_i32_317 : i32 to index
    %c0_324 = arith.constant 0 : index
    %c0_325 = arith.constant 0 : index
    %1115 = vector.load %arg8[%1114, %c0_324, %c0_325] : memref<8x8x128xf32, #tpu.memory_space<vmem>>, vector<1x8x128xf32>
    %1116 = vector.shape_cast %1115 : vector<1x8x128xf32> to vector<8x128xf32>
    %1117 = vector.shape_cast %1113 : vector<8x128xf32> to vector<1x8x128xf32>
    tpu.vector_store %arg8[%1114, %c0_324, %c0_325], %1117 {strides = array<i32>} : memref<8x8x128xf32, #tpu.memory_space<vmem>>, vector<1x8x128xf32>,
    %c3_i32_326 = arith.constant 3 : i32
    %1118 = arith.index_cast %c3_i32_326 : i32 to index
    %c0_327 = arith.constant 0 : index
    %c0_328 = arith.constant 0 : index
    %1119 = vector.load %arg12[%1118, %c0_327, %c0_328] : memref<8x8x512xf32, #tpu.memory_space<vmem>>, vector<1x8x512xf32>
    %1120 = vector.shape_cast %1119 : vector<1x8x512xf32> to vector<8x512xf32>
    %1121 = arith.truncf %1113 : vector<8x128xf32> to vector<8x128xbf16>
    %cst_329 = arith.constant dense<0.000000e+00> : vector<8x512xf32>
    %1122 = tpu.matmul %1121, %1000, %cst_329 {dimension_numbers = #tpu.dot_dimension_numbers<[1], [0], [0], [1], [0, 0, 1, 1], [], []>} : vector<8x128xbf16>, vector<128x512xbf16>, vector<8x512xf32> -> vector<8x512xf32>
    %1123 = arith.addf %1120, %1122 : vector<8x512xf32>
    %1124 = vector.extract_strided_slice %1123 {offsets = [0, 0], sizes = [8, 128], strides = [1, 1]} : vector<8x512xf32> to vector<8x128xf32>
    %1125 = arith.negf %1124 : vector<8x128xf32>
    %1126 = math.exp %1125 : vector<8x128xf32>
    %cst_330 = arith.constant 1.000000e+00 : f32
    %1127 = vector.broadcast %cst_330 : f32 to vector<8x128xf32>
    %1128 = arith.addf %1127, %1126 : vector<8x128xf32>
    %1129 = arith.divf %1127, %1128 : vector<8x128xf32>
    %1130 = vector.extract_strided_slice %1123 {offsets = [0, 128], sizes = [8, 128], strides = [1, 1]} : vector<8x512xf32> to vector<8x128xf32>
    %1131 = arith.negf %1130 : vector<8x128xf32>
    %1132 = math.exp %1131 : vector<8x128xf32>
    %cst_331 = arith.constant 1.000000e+00 : f32
    %1133 = vector.broadcast %cst_331 : f32 to vector<8x128xf32>
    %1134 = arith.addf %1133, %1132 : vector<8x128xf32>
    %1135 = arith.divf %1133, %1134 : vector<8x128xf32>
    %1136 = vector.extract_strided_slice %1123 {offsets = [0, 256], sizes = [8, 128], strides = [1, 1]} : vector<8x512xf32> to vector<8x128xf32>
    %1137 = math.tanh %1136 : vector<8x128xf32>
    %1138 = vector.extract_strided_slice %1123 {offsets = [0, 384], sizes = [8, 128], strides = [1, 1]} : vector<8x512xf32> to vector<8x128xf32>
    %1139 = arith.negf %1138 : vector<8x128xf32>
    %1140 = math.exp %1139 : vector<8x128xf32>
    %cst_332 = arith.constant 1.000000e+00 : f32
    %1141 = vector.broadcast %cst_332 : f32 to vector<8x128xf32>
    %1142 = arith.addf %1141, %1140 : vector<8x128xf32>
    %1143 = arith.divf %1141, %1142 : vector<8x128xf32>
    %1144 = arith.mulf %1135, %1111 : vector<8x128xf32>
    %1145 = arith.mulf %1129, %1137 : vector<8x128xf32>
    %1146 = arith.addf %1144, %1145 : vector<8x128xf32>
    %1147 = math.tanh %1146 : vector<8x128xf32>
    %1148 = arith.mulf %1143, %1147 : vector<8x128xf32>
    %1149 = arith.index_cast %c3_i32_326 : i32 to index
    %c0_333 = arith.constant 0 : index
    %c0_334 = arith.constant 0 : index
    %1150 = vector.load %arg8[%1149, %c0_333, %c0_334] : memref<8x8x128xf32, #tpu.memory_space<vmem>>, vector<1x8x128xf32>
    %1151 = vector.shape_cast %1150 : vector<1x8x128xf32> to vector<8x128xf32>
    %1152 = vector.shape_cast %1148 : vector<8x128xf32> to vector<1x8x128xf32>
    tpu.vector_store %arg8[%1149, %c0_333, %c0_334], %1152 {strides = array<i32>} : memref<8x8x128xf32, #tpu.memory_space<vmem>>, vector<1x8x128xf32>,
    %c4_i32_335 = arith.constant 4 : i32
    %1153 = arith.index_cast %c4_i32_335 : i32 to index
    %c0_336 = arith.constant 0 : index
    %c0_337 = arith.constant 0 : index
    %1154 = vector.load %arg12[%1153, %c0_336, %c0_337] : memref<8x8x512xf32, #tpu.memory_space<vmem>>, vector<1x8x512xf32>
    %1155 = vector.shape_cast %1154 : vector<1x8x512xf32> to vector<8x512xf32>
    %1156 = arith.truncf %1148 : vector<8x128xf32> to vector<8x128xbf16>
    %cst_338 = arith.constant dense<0.000000e+00> : vector<8x512xf32>
    %1157 = tpu.matmul %1156, %1000, %cst_338 {dimension_numbers = #tpu.dot_dimension_numbers<[1], [0], [0], [1], [0, 0, 1, 1], [], []>} : vector<8x128xbf16>, vector<128x512xbf16>, vector<8x512xf32> -> vector<8x512xf32>
    %1158 = arith.addf %1155, %1157 : vector<8x512xf32>
    %1159 = vector.extract_strided_slice %1158 {offsets = [0, 0], sizes = [8, 128], strides = [1, 1]} : vector<8x512xf32> to vector<8x128xf32>
    %1160 = arith.negf %1159 : vector<8x128xf32>
    %1161 = math.exp %1160 : vector<8x128xf32>
    %cst_339 = arith.constant 1.000000e+00 : f32
    %1162 = vector.broadcast %cst_339 : f32 to vector<8x128xf32>
    %1163 = arith.addf %1162, %1161 : vector<8x128xf32>
    %1164 = arith.divf %1162, %1163 : vector<8x128xf32>
    %1165 = vector.extract_strided_slice %1158 {offsets = [0, 128], sizes = [8, 128], strides = [1, 1]} : vector<8x512xf32> to vector<8x128xf32>
    %1166 = arith.negf %1165 : vector<8x128xf32>
    %1167 = math.exp %1166 : vector<8x128xf32>
    %cst_340 = arith.constant 1.000000e+00 : f32
    %1168 = vector.broadcast %cst_340 : f32 to vector<8x128xf32>
    %1169 = arith.addf %1168, %1167 : vector<8x128xf32>
    %1170 = arith.divf %1168, %1169 : vector<8x128xf32>
    %1171 = vector.extract_strided_slice %1158 {offsets = [0, 256], sizes = [8, 128], strides = [1, 1]} : vector<8x512xf32> to vector<8x128xf32>
    %1172 = math.tanh %1171 : vector<8x128xf32>
    %1173 = vector.extract_strided_slice %1158 {offsets = [0, 384], sizes = [8, 128], strides = [1, 1]} : vector<8x512xf32> to vector<8x128xf32>
    %1174 = arith.negf %1173 : vector<8x128xf32>
    %1175 = math.exp %1174 : vector<8x128xf32>
    %cst_341 = arith.constant 1.000000e+00 : f32
    %1176 = vector.broadcast %cst_341 : f32 to vector<8x128xf32>
    %1177 = arith.addf %1176, %1175 : vector<8x128xf32>
    %1178 = arith.divf %1176, %1177 : vector<8x128xf32>
    %1179 = arith.mulf %1170, %1146 : vector<8x128xf32>
    %1180 = arith.mulf %1164, %1172 : vector<8x128xf32>
    %1181 = arith.addf %1179, %1180 : vector<8x128xf32>
    %1182 = math.tanh %1181 : vector<8x128xf32>
    %1183 = arith.mulf %1178, %1182 : vector<8x128xf32>
    %1184 = arith.index_cast %c4_i32_335 : i32 to index
    %c0_342 = arith.constant 0 : index
    %c0_343 = arith.constant 0 : index
    %1185 = vector.load %arg8[%1184, %c0_342, %c0_343] : memref<8x8x128xf32, #tpu.memory_space<vmem>>, vector<1x8x128xf32>
    %1186 = vector.shape_cast %1185 : vector<1x8x128xf32> to vector<8x128xf32>
    %1187 = vector.shape_cast %1183 : vector<8x128xf32> to vector<1x8x128xf32>
    tpu.vector_store %arg8[%1184, %c0_342, %c0_343], %1187 {strides = array<i32>} : memref<8x8x128xf32, #tpu.memory_space<vmem>>, vector<1x8x128xf32>,
    %c5_i32_344 = arith.constant 5 : i32
    %1188 = arith.index_cast %c5_i32_344 : i32 to index
    %c0_345 = arith.constant 0 : index
    %c0_346 = arith.constant 0 : index
    %1189 = vector.load %arg12[%1188, %c0_345, %c0_346] : memref<8x8x512xf32, #tpu.memory_space<vmem>>, vector<1x8x512xf32>
    %1190 = vector.shape_cast %1189 : vector<1x8x512xf32> to vector<8x512xf32>
    %1191 = arith.truncf %1183 : vector<8x128xf32> to vector<8x128xbf16>
    %cst_347 = arith.constant dense<0.000000e+00> : vector<8x512xf32>
    %1192 = tpu.matmul %1191, %1000, %cst_347 {dimension_numbers = #tpu.dot_dimension_numbers<[1], [0], [0], [1], [0, 0, 1, 1], [], []>} : vector<8x128xbf16>, vector<128x512xbf16>, vector<8x512xf32> -> vector<8x512xf32>
    %1193 = arith.addf %1190, %1192 : vector<8x512xf32>
    %1194 = vector.extract_strided_slice %1193 {offsets = [0, 0], sizes = [8, 128], strides = [1, 1]} : vector<8x512xf32> to vector<8x128xf32>
    %1195 = arith.negf %1194 : vector<8x128xf32>
    %1196 = math.exp %1195 : vector<8x128xf32>
    %cst_348 = arith.constant 1.000000e+00 : f32
    %1197 = vector.broadcast %cst_348 : f32 to vector<8x128xf32>
    %1198 = arith.addf %1197, %1196 : vector<8x128xf32>
    %1199 = arith.divf %1197, %1198 : vector<8x128xf32>
    %1200 = vector.extract_strided_slice %1193 {offsets = [0, 128], sizes = [8, 128], strides = [1, 1]} : vector<8x512xf32> to vector<8x128xf32>
    %1201 = arith.negf %1200 : vector<8x128xf32>
    %1202 = math.exp %1201 : vector<8x128xf32>
    %cst_349 = arith.constant 1.000000e+00 : f32
    %1203 = vector.broadcast %cst_349 : f32 to vector<8x128xf32>
    %1204 = arith.addf %1203, %1202 : vector<8x128xf32>
    %1205 = arith.divf %1203, %1204 : vector<8x128xf32>
    %1206 = vector.extract_strided_slice %1193 {offsets = [0, 256], sizes = [8, 128], strides = [1, 1]} : vector<8x512xf32> to vector<8x128xf32>
    %1207 = math.tanh %1206 : vector<8x128xf32>
    %1208 = vector.extract_strided_slice %1193 {offsets = [0, 384], sizes = [8, 128], strides = [1, 1]} : vector<8x512xf32> to vector<8x128xf32>
    %1209 = arith.negf %1208 : vector<8x128xf32>
    %1210 = math.exp %1209 : vector<8x128xf32>
    %cst_350 = arith.constant 1.000000e+00 : f32
    %1211 = vector.broadcast %cst_350 : f32 to vector<8x128xf32>
    %1212 = arith.addf %1211, %1210 : vector<8x128xf32>
    %1213 = arith.divf %1211, %1212 : vector<8x128xf32>
    %1214 = arith.mulf %1205, %1181 : vector<8x128xf32>
    %1215 = arith.mulf %1199, %1207 : vector<8x128xf32>
    %1216 = arith.addf %1214, %1215 : vector<8x128xf32>
    %1217 = math.tanh %1216 : vector<8x128xf32>
    %1218 = arith.mulf %1213, %1217 : vector<8x128xf32>
    %1219 = arith.index_cast %c5_i32_344 : i32 to index
    %c0_351 = arith.constant 0 : index
    %c0_352 = arith.constant 0 : index
    %1220 = vector.load %arg8[%1219, %c0_351, %c0_352] : memref<8x8x128xf32, #tpu.memory_space<vmem>>, vector<1x8x128xf32>
    %1221 = vector.shape_cast %1220 : vector<1x8x128xf32> to vector<8x128xf32>
    %1222 = vector.shape_cast %1218 : vector<8x128xf32> to vector<1x8x128xf32>
    tpu.vector_store %arg8[%1219, %c0_351, %c0_352], %1222 {strides = array<i32>} : memref<8x8x128xf32, #tpu.memory_space<vmem>>, vector<1x8x128xf32>,
    %c6_i32_353 = arith.constant 6 : i32
    %1223 = arith.index_cast %c6_i32_353 : i32 to index
    %c0_354 = arith.constant 0 : index
    %c0_355 = arith.constant 0 : index
    %1224 = vector.load %arg12[%1223, %c0_354, %c0_355] : memref<8x8x512xf32, #tpu.memory_space<vmem>>, vector<1x8x512xf32>
    %1225 = vector.shape_cast %1224 : vector<1x8x512xf32> to vector<8x512xf32>
    %1226 = arith.truncf %1218 : vector<8x128xf32> to vector<8x128xbf16>
    %cst_356 = arith.constant dense<0.000000e+00> : vector<8x512xf32>
    %1227 = tpu.matmul %1226, %1000, %cst_356 {dimension_numbers = #tpu.dot_dimension_numbers<[1], [0], [0], [1], [0, 0, 1, 1], [], []>} : vector<8x128xbf16>, vector<128x512xbf16>, vector<8x512xf32> -> vector<8x512xf32>
    %1228 = arith.addf %1225, %1227 : vector<8x512xf32>
    %1229 = vector.extract_strided_slice %1228 {offsets = [0, 0], sizes = [8, 128], strides = [1, 1]} : vector<8x512xf32> to vector<8x128xf32>
    %1230 = arith.negf %1229 : vector<8x128xf32>
    %1231 = math.exp %1230 : vector<8x128xf32>
    %cst_357 = arith.constant 1.000000e+00 : f32
    %1232 = vector.broadcast %cst_357 : f32 to vector<8x128xf32>
    %1233 = arith.addf %1232, %1231 : vector<8x128xf32>
    %1234 = arith.divf %1232, %1233 : vector<8x128xf32>
    %1235 = vector.extract_strided_slice %1228 {offsets = [0, 128], sizes = [8, 128], strides = [1, 1]} : vector<8x512xf32> to vector<8x128xf32>
    %1236 = arith.negf %1235 : vector<8x128xf32>
    %1237 = math.exp %1236 : vector<8x128xf32>
    %cst_358 = arith.constant 1.000000e+00 : f32
    %1238 = vector.broadcast %cst_358 : f32 to vector<8x128xf32>
    %1239 = arith.addf %1238, %1237 : vector<8x128xf32>
    %1240 = arith.divf %1238, %1239 : vector<8x128xf32>
    %1241 = vector.extract_strided_slice %1228 {offsets = [0, 256], sizes = [8, 128], strides = [1, 1]} : vector<8x512xf32> to vector<8x128xf32>
    %1242 = math.tanh %1241 : vector<8x128xf32>
    %1243 = vector.extract_strided_slice %1228 {offsets = [0, 384], sizes = [8, 128], strides = [1, 1]} : vector<8x512xf32> to vector<8x128xf32>
    %1244 = arith.negf %1243 : vector<8x128xf32>
    %1245 = math.exp %1244 : vector<8x128xf32>
    %cst_359 = arith.constant 1.000000e+00 : f32
    %1246 = vector.broadcast %cst_359 : f32 to vector<8x128xf32>
    %1247 = arith.addf %1246, %1245 : vector<8x128xf32>
    %1248 = arith.divf %1246, %1247 : vector<8x128xf32>
    %1249 = arith.mulf %1240, %1216 : vector<8x128xf32>
    %1250 = arith.mulf %1234, %1242 : vector<8x128xf32>
    %1251 = arith.addf %1249, %1250 : vector<8x128xf32>
    %1252 = math.tanh %1251 : vector<8x128xf32>
    %1253 = arith.mulf %1248, %1252 : vector<8x128xf32>
    %1254 = arith.index_cast %c6_i32_353 : i32 to index
    %c0_360 = arith.constant 0 : index
    %c0_361 = arith.constant 0 : index
    %1255 = vector.load %arg8[%1254, %c0_360, %c0_361] : memref<8x8x128xf32, #tpu.memory_space<vmem>>, vector<1x8x128xf32>
    %1256 = vector.shape_cast %1255 : vector<1x8x128xf32> to vector<8x128xf32>
    %1257 = vector.shape_cast %1253 : vector<8x128xf32> to vector<1x8x128xf32>
    tpu.vector_store %arg8[%1254, %c0_360, %c0_361], %1257 {strides = array<i32>} : memref<8x8x128xf32, #tpu.memory_space<vmem>>, vector<1x8x128xf32>,
    %c7_i32_362 = arith.constant 7 : i32
    %1258 = arith.index_cast %c7_i32_362 : i32 to index
    %c0_363 = arith.constant 0 : index
    %c0_364 = arith.constant 0 : index
    %1259 = vector.load %arg12[%1258, %c0_363, %c0_364] : memref<8x8x512xf32, #tpu.memory_space<vmem>>, vector<1x8x512xf32>
    %1260 = vector.shape_cast %1259 : vector<1x8x512xf32> to vector<8x512xf32>
    %1261 = arith.truncf %1253 : vector<8x128xf32> to vector<8x128xbf16>
    %cst_365 = arith.constant dense<0.000000e+00> : vector<8x512xf32>
    %1262 = tpu.matmul %1261, %1000, %cst_365 {dimension_numbers = #tpu.dot_dimension_numbers<[1], [0], [0], [1], [0, 0, 1, 1], [], []>} : vector<8x128xbf16>, vector<128x512xbf16>, vector<8x512xf32> -> vector<8x512xf32>
    %1263 = arith.addf %1260, %1262 : vector<8x512xf32>
    %1264 = vector.extract_strided_slice %1263 {offsets = [0, 0], sizes = [8, 128], strides = [1, 1]} : vector<8x512xf32> to vector<8x128xf32>
    %1265 = arith.negf %1264 : vector<8x128xf32>
    %1266 = math.exp %1265 : vector<8x128xf32>
    %cst_366 = arith.constant 1.000000e+00 : f32
    %1267 = vector.broadcast %cst_366 : f32 to vector<8x128xf32>
    %1268 = arith.addf %1267, %1266 : vector<8x128xf32>
    %1269 = arith.divf %1267, %1268 : vector<8x128xf32>
    %1270 = vector.extract_strided_slice %1263 {offsets = [0, 128], sizes = [8, 128], strides = [1, 1]} : vector<8x512xf32> to vector<8x128xf32>
    %1271 = arith.negf %1270 : vector<8x128xf32>
    %1272 = math.exp %1271 : vector<8x128xf32>
    %cst_367 = arith.constant 1.000000e+00 : f32
    %1273 = vector.broadcast %cst_367 : f32 to vector<8x128xf32>
    %1274 = arith.addf %1273, %1272 : vector<8x128xf32>
    %1275 = arith.divf %1273, %1274 : vector<8x128xf32>
    %1276 = vector.extract_strided_slice %1263 {offsets = [0, 256], sizes = [8, 128], strides = [1, 1]} : vector<8x512xf32> to vector<8x128xf32>
    %1277 = math.tanh %1276 : vector<8x128xf32>
    %1278 = vector.extract_strided_slice %1263 {offsets = [0, 384], sizes = [8, 128], strides = [1, 1]} : vector<8x512xf32> to vector<8x128xf32>
    %1279 = arith.negf %1278 : vector<8x128xf32>
    %1280 = math.exp %1279 : vector<8x128xf32>
    %cst_368 = arith.constant 1.000000e+00 : f32
    %1281 = vector.broadcast %cst_368 : f32 to vector<8x128xf32>
    %1282 = arith.addf %1281, %1280 : vector<8x128xf32>
    %1283 = arith.divf %1281, %1282 : vector<8x128xf32>
    %1284 = arith.mulf %1275, %1251 : vector<8x128xf32>
    %1285 = arith.mulf %1269, %1277 : vector<8x128xf32>
    %1286 = arith.addf %1284, %1285 : vector<8x128xf32>
    %1287 = math.tanh %1286 : vector<8x128xf32>
    %1288 = arith.mulf %1283, %1287 : vector<8x128xf32>
    %1289 = arith.index_cast %c7_i32_362 : i32 to index
    %c0_369 = arith.constant 0 : index
    %c0_370 = arith.constant 0 : index
    %1290 = vector.load %arg8[%1289, %c0_369, %c0_370] : memref<8x8x128xf32, #tpu.memory_space<vmem>>, vector<1x8x128xf32>
    %1291 = vector.shape_cast %1290 : vector<1x8x128xf32> to vector<8x128xf32>
    %1292 = vector.shape_cast %1288 : vector<8x128xf32> to vector<1x8x128xf32>
    tpu.vector_store %arg8[%1289, %c0_369, %c0_370], %1292 {strides = array<i32>} : memref<8x8x128xf32, #tpu.memory_space<vmem>>, vector<1x8x128xf32>,
    %c8_i32_371 = arith.constant 8 : i32
    return
  }
}

</mosaic_0001>

<bundles_post_ra>
// kernel: model_forward_pallas.1
= control target key start
LH: loop header
LB: loop body
LE: loop exit
PB: predicated region body
PF: predicated region fallthrough
CT: control target
= control target key end

     0   :  { %13 = vsyncpa [#allocation11], 0  ;;  %s10654_s0 = inlined_call_operand.vmem [shape: s32[8,128], index: 0, kind: input, shape index: {}]   ;;  %s10655_s1 = inlined_call_operand.vmem [shape: f32[8,8,128], index: 1, kind: input, shape index: {}]   ;;  %s10656_s2 = inlined_call_operand.hbm [shape: bf16[2,128,512], index: 2, kind: input, shape index: {}]   ;;  %s10657_s3 = inlined_call_operand.hbm [shape: bf16[2,128,512], index: 3, kind: input, shape index: {}]   ;;  %s10658_s4 = inlined_call_operand.vmem [shape: f32[2,1,512], index: 4, kind: input, shape index: {}]   ;;  %s10659_s5 = inlined_call_operand.hbm [shape: bf16[2,128,512], index: 5, kind: input, shape index: {}]   ;;  %s10660_s6 = inlined_call_operand.hbm [shape: bf16[2,128,512], index: 6, kind: input, shape index: {}]   ;;  %s10661_s7 = inlined_call_operand.vmem [shape: f32[2,1,512], index: 7, kind: input, shape index: {}]   ;;  %s10662_s8 = inlined_call_operand.vmem [shape: f32[8,8,128], index: 8, kind: output, shape index: {}]  }
   0x1   :  { %14 = vsyncpa [#allocation13], 0  ;;  %s8013_s27 = smov [#allocation10]  }
   0x2   :  { %s24_s28 = sshll.u32 %s8013_s27, 4  ;;  %s25_s28 = int_to_ptr.vmem [resolvable:$true] %s24_s28 }
   0x3   :  { %s7931_s29 = scalar_lea.vmem %s25_s28, 8192  ;;  %p7936_p1 = scmp.lt.s32.totalorder %s25_s28, %s25_s28 }
   0x4   :  { %p7932_p0 = scmp.ne.s32.totalorder %s25_s28, %s7931_s29  ;;  %p7937_p2 = scmp.lt.s32.totalorder %s7931_s29, %s7931_s29 }
   0x6   :  { %p7938_p3 = por %p7937_p2, %p7936_p1 }
   0x8   :  { %p7939_p4 = pnand %p7938_p3, %p7932_p0 }
   0xa   :  { %7942 = shalt.err (!%p7939_p4)
}
   0xb   :  { %s8014_s30 = smov 256   ;;  %s8015_s9 = smov 16  }
   0xc   :  { %30 = dma.hbm_to_vmem [thread:$0]  %s10656_s2, 8192, %s25_s28, [#allocation11], %s8014_s30, %s8014_s30, %s8015_s9  }
   0xd   :  { %s8016_s12 = smov [#allocation12]  }
   0xe   :  { %s36_s13 = sshll.u32 %s8016_s12, 4  ;;  %s37_s13 = int_to_ptr.vmem [resolvable:$true] %s36_s13 }
   0xf   :  { %s7951_s14 = scalar_lea.vmem %s37_s13, 8192  ;;  %p7956_p6 = scmp.lt.s32.totalorder %s37_s13, %s37_s13 }
  0x10   :  { %p7952_p5 = scmp.ne.s32.totalorder %s37_s13, %s7951_s14  ;;  %p7957_p7 = scmp.lt.s32.totalorder %s7951_s14, %s7951_s14 }
  0x12   :  { %p7958_p8 = por %p7957_p7, %p7956_p6 }
  0x14   :  { %p7959_p9 = pnand %p7958_p8, %p7952_p5 }
  0x16   :  { %7962 = shalt.err (!%p7959_p9)
}
  0x17   :  { %42 = dma.hbm_to_vmem [thread:$0]  %s10657_s3, 8192, %s37_s13, [#allocation13], %s8014_s30, %s8014_s30, %s8015_s9  }
  0x18   :  { %8003 = dma.done.wait [#allocation11], 8192  }
  0x19   :  { %8004 = vsyncadd [#allocation11], 4294959104 }
  0x1a   :  { %8005 = dma.done.wait [#allocation13], 8192  }
  0x1b   :  { %8006 = vsyncadd [#allocation13], 4294959104  ;;  %s8017_s17 = smov [#allocation6]   ;;  %s8018_s18 = smov [#allocation7]  }
  0x1c   :  { %s60_s2 = sshll.u32 %s8017_s17, 4  ;;  %s72_s19 = sshll.u32 %s8018_s18, 4  ;;  %s61_s2 = int_to_ptr.vmem [resolvable:$true] %s60_s2  ;;  %s73_s19 = int_to_ptr.vmem [resolvable:$true] %s72_s19 }
  0x1d   :  { %s7971_s20 = scalar_lea.vmem %s61_s2, 8192  ;;  %p7976_p11 = scmp.lt.s32.totalorder %s61_s2, %s61_s2 }
  0x1e   :  { %p7972_p10 = scmp.ne.s32.totalorder %s61_s2, %s7971_s20  ;;  %p7977_p12 = scmp.lt.s32.totalorder %s7971_s20, %s7971_s20 }
  0x20   :  { %p7978_p13 = por %p7977_p12, %p7976_p11 }
  0x22   :  { %p7979_p0 = pnand %p7978_p13, %p7972_p10 }
  0x24   :  { %7982 = shalt.err (!%p7979_p0)  }
  0x25   :  { %63 = dma.hbm_to_vmem [thread:$0]  %s10659_s5, 8192, %s61_s2, [#allocation9] }
  0x26   :  { %s7991_s3 = scalar_lea.vmem %s73_s19, 8192  ;;  %p7996_p2 = scmp.lt.s32.totalorder %s73_s19, %s73_s19 }
  0x27   :  { %p7992_p1 = scmp.ne.s32.totalorder %s73_s19, %s7991_s3  ;;  %p7997_p3 = scmp.lt.s32.totalorder %s7991_s3, %s7991_s3 }
  0x29   :  { %p7998_p4 = por %p7997_p3, %p7996_p2 }
  0x2b   :  { %p7999_p5 = pnand %p7998_p4, %p7992_p1 }
  0x2d   :  { %8002 = shalt.err (!%p7999_p5)  }
  0x2e   :  { %75 = dma.hbm_to_vmem [thread:$0]  %s10660_s6, 8192, %s73_s19, [#allocation9 + $0x1]  ;;  %v8080_v0 = vld [vmem:[%s10654_s0] sm:$0xff] }
  0x2f   :  { %v110_v1 = vld [vmem:[%s10661_s7] sm:$0xff] }
  0x30   :  { %111 = vst [vmem:[#allocation8] sm:$0xff] %v110_v1 }
  0x31   :  { %119 = vsyncadd [#allocation9 + $0x2], 128  ;;  %v6899_v2 = vld [vmem:[#allocation10 + $0xe4] ss:$16 sps:$4 sm:$0xff]   ;;  %v10663_v3 = vmov 0   ;;  %v185_v35 = vld [vmem:[%s10655_s1] sm:$0xff] }
  0x32   :  { %389 = vmatprep.mubr.bf16.mxu0 %v10663_v3  ;;  %462 = vmatprep.mubr.bf16.mxu1 %v10663_v3  ;;  %v6901_v4 = vld [vmem:[#allocation10 + $0xec] ss:$16 sps:$4 sm:$0xff]   ;;  %v6903_v5 = vld [vmem:[#allocation10 + $0xe0] ss:$16 sps:$4 sm:$0xff]   ;;  %v6904_v6 = vld [vmem:[#allocation10 + $0xe8] ss:$16 sps:$4 sm:$0xff]  }
  0x33   :  { %357 = vmatprep.subr.bf16.mxu0 %v6899_v2  ;;  %v6905_v7 = vld [vmem:[#allocation10 + $0xc4] ss:$16 sps:$4 sm:$0xff]   ;;  %430 = vmatprep.subr.bf16.mxu1 %v6901_v4  ;;  %v6907_v8 = vld [vmem:[#allocation10 + $0xcc] ss:$16 sps:$4 sm:$0xff]   ;;  %v6909_v9 = vld [vmem:[#allocation10 + $0xc0] ss:$16 sps:$4 sm:$0xff]  }
  0x34   :  { %358 = vmatpush1.bf16.msra.mxu0 %v6903_v5  ;;  %431 = vmatpush1.bf16.msra.mxu1 %v6904_v6  ;;  %v6910_v10 = vld [vmem:[#allocation10 + $0xc8] ss:$16 sps:$4 sm:$0xff]   ;;  %v6911_v11 = vld [vmem:[#allocation10 + $0xa4] ss:$16 sps:$4 sm:$0xff]   ;;  %v6913_v12 = vld [vmem:[#allocation10 + $0xac] ss:$16 sps:$4 sm:$0xff]  }
  0x35   :  { %359 = vmatprep.subr.bf16.mxu0 %v6905_v7  ;;  %432 = vmatprep.subr.bf16.mxu1 %v6907_v8  ;;  %v6915_v13 = vld [vmem:[#allocation10 + $0xa0] ss:$16 sps:$4 sm:$0xff]   ;;  %v6916_v14 = vld [vmem:[#allocation10 + $0xa8] ss:$16 sps:$4 sm:$0xff]   ;;  %v6917_v15 = vld [vmem:[#allocation10 + $0x84] ss:$16 sps:$4 sm:$0xff]  }
  0x36   :  { %v6919_v16 = vld [vmem:[#allocation10 + $0x8c] ss:$16 sps:$4 sm:$0xff]   ;;  %v6921_v17 = vld [vmem:[#allocation10 + $0x80] ss:$16 sps:$4 sm:$0xff]   ;;  %v6922_v18 = vld [vmem:[#allocation10 + $0x88] ss:$16 sps:$4 sm:$0xff]  }
  0x37   :  { %v6923_v19 = vld [vmem:[#allocation10 + $0x64] ss:$16 sps:$4 sm:$0xff]   ;;  %v6925_v20 = vld [vmem:[#allocation10 + $0x6c] ss:$16 sps:$4 sm:$0xff]   ;;  %v6927_v21 = vld [vmem:[#allocation10 + $0x60] ss:$16 sps:$4 sm:$0xff]  }
  0x38   :  { %360 = vmatpush1.bf16.msra.mxu0 %v6909_v9  ;;  %433 = vmatpush1.bf16.msra.mxu1 %v6910_v10  ;;  %v6928_v22 = vld [vmem:[#allocation10 + $0x68] ss:$16 sps:$4 sm:$0xff]   ;;  %v6929_v23 = vld [vmem:[#allocation10 + $0x44] ss:$16 sps:$4 sm:$0xff]   ;;  %v6931_v24 = vld [vmem:[#allocation10 + $0x4c] ss:$16 sps:$4 sm:$0xff]  }
  0x39   :  { %361 = vmatprep.subr.bf16.mxu0 %v6911_v11  ;;  %434 = vmatprep.subr.bf16.mxu1 %v6913_v12  ;;  %v6933_v25 = vld [vmem:[#allocation10 + $0x40] ss:$16 sps:$4 sm:$0xff]   ;;  %v6934_v26 = vld [vmem:[#allocation10 + $0x48] ss:$16 sps:$4 sm:$0xff]   ;;  %v6935_v27 = vld [vmem:[#allocation10 + $0x24] ss:$16 sps:$4 sm:$0xff]  }
  0x3a   :  { %v6937_v28 = vld [vmem:[#allocation10 + $0x2c] ss:$16 sps:$4 sm:$0xff]   ;;  %v6939_v29 = vld [vmem:[#allocation10 + $0x20] ss:$16 sps:$4 sm:$0xff]   ;;  %v6940_v30 = vld [vmem:[#allocation10 + $0x28] ss:$16 sps:$4 sm:$0xff]  }
  0x3b   :  { %v6941_v31 = vld [vmem:[#allocation10 + $0x4] ss:$16 sps:$4 sm:$0xff]   ;;  %v6943_v32 = vld [vmem:[#allocation10 + $0xc] ss:$16 sps:$4 sm:$0xff]   ;;  %v6945_v33 = vld [vmem:[#allocation10] ss:$16 sps:$4 sm:$0xff]  }
  0x3c   :  { %362 = vmatpush1.bf16.msra.mxu0 %v6915_v13  ;;  %435 = vmatpush1.bf16.msra.mxu1 %v6916_v14  ;;  %v6946_v34 = vld [vmem:[#allocation10 + $0x8] ss:$16 sps:$4 sm:$0xff]   ;;  %v186_v36 = vld [vmem:[%s10655_s1 + $0x8] sm:$0xff]  ;;  %v8095_v38 = vld [vmem:[#allocation12 + $0xec] ss:$16 sps:$4 sm:$0xff]   ;;  %vm862_vm0 = vcmp.gt.s32.totalorder %v8080_v0, 0 }
  0x3d   :  { %363 = vmatprep.subr.bf16.mxu0 %v6917_v15  ;;  %436 = vmatprep.subr.bf16.mxu1 %v6919_v16  ;;  %v8093_v37 = vld [vmem:[#allocation12 + $0xe4] ss:$16 sps:$4 sm:$0xff]   ;;  %v193_v39 = vpack.c.bf16 %v186_v36, %v185_v35  ;;  %v8097_v40 = vld [vmem:[#allocation12 + $0xe0] ss:$16 sps:$4 sm:$0xff]   ;;  %v8100_v41 = vld [vmem:[#allocation12 + $0xe8] ss:$16 sps:$4 sm:$0xff]  }
  0x3e   :  { %v8102_v42 = vld [vmem:[#allocation12 + $0xc4] ss:$16 sps:$4 sm:$0xff]   ;;  %v8105_v43 = vld [vmem:[#allocation12 + $0xcc] ss:$16 sps:$4 sm:$0xff]   ;;  %v8107_v44 = vld [vmem:[#allocation12 + $0xc0] ss:$16 sps:$4 sm:$0xff]  }
  0x3f   :  { %v8110_v45 = vld [vmem:[#allocation12 + $0xc8] ss:$16 sps:$4 sm:$0xff]   ;;  %v188_v47 = vld [vmem:[%s10655_s1 + $0x18] sm:$0xff]  ;;  %v8124_v49 = vld [vmem:[#allocation12 + $0xac] ss:$16 sps:$4 sm:$0xff]   ;;  %vm982_vm2 = vcmp.gt.s32.totalorder %v8080_v0, 1 }
  0x40   :  { %364 = vmatpush1.bf16.msra.mxu0 %v6921_v17  ;;  %437 = vmatpush1.bf16.msra.mxu1 %v6922_v18  ;;  %v187_v46 = vld [vmem:[%s10655_s1 + $0x10] sm:$0xff]  ;;  %v8120_v48 = vld [vmem:[#allocation12 + $0xa4] ss:$16 sps:$4 sm:$0xff]   ;;  %v8127_v51 = vld [vmem:[#allocation12 + $0xa0] ss:$16 sps:$4 sm:$0xff]   ;;  %v504_v17 = vlaneseq  ;;  %vm1104_vm3 = vcmp.gt.s32.totalorder %v8080_v0, 2 }
  0x41   :  { %365 = vmatprep.subr.bf16.mxu0 %v6923_v19  ;;  %438 = vmatprep.subr.bf16.mxu1 %v6925_v20  ;;  %v194_v50 = vpack.c.bf16 %v188_v47, %v187_v46  ;;  %v8130_v52 = vld [vmem:[#allocation12 + $0xa8] ss:$16 sps:$4 sm:$0xff]   ;;  %v8134_v53 = vld [vmem:[#allocation12 + $0x84] ss:$16 sps:$4 sm:$0xff]   ;;  %v8137_v54 = vld [vmem:[#allocation12 + $0x8c] ss:$16 sps:$4 sm:$0xff]  }
  0x42   :  { %v8139_v55 = vld [vmem:[#allocation12 + $0x80] ss:$16 sps:$4 sm:$0xff]   ;;  %v189_v56 = vld [vmem:[%s10655_s1 + $0x20] sm:$0xff]  ;;  %v8152_v59 = vld [vmem:[#allocation12 + $0x64] ss:$16 sps:$4 sm:$0xff]   ;;  %v505_v18 = vshrl.u32 %v504_v17, 7 }
  0x43   :  { %v190_v57 = vld [vmem:[%s10655_s1 + $0x28] sm:$0xff]  ;;  %v8150_v58 = vld [vmem:[#allocation12 + $0x88] ss:$16 sps:$4 sm:$0xff]   ;;  %v8154_v60 = vld [vmem:[#allocation12 + $0x6c] ss:$16 sps:$4 sm:$0xff]   ;;  %vm1226_vm4 = vcmp.gt.s32.totalorder %v8080_v0, 3 }
  0x44   :  { %366 = vmatpush1.bf16.msra.mxu0 %v6927_v21  ;;  %439 = vmatpush1.bf16.msra.mxu1 %v6928_v22  ;;  %v8158_v61 = vld [vmem:[#allocation12 + $0x60] ss:$16 sps:$4 sm:$0xff]   ;;  %v195_v62 = vpack.c.bf16 %v190_v57, %v189_v56  ;;  %v8161_v63 = vld [vmem:[#allocation12 + $0x68] ss:$16 sps:$4 sm:$0xff]   ;;  %v8163_v1 = vld [vmem:[#allocation12 + $0x44] ss:$16 sps:$4 sm:$0xff]  }
  0x45   :  { %367 = vmatprep.subr.bf16.mxu0 %v6929_v23  ;;  %440 = vmatprep.subr.bf16.mxu1 %v6931_v24  ;;  %v8166_v2 = vld [vmem:[#allocation12 + $0x4c] ss:$16 sps:$4 sm:$0xff]   ;;  %v8171_v4 = vld [vmem:[#allocation12 + $0x40] ss:$16 sps:$4 sm:$0xff]   ;;  %v8179_v7 = vld [vmem:[#allocation12 + $0x48] ss:$16 sps:$4 sm:$0xff]  }
  0x46   :  { %v191_v5 = vld [vmem:[%s10655_s1 + $0x30] sm:$0xff]  ;;  %v192_v6 = vld [vmem:[%s10655_s1 + $0x38] sm:$0xff]  ;;  %v8253_v19 = vsub.s32 2, %v505_v18  ;;  %v8255_v20 = vsub.s32 0, %v505_v18  ;;  %v184_v21 = vld [vmem:[%s10658_s4] sm:$0xf] }
  0x47   :  { %v8181_v8 = vld [vmem:[#allocation12 + $0x24] ss:$16 sps:$4 sm:$0xff]   ;;  %v8184_v9 = vld [vmem:[#allocation12 + $0x2c] ss:$16 sps:$4 sm:$0xff]   ;;  %v8190_v10 = vld [vmem:[#allocation12 + $0x20] ss:$16 sps:$4 sm:$0xff]   ;;  %v196_v11 = vpack.c.bf16 %v192_v6, %v191_v5 }
  0x48   :  { %368 = vmatpush1.bf16.msra.mxu0 %v6933_v25  ;;  %441 = vmatpush1.bf16.msra.mxu1 %v6934_v26  ;;  %v8193_v12 = vld [vmem:[#allocation12 + $0x28] ss:$16 sps:$4 sm:$0xff]   ;;  %v8195_v13 = vld [vmem:[#allocation12 + $0x4] ss:$16 sps:$4 sm:$0xff]   ;;  %v8198_v14 = vld [vmem:[#allocation12 + $0xc] ss:$16 sps:$4 sm:$0xff]   ;;  %v8269_v26 = vrot.slane %v184_v21, %v8253_v19 }
  0x49   :  { %369 = vmatprep.subr.bf16.mxu0 %v6935_v27  ;;  %442 = vmatprep.subr.bf16.mxu1 %v6937_v28  ;;  %v8203_v15 = vld [vmem:[#allocation12] ss:$16 sps:$4 sm:$0xff]   ;;  %v8205_v16 = vld [vmem:[#allocation12 + $0x8] ss:$16 sps:$4 sm:$0xff]   ;;  %10681 = vst [vmem:[#allocation26_spill] sm:$0xff] %v8253_v19  ;;  %10682 = vst [vmem:[#allocation27_spill] sm:$0xff] %v8255_v20  ;;  %v507_v28 = vrot.slane %v184_v21, %v8255_v20 }
  0x4a   :  { %v8262_v23 = vsub.s32 3, %v505_v18  ;;  %v8266_v25 = vsub.s32 1, %v505_v18  ;;  %vm8365_vm1 = vmpackc.low %vm862_vm0, %vm862_vm0  ;;  %vm1348_vm5 = vcmp.gt.s32.totalorder %v8080_v0, 4  ;;  %vm1470_vm6 = vcmp.gt.s32.totalorder %v8080_v0, 5 }
  0x4b   :  { %vm1592_vm7 = vcmp.gt.s32.totalorder %v8080_v0, 6  ;;  %vm8772_vm8 = vmpackc.low %vm982_vm2, %vm862_vm0  ;;  %vm1714_vm11 = vcmp.gt.s32.totalorder %v8080_v0, 7 }
  0x4c   :  { %370 = vmatpush1.bf16.msra.mxu0 %v6939_v29  ;;  %443 = vmatpush1.bf16.msra.mxu1 %v6940_v30  ;;  %10683 = vst [vmem:[#allocation28_spill] sm:$0xff] %v8262_v23  ;;  %10684 = vst [vmem:[#allocation29_spill] sm:$0xff] %v8266_v25  ;;  %v8277_v30 = vrot.slane %v184_v21, %v8262_v23 }
  0x4d   :  { %371 = vmatprep.subr.bf16.mxu0 %v6941_v31  ;;  %444 = vmatprep.subr.bf16.mxu1 %v6943_v32  ;;  %v511_v32 = vrot.slane %v184_v21, %v8266_v25  ;;  %vm8788_vm9 = vmpackc.low %vm1226_vm4, %vm1104_vm3 }
  0x4e   :  { %vm8804_vm10 = vmpackc.low %vm1470_vm6, %vm1348_vm5 }
  0x4f   :  { %vm8922_vm12 = vmpackc.low %vm1714_vm11, %vm1592_vm7 }
  0x50   :  { %372 = vmatpush1.bf16.msra.mxu0 %v6945_v33  ;;  %445 = vmatpush1.bf16.msra.mxu1 %v6946_v34 }
  0x51   :  { %752 = vmatprep.subr.bf16.mxu0 %v8093_v37  ;;  %793 = vmatprep.subr.bf16.mxu1 %v8095_v38 }
  0x53   :  { %390 = vmatmul.mubr.bf16.vlgmr.msra.gmra.mxu0 %v193_v39  ;;  %463 = vmatmul.mubr.bf16.vlgmr.msra.gmra.mxu1 %v193_v39 }
  0x54   :  { %753 = vmatpush1.bf16.msra.mxu0 %v8097_v40  ;;  %794 = vmatpush1.bf16.msra.mxu1 %v8100_v41 }
  0x55   :  { %754 = vmatprep.subr.bf16.mxu0 %v8102_v42  ;;  %795 = vmatprep.subr.bf16.mxu1 %v8105_v43 }
  0x56   :  { %399 = vmatprep.mubr.bf16.mxu0 %v10663_v3  ;;  %472 = vmatprep.mubr.bf16.mxu1 %v10663_v3 }
  0x58   :  { %755 = vmatpush1.bf16.msra.mxu0 %v8107_v44  ;;  %796 = vmatpush1.bf16.msra.mxu1 %v8110_v45 }
  0x59   :  { %756 = vmatprep.subr.bf16.mxu0 %v8120_v48  ;;  %797 = vmatprep.subr.bf16.mxu1 %v8124_v49 }
  0x5b   :  { %400 = vmatmul.mubr.bf16.gmra.mxu0 %v194_v50  ;;  %473 = vmatmul.mubr.bf16.gmra.mxu1 %v194_v50 }
  0x5c   :  { %757 = vmatpush1.bf16.msra.mxu0 %v8127_v51  ;;  %798 = vmatpush1.bf16.msra.mxu1 %v8130_v52 }
  0x5d   :  { %758 = vmatprep.subr.bf16.mxu0 %v8134_v53  ;;  %799 = vmatprep.subr.bf16.mxu1 %v8137_v54 }
  0x5e   :  { %409 = vmatprep.mubr.bf16.mxu0 %v10663_v3  ;;  %482 = vmatprep.mubr.bf16.mxu1 %v10663_v3 }
  0x60   :  { %759 = vmatpush1.bf16.msra.mxu0 %v8139_v55  ;;  %800 = vmatpush1.bf16.msra.mxu1 %v8150_v58 }
  0x61   :  { %760 = vmatprep.subr.bf16.mxu0 %v8152_v59  ;;  %801 = vmatprep.subr.bf16.mxu1 %v8154_v60 }
  0x63   :  { %410 = vmatmul.mubr.bf16.gmra.mxu0 %v195_v62  ;;  %483 = vmatmul.mubr.bf16.gmra.mxu1 %v195_v62 }
  0x64   :  { %761 = vmatpush1.bf16.msra.mxu0 %v8158_v61  ;;  %802 = vmatpush1.bf16.msra.mxu1 %v8161_v63 }
  0x65   :  { %762 = vmatprep.subr.bf16.mxu0 %v8163_v1  ;;  %803 = vmatprep.subr.bf16.mxu1 %v8166_v2 }
  0x66   :  { %419 = vmatprep.mubr.bf16.mxu0 %v10663_v3  ;;  %492 = vmatprep.mubr.bf16.mxu1 %v10663_v3 }
  0x68   :  { %763 = vmatpush1.bf16.msra.mxu0 %v8171_v4  ;;  %804 = vmatpush1.bf16.msra.mxu1 %v8179_v7 }
  0x69   :  { %764 = vmatprep.subr.bf16.mxu0 %v8181_v8  ;;  %805 = vmatprep.subr.bf16.mxu1 %v8184_v9 }
  0x6b   :  { %420 = vmatmul.mubr.bf16.gmra.mxu0 %v196_v11  ;;  %493 = vmatmul.mubr.bf16.gmra.mxu1 %v196_v11 }
  0x6c   :  { %765 = vmatpush1.bf16.msra.mxu0 %v8190_v10  ;;  %806 = vmatpush1.bf16.msra.mxu1 %v8193_v12 }
  0x6d   :  { %766 = vmatprep.subr.bf16.mxu0 %v8195_v13  ;;  %807 = vmatprep.subr.bf16.mxu1 %v8198_v14 }
  0x6e   :  { %784 = vmatprep.mubr.bf16.mxu0 %v10663_v3  ;;  %825 = vmatprep.mubr.bf16.mxu1 %v10663_v3 }
  0x70   :  { %767 = vmatpush1.bf16.msra.mxu0 %v8203_v15  ;;  %808 = vmatpush1.bf16.msra.mxu1 %v8205_v16 }
  0x71   :  { %872 = vmatprep.subr.bf16.mxu0 %v8093_v37  ;;  %913 = vmatprep.subr.bf16.mxu1 %v8095_v38 }
  0x73   :  { %785 = vmatmul.mubr.bf16.vlgmr.msra.gmra.mxu0 %v10663_v3  ;;  %826 = vmatmul.mubr.bf16.vlgmr.msra.gmra.mxu1 %v10663_v3 }
  0x74   :  { %873 = vmatpush1.bf16.msra.mxu0 %v8097_v40  ;;  %914 = vmatpush1.bf16.msra.mxu1 %v8100_v41 }
  0x75   :  { %874 = vmatprep.subr.bf16.mxu0 %v8102_v42  ;;  %915 = vmatprep.subr.bf16.mxu1 %v8105_v43 }
  0x76   :  { %904 = vmatprep.mubr.bf16.mxu0 %v10663_v3  ;;  %945 = vmatprep.mubr.bf16.mxu1 %v10663_v3 }
  0x78   :  { %875 = vmatpush1.bf16.msra.mxu0 %v8107_v44  ;;  %916 = vmatpush1.bf16.msra.mxu1 %v8110_v45 }
  0x79   :  { %876 = vmatprep.subr.bf16.mxu0 %v8120_v48  ;;  %917 = vmatprep.subr.bf16.mxu1 %v8124_v49 }
  0x7c   :  { %877 = vmatpush1.bf16.msra.mxu0 %v8127_v51  ;;  %918 = vmatpush1.bf16.msra.mxu1 %v8130_v52 }
  0x7d   :  { %878 = vmatprep.subr.bf16.mxu0 %v8134_v53  ;;  %919 = vmatprep.subr.bf16.mxu1 %v8137_v54 }
  0x80   :  { %879 = vmatpush1.bf16.msra.mxu0 %v8139_v55  ;;  %920 = vmatpush1.bf16.msra.mxu1 %v8150_v58 }
  0x81   :  { %880 = vmatprep.subr.bf16.mxu0 %v8152_v59  ;;  %921 = vmatprep.subr.bf16.mxu1 %v8154_v60 }
  0x84   :  { %881 = vmatpush1.bf16.msra.mxu0 %v8158_v61  ;;  %922 = vmatpush1.bf16.msra.mxu1 %v8161_v63 }
  0x85   :  { %882 = vmatprep.subr.bf16.mxu0 %v8163_v1  ;;  %923 = vmatprep.subr.bf16.mxu1 %v8166_v2 }
  0x88   :  { %883 = vmatpush1.bf16.msra.mxu0 %v8171_v4  ;;  %924 = vmatpush1.bf16.msra.mxu1 %v8179_v7 }
  0x89   :  { %884 = vmatprep.subr.bf16.mxu0 %v8181_v8  ;;  %925 = vmatprep.subr.bf16.mxu1 %v8184_v9 }
  0x8c   :  { %885 = vmatpush1.bf16.msra.mxu0 %v8190_v10  ;;  %926 = vmatpush1.bf16.msra.mxu1 %v8193_v12 }
  0x8d   :  { %886 = vmatprep.subr.bf16.mxu0 %v8195_v13  ;;  %927 = vmatprep.subr.bf16.mxu1 %v8198_v14 }
  0x90   :  { %887 = vmatpush1.bf16.msra.mxu0 %v8203_v15  ;;  %928 = vmatpush1.bf16.msra.mxu1 %v8205_v16 }
  0x91   :  { %994 = vmatprep.subr.bf16.mxu0 %v8093_v37  ;;  %1035 = vmatprep.subr.bf16.mxu1 %v8095_v38 }
 0x113   :  { %v8260_v22 = vpop.f32.mrf.mxu0  ;;  %v8264_v24 = vpop.f32.mrf.mxu1 }
 0x115   :  { %v8271_v27 = vpop.f32.mrf.mxu0  ;;  %v8274_v29 = vpop.f32.mrf.mxu1 }
 0x117   :  { %v395_v31 = vpop.f32.mrf.mxu0  ;;  %v468_v34 = vpop.f32.mrf.mxu1 }
 0x118   :  { %v8280_v33 = vadd.f32 %v507_v28, %v395_v31  ;;  %v8283_v35 = vadd.f32 %v8269_v26, %v468_v34 }
 0x119   :  { %v397_v36 = vpop.f32.mrf.mxu0  ;;  %v470_v46 = vpop.f32.mrf.mxu1 }
 0x11a   :  { %v8285_v39 = vadd.f32 %v511_v32, %v397_v36  ;;  %v8288_v47 = vadd.f32 %v8277_v30, %v470_v46 }
 0x11b   :  { %v401_v50 = vpop.f32.mrf.mxu0  ;;  %v474_v57 = vpop.f32.mrf.mxu1 }
 0x11c   :  { %v8290_v56 = vadd.f32 %v507_v28, %v401_v50  ;;  %v8293_v62 = vadd.f32 %v8269_v26, %v474_v57 }
 0x11d   :  { %v403_v5 = vpop.f32.mrf.mxu0  ;;  %v476_v11 = vpop.f32.mrf.mxu1 }
 0x11e   :  { %10685 = vst [vmem:[#allocation30_spill] sm:$0xff] %v8293_v62  ;;  %v8295_v6 = vadd.f32 %v511_v32, %v403_v5  ;;  %v8298_v17 = vadd.f32 %v8277_v30, %v476_v11 }
 0x11f   :  { %v405_v18 = vpop.f32.mrf.mxu0  ;;  %v478_v31 = vpop.f32.mrf.mxu1 }
 0x120   :  { %v8300_v21 = vadd.f32 %v507_v28, %v405_v18  ;;  %v8303_v34 = vadd.f32 %v8269_v26, %v478_v31 }
 0x121   :  { %v407_v36 = vpop.f32.mrf.mxu0  ;;  %v480_v50 = vpop.f32.mrf.mxu1 }
 0x122   :  { %10686 = vst [vmem:[#allocation31_spill] sm:$0xff] %v8300_v21  ;;  %10687 = vst [vmem:[#allocation32_spill] sm:$0xff] %v8303_v34  ;;  %v8305_v46 = vadd.f32 %v511_v32, %v407_v36  ;;  %v8308_v57 = vadd.f32 %v8277_v30, %v480_v50 }
 0x123   :  { %v411_v5 = vpop.f32.mrf.mxu0  ;;  %v484_v19 = vpop.f32.mrf.mxu1 }
 0x124   :  { %10688 = vst [vmem:[#allocation33_spill] sm:$0xff] %v8305_v46  ;;  %10689 = vst [vmem:[#allocation34_spill] sm:$0xff] %v8308_v57  ;;  %v8310_v3 = vadd.f32 %v507_v28, %v411_v5  ;;  %v8313_v11 = vadd.f32 %v8269_v26, %v484_v19 }
 0x125   :  { %v413_v18 = vpop.f32.mrf.mxu0  ;;  %v486_v25 = vpop.f32.mrf.mxu1 }
 0x126   :  { %10690 = vst [vmem:[#allocation35_spill] sm:$0xff] %v8310_v3  ;;  %10691 = vst [vmem:[#allocation36_spill] sm:$0xff] %v8313_v11  ;;  %v8315_v23 = vadd.f32 %v511_v32, %v413_v18  ;;  %v8318_v31 = vadd.f32 %v8277_v30, %v486_v25 }
 0x127   :  { %v415_v36 = vpop.f32.mrf.mxu0  ;;  %v488_v34 = vpop.f32.mrf.mxu1 }
 0x128   :  { %10692 = vst [vmem:[#allocation37_spill] sm:$0xff] %v8315_v23  ;;  %10693 = vst [vmem:[#allocation38_spill] sm:$0xff] %v8318_v31  ;;  %v8320_v20 = vadd.f32 %v507_v28, %v415_v36  ;;  %v8323_v50 = vadd.f32 %v8269_v26, %v488_v34 }
 0x129   :  { %v417_v5 = vpop.f32.mrf.mxu0  ;;  %v490_v57 = vpop.f32.mrf.mxu1 }
 0x12a   :  { %10694 = vst [vmem:[#allocation39_spill] sm:$0xff] %v8320_v20  ;;  %10695 = vst [vmem:[#allocation40_spill] sm:$0xff] %v8323_v50  ;;  %v8325_v3 = vadd.f32 %v511_v32, %v417_v5  ;;  %v8328_v19 = vadd.f32 %v8277_v30, %v490_v57 }
 0x12b   :  { %v421_v18 = vpop.f32.mrf.mxu0  ;;  %v494_v23 = vpop.f32.mrf.mxu1 }
 0x12c   :  { %10696 = vst [vmem:[#allocation41_spill] sm:$0xff] %v8325_v3  ;;  %10697 = vst [vmem:[#allocation42_spill] sm:$0xff] %v8328_v19  ;;  %v8330_v11 = vadd.f32 %v507_v28, %v421_v18  ;;  %v8333_v25 = vadd.f32 %v8269_v26, %v494_v23 }
 0x12d   :  { %v423_v36 = vpop.f32.mrf.mxu0  ;;  %v496_v31 = vpop.f32.mrf.mxu1 }
 0x12e   :  { %10698 = vst [vmem:[#allocation43_spill] sm:$0xff] %v8330_v11  ;;  %10699 = vst [vmem:[#allocation44_spill] sm:$0xff] %v8333_v25  ;;  %v8335_v20 = vadd.f32 %v511_v32, %v423_v36  ;;  %v8338_v34 = vadd.f32 %v8277_v30, %v496_v31  ;;  %v524_v11 = vadd.f32 %v507_v28, %v8260_v22 }
 0x12f   :  { %v425_v5 = vpop.f32.mrf.mxu0  ;;  %v498_v3 = vpop.f32.mrf.mxu1  ;;  %v525_v31 = vadd.f32 %v511_v32, %v8271_v27  ;;  %v526_v27 = vadd.f32 %v8269_v26, %v8264_v24 }
 0x130   :  { %10700 = vst [vmem:[#allocation45_spill] sm:$0xff] %v8335_v20  ;;  %10701 = vst [vmem:[#allocation46_spill] sm:$0xff] %v8338_v34  ;;  %v8340_v50 = vadd.f32 %v507_v28, %v425_v5  ;;  %v8343_v57 = vadd.f32 %v8269_v26, %v498_v3 }
 0x131   :  { %v427_v18 = vpop.f32.mrf.mxu0  ;;  %v500_v23 = vpop.f32.mrf.mxu1 }
 0x132   :  { %10702 = vst [vmem:[#allocation47_spill] sm:$0xff] %v8340_v50  ;;  %10703 = vst [vmem:[#allocation48_spill] sm:$0xff] %v8343_v57  ;;  %v8346_v19 = vadd.f32 %v511_v32, %v427_v18  ;;  %v8349_v36 = vadd.f32 %v8277_v30, %v500_v23  ;;  %v527_v18 = vadd.f32 %v8277_v30, %v8274_v29 }
 0x133   :  { %v786_v25 = vpop.f32.mrf.mxu0  ;;  %v827_v20 = vpop.f32.mrf.mxu1 }
 0x134   :  { %v834_v34 = vadd.f32 %v786_v25, %v524_v11  ;;  %v836_v25 = vadd.f32 %v827_v20, %v526_v27 }
 0x135   :  { %v788_v5 = vpop.f32.mrf.mxu0  ;;  %v829_v21 = vpop.f32.mrf.mxu1 }
 0x136   :  { %v6533_v50 = vmul.f32 -1.442695, %v834_v34  ;;  %v835_v46 = vadd.f32 %v788_v5, %v525_v31  ;;  %v837_v23 = vadd.f32 %v829_v21, %v527_v18  ;;  %v10706_v18 = vmov 0  }
 0x137   :  { %v790_v3 = vpop.f32.mrf.mxu0  ;;  %v831_v62 = vpop.f32.mrf.mxu1 }
 0x138   :  { %7091 = vpow2.f32 %v6533_v50  ;;  %v6534_v57 = vmul.f32 -1.442695, %v835_v46  ;;  %v6535_v32 = vmul.f32 -1.442695, %v837_v23 }
 0x139   :  { %v791_v22 = vpop.f32.mrf.mxu0  ;;  %v832_v28 = vpop.f32.mrf.mxu1 }
 0x13a   :  { %7093 = vpow2.f32 %v6534_v57 }
 0x13b   :  { %7095 = vpow2.f32 %v6535_v32 }
 0x145   :  { %v7092_v11 = vpop.eup %7091 }
 0x146   :  { %v841_v34 = vadd.f32 1.0, %v7092_v11 }
 0x147   :  { %v7094_v31 = vpop.eup %7093 }
 0x148   :  { %7097 = vrcp.f32 %v841_v34  ;;  %v847_v50 = vadd.f32 1.0, %v7094_v31  ;;  %v7096_v62 = vpop.eup %7095 }
 0x149   :  { %7099 = vtanh.f32 %v836_v25  ;;  %v854_v3 = vadd.f32 1.0, %v7096_v62 }
 0x14a   :  { %7101 = vrcp.f32 %v847_v50 }
 0x14b   :  { %7103 = vrcp.f32 %v854_v3 }
 0x155   :  { %v7098_v46 = vpop.eup %7097 }
 0x156   :  { %v7100_v57 = vpop.eup %7099 }
 0x157   :  { %v7102_v5 = vpop.eup %7101  ;;  %v858_v30 = vmul.f32 %v7100_v57, %v7098_v46 }
 0x158   :  { %v857_v29 = vmul.f32 0.0, %v7102_v5  ;;  %v7104_v20 = vpop.eup %7103 }
 0x15a   :  { %v8356_v21 = vadd.f32 %v858_v30, %v857_v29 }
 0x15c   :  { %7105 = vtanh.f32 %v8356_v21 }
 0x169   :  { %v7106_v24 = vpop.eup %7105 }
 0x16a   :  { %v8360_v26 = vmul.f32 %v7106_v24, %v7104_v20 }
 0x16c   :  { %v6537_v28 = vpack.c.bf16 %v8360_v26, %v8360_v26 }
 0x16e   :  { %6538 = vmatmul.mubr.msk.bf16.vlgmr.msra.gmra.mxu0 %vm8365_vm1, %v6537_v28  ;;  %6541 = vmatmul.mubr.msk.bf16.vlgmr.msra.gmra.mxu1 %vm8365_vm1, %v6537_v28 }
 0x16f   :  { %995 = vmatpush1.bf16.msra.mxu0 %v8097_v40  ;;  %1036 = vmatpush1.bf16.msra.mxu1 %v8100_v41 }
 0x170   :  { %996 = vmatprep.subr.bf16.mxu0 %v8102_v42  ;;  %1037 = vmatprep.subr.bf16.mxu1 %v8105_v43 }
 0x171   :  { %1026 = vmatprep.mubr.bf16.mxu0 %v10706_v18  ;;  %1067 = vmatprep.mubr.bf16.mxu1 %v10706_v18 }
 0x173   :  { %997 = vmatpush1.bf16.msra.mxu0 %v8107_v44  ;;  %1038 = vmatpush1.bf16.msra.mxu1 %v8110_v45 }
 0x174   :  { %998 = vmatprep.subr.bf16.mxu0 %v8120_v48  ;;  %1039 = vmatprep.subr.bf16.mxu1 %v8124_v49 }
 0x177   :  { %999 = vmatpush1.bf16.msra.mxu0 %v8127_v51  ;;  %1040 = vmatpush1.bf16.msra.mxu1 %v8130_v52 }
 0x178   :  { %1000 = vmatprep.subr.bf16.mxu0 %v8134_v53  ;;  %1041 = vmatprep.subr.bf16.mxu1 %v8137_v54 }
 0x17b   :  { %1001 = vmatpush1.bf16.msra.mxu0 %v8139_v55  ;;  %1042 = vmatpush1.bf16.msra.mxu1 %v8150_v58 }
 0x17c   :  { %1002 = vmatprep.subr.bf16.mxu0 %v8152_v59  ;;  %1043 = vmatprep.subr.bf16.mxu1 %v8154_v60 }
 0x17f   :  { %1003 = vmatpush1.bf16.msra.mxu0 %v8158_v61  ;;  %1044 = vmatpush1.bf16.msra.mxu1 %v8161_v63 }
 0x180   :  { %1004 = vmatprep.subr.bf16.mxu0 %v8163_v1  ;;  %1045 = vmatprep.subr.bf16.mxu1 %v8166_v2 }
 0x183   :  { %1005 = vmatpush1.bf16.msra.mxu0 %v8171_v4  ;;  %1046 = vmatpush1.bf16.msra.mxu1 %v8179_v7 }
 0x184   :  { %1006 = vmatprep.subr.bf16.mxu0 %v8181_v8  ;;  %1047 = vmatprep.subr.bf16.mxu1 %v8184_v9 }
 0x187   :  { %1007 = vmatpush1.bf16.msra.mxu0 %v8190_v10  ;;  %1048 = vmatpush1.bf16.msra.mxu1 %v8193_v12 }
 0x188   :  { %1008 = vmatprep.subr.bf16.mxu0 %v8195_v13  ;;  %1049 = vmatprep.subr.bf16.mxu1 %v8198_v14 }
 0x18b   :  { %1009 = vmatpush1.bf16.msra.mxu0 %v8203_v15  ;;  %1050 = vmatpush1.bf16.msra.mxu1 %v8205_v16 }
 0x18c   :  { %1116 = vmatprep.subr.bf16.mxu0 %v8093_v37  ;;  %1157 = vmatprep.subr.bf16.mxu1 %v8095_v38 }
 0x22e   :  { %v906_v23 = vpop.f32.mrf.mxu0  ;;  %v947_v27 = vpop.f32.mrf.mxu1 }
 0x22f   :  { %v954_v32 = vadd.f32 %v906_v23, %v8280_v33  ;;  %v956_v29 = vadd.f32 %v947_v27, %v8283_v35 }
 0x230   :  { %v908_v11 = vpop.f32.mrf.mxu0  ;;  %v949_v25 = vpop.f32.mrf.mxu1 }
 0x231   :  { %v6542_v34 = vmul.f32 -1.442695, %v954_v32  ;;  %v955_v31 = vadd.f32 %v908_v11, %v8285_v39  ;;  %v957_v3 = vadd.f32 %v949_v25, %v8288_v47  ;;  %v863_v47 = vsel %vm862_vm0, %v8356_v21, 0.0 }
 0x232   :  { %v910_v50 = vpop.f32.mrf.mxu0  ;;  %v951_v62 = vpop.f32.mrf.mxu1 }
 0x233   :  { %7107 = vpow2.f32 %v6542_v34  ;;  %v6543_v46 = vmul.f32 -1.442695, %v955_v31  ;;  %v6544_v30 = vmul.f32 -1.442695, %v957_v3 }
 0x234   :  { %v911_v57 = vpop.f32.mrf.mxu0  ;;  %v952_v5 = vpop.f32.mrf.mxu1 }
 0x235   :  { %7109 = vpow2.f32 %v6543_v46  ;;  %v864_v57 = vsel %vm862_vm0, %v8360_v26, 0.0 }
 0x236   :  { %7111 = vtanh.f32 %v956_v29 }
 0x237   :  { %7113 = vpow2.f32 %v6544_v30 }
 0x240   :  { %v7108_v20 = vpop.eup %7107 }
 0x241   :  { %v961_v24 = vadd.f32 1.0, %v7108_v20 }
 0x242   :  { %v7110_v33 = vpop.eup %7109 }
 0x243   :  { %7115 = vrcp.f32 %v961_v24  ;;  %v967_v28 = vadd.f32 1.0, %v7110_v33  ;;  %v7112_v39 = vpop.eup %7111 }
 0x244   :  { %v7114_v23 = vpop.eup %7113 }
 0x245   :  { %7117 = vrcp.f32 %v967_v28  ;;  %v974_v25 = vadd.f32 1.0, %v7114_v23 }
 0x247   :  { %7119 = vrcp.f32 %v974_v25 }
 0x250   :  { %v7116_v32 = vpop.eup %7115 }
 0x251   :  { %v978_v11 = vmul.f32 %v7116_v32, %v7112_v39 }
 0x252   :  { %v7118_v34 = vpop.eup %7117 }
 0x253   :  { %v977_v35 = vmul.f32 %v7118_v34, %v863_v47 }
 0x254   :  { %v7120_v50 = vpop.eup %7119 }
 0x255   :  { %v979_v27 = vadd.f32 %v978_v11, %v977_v35 }
 0x257   :  { %7121 = vtanh.f32 %v979_v27  ;;  %v8419_v31 = vsel %vm982_vm2, %v979_v27, %v863_v47  ;;  %v10707_v47 = vld [vmem:[#allocation30_spill] sm:$0xff] }
 0x264   :  { %v7122_v62 = vpop.eup %7121 }
 0x265   :  { %v8421_v46 = vmul.f32 %v7122_v62, %v7120_v50 }
 0x267   :  { %v8429_v21 = vsel %vm982_vm2, %v8421_v46, %v864_v57 }
 0x268   :  { %v993_v5 = vpack.c.bf16 %v8429_v21, %v8429_v21 }
 0x26a   :  { %1027 = vmatmul.mubr.bf16.vlgmr.msra.gmra.mxu0 %v993_v5  ;;  %1068 = vmatmul.mubr.bf16.vlgmr.msra.gmra.mxu1 %v993_v5 }
 0x26b   :  { %1117 = vmatpush1.bf16.msra.mxu0 %v8097_v40  ;;  %1158 = vmatpush1.bf16.msra.mxu1 %v8100_v41 }
 0x26c   :  { %1118 = vmatprep.subr.bf16.mxu0 %v8102_v42  ;;  %1159 = vmatprep.subr.bf16.mxu1 %v8105_v43 }
 0x26d   :  { %1148 = vmatprep.mubr.bf16.mxu0 %v10706_v18  ;;  %1189 = vmatprep.mubr.bf16.mxu1 %v10706_v18 }
 0x26f   :  { %1119 = vmatpush1.bf16.msra.mxu0 %v8107_v44  ;;  %1160 = vmatpush1.bf16.msra.mxu1 %v8110_v45 }
 0x270   :  { %1120 = vmatprep.subr.bf16.mxu0 %v8120_v48  ;;  %1161 = vmatprep.subr.bf16.mxu1 %v8124_v49 }
 0x273   :  { %1121 = vmatpush1.bf16.msra.mxu0 %v8127_v51  ;;  %1162 = vmatpush1.bf16.msra.mxu1 %v8130_v52 }
 0x274   :  { %1122 = vmatprep.subr.bf16.mxu0 %v8134_v53  ;;  %1163 = vmatprep.subr.bf16.mxu1 %v8137_v54 }
 0x277   :  { %1123 = vmatpush1.bf16.msra.mxu0 %v8139_v55  ;;  %1164 = vmatpush1.bf16.msra.mxu1 %v8150_v58 }
 0x278   :  { %1124 = vmatprep.subr.bf16.mxu0 %v8152_v59  ;;  %1165 = vmatprep.subr.bf16.mxu1 %v8154_v60 }
 0x27b   :  { %1125 = vmatpush1.bf16.msra.mxu0 %v8158_v61  ;;  %1166 = vmatpush1.bf16.msra.mxu1 %v8161_v63 }
 0x27c   :  { %1126 = vmatprep.subr.bf16.mxu0 %v8163_v1  ;;  %1167 = vmatprep.subr.bf16.mxu1 %v8166_v2 }
 0x27f   :  { %1127 = vmatpush1.bf16.msra.mxu0 %v8171_v4  ;;  %1168 = vmatpush1.bf16.msra.mxu1 %v8179_v7 }
 0x280   :  { %1128 = vmatprep.subr.bf16.mxu0 %v8181_v8  ;;  %1169 = vmatprep.subr.bf16.mxu1 %v8184_v9 }
 0x283   :  { %1129 = vmatpush1.bf16.msra.mxu0 %v8190_v10  ;;  %1170 = vmatpush1.bf16.msra.mxu1 %v8193_v12 }
 0x284   :  { %1130 = vmatprep.subr.bf16.mxu0 %v8195_v13  ;;  %1171 = vmatprep.subr.bf16.mxu1 %v8198_v14 }
 0x287   :  { %1131 = vmatpush1.bf16.msra.mxu0 %v8203_v15  ;;  %1172 = vmatpush1.bf16.msra.mxu1 %v8205_v16 }
 0x288   :  { %1238 = vmatprep.subr.bf16.mxu0 %v8093_v37  ;;  %1279 = vmatprep.subr.bf16.mxu1 %v8095_v38 }
 0x32a   :  { %v1028_v3 = vpop.f32.mrf.mxu0  ;;  %v1069_v29 = vpop.f32.mrf.mxu1 }
 0x32b   :  { %v1076_v30 = vadd.f32 %v1028_v3, %v8290_v56  ;;  %v1078_v38 = vadd.f32 %v1069_v29, %v10707_v47 }
 0x32c   :  { %v1030_v20 = vpop.f32.mrf.mxu0  ;;  %v1071_v24 = vpop.f32.mrf.mxu1 }
 0x32d   :  { %v6545_v33 = vmul.f32 -1.442695, %v1076_v30  ;;  %v1077_v28 = vadd.f32 %v1030_v20, %v8295_v6  ;;  %v1079_v37 = vadd.f32 %v1071_v24, %v8298_v17 }
 0x32e   :  { %v1032_v39 = vpop.f32.mrf.mxu0  ;;  %v1073_v23 = vpop.f32.mrf.mxu1 }
 0x32f   :  { %7123 = vpow2.f32 %v6545_v33  ;;  %v6546_v32 = vmul.f32 -1.442695, %v1077_v28  ;;  %v6547_v25 = vmul.f32 -1.442695, %v1079_v37 }
 0x330   :  { %v1033_v11 = vpop.f32.mrf.mxu0  ;;  %v1074_v34 = vpop.f32.mrf.mxu1 }
 0x331   :  { %7125 = vpow2.f32 %v6546_v32 }
 0x332   :  { %7127 = vtanh.f32 %v1078_v38 }
 0x333   :  { %7129 = vpow2.f32 %v6547_v25 }
 0x33c   :  { %v7124_v35 = vpop.eup %7123 }
 0x33d   :  { %v1083_v27 = vadd.f32 1.0, %v7124_v35 }
 0x33e   :  { %v7126_v56 = vpop.eup %7125 }
 0x33f   :  { %7131 = vrcp.f32 %v1083_v27  ;;  %v1089_v50 = vadd.f32 1.0, %v7126_v56  ;;  %v7128_v6 = vpop.eup %7127 }
 0x340   :  { %v7130_v62 = vpop.eup %7129 }
 0x341   :  { %7133 = vrcp.f32 %v1089_v50  ;;  %v1096_v30 = vadd.f32 1.0, %v7130_v62 }
 0x343   :  { %7135 = vrcp.f32 %v1096_v30 }
 0x34c   :  { %v7132_v57 = vpop.eup %7131 }
 0x34d   :  { %v1100_v5 = vmul.f32 %v7132_v57, %v7128_v6 }
 0x34e   :  { %v7134_v3 = vpop.eup %7133 }
 0x34f   :  { %v1099_v20 = vmul.f32 %v7134_v3, %v8419_v31 }
 0x350   :  { %v7136_v24 = vpop.eup %7135 }
 0x351   :  { %v1101_v17 = vadd.f32 %v1100_v5, %v1099_v20 }
 0x353   :  { %7137 = vtanh.f32 %v1101_v17  ;;  %v8476_v29 = vsel %vm1104_vm3, %v1101_v17, %v8419_v31  ;;  %v8547_v17 = vld [vmem:[#allocation12 + $0xe0] ss:$16 sps:$4 sm:$0xff]  }
 0x360   :  { %v7138_v33 = vpop.eup %7137 }
 0x361   :  { %v8478_v28 = vmul.f32 %v7138_v33, %v7136_v24  ;;  %v8553_v24 = vld [vmem:[#allocation12 + $0xc4] ss:$16 sps:$4 sm:$0xff]   ;;  %v8556_v33 = vld [vmem:[#allocation12 + $0xcc] ss:$16 sps:$4 sm:$0xff]  }
 0x363   :  { %v8484_v39 = vsel %vm1104_vm3, %v8478_v28, %v8429_v21 }
 0x364   :  { %v1115_v23 = vpack.c.bf16 %v8484_v39, %v8484_v39 }
 0x366   :  { %1149 = vmatmul.mubr.bf16.vlgmr.msra.gmra.mxu0 %v1115_v23  ;;  %1190 = vmatmul.mubr.bf16.vlgmr.msra.gmra.mxu1 %v1115_v23  ;;  %v8564_v23 = vld [vmem:[#allocation12 + $0xc8] ss:$16 sps:$4 sm:$0xff]  }
 0x367   :  { %1239 = vmatpush1.bf16.msra.mxu0 %v8097_v40  ;;  %1280 = vmatpush1.bf16.msra.mxu1 %v8100_v41  ;;  %v8520_v40 = vld [vmem:[#allocation12 + $0xe4] ss:$16 sps:$4 sm:$0xff]   ;;  %v8523_v41 = vld [vmem:[#allocation12 + $0xec] ss:$16 sps:$4 sm:$0xff]  }
 0x368   :  { %1240 = vmatprep.subr.bf16.mxu0 %v8102_v42  ;;  %1281 = vmatprep.subr.bf16.mxu1 %v8105_v43 }
 0x369   :  { %1270 = vmatprep.mubr.bf16.mxu0 %v10706_v18  ;;  %1311 = vmatprep.mubr.bf16.mxu1 %v10706_v18 }
 0x36b   :  { %1241 = vmatpush1.bf16.msra.mxu0 %v8107_v44  ;;  %1282 = vmatpush1.bf16.msra.mxu1 %v8110_v45  ;;  %v10708_v44 = vld [vmem:[#allocation31_spill] sm:$0xff] }
 0x36c   :  { %1242 = vmatprep.subr.bf16.mxu0 %v8120_v48  ;;  %1283 = vmatprep.subr.bf16.mxu1 %v8124_v49 }
 0x36f   :  { %1243 = vmatpush1.bf16.msra.mxu0 %v8127_v51  ;;  %1284 = vmatpush1.bf16.msra.mxu1 %v8130_v52  ;;  %v10709_v52 = vld [vmem:[#allocation33_spill] sm:$0xff] }
 0x370   :  { %1244 = vmatprep.subr.bf16.mxu0 %v8134_v53  ;;  %1285 = vmatprep.subr.bf16.mxu1 %v8137_v54 }
 0x373   :  { %1245 = vmatpush1.bf16.msra.mxu0 %v8139_v55  ;;  %1286 = vmatpush1.bf16.msra.mxu1 %v8150_v58 }
 0x374   :  { %1246 = vmatprep.subr.bf16.mxu0 %v8152_v59  ;;  %1287 = vmatprep.subr.bf16.mxu1 %v8154_v60 }
 0x377   :  { %1247 = vmatpush1.bf16.msra.mxu0 %v8158_v61  ;;  %1288 = vmatpush1.bf16.msra.mxu1 %v8161_v63  ;;  %v10710_v61 = vld [vmem:[#allocation34_spill] sm:$0xff] }
 0x378   :  { %1248 = vmatprep.subr.bf16.mxu0 %v8163_v1  ;;  %1289 = vmatprep.subr.bf16.mxu1 %v8166_v2  ;;  %v10711_v1 = vld [vmem:[#allocation32_spill] sm:$0xff] }
 0x37b   :  { %1249 = vmatpush1.bf16.msra.mxu0 %v8171_v4  ;;  %1290 = vmatpush1.bf16.msra.mxu1 %v8179_v7 }
 0x37c   :  { %1250 = vmatprep.subr.bf16.mxu0 %v8181_v8  ;;  %1291 = vmatprep.subr.bf16.mxu1 %v8184_v9 }
 0x37f   :  { %1251 = vmatpush1.bf16.msra.mxu0 %v8190_v10  ;;  %1292 = vmatpush1.bf16.msra.mxu1 %v8193_v12 }
 0x380   :  { %1252 = vmatprep.subr.bf16.mxu0 %v8195_v13  ;;  %1293 = vmatprep.subr.bf16.mxu1 %v8198_v14 }
 0x383   :  { %1253 = vmatpush1.bf16.msra.mxu0 %v8203_v15  ;;  %1294 = vmatpush1.bf16.msra.mxu1 %v8205_v16 }
 0x384   :  { %1360 = vmatprep.subr.bf16.mxu0 %v8520_v40  ;;  %1401 = vmatprep.subr.bf16.mxu1 %v8523_v41 }
 0x426   :  { %v1150_v42 = vpop.f32.mrf.mxu0  ;;  %v1191_v43 = vpop.f32.mrf.mxu1 }
 0x427   :  { %v1198_v45 = vadd.f32 %v1150_v42, %v10708_v44  ;;  %v1200_v31 = vadd.f32 %v1191_v43, %v10711_v1  ;;  %v8567_v42 = vld [vmem:[#allocation12 + $0xa4] ss:$16 sps:$4 sm:$0xff]   ;;  %v8570_v43 = vld [vmem:[#allocation12 + $0xac] ss:$16 sps:$4 sm:$0xff]   ;;  %v8573_v44 = vld [vmem:[#allocation12 + $0xa0] ss:$16 sps:$4 sm:$0xff]  }
 0x428   :  { %v1152_v48 = vpop.f32.mrf.mxu0  ;;  %v1193_v49 = vpop.f32.mrf.mxu1 }
 0x429   :  { %v6548_v51 = vmul.f32 -1.442695, %v1198_v45  ;;  %v1199_v53 = vadd.f32 %v1152_v48, %v10709_v52  ;;  %v1201_v63 = vadd.f32 %v1193_v49, %v10710_v61  ;;  %v8576_v45 = vld [vmem:[#allocation12 + $0xa8] ss:$16 sps:$4 sm:$0xff]   ;;  %v8579_v48 = vld [vmem:[#allocation12 + $0x84] ss:$16 sps:$4 sm:$0xff]  }
 0x42a   :  { %v1154_v54 = vpop.f32.mrf.mxu0  ;;  %v1195_v55 = vpop.f32.mrf.mxu1  ;;  %v8582_v49 = vld [vmem:[#allocation12 + $0x8c] ss:$16 sps:$4 sm:$0xff]   ;;  %v8588_v52 = vld [vmem:[#allocation12 + $0x88] ss:$16 sps:$4 sm:$0xff]  }
 0x42b   :  { %7139 = vpow2.f32 %v6548_v51  ;;  %v6549_v58 = vmul.f32 -1.442695, %v1199_v53  ;;  %v6550_v21 = vmul.f32 -1.442695, %v1201_v63  ;;  %v8585_v51 = vld [vmem:[#allocation12 + $0x80] ss:$16 sps:$4 sm:$0xff]  }
 0x42c   :  { %v1155_v59 = vpop.f32.mrf.mxu0  ;;  %v1196_v60 = vpop.f32.mrf.mxu1  ;;  %v8591_v53 = vld [vmem:[#allocation12 + $0x64] ss:$16 sps:$4 sm:$0xff]   ;;  %v8594_v54 = vld [vmem:[#allocation12 + $0x6c] ss:$16 sps:$4 sm:$0xff]   ;;  %v8597_v55 = vld [vmem:[#allocation12 + $0x60] ss:$16 sps:$4 sm:$0xff]  }
 0x42d   :  { %7141 = vpow2.f32 %v6549_v58  ;;  %v8600_v58 = vld [vmem:[#allocation12 + $0x68] ss:$16 sps:$4 sm:$0xff]   ;;  %v8603_v59 = vld [vmem:[#allocation12 + $0x44] ss:$16 sps:$4 sm:$0xff]  }
 0x42e   :  { %7143 = vtanh.f32 %v1200_v31 }
 0x42f   :  { %7145 = vpow2.f32 %v6550_v21  ;;  %v10715_v21 = vld [vmem:[#allocation36_spill] sm:$0xff] }
 0x438   :  { %v7140_v32 = vpop.eup %7139 }
 0x439   :  { %v1205_v11 = vadd.f32 1.0, %v7140_v32 }
 0x43a   :  { %v7142_v34 = vpop.eup %7141 }
 0x43b   :  { %7147 = vrcp.f32 %v1205_v11  ;;  %v1211_v37 = vadd.f32 1.0, %v7142_v34  ;;  %v7144_v47 = vpop.eup %7143 }
 0x43c   :  { %v7146_v38 = vpop.eup %7145 }
 0x43d   :  { %7149 = vrcp.f32 %v1211_v37  ;;  %v1218_v56 = vadd.f32 1.0, %v7146_v38 }
 0x43f   :  { %7151 = vrcp.f32 %v1218_v56 }
 0x448   :  { %v7148_v25 = vpop.eup %7147 }
 0x449   :  { %v1222_v35 = vmul.f32 %v7148_v25, %v7144_v47 }
 0x44a   :  { %v7150_v27 = vpop.eup %7149 }
 0x44b   :  { %v1221_v50 = vmul.f32 %v7150_v27, %v8476_v29 }
 0x44c   :  { %v7152_v57 = vpop.eup %7151 }
 0x44d   :  { %v1223_v6 = vadd.f32 %v1222_v35, %v1221_v50 }
 0x44f   :  { %7153 = vtanh.f32 %v1223_v6  ;;  %v8535_v62 = vsel %vm1226_vm4, %v1223_v6, %v8476_v29  ;;  %v8550_v29 = vld [vmem:[#allocation12 + $0xe8] ss:$16 sps:$4 sm:$0xff]  }
 0x45c   :  { %v7154_v5 = vpop.eup %7153 }
 0x45d   :  { %v8537_v3 = vmul.f32 %v7154_v5, %v7152_v57 }
 0x45f   :  { %v8543_v30 = vsel %vm1226_vm4, %v8537_v3, %v8484_v39  ;;  %v8561_v39 = vld [vmem:[#allocation12 + $0xc0] ss:$16 sps:$4 sm:$0xff]  }
 0x460   :  { %v1237_v20 = vpack.c.bf16 %v8543_v30, %v8543_v30 }
 0x462   :  { %1271 = vmatmul.mubr.bf16.vlgmr.msra.gmra.mxu0 %v1237_v20  ;;  %1312 = vmatmul.mubr.bf16.vlgmr.msra.gmra.mxu1 %v1237_v20 }
 0x463   :  { %1361 = vmatpush1.bf16.msra.mxu0 %v8547_v17  ;;  %1402 = vmatpush1.bf16.msra.mxu1 %v8550_v29 }
 0x464   :  { %1362 = vmatprep.subr.bf16.mxu0 %v8553_v24  ;;  %1403 = vmatprep.subr.bf16.mxu1 %v8556_v33 }
 0x465   :  { %1392 = vmatprep.mubr.bf16.mxu0 %v10706_v18  ;;  %1433 = vmatprep.mubr.bf16.mxu1 %v10706_v18 }
 0x467   :  { %1363 = vmatpush1.bf16.msra.mxu0 %v8561_v39  ;;  %1404 = vmatpush1.bf16.msra.mxu1 %v8564_v23 }
 0x468   :  { %1364 = vmatprep.subr.bf16.mxu0 %v8567_v42  ;;  %1405 = vmatprep.subr.bf16.mxu1 %v8570_v43 }
 0x46b   :  { %1365 = vmatpush1.bf16.msra.mxu0 %v8573_v44  ;;  %1406 = vmatpush1.bf16.msra.mxu1 %v8576_v45 }
 0x46c   :  { %1366 = vmatprep.subr.bf16.mxu0 %v8579_v48  ;;  %1407 = vmatprep.subr.bf16.mxu1 %v8582_v49 }
 0x46f   :  { %1367 = vmatpush1.bf16.msra.mxu0 %v8585_v51  ;;  %1408 = vmatpush1.bf16.msra.mxu1 %v8588_v52 }
 0x470   :  { %1368 = vmatprep.subr.bf16.mxu0 %v8591_v53  ;;  %1409 = vmatprep.subr.bf16.mxu1 %v8594_v54 }
 0x473   :  { %1369 = vmatpush1.bf16.msra.mxu0 %v8597_v55  ;;  %1410 = vmatpush1.bf16.msra.mxu1 %v8600_v58 }
 0x474   :  { %1370 = vmatprep.subr.bf16.mxu0 %v8603_v59  ;;  %1411 = vmatprep.subr.bf16.mxu1 %v8166_v2 }
 0x477   :  { %1371 = vmatpush1.bf16.msra.mxu0 %v8171_v4  ;;  %1412 = vmatpush1.bf16.msra.mxu1 %v8179_v7  ;;  %v10712_v7 = vld [vmem:[#allocation35_spill] sm:$0xff] }
 0x478   :  { %1372 = vmatprep.subr.bf16.mxu0 %v8181_v8  ;;  %1413 = vmatprep.subr.bf16.mxu1 %v8184_v9 }
 0x47b   :  { %1373 = vmatpush1.bf16.msra.mxu0 %v8190_v10  ;;  %1414 = vmatpush1.bf16.msra.mxu1 %v8193_v12  ;;  %v10713_v12 = vld [vmem:[#allocation37_spill] sm:$0xff] }
 0x47c   :  { %1374 = vmatprep.subr.bf16.mxu0 %v8195_v13  ;;  %1415 = vmatprep.subr.bf16.mxu1 %v8198_v14 }
 0x47f   :  { %1375 = vmatpush1.bf16.msra.mxu0 %v8203_v15  ;;  %1416 = vmatpush1.bf16.msra.mxu1 %v8205_v16  ;;  %v10714_v16 = vld [vmem:[#allocation38_spill] sm:$0xff] }
 0x480   :  { %1482 = vmatprep.subr.bf16.mxu0 %v8520_v40  ;;  %1523 = vmatprep.subr.bf16.mxu1 %v8523_v41 }
 0x522   :  { %v1272_v2 = vpop.f32.mrf.mxu0  ;;  %v1313_v4 = vpop.f32.mrf.mxu1 }
 0x523   :  { %v1320_v8 = vadd.f32 %v1272_v2, %v10712_v7  ;;  %v1322_v32 = vadd.f32 %v1313_v4, %v10715_v21  ;;  %v10716_v21 = vld [vmem:[#allocation39_spill] sm:$0xff] }
 0x524   :  { %v1274_v9 = vpop.f32.mrf.mxu0  ;;  %v1315_v10 = vpop.f32.mrf.mxu1 }
 0x525   :  { %v6551_v60 = vmul.f32 -1.442695, %v1320_v8  ;;  %v1321_v61 = vadd.f32 %v1274_v9, %v10713_v12  ;;  %v1323_v31 = vadd.f32 %v1315_v10, %v10714_v16  ;;  %v8667_v10 = vld [vmem:[#allocation12 + $0x48] ss:$16 sps:$4 sm:$0xff]   ;;  %v8673_v12 = vld [vmem:[#allocation12 + $0x2c] ss:$16 sps:$4 sm:$0xff]  }
 0x526   :  { %v1276_v13 = vpop.f32.mrf.mxu0  ;;  %v1317_v63 = vpop.f32.mrf.mxu1 }
 0x527   :  { %7155 = vpow2.f32 %v6551_v60  ;;  %v6552_v14 = vmul.f32 -1.442695, %v1321_v61  ;;  %v6553_v11 = vmul.f32 -1.442695, %v1323_v31  ;;  %v8670_v60 = vld [vmem:[#allocation12 + $0x24] ss:$16 sps:$4 sm:$0xff]  }
 0x528   :  { %v1277_v15 = vpop.f32.mrf.mxu0  ;;  %v1318_v1 = vpop.f32.mrf.mxu1  ;;  %v8676_v61 = vld [vmem:[#allocation12 + $0x20] ss:$16 sps:$4 sm:$0xff]   ;;  %v8679_v13 = vld [vmem:[#allocation12 + $0x28] ss:$16 sps:$4 sm:$0xff]   ;;  %v8682_v63 = vld [vmem:[#allocation12 + $0x4] ss:$16 sps:$4 sm:$0xff]  }
 0x529   :  { %7157 = vpow2.f32 %v6552_v14  ;;  %v8685_v14 = vld [vmem:[#allocation12 + $0xc] ss:$16 sps:$4 sm:$0xff]   ;;  %v8688_v15 = vld [vmem:[#allocation12] ss:$16 sps:$4 sm:$0xff]   ;;  %v8691_v1 = vld [vmem:[#allocation12 + $0x8] ss:$16 sps:$4 sm:$0xff]  }
 0x52a   :  { %7159 = vtanh.f32 %v1322_v32 }
 0x52b   :  { %7161 = vpow2.f32 %v6553_v11 }
 0x534   :  { %v7156_v34 = vpop.eup %7155 }
 0x535   :  { %v1327_v37 = vadd.f32 1.0, %v7156_v34 }
 0x536   :  { %v7158_v47 = vpop.eup %7157 }
 0x537   :  { %7163 = vrcp.f32 %v1327_v37  ;;  %v1333_v38 = vadd.f32 1.0, %v7158_v47  ;;  %v7160_v25 = vpop.eup %7159  ;;  %v10717_v47 = vld [vmem:[#allocation41_spill] sm:$0xff] }
 0x538   :  { %v7162_v35 = vpop.eup %7161 }
 0x539   :  { %7165 = vrcp.f32 %v1333_v38  ;;  %v1340_v6 = vadd.f32 1.0, %v7162_v35 }
 0x53b   :  { %7167 = vrcp.f32 %v1340_v6  ;;  %v10718_v6 = vld [vmem:[#allocation42_spill] sm:$0xff] }
 0x544   :  { %v7164_v27 = vpop.eup %7163 }
 0x545   :  { %v1344_v56 = vmul.f32 %v7164_v27, %v7160_v25 }
 0x546   :  { %v7166_v50 = vpop.eup %7165 }
 0x547   :  { %v1343_v57 = vmul.f32 %v7166_v50, %v8535_v62 }
 0x548   :  { %v7168_v2 = vpop.eup %7167 }
 0x549   :  { %v1345_v5 = vadd.f32 %v1344_v56, %v1343_v57  ;;  %v10719_v57 = vld [vmem:[#allocation40_spill] sm:$0xff] }
 0x54b   :  { %7169 = vtanh.f32 %v1345_v5  ;;  %v8628_v20 = vsel %vm1348_vm5, %v1345_v5, %v8535_v62  ;;  %v8661_v62 = vld [vmem:[#allocation12 + $0x4c] ss:$16 sps:$4 sm:$0xff]  }
 0x558   :  { %v7170_v4 = vpop.eup %7169 }
 0x559   :  { %v8630_v7 = vmul.f32 %v7170_v4, %v7168_v2 }
 0x55b   :  { %v8636_v8 = vsel %vm1348_vm5, %v8630_v7, %v8543_v30  ;;  %v8664_v30 = vld [vmem:[#allocation12 + $0x40] ss:$16 sps:$4 sm:$0xff]  }
 0x55c   :  { %v1359_v9 = vpack.c.bf16 %v8636_v8, %v8636_v8 }
 0x55e   :  { %1393 = vmatmul.mubr.bf16.vlgmr.msra.gmra.mxu0 %v1359_v9  ;;  %1434 = vmatmul.mubr.bf16.vlgmr.msra.gmra.mxu1 %v1359_v9 }
 0x55f   :  { %1483 = vmatpush1.bf16.msra.mxu0 %v8547_v17  ;;  %1524 = vmatpush1.bf16.msra.mxu1 %v8550_v29 }
 0x560   :  { %1484 = vmatprep.subr.bf16.mxu0 %v8553_v24  ;;  %1525 = vmatprep.subr.bf16.mxu1 %v8556_v33 }
 0x561   :  { %1514 = vmatprep.mubr.bf16.mxu0 %v10706_v18  ;;  %1555 = vmatprep.mubr.bf16.mxu1 %v10706_v18 }
 0x563   :  { %1485 = vmatpush1.bf16.msra.mxu0 %v8561_v39  ;;  %1526 = vmatpush1.bf16.msra.mxu1 %v8564_v23 }
 0x564   :  { %1486 = vmatprep.subr.bf16.mxu0 %v8567_v42  ;;  %1527 = vmatprep.subr.bf16.mxu1 %v8570_v43 }
 0x567   :  { %1487 = vmatpush1.bf16.msra.mxu0 %v8573_v44  ;;  %1528 = vmatpush1.bf16.msra.mxu1 %v8576_v45 }
 0x568   :  { %1488 = vmatprep.subr.bf16.mxu0 %v8579_v48  ;;  %1529 = vmatprep.subr.bf16.mxu1 %v8582_v49 }
 0x56b   :  { %1489 = vmatpush1.bf16.msra.mxu0 %v8585_v51  ;;  %1530 = vmatpush1.bf16.msra.mxu1 %v8588_v52 }
 0x56c   :  { %1490 = vmatprep.subr.bf16.mxu0 %v8591_v53  ;;  %1531 = vmatprep.subr.bf16.mxu1 %v8594_v54 }
 0x56f   :  { %1491 = vmatpush1.bf16.msra.mxu0 %v8597_v55  ;;  %1532 = vmatpush1.bf16.msra.mxu1 %v8600_v58 }
 0x570   :  { %1492 = vmatprep.subr.bf16.mxu0 %v8603_v59  ;;  %1533 = vmatprep.subr.bf16.mxu1 %v8661_v62 }
 0x573   :  { %1493 = vmatpush1.bf16.msra.mxu0 %v8664_v30  ;;  %1534 = vmatpush1.bf16.msra.mxu1 %v8667_v10 }
 0x574   :  { %1494 = vmatprep.subr.bf16.mxu0 %v8670_v60  ;;  %1535 = vmatprep.subr.bf16.mxu1 %v8673_v12 }
 0x577   :  { %1495 = vmatpush1.bf16.msra.mxu0 %v8676_v61  ;;  %1536 = vmatpush1.bf16.msra.mxu1 %v8679_v13 }
 0x578   :  { %1496 = vmatprep.subr.bf16.mxu0 %v8682_v63  ;;  %1537 = vmatprep.subr.bf16.mxu1 %v8685_v14 }
 0x57b   :  { %1497 = vmatpush1.bf16.msra.mxu0 %v8688_v15  ;;  %1538 = vmatpush1.bf16.msra.mxu1 %v8691_v1 }
 0x57c   :  { %1604 = vmatprep.subr.bf16.mxu0 %v8520_v40  ;;  %1645 = vmatprep.subr.bf16.mxu1 %v8523_v41 }
 0x61e   :  { %v1394_v16 = vpop.f32.mrf.mxu0  ;;  %v1435_v31 = vpop.f32.mrf.mxu1 }
 0x61f   :  { %v1442_v32 = vadd.f32 %v1394_v16, %v10716_v21  ;;  %v1444_v41 = vadd.f32 %v1435_v31, %v10719_v57 }
 0x620   :  { %v1396_v11 = vpop.f32.mrf.mxu0  ;;  %v1437_v34 = vpop.f32.mrf.mxu1 }
 0x621   :  { %v6554_v37 = vmul.f32 -1.442695, %v1442_v32  ;;  %v1443_v38 = vadd.f32 %v1396_v11, %v10717_v47  ;;  %v1445_v40 = vadd.f32 %v1437_v34, %v10718_v6 }
 0x622   :  { %v1398_v25 = vpop.f32.mrf.mxu0  ;;  %v1439_v35 = vpop.f32.mrf.mxu1 }
 0x623   :  { %7171 = vpow2.f32 %v6554_v37  ;;  %v6555_v27 = vmul.f32 -1.442695, %v1443_v38  ;;  %v6556_v5 = vmul.f32 -1.442695, %v1445_v40 }
 0x624   :  { %v1399_v56 = vpop.f32.mrf.mxu0  ;;  %v1440_v50 = vpop.f32.mrf.mxu1 }
 0x625   :  { %7173 = vpow2.f32 %v6555_v27 }
 0x626   :  { %7175 = vtanh.f32 %v1444_v41 }
 0x627   :  { %7177 = vpow2.f32 %v6556_v5 }
 0x630   :  { %v7172_v2 = vpop.eup %7171 }
 0x631   :  { %v1449_v4 = vadd.f32 1.0, %v7172_v2 }
 0x632   :  { %v7174_v9 = vpop.eup %7173 }
 0x633   :  { %7179 = vrcp.f32 %v1449_v4  ;;  %v1455_v16 = vadd.f32 1.0, %v7174_v9  ;;  %v7176_v21 = vpop.eup %7175  ;;  %v6995_v4 = vld [vmem:[#allocation10 + $0x1e0] ss:$16 sps:$4 sm:$0xff]   ;;  %v6998_v9 = vld [vmem:[#allocation10 + $0x1e8] ss:$16 sps:$4 sm:$0xff]  }
 0x634   :  { %v7178_v32 = vpop.eup %7177 }
 0x635   :  { %7181 = vrcp.f32 %v1455_v16  ;;  %v1462_v38 = vadd.f32 1.0, %v7178_v32  ;;  %v7003_v32 = vld [vmem:[#allocation10 + $0x1c4] ss:$16 sps:$4 sm:$0xff]  }
 0x637   :  { %7183 = vrcp.f32 %v1462_v38  ;;  %v7009_v38 = vld [vmem:[#allocation10 + $0x1a4] ss:$16 sps:$4 sm:$0xff]  }
 0x640   :  { %v7180_v11 = vpop.eup %7179 }
 0x641   :  { %v1466_v37 = vmul.f32 %v7180_v11, %v7176_v21  ;;  %v7006_v11 = vld [vmem:[#allocation10 + $0x1cc] ss:$16 sps:$4 sm:$0xff]  }
 0x642   :  { %v7182_v47 = vpop.eup %7181 }
 0x643   :  { %v1465_v25 = vmul.f32 %v7182_v47, %v8628_v20  ;;  %v7004_v47 = vld [vmem:[#allocation10 + $0x1c8] ss:$16 sps:$4 sm:$0xff]  }
 0x644   :  { %v7184_v35 = vpop.eup %7183 }
 0x645   :  { %v1467_v31 = vadd.f32 %v1466_v37, %v1465_v25  ;;  %v7001_v37 = vld [vmem:[#allocation10 + $0x1c0] ss:$16 sps:$4 sm:$0xff]   ;;  %v7012_v25 = vld [vmem:[#allocation10 + $0x1ac] ss:$16 sps:$4 sm:$0xff]  }
 0x647   :  { %7185 = vtanh.f32 %v1467_v31  ;;  %v8705_v34 = vsel %vm1470_vm6, %v1467_v31, %v8628_v20  ;;  %v7007_v31 = vld [vmem:[#allocation10 + $0x1a0] ss:$16 sps:$4 sm:$0xff]  }
 0x654   :  { %v7186_v27 = vpop.eup %7185 }
 0x655   :  { %v8707_v56 = vmul.f32 %v7186_v27, %v7184_v35  ;;  %v7015_v35 = vld [vmem:[#allocation10 + $0x184] ss:$16 sps:$4 sm:$0xff]   ;;  %v7018_v27 = vld [vmem:[#allocation10 + $0x18c] ss:$16 sps:$4 sm:$0xff]  }
 0x657   :  { %v8713_v50 = vsel %vm1470_vm6, %v8707_v56, %v8636_v8 }
 0x658   :  { %v1481_v6 = vpack.c.bf16 %v8713_v50, %v8713_v50 }
 0x65a   :  { %1515 = vmatmul.mubr.bf16.vlgmr.msra.gmra.mxu0 %v1481_v6  ;;  %1556 = vmatmul.mubr.bf16.vlgmr.msra.gmra.mxu1 %v1481_v6  ;;  %v7016_v6 = vld [vmem:[#allocation10 + $0x188] ss:$16 sps:$4 sm:$0xff]  }
 0x65b   :  { %1605 = vmatpush1.bf16.msra.mxu0 %v8547_v17  ;;  %1646 = vmatpush1.bf16.msra.mxu1 %v8550_v29  ;;  %v6997_v17 = vld [vmem:[#allocation10 + $0x1e4] ss:$16 sps:$4 sm:$0xff]   ;;  %v7000_v29 = vld [vmem:[#allocation10 + $0x1ec] ss:$16 sps:$4 sm:$0xff]  }
 0x65c   :  { %1606 = vmatprep.subr.bf16.mxu0 %v8553_v24  ;;  %1647 = vmatprep.subr.bf16.mxu1 %v8556_v33 }
 0x65d   :  { %1636 = vmatprep.mubr.bf16.mxu0 %v10706_v18  ;;  %1677 = vmatprep.mubr.bf16.mxu1 %v10706_v18 }
 0x65f   :  { %1607 = vmatpush1.bf16.msra.mxu0 %v8561_v39  ;;  %1648 = vmatpush1.bf16.msra.mxu1 %v8564_v23  ;;  %v10720_v39 = vld [vmem:[#allocation43_spill] sm:$0xff] }
 0x660   :  { %1608 = vmatprep.subr.bf16.mxu0 %v8567_v42  ;;  %1649 = vmatprep.subr.bf16.mxu1 %v8570_v43 }
 0x663   :  { %1609 = vmatpush1.bf16.msra.mxu0 %v8573_v44  ;;  %1650 = vmatpush1.bf16.msra.mxu1 %v8576_v45  ;;  %v10721_v45 = vld [vmem:[#allocation45_spill] sm:$0xff] }
 0x664   :  { %1610 = vmatprep.subr.bf16.mxu0 %v8579_v48  ;;  %1651 = vmatprep.subr.bf16.mxu1 %v8582_v49 }
 0x667   :  { %1611 = vmatpush1.bf16.msra.mxu0 %v8585_v51  ;;  %1652 = vmatpush1.bf16.msra.mxu1 %v8588_v52 }
 0x668   :  { %1612 = vmatprep.subr.bf16.mxu0 %v8591_v53  ;;  %1653 = vmatprep.subr.bf16.mxu1 %v8594_v54 }
 0x66b   :  { %1613 = vmatpush1.bf16.msra.mxu0 %v8597_v55  ;;  %1654 = vmatpush1.bf16.msra.mxu1 %v8600_v58  ;;  %v10722_v55 = vld [vmem:[#allocation46_spill] sm:$0xff] }
 0x66c   :  { %1614 = vmatprep.subr.bf16.mxu0 %v8603_v59  ;;  %1655 = vmatprep.subr.bf16.mxu1 %v8661_v62  ;;  %v10723_v59 = vld [vmem:[#allocation44_spill] sm:$0xff] }
 0x66f   :  { %1615 = vmatpush1.bf16.msra.mxu0 %v8664_v30  ;;  %1656 = vmatpush1.bf16.msra.mxu1 %v8667_v10 }
 0x670   :  { %1616 = vmatprep.subr.bf16.mxu0 %v8670_v60  ;;  %1657 = vmatprep.subr.bf16.mxu1 %v8673_v12 }
 0x673   :  { %1617 = vmatpush1.bf16.msra.mxu0 %v8676_v61  ;;  %1658 = vmatpush1.bf16.msra.mxu1 %v8679_v13 }
 0x674   :  { %1618 = vmatprep.subr.bf16.mxu0 %v8682_v63  ;;  %1659 = vmatprep.subr.bf16.mxu1 %v8685_v14 }
 0x677   :  { %1619 = vmatpush1.bf16.msra.mxu0 %v8688_v15  ;;  %1660 = vmatpush1.bf16.msra.mxu1 %v8691_v1 }
 0x678   :  { %1958 = vmatprep.subr.bf16.mxu0 %v6997_v17  ;;  %2031 = vmatprep.subr.bf16.mxu1 %v7000_v29  ;;  %v7021_v17 = vld [vmem:[#allocation10 + $0x164] ss:$16 sps:$4 sm:$0xff]   ;;  %v7024_v29 = vld [vmem:[#allocation10 + $0x16c] ss:$16 sps:$4 sm:$0xff]  }
 0x71a   :  { %v1516_v24 = vpop.f32.mrf.mxu0  ;;  %v1557_v33 = vpop.f32.mrf.mxu1 }
 0x71b   :  { %v1564_v23 = vadd.f32 %v1516_v24, %v10720_v39  ;;  %v1566_v20 = vadd.f32 %v1557_v33, %v10723_v59  ;;  %v7019_v24 = vld [vmem:[#allocation10 + $0x160] ss:$16 sps:$4 sm:$0xff]   ;;  %v7022_v33 = vld [vmem:[#allocation10 + $0x168] ss:$16 sps:$4 sm:$0xff]   ;;  %v7027_v39 = vld [vmem:[#allocation10 + $0x144] ss:$16 sps:$4 sm:$0xff]  }
 0x71c   :  { %v1518_v42 = vpop.f32.mrf.mxu0  ;;  %v1559_v43 = vpop.f32.mrf.mxu1  ;;  %v10727_v59 = vmov 0 }
 0x71d   :  { %v6557_v44 = vmul.f32 -1.442695, %v1564_v23  ;;  %v1565_v48 = vadd.f32 %v1518_v42, %v10721_v45  ;;  %v1567_v58 = vadd.f32 %v1559_v43, %v10722_v55  ;;  %v7030_v23 = vld [vmem:[#allocation10 + $0x14c] ss:$16 sps:$4 sm:$0xff]   ;;  %v7025_v42 = vld [vmem:[#allocation10 + $0x140] ss:$16 sps:$4 sm:$0xff]  }
 0x71e   :  { %v1520_v49 = vpop.f32.mrf.mxu0  ;;  %v1561_v51 = vpop.f32.mrf.mxu1  ;;  %v7028_v43 = vld [vmem:[#allocation10 + $0x148] ss:$16 sps:$4 sm:$0xff]   ;;  %v7036_v45 = vld [vmem:[#allocation10 + $0x12c] ss:$16 sps:$4 sm:$0xff]   ;;  %v10724_v55 = vmov 0  ;;  %v10728_v59 = vsel %vm8788_vm9, 4294967295, %v10727_v59 }
 0x71f   :  { %7187 = vpow2.f32 %v6557_v44  ;;  %v6558_v52 = vmul.f32 -1.442695, %v1565_v48  ;;  %v6559_v8 = vmul.f32 -1.442695, %v1567_v58  ;;  %v7033_v44 = vld [vmem:[#allocation10 + $0x124] ss:$16 sps:$4 sm:$0xff]   ;;  %v6845_v58 = vpack.c.bf16 %v8421_v46, %v8360_v26 }
 0x720   :  { %v1521_v53 = vpop.f32.mrf.mxu0  ;;  %v1562_v54 = vpop.f32.mrf.mxu1  ;;  %v7031_v48 = vld [vmem:[#allocation10 + $0x120] ss:$16 sps:$4 sm:$0xff]   ;;  %v7034_v49 = vld [vmem:[#allocation10 + $0x128] ss:$16 sps:$4 sm:$0xff]   ;;  %v7039_v51 = vld [vmem:[#allocation10 + $0x104] ss:$16 sps:$4 sm:$0xff]   ;;  %v6848_v26 = vpack.c.bf16 %v8537_v3, %v8478_v28  ;;  %v6851_v28 = vpack.c.bf16 %v8707_v56, %v8630_v7 }
 0x721   :  { %7189 = vpow2.f32 %v6558_v52  ;;  %v7042_v52 = vld [vmem:[#allocation10 + $0x10c] ss:$16 sps:$4 sm:$0xff]   ;;  %v7037_v53 = vld [vmem:[#allocation10 + $0x100] ss:$16 sps:$4 sm:$0xff]   ;;  %v7040_v54 = vld [vmem:[#allocation10 + $0x108] ss:$16 sps:$4 sm:$0xff]  }
 0x722   :  { %7191 = vtanh.f32 %v1566_v20  ;;  %v10725_v55 = vsel %vm8772_vm8, 4294967295, %v10724_v55  ;;  %10729 = vst [vmem:[#allocation31_spill] sm:$0xff] %v10728_v59  ;;  %v10730_v46 = vmov 0  ;;  %v8816_v3 = vld [vmem:[#allocation12 + $0x1e4] ss:$16 sps:$4 sm:$0xff]  }
 0x723   :  { %7193 = vpow2.f32 %v6559_v8  ;;  %10726 = vst [vmem:[#allocation30_spill] sm:$0xff] %v10725_v55  ;;  %v10731_v46 = vsel %vm8804_vm10, 4294967295, %v10730_v46  ;;  %v8818_v20 = vld [vmem:[#allocation12 + $0x1ec] ss:$16 sps:$4 sm:$0xff]   ;;  %v8820_v8 = vld [vmem:[#allocation12 + $0x1e0] ss:$16 sps:$4 sm:$0xff]  }
 0x724   :  { %10732 = vst [vmem:[#allocation33_spill] sm:$0xff] %v10731_v46  ;;  %v8828_v7 = vld [vmem:[#allocation12 + $0x1c4] ss:$16 sps:$4 sm:$0xff]   ;;  %v8830_v56 = vld [vmem:[#allocation12 + $0x1cc] ss:$16 sps:$4 sm:$0xff]  }
 0x72c   :  { %v7188_v62 = vpop.eup %7187 }
 0x72d   :  { %v1571_v30 = vadd.f32 1.0, %v7188_v62  ;;  %v8822_v62 = vld [vmem:[#allocation12 + $0x1e8] ss:$16 sps:$4 sm:$0xff]  }
 0x72e   :  { %v7190_v10 = vpop.eup %7189 }
 0x72f   :  { %7195 = vrcp.f32 %v1571_v30  ;;  %v1577_v60 = vadd.f32 1.0, %v7190_v10  ;;  %v7192_v12 = vpop.eup %7191  ;;  %v8832_v30 = vld [vmem:[#allocation12 + $0x1c0] ss:$16 sps:$4 sm:$0xff]   ;;  %v8834_v10 = vld [vmem:[#allocation12 + $0x1c8] ss:$16 sps:$4 sm:$0xff]  }
 0x730   :  { %v7194_v61 = vpop.eup %7193 }
 0x731   :  { %7197 = vrcp.f32 %v1577_v60  ;;  %v1584_v15 = vadd.f32 1.0, %v7194_v61  ;;  %v8840_v60 = vld [vmem:[#allocation12 + $0x1a4] ss:$16 sps:$4 sm:$0xff]   ;;  %v8844_v61 = vld [vmem:[#allocation12 + $0x1a0] ss:$16 sps:$4 sm:$0xff]  }
 0x733   :  { %7199 = vrcp.f32 %v1584_v15  ;;  %v8856_v15 = vld [vmem:[#allocation12 + $0x180] ss:$16 sps:$4 sm:$0xff]  }
 0x73c   :  { %v7196_v13 = vpop.eup %7195 }
 0x73d   :  { %v1588_v63 = vmul.f32 %v7196_v13, %v7192_v12  ;;  %v8842_v12 = vld [vmem:[#allocation12 + $0x1ac] ss:$16 sps:$4 sm:$0xff]   ;;  %v8846_v13 = vld [vmem:[#allocation12 + $0x1a8] ss:$16 sps:$4 sm:$0xff]  }
 0x73e   :  { %v7198_v14 = vpop.eup %7197 }
 0x73f   :  { %v1587_v1 = vmul.f32 %v7198_v14, %v8705_v34  ;;  %v8854_v14 = vld [vmem:[#allocation12 + $0x18c] ss:$16 sps:$4 sm:$0xff]  }
 0x740   :  { %v7200_v41 = vpop.eup %7199 }
 0x741   :  { %v1589_v40 = vadd.f32 %v1588_v63, %v1587_v1  ;;  %v8852_v63 = vld [vmem:[#allocation12 + $0x184] ss:$16 sps:$4 sm:$0xff]   ;;  %v8858_v1 = vld [vmem:[#allocation12 + $0x188] ss:$16 sps:$4 sm:$0xff]  }
 0x743   :  { %7201 = vtanh.f32 %v1589_v40  ;;  %v8758_v57 = vsel %vm1592_vm7, %v1589_v40, %v8705_v34  ;;  %v7010_v34 = vld [vmem:[#allocation10 + $0x1a8] ss:$16 sps:$4 sm:$0xff]   ;;  %v8864_v40 = vld [vmem:[#allocation12 + $0x164] ss:$16 sps:$4 sm:$0xff]  }
 0x750   :  { %v7202_v5 = vpop.eup %7201 }
 0x751   :  { %v8760_v2 = vmul.f32 %v7202_v5, %v7200_v41  ;;  %v8866_v41 = vld [vmem:[#allocation12 + $0x16c] ss:$16 sps:$4 sm:$0xff]   ;;  %v8868_v5 = vld [vmem:[#allocation12 + $0x160] ss:$16 sps:$4 sm:$0xff]  }
 0x753   :  { %v1594_v16 = vsel %vm1592_vm7, %v8760_v2, %v8713_v50  ;;  %v7013_v50 = vld [vmem:[#allocation10 + $0x180] ss:$16 sps:$4 sm:$0xff]  }
 0x754   :  { %v1603_v21 = vpack.c.bf16 %v1594_v16, %v1594_v16  ;;  %v8878_v16 = vld [vmem:[#allocation12 + $0x14c] ss:$16 sps:$4 sm:$0xff]  }
 0x756   :  { %1637 = vmatmul.mubr.bf16.vlgmr.msra.gmra.mxu0 %v1603_v21  ;;  %1678 = vmatmul.mubr.bf16.vlgmr.msra.gmra.mxu1 %v1603_v21  ;;  %v8880_v21 = vld [vmem:[#allocation12 + $0x140] ss:$16 sps:$4 sm:$0xff]  }
 0x757   :  { %1959 = vmatpush1.bf16.msra.mxu0 %v6995_v4  ;;  %2032 = vmatpush1.bf16.msra.mxu1 %v6998_v9  ;;  %v8870_v4 = vld [vmem:[#allocation12 + $0x168] ss:$16 sps:$4 sm:$0xff]   ;;  %v8876_v9 = vld [vmem:[#allocation12 + $0x144] ss:$16 sps:$4 sm:$0xff]  }
 0x758   :  { %1960 = vmatprep.subr.bf16.mxu0 %v7003_v32  ;;  %2033 = vmatprep.subr.bf16.mxu1 %v7006_v11  ;;  %v8882_v32 = vld [vmem:[#allocation12 + $0x148] ss:$16 sps:$4 sm:$0xff]   ;;  %v8888_v11 = vld [vmem:[#allocation12 + $0x124] ss:$16 sps:$4 sm:$0xff]  }
 0x759   :  { %1990 = vmatprep.mubr.bf16.mxu0 %v10706_v18  ;;  %2063 = vmatprep.mubr.bf16.mxu1 %v10706_v18 }
 0x75b   :  { %1961 = vmatpush1.bf16.msra.mxu0 %v7001_v37  ;;  %2034 = vmatpush1.bf16.msra.mxu1 %v7004_v47  ;;  %v8890_v37 = vld [vmem:[#allocation12 + $0x12c] ss:$16 sps:$4 sm:$0xff]   ;;  %v8892_v47 = vld [vmem:[#allocation12 + $0x120] ss:$16 sps:$4 sm:$0xff]  }
 0x75c   :  { %1962 = vmatprep.subr.bf16.mxu0 %v7009_v38  ;;  %2035 = vmatprep.subr.bf16.mxu1 %v7012_v25  ;;  %v8894_v38 = vld [vmem:[#allocation12 + $0x128] ss:$16 sps:$4 sm:$0xff]   ;;  %v8896_v25 = vld [vmem:[#allocation12 + $0x104] ss:$16 sps:$4 sm:$0xff]  }
 0x75f   :  { %1963 = vmatpush1.bf16.msra.mxu0 %v7007_v31  ;;  %2036 = vmatpush1.bf16.msra.mxu1 %v7010_v34  ;;  %v8900_v31 = vld [vmem:[#allocation12 + $0x10c] ss:$16 sps:$4 sm:$0xff]   ;;  %v8904_v34 = vld [vmem:[#allocation12 + $0x100] ss:$16 sps:$4 sm:$0xff]  }
 0x760   :  { %1964 = vmatprep.subr.bf16.mxu0 %v7015_v35  ;;  %2037 = vmatprep.subr.bf16.mxu1 %v7018_v27  ;;  %v8906_v35 = vld [vmem:[#allocation12 + $0x108] ss:$16 sps:$4 sm:$0xff]  }
 0x763   :  { %1965 = vmatpush1.bf16.msra.mxu0 %v7013_v50  ;;  %2038 = vmatpush1.bf16.msra.mxu1 %v7016_v6  ;;  %v10733_v6 = vld [vmem:[#allocation47_spill] sm:$0xff] }
 0x764   :  { %1966 = vmatprep.subr.bf16.mxu0 %v7021_v17  ;;  %2039 = vmatprep.subr.bf16.mxu1 %v7024_v29 }
 0x767   :  { %1967 = vmatpush1.bf16.msra.mxu0 %v7019_v24  ;;  %2040 = vmatpush1.bf16.msra.mxu1 %v7022_v33 }
 0x768   :  { %1968 = vmatprep.subr.bf16.mxu0 %v7027_v39  ;;  %2041 = vmatprep.subr.bf16.mxu1 %v7030_v23 }
 0x76b   :  { %1969 = vmatpush1.bf16.msra.mxu0 %v7025_v42  ;;  %2042 = vmatpush1.bf16.msra.mxu1 %v7028_v43 }
 0x76c   :  { %1970 = vmatprep.subr.bf16.mxu0 %v7033_v44  ;;  %2043 = vmatprep.subr.bf16.mxu1 %v7036_v45 }
 0x76f   :  { %1971 = vmatpush1.bf16.msra.mxu0 %v7031_v48  ;;  %2044 = vmatpush1.bf16.msra.mxu1 %v7034_v49  ;;  %v10734_v49 = vld [vmem:[#allocation48_spill] sm:$0xff] }
 0x770   :  { %1972 = vmatprep.subr.bf16.mxu0 %v7039_v51  ;;  %2045 = vmatprep.subr.bf16.mxu1 %v7042_v52 }
 0x773   :  { %1973 = vmatpush1.bf16.msra.mxu0 %v7037_v53  ;;  %2046 = vmatpush1.bf16.msra.mxu1 %v7040_v54 }
 0x774   :  { %2353 = vmatprep.subr.bf16.mxu0 %v8816_v3  ;;  %2394 = vmatprep.subr.bf16.mxu1 %v8818_v20 }
 0x776   :  { %6846 = vmatmul.mubr.msk.bf16.vlgmr.msra.gmra.mxu0 %vm8772_vm8, %v6845_v58  ;;  %6858 = vmatmul.mubr.msk.bf16.vlgmr.msra.gmra.mxu1 %vm8772_vm8, %v6845_v58 }
 0x777   :  { %2000 = vmatprep.mubr.bf16.mxu0 %v10706_v18  ;;  %2073 = vmatprep.mubr.bf16.mxu1 %v10706_v18 }
 0x778   :  { %2354 = vmatpush1.bf16.msra.mxu0 %v8820_v8  ;;  %2395 = vmatpush1.bf16.msra.mxu1 %v8822_v62 }
 0x779   :  { %2355 = vmatprep.subr.bf16.mxu0 %v8828_v7  ;;  %2396 = vmatprep.subr.bf16.mxu1 %v8830_v56 }
 0x77c   :  { %2356 = vmatpush1.bf16.msra.mxu0 %v8832_v30  ;;  %2397 = vmatpush1.bf16.msra.mxu1 %v8834_v10 }
 0x77d   :  { %2357 = vmatprep.subr.bf16.mxu0 %v8840_v60  ;;  %2398 = vmatprep.subr.bf16.mxu1 %v8842_v12 }
 0x77e   :  { %6849 = vmatmul.mubr.msk.bf16.gmra.mxu0 %vm8788_vm9, %v6848_v26  ;;  %6861 = vmatmul.mubr.msk.bf16.gmra.mxu1 %vm8788_vm9, %v6848_v26 }
 0x77f   :  { %2010 = vmatprep.mubr.bf16.mxu0 %v10706_v18  ;;  %2083 = vmatprep.mubr.bf16.mxu1 %v10706_v18 }
 0x780   :  { %2358 = vmatpush1.bf16.msra.mxu0 %v8844_v61  ;;  %2399 = vmatpush1.bf16.msra.mxu1 %v8846_v13 }
 0x781   :  { %2359 = vmatprep.subr.bf16.mxu0 %v8852_v63  ;;  %2400 = vmatprep.subr.bf16.mxu1 %v8854_v14 }
 0x784   :  { %2360 = vmatpush1.bf16.msra.mxu0 %v8856_v15  ;;  %2401 = vmatpush1.bf16.msra.mxu1 %v8858_v1 }
 0x785   :  { %2361 = vmatprep.subr.bf16.mxu0 %v8864_v40  ;;  %2402 = vmatprep.subr.bf16.mxu1 %v8866_v41 }
 0x786   :  { %6852 = vmatmul.mubr.msk.bf16.gmra.mxu0 %vm8804_vm10, %v6851_v28  ;;  %6864 = vmatmul.mubr.msk.bf16.gmra.mxu1 %vm8804_vm10, %v6851_v28 }
 0x787   :  { %2020 = vmatprep.mubr.bf16.mxu0 %v10706_v18  ;;  %2093 = vmatprep.mubr.bf16.mxu1 %v10706_v18 }
 0x788   :  { %2362 = vmatpush1.bf16.msra.mxu0 %v8868_v5  ;;  %2403 = vmatpush1.bf16.msra.mxu1 %v8870_v4 }
 0x789   :  { %2363 = vmatprep.subr.bf16.mxu0 %v8876_v9  ;;  %2404 = vmatprep.subr.bf16.mxu1 %v8878_v16 }
 0x78c   :  { %2364 = vmatpush1.bf16.msra.mxu0 %v8880_v21  ;;  %2405 = vmatpush1.bf16.msra.mxu1 %v8882_v32 }
 0x78d   :  { %2365 = vmatprep.subr.bf16.mxu0 %v8888_v11  ;;  %2406 = vmatprep.subr.bf16.mxu1 %v8890_v37 }
 0x790   :  { %2366 = vmatpush1.bf16.msra.mxu0 %v8892_v47  ;;  %2407 = vmatpush1.bf16.msra.mxu1 %v8894_v38 }
 0x791   :  { %2367 = vmatprep.subr.bf16.mxu0 %v8896_v25  ;;  %2408 = vmatprep.subr.bf16.mxu1 %v8900_v31 }
 0x794   :  { %2368 = vmatpush1.bf16.msra.mxu0 %v8904_v34  ;;  %2409 = vmatpush1.bf16.msra.mxu1 %v8906_v35 }
 0x795   :  { %2471 = vmatprep.subr.bf16.mxu0 %v8816_v3  ;;  %2512 = vmatprep.subr.bf16.mxu1 %v8818_v20 }
 0x816   :  { %v1638_v27 = vpop.f32.mrf.mxu0  ;;  %v1679_v50 = vpop.f32.mrf.mxu1 }
 0x817   :  { %v1686_v17 = vadd.f32 %v1638_v27, %v10733_v6  ;;  %v1688_v51 = vadd.f32 %v1679_v50, %v10734_v49 }
 0x818   :  { %v1640_v29 = vpop.f32.mrf.mxu0  ;;  %v1681_v24 = vpop.f32.mrf.mxu1 }
 0x819   :  { %v6560_v33 = vmul.f32 -1.442695, %v1686_v17  ;;  %v1687_v39 = vadd.f32 %v1640_v29, %v8346_v19  ;;  %v1689_v48 = vadd.f32 %v1681_v24, %v8349_v36 }
 0x81a   :  { %v1642_v23 = vpop.f32.mrf.mxu0  ;;  %v1683_v42 = vpop.f32.mrf.mxu1 }
 0x81b   :  { %7203 = vpow2.f32 %v6560_v33  ;;  %v6561_v43 = vmul.f32 -1.442695, %v1687_v39  ;;  %v6562_v52 = vmul.f32 -1.442695, %v1689_v48  ;;  %v10735_v23 = vmov 0 }
 0x81c   :  { %v1643_v44 = vpop.f32.mrf.mxu0  ;;  %v1684_v45 = vpop.f32.mrf.mxu1  ;;  %v10736_v23 = vsel %vm8922_vm12, 4294967295, %v10735_v23 }
 0x81d   :  { %7205 = vpow2.f32 %v6561_v43  ;;  %10737 = vst [vmem:[#allocation34_spill] sm:$0xff] %v10736_v23 }
 0x81e   :  { %7207 = vtanh.f32 %v1688_v51 }
 0x81f   :  { %7209 = vpow2.f32 %v6562_v52 }
 0x828   :  { %v7204_v53 = vpop.eup %7203 }
 0x829   :  { %v1693_v54 = vadd.f32 1.0, %v7204_v53 }
 0x82a   :  { %v7206_v58 = vpop.eup %7205 }
 0x82b   :  { %7211 = vrcp.f32 %v1693_v54  ;;  %v1699_v26 = vadd.f32 1.0, %v7206_v58  ;;  %v7208_v19 = vpop.eup %7207 }
 0x82c   :  { %v7210_v28 = vpop.eup %7209 }
 0x82d   :  { %7213 = vrcp.f32 %v1699_v26  ;;  %v1706_v29 = vadd.f32 1.0, %v7210_v28 }
 0x82f   :  { %7215 = vrcp.f32 %v1706_v29 }
 0x838   :  { %v7212_v27 = vpop.eup %7211 }
 0x839   :  { %v1710_v6 = vmul.f32 %v7212_v27, %v7208_v19 }
 0x83a   :  { %v7214_v17 = vpop.eup %7213 }
 0x83b   :  { %v1709_v33 = vmul.f32 %v7214_v17, %v8758_v57  ;;  %v1992_v57 = vpop.f32.mrf.mxu0 }
 0x83c   :  { %v7216_v50 = vpop.eup %7215 }
 0x83d   :  { %v1711_v36 = vadd.f32 %v1710_v6, %v1709_v33  ;;  %v1994_v43 = vpop.f32.mrf.mxu0 }
 0x83f   :  { %7217 = vtanh.f32 %v1711_v36  ;;  %v8969_v45 = vpop.f32.mrf.mxu0 }
 0x841   :  { %v8973_v49 = vpop.f32.mrf.mxu0 }
 0x843   :  { %v8977_v52 = vpop.f32.mrf.mxu0 }
 0x844   :  { %10738 = vst [vmem:[#allocation32_spill] sm:$0xff] %v8977_v52 }
 0x845   :  { %v8981_v54 = vpop.f32.mrf.mxu0 }
 0x846   :  { %10740 = vst [vmem:[#allocation37_spill] sm:$0xff] %v8981_v54  ;;  %v10765_v54 = vld [vmem:[#allocation26_spill] sm:$0xff] }
 0x847   :  { %v8985_v26 = vpop.f32.mrf.mxu0 }
 0x848   :  { %10742 = vst [vmem:[#allocation36_spill] sm:$0xff] %v8985_v26 }
 0x849   :  { %v8989_v28 = vpop.f32.mrf.mxu0 }
 0x84a   :  { %10744 = vst [vmem:[#allocation41_spill] sm:$0xff] %v8989_v28 }
 0x84b   :  { %v8993_v6 = vpop.f32.mrf.mxu0 }
 0x84c   :  { %v7218_v24 = vpop.eup %7217  ;;  %10746 = vst [vmem:[#allocation40_spill] sm:$0xff] %v8993_v6 }
 0x84d   :  { %v1713_v39 = vmul.f32 %v7218_v24, %v7216_v50  ;;  %v8997_v29 = vpop.f32.mrf.mxu0 }
 0x84e   :  { %10748 = vst [vmem:[#allocation45_spill] sm:$0xff] %v8997_v29 }
 0x84f   :  { %v6854_v42 = vpack.c.bf16 %v1713_v39, %v8760_v2  ;;  %v2065_v2 = vpop.f32.mrf.mxu1  ;;  %v9001_v36 = vpop.f32.mrf.mxu0 }
 0x850   :  { %10750 = vst [vmem:[#allocation44_spill] sm:$0xff] %v9001_v36 }
 0x851   :  { %6855 = vmatmul.mubr.msk.bf16.gmra.mxu0 %vm8922_vm12, %v6854_v42  ;;  %6867 = vmatmul.mubr.msk.bf16.gmra.mxu1 %vm8922_vm12, %v6854_v42  ;;  %v2067_v44 = vpop.f32.mrf.mxu1  ;;  %v9005_v24 = vpop.f32.mrf.mxu0  ;;  %v6563_v42 = vld [vmem:[%s10658_s4 + $0x4] sm:$0xf] }
 0x852   :  { %2385 = vmatprep.mubr.bf16.mxu0 %v10706_v18  ;;  %2426 = vmatprep.mubr.bf16.mxu1 %v10706_v18  ;;  %10752 = vst [vmem:[#allocation48_spill] sm:$0xff] %v9005_v24  ;;  %v9041_v52 = vrot.slane %v6563_v42, %v10765_v54 }
 0x853   :  { %v8971_v48 = vpop.f32.mrf.mxu1 }
 0x855   :  { %v8975_v51 = vpop.f32.mrf.mxu1 }
 0x857   :  { %v8979_v53 = vpop.f32.mrf.mxu1 }
 0x858   :  { %10739 = vst [vmem:[#allocation35_spill] sm:$0xff] %v8979_v53  ;;  %v10764_v53 = vld [vmem:[#allocation28_spill] sm:$0xff] }
 0x859   :  { %2386 = vmatmul.mubr.bf16.vlgmr.msra.gmra.mxu0 %v10706_v18  ;;  %2427 = vmatmul.mubr.bf16.vlgmr.msra.gmra.mxu1 %v10706_v18  ;;  %v8983_v58 = vpop.f32.mrf.mxu1 }
 0x85a   :  { %2472 = vmatpush1.bf16.msra.mxu0 %v8820_v8  ;;  %2513 = vmatpush1.bf16.msra.mxu1 %v8822_v62  ;;  %10741 = vst [vmem:[#allocation38_spill] sm:$0xff] %v8983_v58  ;;  %v9037_v58 = vrot.slane %v6563_v42, %v10764_v53 }
 0x85b   :  { %2473 = vmatprep.subr.bf16.mxu0 %v8828_v7  ;;  %2514 = vmatprep.subr.bf16.mxu1 %v8830_v56  ;;  %v8987_v19 = vpop.f32.mrf.mxu1 }
 0x85c   :  { %2503 = vmatprep.mubr.bf16.mxu0 %v10706_v18  ;;  %2544 = vmatprep.mubr.bf16.mxu1 %v10706_v18  ;;  %10743 = vst [vmem:[#allocation39_spill] sm:$0xff] %v8987_v19 }
 0x85d   :  { %v8991_v27 = vpop.f32.mrf.mxu1 }
 0x85e   :  { %2474 = vmatpush1.bf16.msra.mxu0 %v8832_v30  ;;  %2515 = vmatpush1.bf16.msra.mxu1 %v8834_v10  ;;  %10745 = vst [vmem:[#allocation42_spill] sm:$0xff] %v8991_v27 }
 0x85f   :  { %2475 = vmatprep.subr.bf16.mxu0 %v8840_v60  ;;  %2516 = vmatprep.subr.bf16.mxu1 %v8842_v12  ;;  %v8995_v17 = vpop.f32.mrf.mxu1 }
 0x860   :  { %10747 = vst [vmem:[#allocation43_spill] sm:$0xff] %v8995_v17  ;;  %v10758_v17 = vld [vmem:[#allocation27_spill] sm:$0xff] }
 0x861   :  { %v8999_v33 = vpop.f32.mrf.mxu1  ;;  %v9021_v36 = vrot.slane %v6563_v42, %v10758_v17 }
 0x862   :  { %2476 = vmatpush1.bf16.msra.mxu0 %v8844_v61  ;;  %2517 = vmatpush1.bf16.msra.mxu1 %v8846_v13  ;;  %10749 = vst [vmem:[#allocation46_spill] sm:$0xff] %v8999_v33 }
 0x863   :  { %2477 = vmatprep.subr.bf16.mxu0 %v8852_v63  ;;  %2518 = vmatprep.subr.bf16.mxu1 %v8854_v14  ;;  %v9003_v50 = vpop.f32.mrf.mxu1  ;;  %v2129_v22 = vadd.f32 %v9021_v36, %v8969_v45  ;;  %v2132_v45 = vadd.f32 %v9037_v58, %v8975_v51 }
 0x864   :  { %10751 = vst [vmem:[#allocation47_spill] sm:$0xff] %v9003_v50 }
 0x865   :  { %v9007_v39 = vpop.f32.mrf.mxu1 }
 0x866   :  { %2478 = vmatpush1.bf16.msra.mxu0 %v8856_v15  ;;  %2519 = vmatpush1.bf16.msra.mxu1 %v8858_v1  ;;  %10753 = vst [vmem:[#allocation49_spill] sm:$0xff] %v9007_v39  ;;  %v10761_v39 = vld [vmem:[#allocation29_spill] sm:$0xff] }
 0x867   :  { %2479 = vmatprep.subr.bf16.mxu0 %v8864_v40  ;;  %2520 = vmatprep.subr.bf16.mxu1 %v8866_v41  ;;  %v9028_v33 = vrot.slane %v6563_v42, %v10761_v39 }
 0x86a   :  { %2480 = vmatpush1.bf16.msra.mxu0 %v8868_v5  ;;  %2521 = vmatpush1.bf16.msra.mxu1 %v8870_v4 }
 0x86b   :  { %2481 = vmatprep.subr.bf16.mxu0 %v8876_v9  ;;  %2522 = vmatprep.subr.bf16.mxu1 %v8878_v16 }
 0x86e   :  { %2482 = vmatpush1.bf16.msra.mxu0 %v8880_v21  ;;  %2523 = vmatpush1.bf16.msra.mxu1 %v8882_v32 }
 0x86f   :  { %2483 = vmatprep.subr.bf16.mxu0 %v8888_v11  ;;  %2524 = vmatprep.subr.bf16.mxu1 %v8890_v37 }
 0x872   :  { %2484 = vmatpush1.bf16.msra.mxu0 %v8892_v47  ;;  %2525 = vmatpush1.bf16.msra.mxu1 %v8894_v38 }
 0x873   :  { %2485 = vmatprep.subr.bf16.mxu0 %v8896_v25  ;;  %2526 = vmatprep.subr.bf16.mxu1 %v8900_v31 }
 0x876   :  { %2486 = vmatpush1.bf16.msra.mxu0 %v8904_v34  ;;  %2527 = vmatpush1.bf16.msra.mxu1 %v8906_v35 }
 0x877   :  { %2591 = vmatprep.subr.bf16.mxu0 %v8816_v3  ;;  %2632 = vmatprep.subr.bf16.mxu1 %v8818_v20 }
 0x911   :  { %v9012_v23 = vpop.f32.mrf.mxu0  ;;  %v9014_v46 = vpop.f32.mrf.mxu1 }
 0x912   :  { %10754 = vst [vmem:[#allocation50_spill] sm:$0xff] %v9012_v23  ;;  %10755 = vst [vmem:[#allocation51_spill] sm:$0xff] %v9014_v46  ;;  %v2125_v46 = vadd.f32 %v9021_v36, %v1992_v57  ;;  %v2128_v57 = vadd.f32 %v9037_v58, %v2067_v44 }
 0x913   :  { %v9016_v59 = vpop.f32.mrf.mxu0  ;;  %v9018_v55 = vpop.f32.mrf.mxu1 }
 0x914   :  { %10756 = vst [vmem:[#allocation52_spill] sm:$0xff] %v9016_v59  ;;  %10757 = vst [vmem:[#allocation53_spill] sm:$0xff] %v9018_v55  ;;  %v2126_v55 = vadd.f32 %v9028_v33, %v1994_v43 }
 0x915   :  { %v9023_v50 = vpop.f32.mrf.mxu0  ;;  %v9025_v24 = vpop.f32.mrf.mxu1 }
 0x916   :  { %10759 = vst [vmem:[#allocation54_spill] sm:$0xff] %v9023_v50  ;;  %10760 = vst [vmem:[#allocation55_spill] sm:$0xff] %v9025_v24 }
 0x917   :  { %v9030_v29 = vpop.f32.mrf.mxu0  ;;  %v9032_v6 = vpop.f32.mrf.mxu1 }
 0x918   :  { %10762 = vst [vmem:[#allocation56_spill] sm:$0xff] %v9030_v29  ;;  %10763 = vst [vmem:[#allocation57_spill] sm:$0xff] %v9032_v6 }
 0x919   :  { %v2387_v23 = vpop.f32.mrf.mxu0  ;;  %v2428_v59 = vpop.f32.mrf.mxu1 }
 0x91a   :  { %v2435_v19 = vadd.f32 %v2387_v23, %v2125_v46  ;;  %v2127_v23 = vadd.f32 %v9041_v52, %v2065_v2 }
 0x91b   :  { %v2389_v17 = vpop.f32.mrf.mxu0  ;;  %v2430_v27 = vpop.f32.mrf.mxu1 }
 0x91c   :  { %v6628_v28 = vmul.f32 -1.442695, %v2435_v19  ;;  %v2436_v50 = vadd.f32 %v2389_v17, %v2126_v55  ;;  %v2438_v46 = vadd.f32 %v2430_v27, %v2128_v57 }
 0x91d   :  { %v2391_v26 = vpop.f32.mrf.mxu0  ;;  %v2432_v24 = vpop.f32.mrf.mxu1 }
 0x91e   :  { %7219 = vpow2.f32 %v6628_v28  ;;  %v6629_v39 = vmul.f32 -1.442695, %v2436_v50  ;;  %v6630_v43 = vmul.f32 -1.442695, %v2438_v46  ;;  %v2437_v26 = vadd.f32 %v2428_v59, %v2127_v23 }
 0x91f   :  { %v2392_v29 = vpop.f32.mrf.mxu0  ;;  %v2433_v6 = vpop.f32.mrf.mxu1 }
 0x920   :  { %7221 = vpow2.f32 %v6629_v39 }
 0x921   :  { %7223 = vpow2.f32 %v6630_v43 }
 0x92b   :  { %v7220_v55 = vpop.eup %7219 }
 0x92c   :  { %v2442_v19 = vadd.f32 1.0, %v7220_v55  ;;  %v2130_v55 = vadd.f32 %v9028_v33, %v8973_v49 }
 0x92d   :  { %v7222_v28 = vpop.eup %7221 }
 0x92e   :  { %7225 = vrcp.f32 %v2442_v19  ;;  %v2448_v17 = vadd.f32 1.0, %v7222_v28  ;;  %v7224_v6 = vpop.eup %7223 }
 0x92f   :  { %7227 = vtanh.f32 %v2437_v26  ;;  %v2455_v24 = vadd.f32 1.0, %v7224_v6 }
 0x930   :  { %7229 = vrcp.f32 %v2448_v17 }
 0x931   :  { %7231 = vrcp.f32 %v2455_v24 }
 0x93b   :  { %v7226_v29 = vpop.eup %7225 }
 0x93c   :  { %v7228_v50 = vpop.eup %7227 }
 0x93d   :  { %v7230_v44 = vpop.eup %7229  ;;  %v2459_v42 = vmul.f32 %v7228_v50, %v7226_v29 }
 0x93e   :  { %v2458_v39 = vmul.f32 0.0, %v7230_v44  ;;  %v7232_v59 = vpop.eup %7231 }
 0x940   :  { %v9044_v27 = vadd.f32 %v2459_v42, %v2458_v39 }
 0x942   :  { %7233 = vtanh.f32 %v9044_v27  ;;  %v2463_v51 = vsel %vm862_vm0, %v9044_v27, 0.0 }
 0x94f   :  { %v7234_v2 = vpop.eup %7233 }
 0x950   :  { %v9047_v57 = vmul.f32 %v7234_v2, %v7232_v59  ;;  %v2131_v59 = vadd.f32 %v9041_v52, %v8971_v48 }
 0x952   :  { %v6632_v46 = vpack.c.bf16 %v9047_v57, %v9047_v57 }
 0x954   :  { %6633 = vmatmul.mubr.msk.bf16.vlgmr.msra.gmra.mxu0 %vm8365_vm1, %v6632_v46  ;;  %6636 = vmatmul.mubr.msk.bf16.vlgmr.msra.gmra.mxu1 %vm8365_vm1, %v6632_v46 }
 0x955   :  { %2592 = vmatpush1.bf16.msra.mxu0 %v8820_v8  ;;  %2633 = vmatpush1.bf16.msra.mxu1 %v8822_v62 }
 0x956   :  { %2593 = vmatprep.subr.bf16.mxu0 %v8828_v7  ;;  %2634 = vmatprep.subr.bf16.mxu1 %v8830_v56 }
 0x957   :  { %2623 = vmatprep.mubr.bf16.mxu0 %v10706_v18  ;;  %2664 = vmatprep.mubr.bf16.mxu1 %v10706_v18 }
 0x959   :  { %2594 = vmatpush1.bf16.msra.mxu0 %v8832_v30  ;;  %2635 = vmatpush1.bf16.msra.mxu1 %v8834_v10 }
 0x95a   :  { %2595 = vmatprep.subr.bf16.mxu0 %v8840_v60  ;;  %2636 = vmatprep.subr.bf16.mxu1 %v8842_v12 }
 0x95d   :  { %2596 = vmatpush1.bf16.msra.mxu0 %v8844_v61  ;;  %2637 = vmatpush1.bf16.msra.mxu1 %v8846_v13 }
 0x95e   :  { %2597 = vmatprep.subr.bf16.mxu0 %v8852_v63  ;;  %2638 = vmatprep.subr.bf16.mxu1 %v8854_v14 }
 0x961   :  { %2598 = vmatpush1.bf16.msra.mxu0 %v8856_v15  ;;  %2639 = vmatpush1.bf16.msra.mxu1 %v8858_v1 }
 0x962   :  { %2599 = vmatprep.subr.bf16.mxu0 %v8864_v40  ;;  %2640 = vmatprep.subr.bf16.mxu1 %v8866_v41 }
 0x965   :  { %2600 = vmatpush1.bf16.msra.mxu0 %v8868_v5  ;;  %2641 = vmatpush1.bf16.msra.mxu1 %v8870_v4 }
 0x966   :  { %2601 = vmatprep.subr.bf16.mxu0 %v8876_v9  ;;  %2642 = vmatprep.subr.bf16.mxu1 %v8878_v16 }
 0x969   :  { %2602 = vmatpush1.bf16.msra.mxu0 %v8880_v21  ;;  %2643 = vmatpush1.bf16.msra.mxu1 %v8882_v32 }
 0x96a   :  { %2603 = vmatprep.subr.bf16.mxu0 %v8888_v11  ;;  %2644 = vmatprep.subr.bf16.mxu1 %v8890_v37 }
 0x96d   :  { %2604 = vmatpush1.bf16.msra.mxu0 %v8892_v47  ;;  %2645 = vmatpush1.bf16.msra.mxu1 %v8894_v38 }
 0x96e   :  { %2605 = vmatprep.subr.bf16.mxu0 %v8896_v25  ;;  %2646 = vmatprep.subr.bf16.mxu1 %v8900_v31 }
 0x971   :  { %2606 = vmatpush1.bf16.msra.mxu0 %v8904_v34  ;;  %2647 = vmatpush1.bf16.msra.mxu1 %v8906_v35 }
 0x972   :  { %2711 = vmatprep.subr.bf16.mxu0 %v8816_v3  ;;  %2752 = vmatprep.subr.bf16.mxu1 %v8818_v20 }
 0xa14   :  { %v2505_v23 = vpop.f32.mrf.mxu0  ;;  %v2546_v43 = vpop.f32.mrf.mxu1 }
 0xa15   :  { %v2553_v26 = vadd.f32 %v2505_v23, %v2129_v22  ;;  %v2555_v49 = vadd.f32 %v2546_v43, %v2131_v59  ;;  %v10766_v59 = vld [vmem:[#allocation32_spill] sm:$0xff] }
 0xa16   :  { %v2507_v19 = vpop.f32.mrf.mxu0  ;;  %v2548_v28 = vpop.f32.mrf.mxu1 }
 0xa17   :  { %v6637_v17 = vmul.f32 -1.442695, %v2553_v26  ;;  %v2554_v6 = vadd.f32 %v2507_v19, %v2130_v55  ;;  %v2556_v42 = vadd.f32 %v2548_v28, %v2132_v45  ;;  %v2464_v45 = vsel %vm862_vm0, %v9047_v57, 0.0 }
 0xa18   :  { %v2509_v29 = vpop.f32.mrf.mxu0  ;;  %v2550_v50 = vpop.f32.mrf.mxu1 }
 0xa19   :  { %7235 = vpow2.f32 %v6637_v17  ;;  %v6638_v44 = vmul.f32 -1.442695, %v2554_v6  ;;  %v6639_v2 = vmul.f32 -1.442695, %v2556_v42 }
 0xa1a   :  { %v2510_v24 = vpop.f32.mrf.mxu0  ;;  %v2551_v39 = vpop.f32.mrf.mxu1 }
 0xa1b   :  { %7237 = vpow2.f32 %v6638_v44 }
 0xa1c   :  { %7239 = vtanh.f32 %v2555_v49  ;;  %v2133_v49 = vadd.f32 %v9021_v36, %v10766_v59 }
 0xa1d   :  { %7241 = vpow2.f32 %v6639_v2 }
 0xa26   :  { %v7236_v46 = vpop.eup %7235 }
 0xa27   :  { %v2560_v22 = vadd.f32 1.0, %v7236_v46 }
 0xa28   :  { %v7238_v23 = vpop.eup %7237 }
 0xa29   :  { %7243 = vrcp.f32 %v2560_v22  ;;  %v2566_v55 = vadd.f32 1.0, %v7238_v23  ;;  %v7240_v26 = vpop.eup %7239  ;;  %v10767_v22 = vld [vmem:[#allocation37_spill] sm:$0xff] }
 0xa2a   :  { %v7242_v19 = vpop.eup %7241  ;;  %v2134_v23 = vadd.f32 %v9028_v33, %v10767_v22 }
 0xa2b   :  { %7245 = vrcp.f32 %v2566_v55  ;;  %v2573_v48 = vadd.f32 1.0, %v7242_v19 }
 0xa2d   :  { %7247 = vrcp.f32 %v2573_v48 }
 0xa36   :  { %v7244_v17 = vpop.eup %7243 }
 0xa37   :  { %v2577_v6 = vmul.f32 %v7244_v17, %v7240_v26 }
 0xa38   :  { %v7246_v29 = vpop.eup %7245 }
 0xa39   :  { %v2576_v43 = vmul.f32 %v7246_v29, %v2463_v51 }
 0xa3a   :  { %v7248_v44 = vpop.eup %7247 }
 0xa3b   :  { %v2578_v28 = vadd.f32 %v2577_v6, %v2576_v43 }
 0xa3d   :  { %7249 = vtanh.f32 %v2578_v28  ;;  %v9102_v50 = vsel %vm982_vm2, %v2578_v28, %v2463_v51 }
 0xa4a   :  { %v7250_v24 = vpop.eup %7249 }
 0xa4b   :  { %v9104_v39 = vmul.f32 %v7250_v24, %v7248_v44  ;;  %v10768_v44 = vld [vmem:[#allocation38_spill] sm:$0xff] }
 0xa4c   :  { %v2136_v24 = vadd.f32 %v9037_v58, %v10768_v44 }
 0xa4d   :  { %v9112_v27 = vsel %vm982_vm2, %v9104_v39, %v2464_v45 }
 0xa4e   :  { %v2590_v42 = vpack.c.bf16 %v9112_v27, %v9112_v27 }
 0xa50   :  { %2624 = vmatmul.mubr.bf16.vlgmr.msra.gmra.mxu0 %v2590_v42  ;;  %2665 = vmatmul.mubr.bf16.vlgmr.msra.gmra.mxu1 %v2590_v42  ;;  %v10769_v42 = vld [vmem:[#allocation35_spill] sm:$0xff] }
 0xa51   :  { %2712 = vmatpush1.bf16.msra.mxu0 %v8820_v8  ;;  %2753 = vmatpush1.bf16.msra.mxu1 %v8822_v62  ;;  %v2135_v59 = vadd.f32 %v9041_v52, %v10769_v42 }
 0xa52   :  { %2713 = vmatprep.subr.bf16.mxu0 %v8828_v7  ;;  %2754 = vmatprep.subr.bf16.mxu1 %v8830_v56 }
 0xa53   :  { %2743 = vmatprep.mubr.bf16.mxu0 %v10706_v18  ;;  %2784 = vmatprep.mubr.bf16.mxu1 %v10706_v18 }
 0xa55   :  { %2714 = vmatpush1.bf16.msra.mxu0 %v8832_v30  ;;  %2755 = vmatpush1.bf16.msra.mxu1 %v8834_v10 }
 0xa56   :  { %2715 = vmatprep.subr.bf16.mxu0 %v8840_v60  ;;  %2756 = vmatprep.subr.bf16.mxu1 %v8842_v12 }
 0xa59   :  { %2716 = vmatpush1.bf16.msra.mxu0 %v8844_v61  ;;  %2757 = vmatpush1.bf16.msra.mxu1 %v8846_v13 }
 0xa5a   :  { %2717 = vmatprep.subr.bf16.mxu0 %v8852_v63  ;;  %2758 = vmatprep.subr.bf16.mxu1 %v8854_v14 }
 0xa5d   :  { %2718 = vmatpush1.bf16.msra.mxu0 %v8856_v15  ;;  %2759 = vmatpush1.bf16.msra.mxu1 %v8858_v1 }
 0xa5e   :  { %2719 = vmatprep.subr.bf16.mxu0 %v8864_v40  ;;  %2760 = vmatprep.subr.bf16.mxu1 %v8866_v41 }
 0xa61   :  { %2720 = vmatpush1.bf16.msra.mxu0 %v8868_v5  ;;  %2761 = vmatpush1.bf16.msra.mxu1 %v8870_v4 }
 0xa62   :  { %2721 = vmatprep.subr.bf16.mxu0 %v8876_v9  ;;  %2762 = vmatprep.subr.bf16.mxu1 %v8878_v16 }
 0xa65   :  { %2722 = vmatpush1.bf16.msra.mxu0 %v8880_v21  ;;  %2763 = vmatpush1.bf16.msra.mxu1 %v8882_v32 }
 0xa66   :  { %2723 = vmatprep.subr.bf16.mxu0 %v8888_v11  ;;  %2764 = vmatprep.subr.bf16.mxu1 %v8890_v37 }
 0xa69   :  { %2724 = vmatpush1.bf16.msra.mxu0 %v8892_v47  ;;  %2765 = vmatpush1.bf16.msra.mxu1 %v8894_v38 }
 0xa6a   :  { %2725 = vmatprep.subr.bf16.mxu0 %v8896_v25  ;;  %2766 = vmatprep.subr.bf16.mxu1 %v8900_v31 }
 0xa6d   :  { %2726 = vmatpush1.bf16.msra.mxu0 %v8904_v34  ;;  %2767 = vmatpush1.bf16.msra.mxu1 %v8906_v35 }
 0xa6e   :  { %2831 = vmatprep.subr.bf16.mxu0 %v8816_v3  ;;  %2872 = vmatprep.subr.bf16.mxu1 %v8818_v20 }
 0xb10   :  { %v2625_v2 = vpop.f32.mrf.mxu0  ;;  %v2666_v46 = vpop.f32.mrf.mxu1 }
 0xb11   :  { %v2673_v55 = vadd.f32 %v2625_v2, %v2133_v49  ;;  %v2675_v22 = vadd.f32 %v2666_v46, %v2135_v59 }
 0xb12   :  { %v2627_v26 = vpop.f32.mrf.mxu0  ;;  %v2668_v19 = vpop.f32.mrf.mxu1 }
 0xb13   :  { %v6640_v17 = vmul.f32 -1.442695, %v2673_v55  ;;  %v2674_v6 = vadd.f32 %v2627_v26, %v2134_v23  ;;  %v2676_v45 = vadd.f32 %v2668_v19, %v2136_v24 }
 0xb14   :  { %v2629_v29 = vpop.f32.mrf.mxu0  ;;  %v2670_v51 = vpop.f32.mrf.mxu1 }
 0xb15   :  { %7251 = vpow2.f32 %v6640_v17  ;;  %v6641_v48 = vmul.f32 -1.442695, %v2674_v6  ;;  %v6642_v49 = vmul.f32 -1.442695, %v2676_v45 }
 0xb16   :  { %v2630_v43 = vpop.f32.mrf.mxu0  ;;  %v2671_v28 = vpop.f32.mrf.mxu1 }
 0xb17   :  { %7253 = vpow2.f32 %v6641_v48 }
 0xb18   :  { %7255 = vtanh.f32 %v2675_v22  ;;  %v10771_v22 = vld [vmem:[#allocation41_spill] sm:$0xff] }
 0xb19   :  { %7257 = vpow2.f32 %v6642_v49  ;;  %v2138_v49 = vadd.f32 %v9028_v33, %v10771_v22 }
 0xb22   :  { %v7252_v2 = vpop.eup %7251 }
 0xb23   :  { %v2680_v53 = vadd.f32 1.0, %v7252_v2 }
 0xb24   :  { %v7254_v23 = vpop.eup %7253 }
 0xb25   :  { %7259 = vrcp.f32 %v2680_v53  ;;  %v2686_v55 = vadd.f32 1.0, %v7254_v23  ;;  %v7256_v26 = vpop.eup %7255 }
 0xb26   :  { %v7258_v17 = vpop.eup %7257 }
 0xb27   :  { %7261 = vrcp.f32 %v2686_v55  ;;  %v2693_v48 = vadd.f32 1.0, %v7258_v17 }
 0xb29   :  { %7263 = vrcp.f32 %v2693_v48 }
 0xb32   :  { %v7260_v6 = vpop.eup %7259 }
 0xb33   :  { %v2697_v29 = vmul.f32 %v7260_v6, %v7256_v26 }
 0xb34   :  { %v7262_v51 = vpop.eup %7261 }
 0xb35   :  { %v2696_v19 = vmul.f32 %v7262_v51, %v9102_v50 }
 0xb36   :  { %v7264_v28 = vpop.eup %7263 }
 0xb37   :  { %v2698_v43 = vadd.f32 %v2697_v29, %v2696_v19 }
 0xb39   :  { %7265 = vtanh.f32 %v2698_v43  ;;  %v9162_v46 = vsel %vm1104_vm3, %v2698_v43, %v9102_v50  ;;  %v10770_v50 = vld [vmem:[#allocation36_spill] sm:$0xff]  ;;  %v10772_v43 = vld [vmem:[#allocation42_spill] sm:$0xff] }
 0xb46   :  { %v7266_v53 = vpop.eup %7265 }
 0xb47   :  { %v9164_v44 = vmul.f32 %v7266_v53, %v7264_v28  ;;  %v2140_v28 = vadd.f32 %v9037_v58, %v10772_v43 }
 0xb49   :  { %v9170_v24 = vsel %vm1104_vm3, %v9164_v44, %v9112_v27  ;;  %v2137_v27 = vadd.f32 %v9021_v36, %v10770_v50 }
 0xb4a   :  { %v2710_v45 = vpack.c.bf16 %v9170_v24, %v9170_v24 }
 0xb4c   :  { %2744 = vmatmul.mubr.bf16.vlgmr.msra.gmra.mxu0 %v2710_v45  ;;  %2785 = vmatmul.mubr.bf16.vlgmr.msra.gmra.mxu1 %v2710_v45  ;;  %v10773_v45 = vld [vmem:[#allocation39_spill] sm:$0xff] }
 0xb4d   :  { %2832 = vmatpush1.bf16.msra.mxu0 %v8820_v8  ;;  %2873 = vmatpush1.bf16.msra.mxu1 %v8822_v62  ;;  %v2139_v50 = vadd.f32 %v9041_v52, %v10773_v45 }
 0xb4e   :  { %2833 = vmatprep.subr.bf16.mxu0 %v8828_v7  ;;  %2874 = vmatprep.subr.bf16.mxu1 %v8830_v56 }
 0xb4f   :  { %2863 = vmatprep.mubr.bf16.mxu0 %v10706_v18  ;;  %2904 = vmatprep.mubr.bf16.mxu1 %v10706_v18 }
 0xb51   :  { %2834 = vmatpush1.bf16.msra.mxu0 %v8832_v30  ;;  %2875 = vmatpush1.bf16.msra.mxu1 %v8834_v10 }
 0xb52   :  { %2835 = vmatprep.subr.bf16.mxu0 %v8840_v60  ;;  %2876 = vmatprep.subr.bf16.mxu1 %v8842_v12 }
 0xb55   :  { %2836 = vmatpush1.bf16.msra.mxu0 %v8844_v61  ;;  %2877 = vmatpush1.bf16.msra.mxu1 %v8846_v13 }
 0xb56   :  { %2837 = vmatprep.subr.bf16.mxu0 %v8852_v63  ;;  %2878 = vmatprep.subr.bf16.mxu1 %v8854_v14 }
 0xb59   :  { %2838 = vmatpush1.bf16.msra.mxu0 %v8856_v15  ;;  %2879 = vmatpush1.bf16.msra.mxu1 %v8858_v1 }
 0xb5a   :  { %2839 = vmatprep.subr.bf16.mxu0 %v8864_v40  ;;  %2880 = vmatprep.subr.bf16.mxu1 %v8866_v41 }
 0xb5d   :  { %2840 = vmatpush1.bf16.msra.mxu0 %v8868_v5  ;;  %2881 = vmatpush1.bf16.msra.mxu1 %v8870_v4 }
 0xb5e   :  { %2841 = vmatprep.subr.bf16.mxu0 %v8876_v9  ;;  %2882 = vmatprep.subr.bf16.mxu1 %v8878_v16 }
 0xb61   :  { %2842 = vmatpush1.bf16.msra.mxu0 %v8880_v21  ;;  %2883 = vmatpush1.bf16.msra.mxu1 %v8882_v32 }
 0xb62   :  { %2843 = vmatprep.subr.bf16.mxu0 %v8888_v11  ;;  %2884 = vmatprep.subr.bf16.mxu1 %v8890_v37 }
 0xb65   :  { %2844 = vmatpush1.bf16.msra.mxu0 %v8892_v47  ;;  %2885 = vmatpush1.bf16.msra.mxu1 %v8894_v38 }
 0xb66   :  { %2845 = vmatprep.subr.bf16.mxu0 %v8896_v25  ;;  %2886 = vmatprep.subr.bf16.mxu1 %v8900_v31 }
 0xb69   :  { %2846 = vmatpush1.bf16.msra.mxu0 %v8904_v34  ;;  %2887 = vmatpush1.bf16.msra.mxu1 %v8906_v35 }
 0xb6a   :  { %2951 = vmatprep.subr.bf16.mxu0 %v8816_v3  ;;  %2992 = vmatprep.subr.bf16.mxu1 %v8818_v20 }
 0xc0c   :  { %v2745_v42 = vpop.f32.mrf.mxu0  ;;  %v2786_v59 = vpop.f32.mrf.mxu1 }
 0xc0d   :  { %v2793_v2 = vadd.f32 %v2745_v42, %v2137_v27  ;;  %v2795_v22 = vadd.f32 %v2786_v59, %v2139_v50 }
 0xc0e   :  { %v2747_v23 = vpop.f32.mrf.mxu0  ;;  %v2788_v55 = vpop.f32.mrf.mxu1 }
 0xc0f   :  { %v6643_v26 = vmul.f32 -1.442695, %v2793_v2  ;;  %v2794_v17 = vadd.f32 %v2747_v23, %v2138_v49  ;;  %v2796_v53 = vadd.f32 %v2788_v55, %v2140_v28 }
 0xc10   :  { %v2749_v6 = vpop.f32.mrf.mxu0  ;;  %v2790_v29 = vpop.f32.mrf.mxu1 }
 0xc11   :  { %7267 = vpow2.f32 %v6643_v26  ;;  %v6644_v51 = vmul.f32 -1.442695, %v2794_v17  ;;  %v6645_v27 = vmul.f32 -1.442695, %v2796_v53 }
 0xc12   :  { %v2750_v48 = vpop.f32.mrf.mxu0  ;;  %v2791_v19 = vpop.f32.mrf.mxu1 }
 0xc13   :  { %7269 = vpow2.f32 %v6644_v51 }
 0xc14   :  { %7271 = vtanh.f32 %v2795_v22 }
 0xc15   :  { %7273 = vpow2.f32 %v6645_v27 }
 0xc1e   :  { %v7268_v42 = vpop.eup %7267 }
 0xc1f   :  { %v2800_v54 = vadd.f32 1.0, %v7268_v42 }
 0xc20   :  { %v7270_v49 = vpop.eup %7269 }
 0xc21   :  { %7275 = vrcp.f32 %v2800_v54  ;;  %v2806_v2 = vadd.f32 1.0, %v7270_v49  ;;  %v7272_v23 = vpop.eup %7271 }
 0xc22   :  { %v7274_v26 = vpop.eup %7273 }
 0xc23   :  { %7277 = vrcp.f32 %v2806_v2  ;;  %v2813_v51 = vadd.f32 1.0, %v7274_v26  ;;  %v9293_v26 = vld [vmem:[#allocation12 + $0x1e8] ss:$16 sps:$4 sm:$0xff]  }
 0xc25   :  { %7279 = vrcp.f32 %v2813_v51  ;;  %v9307_v51 = vld [vmem:[#allocation12 + $0x1c8] ss:$16 sps:$4 sm:$0xff]  }
 0xc2e   :  { %v7276_v17 = vpop.eup %7275 }
 0xc2f   :  { %v2817_v6 = vmul.f32 %v7276_v17, %v7272_v23  ;;  %v9290_v23 = vld [vmem:[#allocation12 + $0x1e0] ss:$16 sps:$4 sm:$0xff]   ;;  %v9296_v17 = vld [vmem:[#allocation12 + $0x1c4] ss:$16 sps:$4 sm:$0xff]  }
 0xc30   :  { %v7278_v29 = vpop.eup %7277 }
 0xc31   :  { %v2816_v55 = vmul.f32 %v7278_v29, %v9162_v46  ;;  %v9304_v29 = vld [vmem:[#allocation12 + $0x1c0] ss:$16 sps:$4 sm:$0xff]  }
 0xc32   :  { %v7280_v19 = vpop.eup %7279 }
 0xc33   :  { %v2818_v48 = vadd.f32 %v2817_v6, %v2816_v55  ;;  %v9299_v6 = vld [vmem:[#allocation12 + $0x1cc] ss:$16 sps:$4 sm:$0xff]   ;;  %v9310_v55 = vld [vmem:[#allocation12 + $0x1a4] ss:$16 sps:$4 sm:$0xff]  }
 0xc35   :  { %7281 = vtanh.f32 %v2818_v48  ;;  %v9220_v59 = vsel %vm1226_vm4, %v2818_v48, %v9162_v46  ;;  %v9313_v48 = vld [vmem:[#allocation12 + $0x1ac] ss:$16 sps:$4 sm:$0xff]  }
 0xc42   :  { %v7282_v54 = vpop.eup %7281 }
 0xc43   :  { %v9222_v43 = vmul.f32 %v7282_v54, %v7280_v19  ;;  %v9319_v19 = vld [vmem:[#allocation12 + $0x1a8] ss:$16 sps:$4 sm:$0xff]   ;;  %v9322_v54 = vld [vmem:[#allocation12 + $0x184] ss:$16 sps:$4 sm:$0xff]  }
 0xc45   :  { %v9228_v28 = vsel %vm1226_vm4, %v9222_v43, %v9170_v24 }
 0xc46   :  { %v2830_v53 = vpack.c.bf16 %v9228_v28, %v9228_v28 }
 0xc48   :  { %2864 = vmatmul.mubr.bf16.vlgmr.msra.gmra.mxu0 %v2830_v53  ;;  %2905 = vmatmul.mubr.bf16.vlgmr.msra.gmra.mxu1 %v2830_v53  ;;  %v9328_v53 = vld [vmem:[#allocation12 + $0x180] ss:$16 sps:$4 sm:$0xff]  }
 0xc49   :  { %2952 = vmatpush1.bf16.msra.mxu0 %v8820_v8  ;;  %2993 = vmatpush1.bf16.msra.mxu1 %v8822_v62  ;;  %v10774_v8 = vld [vmem:[#allocation40_spill] sm:$0xff] }
 0xc4a   :  { %2953 = vmatprep.subr.bf16.mxu0 %v8828_v7  ;;  %2994 = vmatprep.subr.bf16.mxu1 %v8830_v56  ;;  %v2141_v62 = vadd.f32 %v9021_v36, %v10774_v8  ;;  %v9331_v8 = vld [vmem:[#allocation12 + $0x188] ss:$16 sps:$4 sm:$0xff]  }
 0xc4b   :  { %2983 = vmatprep.mubr.bf16.mxu0 %v10706_v18  ;;  %3024 = vmatprep.mubr.bf16.mxu1 %v10706_v18 }
 0xc4d   :  { %2954 = vmatpush1.bf16.msra.mxu0 %v8832_v30  ;;  %2995 = vmatpush1.bf16.msra.mxu1 %v8834_v10  ;;  %v10775_v30 = vld [vmem:[#allocation45_spill] sm:$0xff] }
 0xc4e   :  { %2955 = vmatprep.subr.bf16.mxu0 %v8840_v60  ;;  %2996 = vmatprep.subr.bf16.mxu1 %v8842_v12  ;;  %v2142_v10 = vadd.f32 %v9028_v33, %v10775_v30  ;;  %v9343_v30 = vld [vmem:[#allocation12 + $0x168] ss:$16 sps:$4 sm:$0xff]  }
 0xc51   :  { %2956 = vmatpush1.bf16.msra.mxu0 %v8844_v61  ;;  %2997 = vmatpush1.bf16.msra.mxu1 %v8846_v13 }
 0xc52   :  { %2957 = vmatprep.subr.bf16.mxu0 %v8852_v63  ;;  %2998 = vmatprep.subr.bf16.mxu1 %v8854_v14 }
 0xc55   :  { %2958 = vmatpush1.bf16.msra.mxu0 %v8856_v15  ;;  %2999 = vmatpush1.bf16.msra.mxu1 %v8858_v1 }
 0xc56   :  { %2959 = vmatprep.subr.bf16.mxu0 %v8864_v40  ;;  %3000 = vmatprep.subr.bf16.mxu1 %v8866_v41 }
 0xc59   :  { %2960 = vmatpush1.bf16.msra.mxu0 %v8868_v5  ;;  %3001 = vmatpush1.bf16.msra.mxu1 %v8870_v4  ;;  %v10777_v4 = vld [vmem:[#allocation43_spill] sm:$0xff] }
 0xc5a   :  { %2961 = vmatprep.subr.bf16.mxu0 %v8876_v9  ;;  %3002 = vmatprep.subr.bf16.mxu1 %v8878_v16  ;;  %v2143_v9 = vadd.f32 %v9041_v52, %v10777_v4  ;;  %v10778_v4 = vld [vmem:[#allocation44_spill] sm:$0xff] }
 0xc5d   :  { %2962 = vmatpush1.bf16.msra.mxu0 %v8880_v21  ;;  %3003 = vmatpush1.bf16.msra.mxu1 %v8882_v32 }
 0xc5e   :  { %2963 = vmatprep.subr.bf16.mxu0 %v8888_v11  ;;  %3004 = vmatprep.subr.bf16.mxu1 %v8890_v37 }
 0xc61   :  { %2964 = vmatpush1.bf16.msra.mxu0 %v8892_v47  ;;  %3005 = vmatpush1.bf16.msra.mxu1 %v8894_v38 }
 0xc62   :  { %2965 = vmatprep.subr.bf16.mxu0 %v8896_v25  ;;  %3006 = vmatprep.subr.bf16.mxu1 %v8900_v31 }
 0xc65   :  { %2966 = vmatpush1.bf16.msra.mxu0 %v8904_v34  ;;  %3007 = vmatpush1.bf16.msra.mxu1 %v8906_v35 }
 0xc66   :  { %3071 = vmatprep.subr.bf16.mxu0 %v8816_v3  ;;  %3112 = vmatprep.subr.bf16.mxu1 %v8818_v20  ;;  %v10776_v20 = vld [vmem:[#allocation46_spill] sm:$0xff] }
 0xc67   :  { %v2144_v41 = vadd.f32 %v9037_v58, %v10776_v20  ;;  %v9379_v20 = vld [vmem:[#allocation12 + $0x108] ss:$16 sps:$4 sm:$0xff]  }
 0xd08   :  { %v2865_v7 = vpop.f32.mrf.mxu0  ;;  %v2906_v56 = vpop.f32.mrf.mxu1 }
 0xd09   :  { %v2913_v60 = vadd.f32 %v2865_v7, %v2141_v62  ;;  %v2915_v16 = vadd.f32 %v2906_v56, %v2143_v9  ;;  %v9334_v62 = vld [vmem:[#allocation12 + $0x164] ss:$16 sps:$4 sm:$0xff]   ;;  %v9337_v7 = vld [vmem:[#allocation12 + $0x16c] ss:$16 sps:$4 sm:$0xff]   ;;  %v9340_v56 = vld [vmem:[#allocation12 + $0x160] ss:$16 sps:$4 sm:$0xff]   ;;  %v2145_v9 = vadd.f32 %v9021_v36, %v10778_v4 }
 0xd0a   :  { %v2867_v12 = vpop.f32.mrf.mxu0  ;;  %v2908_v61 = vpop.f32.mrf.mxu1 }
 0xd0b   :  { %v6646_v13 = vmul.f32 -1.442695, %v2913_v60  ;;  %v2914_v63 = vadd.f32 %v2867_v12, %v2142_v10  ;;  %v2916_v5 = vadd.f32 %v2908_v61, %v2144_v41  ;;  %v9346_v10 = vld [vmem:[#allocation12 + $0x144] ss:$16 sps:$4 sm:$0xff]   ;;  %v9349_v60 = vld [vmem:[#allocation12 + $0x14c] ss:$16 sps:$4 sm:$0xff]  }
 0xd0c   :  { %v2869_v14 = vpop.f32.mrf.mxu0  ;;  %v2910_v15 = vpop.f32.mrf.mxu1  ;;  %v9352_v12 = vld [vmem:[#allocation12 + $0x140] ss:$16 sps:$4 sm:$0xff]   ;;  %v9355_v61 = vld [vmem:[#allocation12 + $0x148] ss:$16 sps:$4 sm:$0xff]   ;;  %v7409_v41 = vld [vmem:[#allocation12 + $0x1e4] ss:$16 sps:$4 sm:$0xff]  }
 0xd0d   :  { %7283 = vpow2.f32 %v6646_v13  ;;  %v6647_v1 = vmul.f32 -1.442695, %v2914_v63  ;;  %v6648_v21 = vmul.f32 -1.442695, %v2916_v5  ;;  %v9358_v13 = vld [vmem:[#allocation12 + $0x124] ss:$16 sps:$4 sm:$0xff]  }
 0xd0e   :  { %v2870_v3 = vpop.f32.mrf.mxu0  ;;  %v2911_v40 = vpop.f32.mrf.mxu1  ;;  %v9361_v63 = vld [vmem:[#allocation12 + $0x12c] ss:$16 sps:$4 sm:$0xff]   ;;  %v9364_v14 = vld [vmem:[#allocation12 + $0x120] ss:$16 sps:$4 sm:$0xff]   ;;  %v9367_v15 = vld [vmem:[#allocation12 + $0x128] ss:$16 sps:$4 sm:$0xff]  }
 0xd0f   :  { %7285 = vpow2.f32 %v6647_v1  ;;  %v9370_v1 = vld [vmem:[#allocation12 + $0x104] ss:$16 sps:$4 sm:$0xff]   ;;  %v9373_v3 = vld [vmem:[#allocation12 + $0x10c] ss:$16 sps:$4 sm:$0xff]   ;;  %v9376_v40 = vld [vmem:[#allocation12 + $0x100] ss:$16 sps:$4 sm:$0xff]  }
 0xd10   :  { %7287 = vtanh.f32 %v2915_v16  ;;  %v7410_v5 = vld [vmem:[#allocation12 + $0x1ec] ss:$16 sps:$4 sm:$0xff]  }
 0xd11   :  { %7289 = vpow2.f32 %v6648_v21 }
 0xd1a   :  { %v7284_v32 = vpop.eup %7283 }
 0xd1b   :  { %v2920_v11 = vadd.f32 1.0, %v7284_v32  ;;  %v10779_v32 = vld [vmem:[#allocation48_spill] sm:$0xff] }
 0xd1c   :  { %v7286_v37 = vpop.eup %7285 }
 0xd1d   :  { %7291 = vrcp.f32 %v2920_v11  ;;  %v2926_v47 = vadd.f32 1.0, %v7286_v37  ;;  %v7288_v38 = vpop.eup %7287  ;;  %v2146_v11 = vadd.f32 %v9028_v33, %v10779_v32 }
 0xd1e   :  { %v7290_v25 = vpop.eup %7289 }
 0xd1f   :  { %7293 = vrcp.f32 %v2926_v47  ;;  %v2933_v46 = vadd.f32 1.0, %v7290_v25 }
 0xd21   :  { %7295 = vrcp.f32 %v2933_v46 }
 0xd2a   :  { %v7292_v31 = vpop.eup %7291 }
 0xd2b   :  { %v2937_v34 = vmul.f32 %v7292_v31, %v7288_v38 }
 0xd2c   :  { %v7294_v35 = vpop.eup %7293 }
 0xd2d   :  { %v2936_v24 = vmul.f32 %v7294_v35, %v9220_v59 }
 0xd2e   :  { %v7296_v22 = vpop.eup %7295 }
 0xd2f   :  { %v2938_v45 = vadd.f32 %v2937_v34, %v2936_v24 }
 0xd31   :  { %7297 = vtanh.f32 %v2938_v45  ;;  %v9278_v50 = vsel %vm1348_vm5, %v2938_v45, %v9220_v59  ;;  %v9316_v59 = vld [vmem:[#allocation12 + $0x1a0] ss:$16 sps:$4 sm:$0xff]  }
 0xd3e   :  { %v7298_v27 = vpop.eup %7297 }
 0xd3f   :  { %v9280_v42 = vmul.f32 %v7298_v27, %v7296_v22  ;;  %v10780_v22 = vld [vmem:[#allocation49_spill] sm:$0xff] }
 0xd40   :  { %v2148_v27 = vadd.f32 %v9037_v58, %v10780_v22 }
 0xd41   :  { %v9286_v49 = vsel %vm1348_vm5, %v9280_v42, %v9228_v28  ;;  %v9325_v28 = vld [vmem:[#allocation12 + $0x18c] ss:$16 sps:$4 sm:$0xff]  }
 0xd42   :  { %v2950_v2 = vpack.c.bf16 %v9286_v49, %v9286_v49 }
 0xd44   :  { %2984 = vmatmul.mubr.bf16.vlgmr.msra.gmra.mxu0 %v2950_v2  ;;  %3025 = vmatmul.mubr.bf16.vlgmr.msra.gmra.mxu1 %v2950_v2 }
 0xd45   :  { %3072 = vmatpush1.bf16.msra.mxu0 %v9290_v23  ;;  %3113 = vmatpush1.bf16.msra.mxu1 %v9293_v26 }
 0xd46   :  { %3073 = vmatprep.subr.bf16.mxu0 %v9296_v17  ;;  %3114 = vmatprep.subr.bf16.mxu1 %v9299_v6 }
 0xd47   :  { %3103 = vmatprep.mubr.bf16.mxu0 %v10706_v18  ;;  %3144 = vmatprep.mubr.bf16.mxu1 %v10706_v18 }
 0xd49   :  { %3074 = vmatpush1.bf16.msra.mxu0 %v9304_v29  ;;  %3115 = vmatpush1.bf16.msra.mxu1 %v9307_v51 }
 0xd4a   :  { %3075 = vmatprep.subr.bf16.mxu0 %v9310_v55  ;;  %3116 = vmatprep.subr.bf16.mxu1 %v9313_v48 }
 0xd4d   :  { %3076 = vmatpush1.bf16.msra.mxu0 %v9316_v59  ;;  %3117 = vmatpush1.bf16.msra.mxu1 %v9319_v19 }
 0xd4e   :  { %3077 = vmatprep.subr.bf16.mxu0 %v9322_v54  ;;  %3118 = vmatprep.subr.bf16.mxu1 %v9325_v28 }
 0xd51   :  { %3078 = vmatpush1.bf16.msra.mxu0 %v9328_v53  ;;  %3119 = vmatpush1.bf16.msra.mxu1 %v9331_v8 }
 0xd52   :  { %3079 = vmatprep.subr.bf16.mxu0 %v9334_v62  ;;  %3120 = vmatprep.subr.bf16.mxu1 %v9337_v7 }
 0xd55   :  { %3080 = vmatpush1.bf16.msra.mxu0 %v9340_v56  ;;  %3121 = vmatpush1.bf16.msra.mxu1 %v9343_v30 }
 0xd56   :  { %3081 = vmatprep.subr.bf16.mxu0 %v9346_v10  ;;  %3122 = vmatprep.subr.bf16.mxu1 %v9349_v60 }
 0xd59   :  { %3082 = vmatpush1.bf16.msra.mxu0 %v9352_v12  ;;  %3123 = vmatpush1.bf16.msra.mxu1 %v9355_v61 }
 0xd5a   :  { %3083 = vmatprep.subr.bf16.mxu0 %v9358_v13  ;;  %3124 = vmatprep.subr.bf16.mxu1 %v9361_v63 }
 0xd5d   :  { %3084 = vmatpush1.bf16.msra.mxu0 %v9364_v14  ;;  %3125 = vmatpush1.bf16.msra.mxu1 %v9367_v15 }
 0xd5e   :  { %3085 = vmatprep.subr.bf16.mxu0 %v9370_v1  ;;  %3126 = vmatprep.subr.bf16.mxu1 %v9373_v3 }
 0xd61   :  { %3086 = vmatpush1.bf16.msra.mxu0 %v9376_v40  ;;  %3127 = vmatpush1.bf16.msra.mxu1 %v9379_v20 }
 0xd62   :  { %3191 = vmatprep.subr.bf16.mxu0 %v7409_v41  ;;  %3232 = vmatprep.subr.bf16.mxu1 %v7410_v5  ;;  %v10781_v41 = vld [vmem:[#allocation47_spill] sm:$0xff] }
 0xd63   :  { %v2147_v5 = vadd.f32 %v9041_v52, %v10781_v41 }
 0xe04   :  { %v2985_v16 = vpop.f32.mrf.mxu0  ;;  %v3026_v21 = vpop.f32.mrf.mxu1 }
 0xe05   :  { %v3033_v37 = vadd.f32 %v2985_v16, %v2145_v9  ;;  %v3035_v4 = vadd.f32 %v3026_v21, %v2147_v5 }
 0xe06   :  { %v2987_v47 = vpop.f32.mrf.mxu0  ;;  %v3028_v38 = vpop.f32.mrf.mxu1 }
 0xe07   :  { %v6649_v25 = vmul.f32 -1.442695, %v3033_v37  ;;  %v3034_v31 = vadd.f32 %v2987_v47, %v2146_v11  ;;  %v3036_v2 = vadd.f32 %v3028_v38, %v2148_v27 }
 0xe08   :  { %v2989_v34 = vpop.f32.mrf.mxu0  ;;  %v3030_v35 = vpop.f32.mrf.mxu1 }
 0xe09   :  { %7299 = vpow2.f32 %v6649_v25  ;;  %v6650_v46 = vmul.f32 -1.442695, %v3034_v31  ;;  %v6651_v9 = vmul.f32 -1.442695, %v3036_v2 }
 0xe0a   :  { %v2990_v24 = vpop.f32.mrf.mxu0  ;;  %v3031_v45 = vpop.f32.mrf.mxu1 }
 0xe0b   :  { %7301 = vpow2.f32 %v6650_v46 }
 0xe0c   :  { %7303 = vtanh.f32 %v3035_v4 }
 0xe0d   :  { %7305 = vpow2.f32 %v6651_v9 }
 0xe16   :  { %v7300_v16 = vpop.eup %7299 }
 0xe17   :  { %v3040_v32 = vadd.f32 1.0, %v7300_v16 }
 0xe18   :  { %v7302_v11 = vpop.eup %7301 }
 0xe19   :  { %7307 = vrcp.f32 %v3040_v32  ;;  %v3046_v37 = vadd.f32 1.0, %v7302_v11  ;;  %v7304_v47 = vpop.eup %7303 }
 0xe1a   :  { %v7306_v25 = vpop.eup %7305 }
 0xe1b   :  { %7309 = vrcp.f32 %v3046_v37  ;;  %v3053_v46 = vadd.f32 1.0, %v7306_v25 }
 0xe1d   :  { %7311 = vrcp.f32 %v3053_v46 }
 0xe26   :  { %v7308_v31 = vpop.eup %7307 }
 0xe27   :  { %v3057_v34 = vmul.f32 %v7308_v31, %v7304_v47  ;;  %v10786_v31 = vld [vmem:[#allocation54_spill] sm:$0xff] }
 0xe28   :  { %v7310_v35 = vpop.eup %7309 }
 0xe29   :  { %v3056_v38 = vmul.f32 %v7310_v35, %v9278_v50 }
 0xe2a   :  { %v7312_v45 = vpop.eup %7311 }
 0xe2b   :  { %v3058_v24 = vadd.f32 %v3057_v34, %v3056_v38  ;;  %v2153_v34 = vadd.f32 %v9021_v36, %v10786_v31  ;;  %v10787_v38 = vld [vmem:[#allocation56_spill] sm:$0xff] }
 0xe2d   :  { %7313 = vtanh.f32 %v3058_v24  ;;  %v9394_v21 = vsel %vm1470_vm6, %v3058_v24, %v9278_v50  ;;  %v10782_v50 = vld [vmem:[#allocation50_spill] sm:$0xff]  ;;  %v2154_v24 = vadd.f32 %v9028_v33, %v10787_v38 }
 0xe3a   :  { %v7314_v22 = vpop.eup %7313 }
 0xe3b   :  { %v9396_v27 = vmul.f32 %v7314_v22, %v7312_v45 }
 0xe3d   :  { %v9402_v2 = vsel %vm1470_vm6, %v9396_v27, %v9286_v49  ;;  %v2149_v49 = vadd.f32 %v9021_v36, %v10782_v50 }
 0xe3e   :  { %v3070_v41 = vpack.c.bf16 %v9402_v2, %v9402_v2 }
 0xe40   :  { %3104 = vmatmul.mubr.bf16.vlgmr.msra.gmra.mxu0 %v3070_v41  ;;  %3145 = vmatmul.mubr.bf16.vlgmr.msra.gmra.mxu1 %v3070_v41 }
 0xe41   :  { %3192 = vmatpush1.bf16.msra.mxu0 %v9290_v23  ;;  %3233 = vmatpush1.bf16.msra.mxu1 %v9293_v26 }
 0xe42   :  { %3193 = vmatprep.subr.bf16.mxu0 %v9296_v17  ;;  %3234 = vmatprep.subr.bf16.mxu1 %v9299_v6  ;;  %v10783_v17 = vld [vmem:[#allocation52_spill] sm:$0xff] }
 0xe43   :  { %3223 = vmatprep.mubr.bf16.mxu0 %v10706_v18  ;;  %3264 = vmatprep.mubr.bf16.mxu1 %v10706_v18  ;;  %v2150_v6 = vadd.f32 %v9028_v33, %v10783_v17  ;;  %v10788_v17 = vld [vmem:[#allocation57_spill] sm:$0xff] }
 0xe44   :  { %v2156_v36 = vadd.f32 %v9037_v58, %v10788_v17 }
 0xe45   :  { %3194 = vmatpush1.bf16.msra.mxu0 %v9304_v29  ;;  %3235 = vmatpush1.bf16.msra.mxu1 %v9307_v51 }
 0xe46   :  { %3195 = vmatprep.subr.bf16.mxu0 %v9310_v55  ;;  %3236 = vmatprep.subr.bf16.mxu1 %v9313_v48 }
 0xe49   :  { %3196 = vmatpush1.bf16.msra.mxu0 %v9316_v59  ;;  %3237 = vmatpush1.bf16.msra.mxu1 %v9319_v19 }
 0xe4a   :  { %3197 = vmatprep.subr.bf16.mxu0 %v9322_v54  ;;  %3238 = vmatprep.subr.bf16.mxu1 %v9325_v28 }
 0xe4d   :  { %3198 = vmatpush1.bf16.msra.mxu0 %v9328_v53  ;;  %3239 = vmatpush1.bf16.msra.mxu1 %v9331_v8 }
 0xe4e   :  { %3199 = vmatprep.subr.bf16.mxu0 %v9334_v62  ;;  %3240 = vmatprep.subr.bf16.mxu1 %v9337_v7  ;;  %v10784_v62 = vld [vmem:[#allocation53_spill] sm:$0xff] }
 0xe4f   :  { %v2152_v7 = vadd.f32 %v9037_v58, %v10784_v62 }
 0xe51   :  { %3200 = vmatpush1.bf16.msra.mxu0 %v9340_v56  ;;  %3241 = vmatpush1.bf16.msra.mxu1 %v9343_v30  ;;  %v10785_v30 = vld [vmem:[#allocation51_spill] sm:$0xff] }
 0xe52   :  { %3201 = vmatprep.subr.bf16.mxu0 %v9346_v10  ;;  %3242 = vmatprep.subr.bf16.mxu1 %v9349_v60  ;;  %v2151_v10 = vadd.f32 %v9041_v52, %v10785_v30 }
 0xe55   :  { %3202 = vmatpush1.bf16.msra.mxu0 %v9352_v12  ;;  %3243 = vmatpush1.bf16.msra.mxu1 %v9355_v61 }
 0xe56   :  { %3203 = vmatprep.subr.bf16.mxu0 %v9358_v13  ;;  %3244 = vmatprep.subr.bf16.mxu1 %v9361_v63 }
 0xe59   :  { %3204 = vmatpush1.bf16.msra.mxu0 %v9364_v14  ;;  %3245 = vmatpush1.bf16.msra.mxu1 %v9367_v15 }
 0xe5a   :  { %3205 = vmatprep.subr.bf16.mxu0 %v9370_v1  ;;  %3246 = vmatprep.subr.bf16.mxu1 %v9373_v3 }
 0xe5d   :  { %3206 = vmatpush1.bf16.msra.mxu0 %v9376_v40  ;;  %3247 = vmatpush1.bf16.msra.mxu1 %v9379_v20 }
 0xf00   :  { %v3105_v23 = vpop.f32.mrf.mxu0  ;;  %v3146_v26 = vpop.f32.mrf.mxu1 }
 0xf01   :  { %v3153_v29 = vadd.f32 %v3105_v23, %v2149_v49  ;;  %v3155_v60 = vadd.f32 %v3146_v26, %v2151_v10 }
 0xf02   :  { %v3107_v51 = vpop.f32.mrf.mxu0  ;;  %v3148_v55 = vpop.f32.mrf.mxu1 }
 0xf03   :  { %v6652_v48 = vmul.f32 -1.442695, %v3153_v29  ;;  %v3154_v59 = vadd.f32 %v3107_v51, %v2150_v6  ;;  %v3156_v56 = vadd.f32 %v3148_v55, %v2152_v7  ;;  %v10789_v29 = vld [vmem:[#allocation55_spill] sm:$0xff] }
 0xf04   :  { %v3109_v19 = vpop.f32.mrf.mxu0  ;;  %v3150_v54 = vpop.f32.mrf.mxu1  ;;  %v2155_v51 = vadd.f32 %v9041_v52, %v10789_v29 }
 0xf05   :  { %7315 = vpow2.f32 %v6652_v48  ;;  %v6653_v28 = vmul.f32 -1.442695, %v3154_v59  ;;  %v6654_v12 = vmul.f32 -1.442695, %v3156_v56 }
 0xf06   :  { %v3110_v53 = vpop.f32.mrf.mxu0  ;;  %v3151_v8 = vpop.f32.mrf.mxu1 }
 0xf07   :  { %7317 = vpow2.f32 %v6653_v28 }
 0xf08   :  { %7319 = vtanh.f32 %v3155_v60 }
 0xf09   :  { %7321 = vpow2.f32 %v6654_v12 }
 0xf12   :  { %v7316_v61 = vpop.eup %7315 }
 0xf13   :  { %v3160_v13 = vadd.f32 1.0, %v7316_v61 }
 0xf14   :  { %v7318_v63 = vpop.eup %7317 }
 0xf15   :  { %7323 = vrcp.f32 %v3160_v13  ;;  %v3166_v14 = vadd.f32 1.0, %v7318_v63  ;;  %v7320_v15 = vpop.eup %7319 }
 0xf16   :  { %v7322_v1 = vpop.eup %7321 }
 0xf17   :  { %7325 = vrcp.f32 %v3166_v14  ;;  %v3173_v5 = vadd.f32 1.0, %v7322_v1 }
 0xf19   :  { %7327 = vrcp.f32 %v3173_v5 }
 0xf22   :  { %v7324_v3 = vpop.eup %7323 }
 0xf23   :  { %v3177_v40 = vmul.f32 %v7324_v3, %v7320_v15 }
 0xf24   :  { %v7326_v20 = vpop.eup %7325 }
 0xf25   :  { %v3176_v4 = vmul.f32 %v7326_v20, %v9394_v21 }
 0xf26   :  { %v7328_v32 = vpop.eup %7327 }
 0xf27   :  { %v3178_v9 = vadd.f32 %v3177_v40, %v3176_v4 }
 0xf29   :  { %7329 = vtanh.f32 %v3178_v9  ;;  %v3181_v16 = vsel %vm1592_vm7, %v3178_v9, %v9394_v21 }
 0xf36   :  { %v7330_v11 = vpop.eup %7329 }
 0xf37   :  { %v9450_v37 = vmul.f32 %v7330_v11, %v7328_v32 }
 0xf39   :  { %v3182_v47 = vsel %vm1592_vm7, %v9450_v37, %v9402_v2 }
 0xf3a   :  { %v3190_v25 = vpack.c.bf16 %v3182_v47, %v3182_v47 }
 0xf3c   :  { %3224 = vmatmul.mubr.bf16.vlgmr.msra.gmra.mxu0 %v3190_v25  ;;  %3265 = vmatmul.mubr.bf16.vlgmr.msra.gmra.mxu1 %v3190_v25 }
 0xffc   :  { %v3225_v35 = vpop.f32.mrf.mxu0  ;;  %v3266_v46 = vpop.f32.mrf.mxu1 }
 0xffd   :  { %v3273_v21 = vadd.f32 %v3225_v35, %v2153_v34  ;;  %v3275_v33 = vadd.f32 %v3266_v46, %v2155_v51 }
 0xffe   :  { %v3227_v45 = vpop.f32.mrf.mxu0  ;;  %v3268_v22 = vpop.f32.mrf.mxu1 }
 0xfff   :  { %v6655_v41 = vmul.f32 -1.442695, %v3273_v21  ;;  %v3274_v50 = vadd.f32 %v3227_v45, %v2154_v24  ;;  %v3276_v6 = vadd.f32 %v3268_v22, %v2156_v36 }
0x1000   :  { %v3229_v49 = vpop.f32.mrf.mxu0  ;;  %v3270_v23 = vpop.f32.mrf.mxu1 }
0x1001   :  { %7331 = vpow2.f32 %v6655_v41  ;;  %v6656_v0 = vmul.f32 -1.442695, %v3274_v50  ;;  %v6657_v55 = vmul.f32 -1.442695, %v3276_v6 }
0x1002   :  { %v3230_v2 = vpop.f32.mrf.mxu0  ;;  %v3271_v26 = vpop.f32.mrf.mxu1 }
0x1003   :  { %7333 = vpow2.f32 %v6656_v0 }
0x1004   :  { %7335 = vtanh.f32 %v3275_v33 }
0x1005   :  { %7337 = vpow2.f32 %v6657_v55 }
0x100e   :  { %v7332_v48 = vpop.eup %7331 }
0x100f   :  { %v3280_v59 = vadd.f32 1.0, %v7332_v48 }
0x1010   :  { %v7334_v19 = vpop.eup %7333 }
0x1011   :  { %7339 = vrcp.f32 %v3280_v59  ;;  %v3286_v54 = vadd.f32 1.0, %v7334_v19  ;;  %v7336_v28 = vpop.eup %7335 }
0x1012   :  { %v7338_v53 = vpop.eup %7337 }
0x1013   :  { %7341 = vrcp.f32 %v3286_v54  ;;  %v3293_v58 = vadd.f32 1.0, %v7338_v53 }
0x1015   :  { %7343 = vrcp.f32 %v3293_v58 }
0x101e   :  { %v7340_v8 = vpop.eup %7339 }
0x101f   :  { %v3297_v62 = vmul.f32 %v7340_v8, %v7336_v28 }
0x1020   :  { %v7342_v7 = vpop.eup %7341 }
0x1021   :  { %v3296_v56 = vmul.f32 %v7342_v7, %v3181_v16 }
0x1022   :  { %v7344_v52 = vpop.eup %7343 }
0x1023   :  { %v3298_v30 = vadd.f32 %v3297_v62, %v3296_v56 }
0x1025   :  { %7345 = vtanh.f32 %v3298_v30 }
0x1032   :  { %v7346_v10 = vpop.eup %7345 }
0x1033   :  { %v9464_v60 = vmul.f32 %v7346_v10, %v7344_v52 }
0x1034   :  { %8007 = dma.done.wait [#allocation9], 8192 }
0x1035   :  { %8008 = vsyncadd [#allocation9], 4294959104 }
0x1036   :  { %8009 = dma.done.wait [#allocation9 + $0x1], 8192 }
0x1037   :  { %8010 = vsyncadd [#allocation9 + $0x1], 4294959104 }
0x1038   :  { %8011 = dma.done.wait [#allocation9 + $0x2], 128 }
0x1039   :  { %8012 = vsyncadd [#allocation9 + $0x2], 4294967168  ;;  %3584 = vmatprep.mubr.bf16.mxu0 %v10706_v18  ;;  %3657 = vmatprep.mubr.bf16.mxu1 %v10706_v18  ;;  %v7411_v12 = vld [vmem:[#allocation6 + $0xe4] ss:$16 sps:$4 sm:$0xff]   ;;  %v7413_v61 = vld [vmem:[#allocation6 + $0xec] ss:$16 sps:$4 sm:$0xff]   ;;  %v6869_v17 = vpack.c.bf16 %v9104_v39, %v9047_v57  ;;  %v6872_v59 = vpack.c.bf16 %v9222_v43, %v9164_v44  ;;  %v6875_v30 = vpack.c.bf16 %v9396_v27, %v9280_v42 }
0x103a   :  { %3552 = vmatprep.subr.bf16.mxu0 %v7411_v12  ;;  %v7415_v13 = vld [vmem:[#allocation6 + $0xe0] ss:$16 sps:$4 sm:$0xff]   ;;  %v7416_v63 = vld [vmem:[#allocation6 + $0xe8] ss:$16 sps:$4 sm:$0xff]   ;;  %3625 = vmatprep.subr.bf16.mxu1 %v7413_v61  ;;  %v7417_v14 = vld [vmem:[#allocation6 + $0xc4] ss:$16 sps:$4 sm:$0xff]  }
0x103b   :  { %3553 = vmatpush1.bf16.msra.mxu0 %v7415_v13  ;;  %3626 = vmatpush1.bf16.msra.mxu1 %v7416_v63  ;;  %v7419_v15 = vld [vmem:[#allocation6 + $0xcc] ss:$16 sps:$4 sm:$0xff]   ;;  %v7421_v1 = vld [vmem:[#allocation6 + $0xc0] ss:$16 sps:$4 sm:$0xff]   ;;  %v7422_v3 = vld [vmem:[#allocation6 + $0xc8] ss:$16 sps:$4 sm:$0xff]  }
0x103c   :  { %3554 = vmatprep.subr.bf16.mxu0 %v7417_v14  ;;  %3627 = vmatprep.subr.bf16.mxu1 %v7419_v15  ;;  %v7423_v40 = vld [vmem:[#allocation6 + $0xa4] ss:$16 sps:$4 sm:$0xff]   ;;  %v7425_v20 = vld [vmem:[#allocation6 + $0xac] ss:$16 sps:$4 sm:$0xff]   ;;  %v7427_v5 = vld [vmem:[#allocation6 + $0xa0] ss:$16 sps:$4 sm:$0xff]   ;;  %v6878_v15 = vpack.c.bf16 %v9464_v60, %v9450_v37 }
0x103d   :  { %v7428_v4 = vld [vmem:[#allocation6 + $0xa8] ss:$16 sps:$4 sm:$0xff]   ;;  %v7429_v9 = vld [vmem:[#allocation6 + $0x84] ss:$16 sps:$4 sm:$0xff]   ;;  %v7431_v16 = vld [vmem:[#allocation6 + $0x8c] ss:$16 sps:$4 sm:$0xff]  }
0x103e   :  { %v7433_v32 = vld [vmem:[#allocation6 + $0x80] ss:$16 sps:$4 sm:$0xff]   ;;  %v7434_v11 = vld [vmem:[#allocation6 + $0x88] ss:$16 sps:$4 sm:$0xff]   ;;  %v7435_v47 = vld [vmem:[#allocation6 + $0x64] ss:$16 sps:$4 sm:$0xff]  }
0x103f   :  { %3555 = vmatpush1.bf16.msra.mxu0 %v7421_v1  ;;  %3628 = vmatpush1.bf16.msra.mxu1 %v7422_v3  ;;  %v7437_v25 = vld [vmem:[#allocation6 + $0x6c] ss:$16 sps:$4 sm:$0xff]   ;;  %v7439_v31 = vld [vmem:[#allocation6 + $0x60] ss:$16 sps:$4 sm:$0xff]   ;;  %v7440_v34 = vld [vmem:[#allocation6 + $0x68] ss:$16 sps:$4 sm:$0xff]  }
0x1040   :  { %3556 = vmatprep.subr.bf16.mxu0 %v7423_v40  ;;  %3629 = vmatprep.subr.bf16.mxu1 %v7425_v20  ;;  %v7441_v35 = vld [vmem:[#allocation6 + $0x44] ss:$16 sps:$4 sm:$0xff]   ;;  %v7443_v46 = vld [vmem:[#allocation6 + $0x4c] ss:$16 sps:$4 sm:$0xff]   ;;  %v7445_v38 = vld [vmem:[#allocation6 + $0x40] ss:$16 sps:$4 sm:$0xff]  }
0x1041   :  { %v7446_v24 = vld [vmem:[#allocation6 + $0x48] ss:$16 sps:$4 sm:$0xff]   ;;  %v7447_v21 = vld [vmem:[#allocation6 + $0x24] ss:$16 sps:$4 sm:$0xff]   ;;  %v7449_v45 = vld [vmem:[#allocation6 + $0x2c] ss:$16 sps:$4 sm:$0xff]  }
0x1042   :  { %v7451_v22 = vld [vmem:[#allocation6 + $0x20] ss:$16 sps:$4 sm:$0xff]   ;;  %v7452_v41 = vld [vmem:[#allocation6 + $0x28] ss:$16 sps:$4 sm:$0xff]   ;;  %v7453_v50 = vld [vmem:[#allocation6 + $0x4] ss:$16 sps:$4 sm:$0xff]  }
0x1043   :  { %3557 = vmatpush1.bf16.msra.mxu0 %v7427_v5  ;;  %3630 = vmatpush1.bf16.msra.mxu1 %v7428_v4  ;;  %v7455_v49 = vld [vmem:[#allocation6 + $0xc] ss:$16 sps:$4 sm:$0xff]   ;;  %v7457_v23 = vld [vmem:[#allocation6] ss:$16 sps:$4 sm:$0xff]   ;;  %v7458_v0 = vld [vmem:[#allocation6 + $0x8] ss:$16 sps:$4 sm:$0xff]  }
0x1044   :  { %3558 = vmatprep.subr.bf16.mxu0 %v7429_v9  ;;  %3631 = vmatprep.subr.bf16.mxu1 %v7431_v16  ;;  %v9468_v2 = vld [vmem:[#allocation7 + $0xe4] ss:$16 sps:$4 sm:$0xff]   ;;  %v9470_v26 = vld [vmem:[#allocation7 + $0xec] ss:$16 sps:$4 sm:$0xff]   ;;  %v9474_v36 = vld [vmem:[#allocation7 + $0xe0] ss:$16 sps:$4 sm:$0xff]  }
0x1045   :  { %v9476_v6 = vld [vmem:[#allocation7 + $0xe8] ss:$16 sps:$4 sm:$0xff]   ;;  %v9478_v29 = vld [vmem:[#allocation7 + $0xc4] ss:$16 sps:$4 sm:$0xff]   ;;  %v9482_v51 = vld [vmem:[#allocation7 + $0xcc] ss:$16 sps:$4 sm:$0xff]  }
0x1046   :  { %v9488_v57 = vld [vmem:[#allocation7 + $0xc0] ss:$16 sps:$4 sm:$0xff]   ;;  %v9492_v39 = vld [vmem:[#allocation7 + $0xc8] ss:$16 sps:$4 sm:$0xff]   ;;  %v9494_v55 = vld [vmem:[#allocation7 + $0xa4] ss:$16 sps:$4 sm:$0xff]  }
0x1047   :  { %3559 = vmatpush1.bf16.msra.mxu0 %v7433_v32  ;;  %3632 = vmatpush1.bf16.msra.mxu1 %v7434_v11  ;;  %v9498_v48 = vld [vmem:[#allocation7 + $0xac] ss:$16 sps:$4 sm:$0xff]   ;;  %v9504_v19 = vld [vmem:[#allocation7 + $0xa0] ss:$16 sps:$4 sm:$0xff]   ;;  %v9506_v54 = vld [vmem:[#allocation7 + $0xa8] ss:$16 sps:$4 sm:$0xff]  }
0x1048   :  { %3560 = vmatprep.subr.bf16.mxu0 %v7435_v47  ;;  %3633 = vmatprep.subr.bf16.mxu1 %v7437_v25  ;;  %v9510_v28 = vld [vmem:[#allocation7 + $0x84] ss:$16 sps:$4 sm:$0xff]   ;;  %v9514_v53 = vld [vmem:[#allocation7 + $0x8c] ss:$16 sps:$4 sm:$0xff]   ;;  %v9516_v8 = vld [vmem:[#allocation7 + $0x80] ss:$16 sps:$4 sm:$0xff]  }
0x1049   :  { %v9518_v62 = vld [vmem:[#allocation7 + $0x88] ss:$16 sps:$4 sm:$0xff]   ;;  %v9524_v43 = vld [vmem:[#allocation7 + $0x64] ss:$16 sps:$4 sm:$0xff]   ;;  %v9526_v7 = vld [vmem:[#allocation7 + $0x6c] ss:$16 sps:$4 sm:$0xff]  }
0x104a   :  { %v9534_v58 = vld [vmem:[#allocation7 + $0x60] ss:$16 sps:$4 sm:$0xff]   ;;  %v9536_v56 = vld [vmem:[#allocation7 + $0x68] ss:$16 sps:$4 sm:$0xff]   ;;  %v9540_v52 = vld [vmem:[#allocation7 + $0x44] ss:$16 sps:$4 sm:$0xff]  }
0x104b   :  { %3561 = vmatpush1.bf16.msra.mxu0 %v7439_v31  ;;  %3634 = vmatpush1.bf16.msra.mxu1 %v7440_v34  ;;  %v9542_v10 = vld [vmem:[#allocation7 + $0x4c] ss:$16 sps:$4 sm:$0xff]   ;;  %v9548_v12 = vld [vmem:[#allocation7 + $0x40] ss:$16 sps:$4 sm:$0xff]   ;;  %v9550_v61 = vld [vmem:[#allocation7 + $0x48] ss:$16 sps:$4 sm:$0xff]  }
0x104c   :  { %3562 = vmatprep.subr.bf16.mxu0 %v7441_v35  ;;  %3635 = vmatprep.subr.bf16.mxu1 %v7443_v46  ;;  %v9556_v42 = vld [vmem:[#allocation7 + $0x24] ss:$16 sps:$4 sm:$0xff]   ;;  %v9558_v27 = vld [vmem:[#allocation7 + $0x2c] ss:$16 sps:$4 sm:$0xff]   ;;  %v9566_v63 = vld [vmem:[#allocation7 + $0x20] ss:$16 sps:$4 sm:$0xff]  }
0x104d   :  { %v9568_v14 = vld [vmem:[#allocation7 + $0x28] ss:$16 sps:$4 sm:$0xff]   ;;  %v9572_v1 = vld [vmem:[#allocation7 + $0x4] ss:$16 sps:$4 sm:$0xff]   ;;  %v9574_v3 = vld [vmem:[#allocation7 + $0xc] ss:$16 sps:$4 sm:$0xff]  }
0x104e   :  { %v9580_v40 = vld [vmem:[#allocation7] ss:$16 sps:$4 sm:$0xff]   ;;  %v9582_v20 = vld [vmem:[#allocation7 + $0x8] ss:$16 sps:$4 sm:$0xff]  }
0x104f   :  { %3563 = vmatpush1.bf16.msra.mxu0 %v7445_v38  ;;  %3636 = vmatpush1.bf16.msra.mxu1 %v7446_v24  ;;  %v3379_v37 = vld [vmem:[#allocation8] sm:$0xf]  ;;  %v10794_v9 = vld [vmem:[#allocation26_spill] sm:$0xff]  ;;  %v10795_v47 = vld [vmem:[#allocation27_spill] sm:$0xff] }
0x1050   :  { %3564 = vmatprep.subr.bf16.mxu0 %v7447_v21  ;;  %3637 = vmatprep.subr.bf16.mxu1 %v7449_v45  ;;  %v9637_v16 = vrot.slane %v3379_v37, %v10794_v9  ;;  %v3702_v25 = vrot.slane %v3379_v37, %v10795_v47  ;;  %v10796_v31 = vld [vmem:[#allocation28_spill] sm:$0xff]  ;;  %v10797_v38 = vld [vmem:[#allocation29_spill] sm:$0xff] }
0x1051   :  { %v9645_v34 = vrot.slane %v3379_v37, %v10796_v31  ;;  %v3706_v24 = vrot.slane %v3379_v37, %v10797_v38 }
0x1053   :  { %3565 = vmatpush1.bf16.msra.mxu0 %v7451_v22  ;;  %3638 = vmatpush1.bf16.msra.mxu1 %v7452_v41 }
0x1054   :  { %3566 = vmatprep.subr.bf16.mxu0 %v7453_v50  ;;  %3639 = vmatprep.subr.bf16.mxu1 %v7455_v49 }
0x1057   :  { %3567 = vmatpush1.bf16.msra.mxu0 %v7457_v23  ;;  %3640 = vmatpush1.bf16.msra.mxu1 %v7458_v0 }
0x1058   :  { %3947 = vmatprep.subr.bf16.mxu0 %v9468_v2  ;;  %3988 = vmatprep.subr.bf16.mxu1 %v9470_v26 }
0x105a   :  { %6870 = vmatmul.mubr.msk.bf16.vlgmr.msra.gmra.mxu0 %vm8772_vm8, %v6869_v17  ;;  %6882 = vmatmul.mubr.msk.bf16.vlgmr.msra.gmra.mxu1 %vm8772_vm8, %v6869_v17 }
0x105b   :  { %3948 = vmatpush1.bf16.msra.mxu0 %v9474_v36  ;;  %3989 = vmatpush1.bf16.msra.mxu1 %v9476_v6 }
0x105c   :  { %3949 = vmatprep.subr.bf16.mxu0 %v9478_v29  ;;  %3990 = vmatprep.subr.bf16.mxu1 %v9482_v51 }
0x105d   :  { %3594 = vmatprep.mubr.bf16.mxu0 %v10706_v18  ;;  %3667 = vmatprep.mubr.bf16.mxu1 %v10706_v18 }
0x105f   :  { %3950 = vmatpush1.bf16.msra.mxu0 %v9488_v57  ;;  %3991 = vmatpush1.bf16.msra.mxu1 %v9492_v39 }
0x1060   :  { %3951 = vmatprep.subr.bf16.mxu0 %v9494_v55  ;;  %3992 = vmatprep.subr.bf16.mxu1 %v9498_v48 }
0x1062   :  { %6873 = vmatmul.mubr.msk.bf16.gmra.mxu0 %vm8788_vm9, %v6872_v59  ;;  %6885 = vmatmul.mubr.msk.bf16.gmra.mxu1 %vm8788_vm9, %v6872_v59 }
0x1063   :  { %3952 = vmatpush1.bf16.msra.mxu0 %v9504_v19  ;;  %3993 = vmatpush1.bf16.msra.mxu1 %v9506_v54 }
0x1064   :  { %3953 = vmatprep.subr.bf16.mxu0 %v9510_v28  ;;  %3994 = vmatprep.subr.bf16.mxu1 %v9514_v53 }
0x1065   :  { %3604 = vmatprep.mubr.bf16.mxu0 %v10706_v18  ;;  %3677 = vmatprep.mubr.bf16.mxu1 %v10706_v18 }
0x1067   :  { %3954 = vmatpush1.bf16.msra.mxu0 %v9516_v8  ;;  %3995 = vmatpush1.bf16.msra.mxu1 %v9518_v62 }
0x1068   :  { %3955 = vmatprep.subr.bf16.mxu0 %v9524_v43  ;;  %3996 = vmatprep.subr.bf16.mxu1 %v9526_v7 }
0x106a   :  { %6876 = vmatmul.mubr.msk.bf16.gmra.mxu0 %vm8804_vm10, %v6875_v30  ;;  %6888 = vmatmul.mubr.msk.bf16.gmra.mxu1 %vm8804_vm10, %v6875_v30 }
0x106b   :  { %3956 = vmatpush1.bf16.msra.mxu0 %v9534_v58  ;;  %3997 = vmatpush1.bf16.msra.mxu1 %v9536_v56 }
0x106c   :  { %3957 = vmatprep.subr.bf16.mxu0 %v9540_v52  ;;  %3998 = vmatprep.subr.bf16.mxu1 %v9542_v10 }
0x106d   :  { %3614 = vmatprep.mubr.bf16.mxu0 %v10706_v18  ;;  %3687 = vmatprep.mubr.bf16.mxu1 %v10706_v18 }
0x106f   :  { %3958 = vmatpush1.bf16.msra.mxu0 %v9548_v12  ;;  %3999 = vmatpush1.bf16.msra.mxu1 %v9550_v61 }
0x1070   :  { %3959 = vmatprep.subr.bf16.mxu0 %v9556_v42  ;;  %4000 = vmatprep.subr.bf16.mxu1 %v9558_v27 }
0x1072   :  { %6879 = vmatmul.mubr.msk.bf16.gmra.mxu0 %vm8922_vm12, %v6878_v15  ;;  %6891 = vmatmul.mubr.msk.bf16.gmra.mxu1 %vm8922_vm12, %v6878_v15 }
0x1073   :  { %3960 = vmatpush1.bf16.msra.mxu0 %v9566_v63  ;;  %4001 = vmatpush1.bf16.msra.mxu1 %v9568_v14 }
0x1074   :  { %3961 = vmatprep.subr.bf16.mxu0 %v9572_v1  ;;  %4002 = vmatprep.subr.bf16.mxu1 %v9574_v3 }
0x1075   :  { %3979 = vmatprep.mubr.bf16.mxu0 %v10706_v18  ;;  %4020 = vmatprep.mubr.bf16.mxu1 %v10706_v18 }
0x1077   :  { %3962 = vmatpush1.bf16.msra.mxu0 %v9580_v40  ;;  %4003 = vmatpush1.bf16.msra.mxu1 %v9582_v20 }
0x1078   :  { %4063 = vmatprep.subr.bf16.mxu0 %v9468_v2  ;;  %4104 = vmatprep.subr.bf16.mxu1 %v9470_v26 }
0x107a   :  { %3980 = vmatmul.mubr.bf16.vlgmr.msra.gmra.mxu0 %v10706_v18  ;;  %4021 = vmatmul.mubr.bf16.vlgmr.msra.gmra.mxu1 %v10706_v18 }
0x107b   :  { %4064 = vmatpush1.bf16.msra.mxu0 %v9474_v36  ;;  %4105 = vmatpush1.bf16.msra.mxu1 %v9476_v6 }
0x107c   :  { %4065 = vmatprep.subr.bf16.mxu0 %v9478_v29  ;;  %4106 = vmatprep.subr.bf16.mxu1 %v9482_v51 }
0x107d   :  { %4095 = vmatprep.mubr.bf16.mxu0 %v10706_v18  ;;  %4136 = vmatprep.mubr.bf16.mxu1 %v10706_v18 }
0x107f   :  { %4066 = vmatpush1.bf16.msra.mxu0 %v9488_v57  ;;  %4107 = vmatpush1.bf16.msra.mxu1 %v9492_v39 }
0x1080   :  { %4067 = vmatprep.subr.bf16.mxu0 %v9494_v55  ;;  %4108 = vmatprep.subr.bf16.mxu1 %v9498_v48 }
0x1083   :  { %4068 = vmatpush1.bf16.msra.mxu0 %v9504_v19  ;;  %4109 = vmatpush1.bf16.msra.mxu1 %v9506_v54 }
0x1084   :  { %4069 = vmatprep.subr.bf16.mxu0 %v9510_v28  ;;  %4110 = vmatprep.subr.bf16.mxu1 %v9514_v53 }
0x1087   :  { %4070 = vmatpush1.bf16.msra.mxu0 %v9516_v8  ;;  %4111 = vmatpush1.bf16.msra.mxu1 %v9518_v62 }
0x1088   :  { %4071 = vmatprep.subr.bf16.mxu0 %v9524_v43  ;;  %4112 = vmatprep.subr.bf16.mxu1 %v9526_v7 }
0x108b   :  { %4072 = vmatpush1.bf16.msra.mxu0 %v9534_v58  ;;  %4113 = vmatpush1.bf16.msra.mxu1 %v9536_v56 }
0x108c   :  { %4073 = vmatprep.subr.bf16.mxu0 %v9540_v52  ;;  %4114 = vmatprep.subr.bf16.mxu1 %v9542_v10 }
0x108f   :  { %4074 = vmatpush1.bf16.msra.mxu0 %v9548_v12  ;;  %4115 = vmatpush1.bf16.msra.mxu1 %v9550_v61 }
0x1090   :  { %4075 = vmatprep.subr.bf16.mxu0 %v9556_v42  ;;  %4116 = vmatprep.subr.bf16.mxu1 %v9558_v27 }
0x1093   :  { %4076 = vmatpush1.bf16.msra.mxu0 %v9566_v63  ;;  %4117 = vmatpush1.bf16.msra.mxu1 %v9568_v14 }
0x1094   :  { %4077 = vmatprep.subr.bf16.mxu0 %v9572_v1  ;;  %4118 = vmatprep.subr.bf16.mxu1 %v9574_v3 }
0x1097   :  { %4078 = vmatpush1.bf16.msra.mxu0 %v9580_v40  ;;  %4119 = vmatpush1.bf16.msra.mxu1 %v9582_v20 }
0x1098   :  { %4179 = vmatprep.subr.bf16.mxu0 %v9468_v2  ;;  %4220 = vmatprep.subr.bf16.mxu1 %v9470_v26 }
0x111a   :  { %v3586_v60 = vpop.f32.mrf.mxu0  ;;  %v9634_v4 = vpop.f32.mrf.mxu1 }
0x111c   :  { %v9639_v32 = vpop.f32.mrf.mxu0  ;;  %v9641_v11 = vpop.f32.mrf.mxu1 }
0x111e   :  { %v3590_v35 = vpop.f32.mrf.mxu0  ;;  %v3663_v46 = vpop.f32.mrf.mxu1 }
0x111f   :  { %v9648_v21 = vadd.f32 %v3702_v25, %v3590_v35  ;;  %v9651_v45 = vadd.f32 %v9637_v16, %v3663_v46 }
0x1120   :  { %v3592_v22 = vpop.f32.mrf.mxu0  ;;  %v3665_v41 = vpop.f32.mrf.mxu1 }
0x1121   :  { %v9653_v50 = vadd.f32 %v3706_v24, %v3592_v22  ;;  %v9656_v49 = vadd.f32 %v9645_v34, %v3665_v41 }
0x1122   :  { %v3596_v23 = vpop.f32.mrf.mxu0  ;;  %v3669_v0 = vpop.f32.mrf.mxu1 }
0x1123   :  { %v9658_v17 = vadd.f32 %v3702_v25, %v3596_v23  ;;  %v9661_v33 = vadd.f32 %v9637_v16, %v3669_v0 }
0x1124   :  { %v3598_v59 = vpop.f32.mrf.mxu0  ;;  %v3671_v44 = vpop.f32.mrf.mxu1 }
0x1125   :  { %10798 = vst [vmem:[#allocation32_spill] sm:$0xff] %v9661_v33  ;;  %v9663_v30 = vadd.f32 %v3706_v24, %v3598_v59  ;;  %v9666_v13 = vadd.f32 %v9645_v34, %v3671_v44 }
0x1126   :  { %v3600_v15 = vpop.f32.mrf.mxu0  ;;  %v3673_v5 = vpop.f32.mrf.mxu1 }
0x1127   :  { %10799 = vst [vmem:[#allocation37_spill] sm:$0xff] %v9666_v13  ;;  %v9668_v37 = vadd.f32 %v3702_v25, %v3600_v15  ;;  %v9671_v35 = vadd.f32 %v9637_v16, %v3673_v5 }
0x1128   :  { %v3602_v46 = vpop.f32.mrf.mxu0  ;;  %v3675_v22 = vpop.f32.mrf.mxu1 }
0x1129   :  { %10800 = vst [vmem:[#allocation38_spill] sm:$0xff] %v9668_v37  ;;  %10801 = vst [vmem:[#allocation35_spill] sm:$0xff] %v9671_v35  ;;  %v9673_v41 = vadd.f32 %v3706_v24, %v3602_v46  ;;  %v9676_v23 = vadd.f32 %v9645_v34, %v3675_v22 }
0x112a   :  { %v3606_v0 = vpop.f32.mrf.mxu0  ;;  %v3679_v59 = vpop.f32.mrf.mxu1 }
0x112b   :  { %10802 = vst [vmem:[#allocation36_spill] sm:$0xff] %v9673_v41  ;;  %10803 = vst [vmem:[#allocation41_spill] sm:$0xff] %v9676_v23  ;;  %v9678_v9 = vadd.f32 %v3702_v25, %v3606_v0  ;;  %v9681_v44 = vadd.f32 %v9637_v16, %v3679_v59 }
0x112c   :  { %v3608_v31 = vpop.f32.mrf.mxu0  ;;  %v3681_v15 = vpop.f32.mrf.mxu1 }
0x112d   :  { %10804 = vst [vmem:[#allocation42_spill] sm:$0xff] %v9678_v9  ;;  %10805 = vst [vmem:[#allocation39_spill] sm:$0xff] %v9681_v44  ;;  %v9683_v38 = vadd.f32 %v3706_v24, %v3608_v31  ;;  %v9686_v5 = vadd.f32 %v9645_v34, %v3681_v15 }
0x112e   :  { %v3610_v47 = vpop.f32.mrf.mxu0  ;;  %v3683_v46 = vpop.f32.mrf.mxu1 }
0x112f   :  { %10806 = vst [vmem:[#allocation40_spill] sm:$0xff] %v9683_v38  ;;  %10807 = vst [vmem:[#allocation45_spill] sm:$0xff] %v9686_v5  ;;  %v9688_v35 = vadd.f32 %v3702_v25, %v3610_v47  ;;  %v9691_v22 = vadd.f32 %v9637_v16, %v3683_v46 }
0x1130   :  { %v3612_v23 = vpop.f32.mrf.mxu0  ;;  %v3685_v0 = vpop.f32.mrf.mxu1 }
0x1131   :  { %10808 = vst [vmem:[#allocation46_spill] sm:$0xff] %v9688_v35  ;;  %10809 = vst [vmem:[#allocation43_spill] sm:$0xff] %v9691_v22  ;;  %v9693_v9 = vadd.f32 %v3706_v24, %v3612_v23  ;;  %v9696_v59 = vadd.f32 %v9645_v34, %v3685_v0 }
0x1132   :  { %v3616_v44 = vpop.f32.mrf.mxu0  ;;  %v3689_v31 = vpop.f32.mrf.mxu1 }
0x1133   :  { %10810 = vst [vmem:[#allocation44_spill] sm:$0xff] %v9693_v9  ;;  %10811 = vst [vmem:[#allocation48_spill] sm:$0xff] %v9696_v59  ;;  %v9698_v38 = vadd.f32 %v3702_v25, %v3616_v44  ;;  %v9701_v15 = vadd.f32 %v9637_v16, %v3689_v31 }
0x1134   :  { %v3618_v5 = vpop.f32.mrf.mxu0  ;;  %v3691_v47 = vpop.f32.mrf.mxu1 }
0x1135   :  { %10812 = vst [vmem:[#allocation49_spill] sm:$0xff] %v9698_v38  ;;  %10813 = vst [vmem:[#allocation47_spill] sm:$0xff] %v9701_v15  ;;  %v9703_v35 = vadd.f32 %v3706_v24, %v3618_v5  ;;  %v9706_v46 = vadd.f32 %v9645_v34, %v3691_v47  ;;  %v3719_v38 = vadd.f32 %v3702_v25, %v3586_v60 }
0x1136   :  { %v3620_v22 = vpop.f32.mrf.mxu0  ;;  %v3693_v23 = vpop.f32.mrf.mxu1  ;;  %v3720_v47 = vadd.f32 %v3706_v24, %v9639_v32 }
0x1137   :  { %10814 = vst [vmem:[#allocation50_spill] sm:$0xff] %v9703_v35  ;;  %10815 = vst [vmem:[#allocation52_spill] sm:$0xff] %v9706_v46  ;;  %v9708_v9 = vadd.f32 %v3702_v25, %v3620_v22  ;;  %v9711_v0 = vadd.f32 %v9637_v16, %v3693_v23  ;;  %v3722_v25 = vadd.f32 %v9645_v34, %v9641_v11 }
0x1138   :  { %v3622_v59 = vpop.f32.mrf.mxu0  ;;  %v3695_v44 = vpop.f32.mrf.mxu1 }
0x1139   :  { %10816 = vst [vmem:[#allocation53_spill] sm:$0xff] %v9708_v9  ;;  %10817 = vst [vmem:[#allocation51_spill] sm:$0xff] %v9711_v0  ;;  %v9713_v41 = vadd.f32 %v3706_v24, %v3622_v59  ;;  %v9716_v31 = vadd.f32 %v9645_v34, %v3695_v44  ;;  %v3721_v44 = vadd.f32 %v9637_v16, %v9634_v4 }
0x113a   :  { %v3981_v5 = vpop.f32.mrf.mxu0  ;;  %v4022_v15 = vpop.f32.mrf.mxu1 }
0x113b   :  { %v4029_v46 = vadd.f32 %v3981_v5, %v3719_v38  ;;  %v4031_v24 = vadd.f32 %v4022_v15, %v3721_v44 }
0x113c   :  { %v3983_v35 = vpop.f32.mrf.mxu0  ;;  %v4024_v37 = vpop.f32.mrf.mxu1 }
0x113d   :  { %v6722_v22 = vmul.f32 -1.442695, %v4029_v46  ;;  %v4030_v9 = vadd.f32 %v3983_v35, %v3720_v47  ;;  %v4032_v59 = vadd.f32 %v4024_v37, %v3722_v25 }
0x113e   :  { %v3985_v33 = vpop.f32.mrf.mxu0  ;;  %v4026_v23 = vpop.f32.mrf.mxu1 }
0x113f   :  { %7603 = vpow2.f32 %v6722_v22  ;;  %v6723_v0 = vmul.f32 -1.442695, %v4030_v9  ;;  %v6724_v32 = vmul.f32 -1.442695, %v4032_v59 }
0x1140   :  { %v3986_v13 = vpop.f32.mrf.mxu0  ;;  %v4027_v60 = vpop.f32.mrf.mxu1 }
0x1141   :  { %7605 = vpow2.f32 %v6723_v0 }
0x1142   :  { %7607 = vpow2.f32 %v6724_v32 }
0x114c   :  { %v7604_v38 = vpop.eup %7603 }
0x114d   :  { %v4036_v5 = vadd.f32 1.0, %v7604_v38 }
0x114e   :  { %v7606_v46 = vpop.eup %7605 }
0x114f   :  { %7609 = vrcp.f32 %v4036_v5  ;;  %v4042_v33 = vadd.f32 1.0, %v7606_v46  ;;  %v7608_v9 = vpop.eup %7607 }
0x1150   :  { %7611 = vtanh.f32 %v4031_v24  ;;  %v4049_v47 = vadd.f32 1.0, %v7608_v9 }
0x1151   :  { %7613 = vrcp.f32 %v4042_v33 }
0x1152   :  { %7615 = vrcp.f32 %v4049_v47 }
0x115c   :  { %v7610_v13 = vpop.eup %7609 }
0x115d   :  { %v7612_v35 = vpop.eup %7611 }
0x115e   :  { %v7614_v0 = vpop.eup %7613  ;;  %v4053_v34 = vmul.f32 %v7612_v35, %v7610_v13 }
0x115f   :  { %v4052_v11 = vmul.f32 0.0, %v7614_v0  ;;  %v7616_v4 = vpop.eup %7615 }
0x1161   :  { %v9723_v37 = vadd.f32 %v4053_v34, %v4052_v11 }
0x1163   :  { %7617 = vtanh.f32 %v9723_v37 }
0x1170   :  { %v7618_v16 = vpop.eup %7617 }
0x1171   :  { %v9726_v15 = vmul.f32 %v7618_v16, %v7616_v4 }
0x1173   :  { %v4062_v22 = vpack.c.bf16 %v9726_v15, %v9726_v15 }
0x1175   :  { %4096 = vmatmul.mubr.bf16.vlgmr.msra.gmra.mxu0 %v4062_v22  ;;  %4137 = vmatmul.mubr.bf16.vlgmr.msra.gmra.mxu1 %v4062_v22 }
0x1176   :  { %4180 = vmatpush1.bf16.msra.mxu0 %v9474_v36  ;;  %4221 = vmatpush1.bf16.msra.mxu1 %v9476_v6 }
0x1177   :  { %4181 = vmatprep.subr.bf16.mxu0 %v9478_v29  ;;  %4222 = vmatprep.subr.bf16.mxu1 %v9482_v51 }
0x1178   :  { %4211 = vmatprep.mubr.bf16.mxu0 %v10706_v18  ;;  %4252 = vmatprep.mubr.bf16.mxu1 %v10706_v18 }
0x117a   :  { %4182 = vmatpush1.bf16.msra.mxu0 %v9488_v57  ;;  %4223 = vmatpush1.bf16.msra.mxu1 %v9492_v39 }
0x117b   :  { %4183 = vmatprep.subr.bf16.mxu0 %v9494_v55  ;;  %4224 = vmatprep.subr.bf16.mxu1 %v9498_v48 }
0x117e   :  { %4184 = vmatpush1.bf16.msra.mxu0 %v9504_v19  ;;  %4225 = vmatpush1.bf16.msra.mxu1 %v9506_v54 }
0x117f   :  { %4185 = vmatprep.subr.bf16.mxu0 %v9510_v28  ;;  %4226 = vmatprep.subr.bf16.mxu1 %v9514_v53 }
0x1182   :  { %4186 = vmatpush1.bf16.msra.mxu0 %v9516_v8  ;;  %4227 = vmatpush1.bf16.msra.mxu1 %v9518_v62 }
0x1183   :  { %4187 = vmatprep.subr.bf16.mxu0 %v9524_v43  ;;  %4228 = vmatprep.subr.bf16.mxu1 %v9526_v7 }
0x1186   :  { %4188 = vmatpush1.bf16.msra.mxu0 %v9534_v58  ;;  %4229 = vmatpush1.bf16.msra.mxu1 %v9536_v56 }
0x1187   :  { %4189 = vmatprep.subr.bf16.mxu0 %v9540_v52  ;;  %4230 = vmatprep.subr.bf16.mxu1 %v9542_v10 }
0x118a   :  { %4190 = vmatpush1.bf16.msra.mxu0 %v9548_v12  ;;  %4231 = vmatpush1.bf16.msra.mxu1 %v9550_v61 }
0x118b   :  { %4191 = vmatprep.subr.bf16.mxu0 %v9556_v42  ;;  %4232 = vmatprep.subr.bf16.mxu1 %v9558_v27 }
0x118e   :  { %4192 = vmatpush1.bf16.msra.mxu0 %v9566_v63  ;;  %4233 = vmatpush1.bf16.msra.mxu1 %v9568_v14 }
0x118f   :  { %4193 = vmatprep.subr.bf16.mxu0 %v9572_v1  ;;  %4234 = vmatprep.subr.bf16.mxu1 %v9574_v3 }
0x1192   :  { %4194 = vmatpush1.bf16.msra.mxu0 %v9580_v40  ;;  %4235 = vmatpush1.bf16.msra.mxu1 %v9582_v20 }
0x1193   :  { %4295 = vmatprep.subr.bf16.mxu0 %v9468_v2  ;;  %4336 = vmatprep.subr.bf16.mxu1 %v9470_v26 }
0x1235   :  { %v4097_v23 = vpop.f32.mrf.mxu0  ;;  %v4138_v60 = vpop.f32.mrf.mxu1 }
0x1236   :  { %v4145_v25 = vadd.f32 %v4097_v23, %v9648_v21  ;;  %v4147_v35 = vadd.f32 %v4138_v60, %v9651_v45 }
0x1237   :  { %v4099_v59 = vpop.f32.mrf.mxu0  ;;  %v4140_v44 = vpop.f32.mrf.mxu1 }
0x1238   :  { %v6725_v32 = vmul.f32 -1.442695, %v4145_v25  ;;  %v4146_v38 = vadd.f32 %v4099_v59, %v9653_v50  ;;  %v4148_v13 = vadd.f32 %v4140_v44, %v9656_v49 }
0x1239   :  { %v4101_v24 = vpop.f32.mrf.mxu0  ;;  %v4142_v5 = vpop.f32.mrf.mxu1 }
0x123a   :  { %7619 = vpow2.f32 %v6725_v32  ;;  %v6726_v46 = vmul.f32 -1.442695, %v4146_v38  ;;  %v6727_v0 = vmul.f32 -1.442695, %v4148_v13 }
0x123b   :  { %v4102_v33 = vpop.f32.mrf.mxu0  ;;  %v4143_v9 = vpop.f32.mrf.mxu1 }
0x123c   :  { %7621 = vpow2.f32 %v6726_v46 }
0x123d   :  { %7623 = vtanh.f32 %v4147_v35 }
0x123e   :  { %7625 = vpow2.f32 %v6727_v0 }
0x1247   :  { %v7620_v47 = vpop.eup %7619 }
0x1248   :  { %v4152_v11 = vadd.f32 1.0, %v7620_v47 }
0x1249   :  { %v7622_v21 = vpop.eup %7621 }
0x124a   :  { %7627 = vrcp.f32 %v4152_v11  ;;  %v4158_v34 = vadd.f32 1.0, %v7622_v21  ;;  %v7624_v50 = vpop.eup %7623  ;;  %v10818_v21 = vld [vmem:[#allocation37_spill] sm:$0xff] }
0x124b   :  { %v7626_v4 = vpop.eup %7625 }
0x124c   :  { %7629 = vrcp.f32 %v4158_v34  ;;  %v4165_v25 = vadd.f32 1.0, %v7626_v4 }
0x124e   :  { %7631 = vrcp.f32 %v4165_v25 }
0x1257   :  { %v7628_v16 = vpop.eup %7627 }
0x1258   :  { %v4169_v22 = vmul.f32 %v7628_v16, %v7624_v50  ;;  %v10819_v50 = vld [vmem:[#allocation32_spill] sm:$0xff] }
0x1259   :  { %v7630_v23 = vpop.eup %7629 }
0x125a   :  { %v4168_v59 = vmul.f32 %v7630_v23, %v9723_v37 }
0x125b   :  { %v7632_v45 = vpop.eup %7631 }
0x125c   :  { %v9769_v49 = vadd.f32 %v4169_v22, %v4168_v59 }
0x125e   :  { %7633 = vtanh.f32 %v9769_v49 }
0x126b   :  { %v7634_v60 = vpop.eup %7633 }
0x126c   :  { %v9772_v44 = vmul.f32 %v7634_v60, %v7632_v45 }
0x126e   :  { %v4178_v32 = vpack.c.bf16 %v9772_v44, %v9772_v44 }
0x1270   :  { %4212 = vmatmul.mubr.bf16.vlgmr.msra.gmra.mxu0 %v4178_v32  ;;  %4253 = vmatmul.mubr.bf16.vlgmr.msra.gmra.mxu1 %v4178_v32 }
0x1271   :  { %4296 = vmatpush1.bf16.msra.mxu0 %v9474_v36  ;;  %4337 = vmatpush1.bf16.msra.mxu1 %v9476_v6 }
0x1272   :  { %4297 = vmatprep.subr.bf16.mxu0 %v9478_v29  ;;  %4338 = vmatprep.subr.bf16.mxu1 %v9482_v51 }
0x1273   :  { %4327 = vmatprep.mubr.bf16.mxu0 %v10706_v18  ;;  %4368 = vmatprep.mubr.bf16.mxu1 %v10706_v18 }
0x1275   :  { %4298 = vmatpush1.bf16.msra.mxu0 %v9488_v57  ;;  %4339 = vmatpush1.bf16.msra.mxu1 %v9492_v39 }
0x1276   :  { %4299 = vmatprep.subr.bf16.mxu0 %v9494_v55  ;;  %4340 = vmatprep.subr.bf16.mxu1 %v9498_v48 }
0x1279   :  { %4300 = vmatpush1.bf16.msra.mxu0 %v9504_v19  ;;  %4341 = vmatpush1.bf16.msra.mxu1 %v9506_v54 }
0x127a   :  { %4301 = vmatprep.subr.bf16.mxu0 %v9510_v28  ;;  %4342 = vmatprep.subr.bf16.mxu1 %v9514_v53 }
0x127d   :  { %4302 = vmatpush1.bf16.msra.mxu0 %v9516_v8  ;;  %4343 = vmatpush1.bf16.msra.mxu1 %v9518_v62 }
0x127e   :  { %4303 = vmatprep.subr.bf16.mxu0 %v9524_v43  ;;  %4344 = vmatprep.subr.bf16.mxu1 %v9526_v7 }
0x1281   :  { %4304 = vmatpush1.bf16.msra.mxu0 %v9534_v58  ;;  %4345 = vmatpush1.bf16.msra.mxu1 %v9536_v56 }
0x1282   :  { %4305 = vmatprep.subr.bf16.mxu0 %v9540_v52  ;;  %4346 = vmatprep.subr.bf16.mxu1 %v9542_v10 }
0x1285   :  { %4306 = vmatpush1.bf16.msra.mxu0 %v9548_v12  ;;  %4347 = vmatpush1.bf16.msra.mxu1 %v9550_v61 }
0x1286   :  { %4307 = vmatprep.subr.bf16.mxu0 %v9556_v42  ;;  %4348 = vmatprep.subr.bf16.mxu1 %v9558_v27 }
0x1289   :  { %4308 = vmatpush1.bf16.msra.mxu0 %v9566_v63  ;;  %4349 = vmatpush1.bf16.msra.mxu1 %v9568_v14 }
0x128a   :  { %4309 = vmatprep.subr.bf16.mxu0 %v9572_v1  ;;  %4350 = vmatprep.subr.bf16.mxu1 %v9574_v3 }
0x128d   :  { %4310 = vmatpush1.bf16.msra.mxu0 %v9580_v40  ;;  %4351 = vmatpush1.bf16.msra.mxu1 %v9582_v20 }
0x128e   :  { %4411 = vmatprep.subr.bf16.mxu0 %v9468_v2  ;;  %4452 = vmatprep.subr.bf16.mxu1 %v9470_v26 }
0x1330   :  { %v4213_v37 = vpop.f32.mrf.mxu0  ;;  %v4254_v38 = vpop.f32.mrf.mxu1 }
0x1331   :  { %v4261_v24 = vadd.f32 %v4213_v37, %v9658_v17  ;;  %v4263_v4 = vadd.f32 %v4254_v38, %v10819_v50 }
0x1332   :  { %v4215_v5 = vpop.f32.mrf.mxu0  ;;  %v4256_v46 = vpop.f32.mrf.mxu1 }
0x1333   :  { %v6728_v33 = vmul.f32 -1.442695, %v4261_v24  ;;  %v4262_v9 = vadd.f32 %v4215_v5, %v9663_v30  ;;  %v4264_v34 = vadd.f32 %v4256_v46, %v10818_v21 }
0x1334   :  { %v4217_v13 = vpop.f32.mrf.mxu0  ;;  %v4258_v35 = vpop.f32.mrf.mxu1 }
0x1335   :  { %7635 = vpow2.f32 %v6728_v33  ;;  %v6729_v0 = vmul.f32 -1.442695, %v4262_v9  ;;  %v6730_v16 = vmul.f32 -1.442695, %v4264_v34 }
0x1336   :  { %v4218_v47 = vpop.f32.mrf.mxu0  ;;  %v4259_v11 = vpop.f32.mrf.mxu1 }
0x1337   :  { %7637 = vpow2.f32 %v6729_v0  ;;  %v10822_v47 = vld [vmem:[#allocation41_spill] sm:$0xff]  ;;  %v10823_v11 = vld [vmem:[#allocation35_spill] sm:$0xff] }
0x1338   :  { %7639 = vtanh.f32 %v4263_v4 }
0x1339   :  { %7641 = vpow2.f32 %v6730_v16 }
0x1342   :  { %v7636_v22 = vpop.eup %7635 }
0x1343   :  { %v4268_v23 = vadd.f32 1.0, %v7636_v22 }
0x1344   :  { %v7638_v17 = vpop.eup %7637 }
0x1345   :  { %7643 = vrcp.f32 %v4268_v23  ;;  %v4274_v25 = vadd.f32 1.0, %v7638_v17  ;;  %v7640_v30 = vpop.eup %7639 }
0x1346   :  { %v7642_v59 = vpop.eup %7641 }
0x1347   :  { %7645 = vrcp.f32 %v4274_v25  ;;  %v4281_v37 = vadd.f32 1.0, %v7642_v59 }
0x1349   :  { %7647 = vrcp.f32 %v4281_v37 }
0x1352   :  { %v7644_v45 = vpop.eup %7643 }
0x1353   :  { %v4285_v60 = vmul.f32 %v7644_v45, %v7640_v30 }
0x1354   :  { %v7646_v32 = vpop.eup %7645 }
0x1355   :  { %v4284_v24 = vmul.f32 %v7646_v32, %v9769_v49 }
0x1356   :  { %v7648_v38 = vpop.eup %7647 }
0x1357   :  { %v9815_v5 = vadd.f32 %v4285_v60, %v4284_v24 }
0x1359   :  { %7649 = vtanh.f32 %v9815_v5 }
0x1366   :  { %v7650_v46 = vpop.eup %7649 }
0x1367   :  { %v9818_v33 = vmul.f32 %v7650_v46, %v7648_v38  ;;  %v9868_v46 = vld [vmem:[#allocation7 + $0xe0] ss:$16 sps:$4 sm:$0xff]  }
0x1369   :  { %v4294_v9 = vpack.c.bf16 %v9818_v33, %v9818_v33 }
0x136b   :  { %4328 = vmatmul.mubr.bf16.vlgmr.msra.gmra.mxu0 %v4294_v9  ;;  %4369 = vmatmul.mubr.bf16.vlgmr.msra.gmra.mxu1 %v4294_v9  ;;  %v9871_v9 = vld [vmem:[#allocation7 + $0xe8] ss:$16 sps:$4 sm:$0xff]  }
0x136c   :  { %4412 = vmatpush1.bf16.msra.mxu0 %v9474_v36  ;;  %4453 = vmatpush1.bf16.msra.mxu1 %v9476_v6 }
0x136d   :  { %4413 = vmatprep.subr.bf16.mxu0 %v9478_v29  ;;  %4454 = vmatprep.subr.bf16.mxu1 %v9482_v51  ;;  %v10820_v29 = vld [vmem:[#allocation38_spill] sm:$0xff] }
0x136e   :  { %4443 = vmatprep.mubr.bf16.mxu0 %v10706_v18  ;;  %4484 = vmatprep.mubr.bf16.mxu1 %v10706_v18 }
0x1370   :  { %4414 = vmatpush1.bf16.msra.mxu0 %v9488_v57  ;;  %4455 = vmatpush1.bf16.msra.mxu1 %v9492_v39 }
0x1371   :  { %4415 = vmatprep.subr.bf16.mxu0 %v9494_v55  ;;  %4456 = vmatprep.subr.bf16.mxu1 %v9498_v48  ;;  %v10821_v48 = vld [vmem:[#allocation36_spill] sm:$0xff] }
0x1374   :  { %4416 = vmatpush1.bf16.msra.mxu0 %v9504_v19  ;;  %4457 = vmatpush1.bf16.msra.mxu1 %v9506_v54 }
0x1375   :  { %4417 = vmatprep.subr.bf16.mxu0 %v9510_v28  ;;  %4458 = vmatprep.subr.bf16.mxu1 %v9514_v53 }
0x1378   :  { %4418 = vmatpush1.bf16.msra.mxu0 %v9516_v8  ;;  %4459 = vmatpush1.bf16.msra.mxu1 %v9518_v62 }
0x1379   :  { %4419 = vmatprep.subr.bf16.mxu0 %v9524_v43  ;;  %4460 = vmatprep.subr.bf16.mxu1 %v9526_v7 }
0x137c   :  { %4420 = vmatpush1.bf16.msra.mxu0 %v9534_v58  ;;  %4461 = vmatpush1.bf16.msra.mxu1 %v9536_v56 }
0x137d   :  { %4421 = vmatprep.subr.bf16.mxu0 %v9540_v52  ;;  %4462 = vmatprep.subr.bf16.mxu1 %v9542_v10 }
0x1380   :  { %4422 = vmatpush1.bf16.msra.mxu0 %v9548_v12  ;;  %4463 = vmatpush1.bf16.msra.mxu1 %v9550_v61 }
0x1381   :  { %4423 = vmatprep.subr.bf16.mxu0 %v9556_v42  ;;  %4464 = vmatprep.subr.bf16.mxu1 %v9558_v27 }
0x1384   :  { %4424 = vmatpush1.bf16.msra.mxu0 %v9566_v63  ;;  %4465 = vmatpush1.bf16.msra.mxu1 %v9568_v14 }
0x1385   :  { %4425 = vmatprep.subr.bf16.mxu0 %v9572_v1  ;;  %4466 = vmatprep.subr.bf16.mxu1 %v9574_v3 }
0x1388   :  { %4426 = vmatpush1.bf16.msra.mxu0 %v9580_v40  ;;  %4467 = vmatpush1.bf16.msra.mxu1 %v9582_v20 }
0x1389   :  { %4527 = vmatprep.subr.bf16.mxu0 %v9468_v2  ;;  %4568 = vmatprep.subr.bf16.mxu1 %v9470_v26 }
0x142b   :  { %v4329_v36 = vpop.f32.mrf.mxu0  ;;  %v4370_v6 = vpop.f32.mrf.mxu1 }
0x142c   :  { %v4377_v51 = vadd.f32 %v4329_v36, %v10820_v29  ;;  %v4379_v26 = vadd.f32 %v4370_v6, %v10823_v11  ;;  %v9877_v36 = vld [vmem:[#allocation7 + $0xcc] ss:$16 sps:$4 sm:$0xff]   ;;  %v9882_v6 = vld [vmem:[#allocation7 + $0xc0] ss:$16 sps:$4 sm:$0xff]   ;;  %v9885_v29 = vld [vmem:[#allocation7 + $0xc8] ss:$16 sps:$4 sm:$0xff]  }
0x142d   :  { %v4331_v57 = vpop.f32.mrf.mxu0  ;;  %v4372_v39 = vpop.f32.mrf.mxu1 }
0x142e   :  { %v6731_v55 = vmul.f32 -1.442695, %v4377_v51  ;;  %v4378_v19 = vadd.f32 %v4331_v57, %v10821_v48  ;;  %v4380_v2 = vadd.f32 %v4372_v39, %v10822_v47  ;;  %v9888_v51 = vld [vmem:[#allocation7 + $0xa4] ss:$16 sps:$4 sm:$0xff]   ;;  %v9891_v57 = vld [vmem:[#allocation7 + $0xac] ss:$16 sps:$4 sm:$0xff]  }
0x142f   :  { %v4333_v54 = vpop.f32.mrf.mxu0  ;;  %v4374_v49 = vpop.f32.mrf.mxu1  ;;  %v9894_v39 = vld [vmem:[#allocation7 + $0xa0] ss:$16 sps:$4 sm:$0xff]  }
0x1430   :  { %7651 = vpow2.f32 %v6731_v55  ;;  %v6732_v13 = vmul.f32 -1.442695, %v4378_v19  ;;  %v6733_v21 = vmul.f32 -1.442695, %v4380_v2  ;;  %v9897_v55 = vld [vmem:[#allocation7 + $0xa8] ss:$16 sps:$4 sm:$0xff]  }
0x1431   :  { %v4334_v35 = vpop.f32.mrf.mxu0  ;;  %v4375_v0 = vpop.f32.mrf.mxu1  ;;  %v10827_v48 = vld [vmem:[#allocation39_spill] sm:$0xff] }
0x1432   :  { %7653 = vpow2.f32 %v6732_v13 }
0x1433   :  { %7655 = vtanh.f32 %v4379_v26 }
0x1434   :  { %7657 = vpow2.f32 %v6733_v21 }
0x143d   :  { %v7652_v34 = vpop.eup %7651 }
0x143e   :  { %v4384_v50 = vadd.f32 1.0, %v7652_v34 }
0x143f   :  { %v7654_v4 = vpop.eup %7653 }
0x1440   :  { %7659 = vrcp.f32 %v4384_v50  ;;  %v4390_v16 = vadd.f32 1.0, %v7654_v4  ;;  %v7656_v22 = vpop.eup %7655 }
0x1441   :  { %v7658_v23 = vpop.eup %7657 }
0x1442   :  { %7661 = vrcp.f32 %v4390_v16  ;;  %v4397_v59 = vadd.f32 1.0, %v7658_v23 }
0x1444   :  { %7663 = vrcp.f32 %v4397_v59  ;;  %v9956_v59 = vld [vmem:[#allocation7 + $0x80] ss:$16 sps:$4 sm:$0xff]  }
0x144d   :  { %v7660_v17 = vpop.eup %7659 }
0x144e   :  { %v4401_v25 = vmul.f32 %v7660_v17, %v7656_v22 }
0x144f   :  { %v7662_v30 = vpop.eup %7661 }
0x1450   :  { %v4400_v45 = vmul.f32 %v7662_v30, %v9815_v5  ;;  %v9874_v5 = vld [vmem:[#allocation7 + $0xc4] ss:$16 sps:$4 sm:$0xff]   ;;  %v9953_v30 = vld [vmem:[#allocation7 + $0x8c] ss:$16 sps:$4 sm:$0xff]  }
0x1451   :  { %v7664_v32 = vpop.eup %7663 }
0x1452   :  { %v9861_v60 = vadd.f32 %v4401_v25, %v4400_v45  ;;  %v9950_v25 = vld [vmem:[#allocation7 + $0x84] ss:$16 sps:$4 sm:$0xff]   ;;  %v9959_v45 = vld [vmem:[#allocation7 + $0x88] ss:$16 sps:$4 sm:$0xff]  }
0x1454   :  { %7665 = vtanh.f32 %v9861_v60 }
0x1461   :  { %v7666_v37 = vpop.eup %7665 }
0x1462   :  { %v9864_v24 = vmul.f32 %v7666_v37, %v7664_v32  ;;  %v9965_v32 = vld [vmem:[#allocation7 + $0x6c] ss:$16 sps:$4 sm:$0xff]   ;;  %v9968_v37 = vld [vmem:[#allocation7 + $0x60] ss:$16 sps:$4 sm:$0xff]  }
0x1464   :  { %v4410_v38 = vpack.c.bf16 %v9864_v24, %v9864_v24 }
0x1466   :  { %4444 = vmatmul.mubr.bf16.vlgmr.msra.gmra.mxu0 %v4410_v38  ;;  %4485 = vmatmul.mubr.bf16.vlgmr.msra.gmra.mxu1 %v4410_v38  ;;  %v9971_v38 = vld [vmem:[#allocation7 + $0x68] ss:$16 sps:$4 sm:$0xff]  }
0x1467   :  { %4528 = vmatpush1.bf16.msra.mxu0 %v9868_v46  ;;  %4569 = vmatpush1.bf16.msra.mxu1 %v9871_v9 }
0x1468   :  { %4529 = vmatprep.subr.bf16.mxu0 %v9874_v5  ;;  %4570 = vmatprep.subr.bf16.mxu1 %v9877_v36 }
0x1469   :  { %4559 = vmatprep.mubr.bf16.mxu0 %v10706_v18  ;;  %4600 = vmatprep.mubr.bf16.mxu1 %v10706_v18 }
0x146b   :  { %4530 = vmatpush1.bf16.msra.mxu0 %v9882_v6  ;;  %4571 = vmatpush1.bf16.msra.mxu1 %v9885_v29 }
0x146c   :  { %4531 = vmatprep.subr.bf16.mxu0 %v9888_v51  ;;  %4572 = vmatprep.subr.bf16.mxu1 %v9891_v57 }
0x146f   :  { %4532 = vmatpush1.bf16.msra.mxu0 %v9894_v39  ;;  %4573 = vmatpush1.bf16.msra.mxu1 %v9897_v55 }
0x1470   :  { %4533 = vmatprep.subr.bf16.mxu0 %v9510_v28  ;;  %4574 = vmatprep.subr.bf16.mxu1 %v9514_v53  ;;  %v9920_v28 = vld [vmem:[#allocation7 + $0xe4] ss:$16 sps:$4 sm:$0xff]   ;;  %v9923_v53 = vld [vmem:[#allocation7 + $0xec] ss:$16 sps:$4 sm:$0xff]  }
0x1473   :  { %4534 = vmatpush1.bf16.msra.mxu0 %v9516_v8  ;;  %4575 = vmatpush1.bf16.msra.mxu1 %v9518_v62 }
0x1474   :  { %4535 = vmatprep.subr.bf16.mxu0 %v9524_v43  ;;  %4576 = vmatprep.subr.bf16.mxu1 %v9526_v7  ;;  %v10824_v43 = vld [vmem:[#allocation42_spill] sm:$0xff] }
0x1477   :  { %4536 = vmatpush1.bf16.msra.mxu0 %v9534_v58  ;;  %4577 = vmatpush1.bf16.msra.mxu1 %v9536_v56 }
0x1478   :  { %4537 = vmatprep.subr.bf16.mxu0 %v9540_v52  ;;  %4578 = vmatprep.subr.bf16.mxu1 %v9542_v10  ;;  %v10825_v10 = vld [vmem:[#allocation40_spill] sm:$0xff] }
0x147b   :  { %4538 = vmatpush1.bf16.msra.mxu0 %v9548_v12  ;;  %4579 = vmatpush1.bf16.msra.mxu1 %v9550_v61 }
0x147c   :  { %4539 = vmatprep.subr.bf16.mxu0 %v9556_v42  ;;  %4580 = vmatprep.subr.bf16.mxu1 %v9558_v27 }
0x147f   :  { %4540 = vmatpush1.bf16.msra.mxu0 %v9566_v63  ;;  %4581 = vmatpush1.bf16.msra.mxu1 %v9568_v14 }
0x1480   :  { %4541 = vmatprep.subr.bf16.mxu0 %v9572_v1  ;;  %4582 = vmatprep.subr.bf16.mxu1 %v9574_v3  ;;  %v10826_v1 = vld [vmem:[#allocation45_spill] sm:$0xff] }
0x1483   :  { %4542 = vmatpush1.bf16.msra.mxu0 %v9580_v40  ;;  %4583 = vmatpush1.bf16.msra.mxu1 %v9582_v20 }
0x1484   :  { %4643 = vmatprep.subr.bf16.mxu0 %v9920_v28  ;;  %4684 = vmatprep.subr.bf16.mxu1 %v9923_v53 }
0x1526   :  { %v4445_v8 = vpop.f32.mrf.mxu0  ;;  %v4486_v62 = vpop.f32.mrf.mxu1 }
0x1527   :  { %v4493_v7 = vadd.f32 %v4445_v8, %v10824_v43  ;;  %v4495_v19 = vadd.f32 %v4486_v62, %v10827_v48  ;;  %v9974_v8 = vld [vmem:[#allocation7 + $0x44] ss:$16 sps:$4 sm:$0xff]   ;;  %v9977_v62 = vld [vmem:[#allocation7 + $0x4c] ss:$16 sps:$4 sm:$0xff]   ;;  %v9980_v43 = vld [vmem:[#allocation7 + $0x40] ss:$16 sps:$4 sm:$0xff]  }
0x1528   :  { %v4447_v58 = vpop.f32.mrf.mxu0  ;;  %v4488_v56 = vpop.f32.mrf.mxu1 }
0x1529   :  { %v6734_v52 = vmul.f32 -1.442695, %v4493_v7  ;;  %v4494_v12 = vadd.f32 %v4447_v58, %v10825_v10  ;;  %v4496_v3 = vadd.f32 %v4488_v56, %v10826_v1  ;;  %v9983_v7 = vld [vmem:[#allocation7 + $0x48] ss:$16 sps:$4 sm:$0xff]   ;;  %v9986_v58 = vld [vmem:[#allocation7 + $0x24] ss:$16 sps:$4 sm:$0xff]  }
0x152a   :  { %v4449_v61 = vpop.f32.mrf.mxu0  ;;  %v4490_v42 = vpop.f32.mrf.mxu1  ;;  %v9989_v56 = vld [vmem:[#allocation7 + $0x2c] ss:$16 sps:$4 sm:$0xff]   ;;  %v9995_v10 = vld [vmem:[#allocation7 + $0x28] ss:$16 sps:$4 sm:$0xff]  }
0x152b   :  { %7667 = vpow2.f32 %v6734_v52  ;;  %v6735_v27 = vmul.f32 -1.442695, %v4494_v12  ;;  %v6736_v54 = vmul.f32 -1.442695, %v4496_v3  ;;  %v9992_v52 = vld [vmem:[#allocation7 + $0x20] ss:$16 sps:$4 sm:$0xff]  }
0x152c   :  { %v4450_v63 = vpop.f32.mrf.mxu0  ;;  %v4491_v14 = vpop.f32.mrf.mxu1  ;;  %v9998_v12 = vld [vmem:[#allocation7 + $0x4] ss:$16 sps:$4 sm:$0xff]   ;;  %v10001_v61 = vld [vmem:[#allocation7 + $0xc] ss:$16 sps:$4 sm:$0xff]  }
0x152d   :  { %7669 = vpow2.f32 %v6735_v27  ;;  %v10828_v63 = vld [vmem:[#allocation46_spill] sm:$0xff] }
0x152e   :  { %7671 = vtanh.f32 %v4495_v19  ;;  %v10829_v19 = vld [vmem:[#allocation44_spill] sm:$0xff] }
0x152f   :  { %7673 = vpow2.f32 %v6736_v54 }
0x1538   :  { %v7668_v49 = vpop.eup %7667 }
0x1539   :  { %v4500_v13 = vadd.f32 1.0, %v7668_v49 }
0x153a   :  { %v7670_v35 = vpop.eup %7669 }
0x153b   :  { %7675 = vrcp.f32 %v4500_v13  ;;  %v4506_v0 = vadd.f32 1.0, %v7670_v35  ;;  %v7672_v47 = vpop.eup %7671 }
0x153c   :  { %v7674_v2 = vpop.eup %7673 }
0x153d   :  { %7677 = vrcp.f32 %v4506_v0  ;;  %v4513_v34 = vadd.f32 1.0, %v7674_v2 }
0x153f   :  { %7679 = vrcp.f32 %v4513_v34 }
0x1548   :  { %v7676_v11 = vpop.eup %7675 }
0x1549   :  { %v4517_v26 = vmul.f32 %v7676_v11, %v7672_v47  ;;  %v10831_v47 = vld [vmem:[#allocation43_spill] sm:$0xff] }
0x154a   :  { %v7678_v21 = vpop.eup %7677 }
0x154b   :  { %v4516_v50 = vmul.f32 %v7678_v21, %v9861_v60  ;;  %v9962_v60 = vld [vmem:[#allocation7 + $0x64] ss:$16 sps:$4 sm:$0xff]  }
0x154c   :  { %v7680_v16 = vpop.eup %7679 }
0x154d   :  { %v9931_v4 = vadd.f32 %v4517_v26, %v4516_v50 }
0x154f   :  { %7681 = vtanh.f32 %v9931_v4 }
0x155c   :  { %v7682_v22 = vpop.eup %7681 }
0x155d   :  { %v9934_v23 = vmul.f32 %v7682_v22, %v7680_v16 }
0x155f   :  { %v4526_v17 = vpack.c.bf16 %v9934_v23, %v9934_v23 }
0x1561   :  { %4560 = vmatmul.mubr.bf16.vlgmr.msra.gmra.mxu0 %v4526_v17  ;;  %4601 = vmatmul.mubr.bf16.vlgmr.msra.gmra.mxu1 %v4526_v17 }
0x1562   :  { %4644 = vmatpush1.bf16.msra.mxu0 %v9868_v46  ;;  %4685 = vmatpush1.bf16.msra.mxu1 %v9871_v9 }
0x1563   :  { %4645 = vmatprep.subr.bf16.mxu0 %v9874_v5  ;;  %4686 = vmatprep.subr.bf16.mxu1 %v9877_v36 }
0x1564   :  { %4675 = vmatprep.mubr.bf16.mxu0 %v10706_v18  ;;  %4716 = vmatprep.mubr.bf16.mxu1 %v10706_v18 }
0x1566   :  { %4646 = vmatpush1.bf16.msra.mxu0 %v9882_v6  ;;  %4687 = vmatpush1.bf16.msra.mxu1 %v9885_v29 }
0x1567   :  { %4647 = vmatprep.subr.bf16.mxu0 %v9888_v51  ;;  %4688 = vmatprep.subr.bf16.mxu1 %v9891_v57 }
0x156a   :  { %4648 = vmatpush1.bf16.msra.mxu0 %v9894_v39  ;;  %4689 = vmatpush1.bf16.msra.mxu1 %v9897_v55 }
0x156b   :  { %4649 = vmatprep.subr.bf16.mxu0 %v9950_v25  ;;  %4690 = vmatprep.subr.bf16.mxu1 %v9953_v30 }
0x156e   :  { %4650 = vmatpush1.bf16.msra.mxu0 %v9956_v59  ;;  %4691 = vmatpush1.bf16.msra.mxu1 %v9959_v45 }
0x156f   :  { %4651 = vmatprep.subr.bf16.mxu0 %v9962_v60  ;;  %4692 = vmatprep.subr.bf16.mxu1 %v9965_v32 }
0x1572   :  { %4652 = vmatpush1.bf16.msra.mxu0 %v9968_v37  ;;  %4693 = vmatpush1.bf16.msra.mxu1 %v9971_v38 }
0x1573   :  { %4653 = vmatprep.subr.bf16.mxu0 %v9974_v8  ;;  %4694 = vmatprep.subr.bf16.mxu1 %v9977_v62 }
0x1576   :  { %4654 = vmatpush1.bf16.msra.mxu0 %v9980_v43  ;;  %4695 = vmatpush1.bf16.msra.mxu1 %v9983_v7 }
0x1577   :  { %4655 = vmatprep.subr.bf16.mxu0 %v9986_v58  ;;  %4696 = vmatprep.subr.bf16.mxu1 %v9989_v56 }
0x157a   :  { %4656 = vmatpush1.bf16.msra.mxu0 %v9992_v52  ;;  %4697 = vmatpush1.bf16.msra.mxu1 %v9995_v10 }
0x157b   :  { %4657 = vmatprep.subr.bf16.mxu0 %v9998_v12  ;;  %4698 = vmatprep.subr.bf16.mxu1 %v10001_v61 }
0x157e   :  { %4658 = vmatpush1.bf16.msra.mxu0 %v9580_v40  ;;  %4699 = vmatpush1.bf16.msra.mxu1 %v9582_v20  ;;  %v10830_v20 = vld [vmem:[#allocation48_spill] sm:$0xff] }
0x157f   :  { %4759 = vmatprep.subr.bf16.mxu0 %v9920_v28  ;;  %4800 = vmatprep.subr.bf16.mxu1 %v9923_v53 }
0x1621   :  { %v4561_v42 = vpop.f32.mrf.mxu0  ;;  %v4602_v27 = vpop.f32.mrf.mxu1 }
0x1622   :  { %v4609_v14 = vadd.f32 %v4561_v42, %v10828_v63  ;;  %v4611_v53 = vadd.f32 %v4602_v27, %v10831_v47 }
0x1623   :  { %v4563_v1 = vpop.f32.mrf.mxu0  ;;  %v4604_v3 = vpop.f32.mrf.mxu1 }
0x1624   :  { %v6737_v48 = vmul.f32 -1.442695, %v4609_v14  ;;  %v4610_v54 = vadd.f32 %v4563_v1, %v10829_v19  ;;  %v4612_v28 = vadd.f32 %v4604_v3, %v10830_v20 }
0x1625   :  { %v4565_v49 = vpop.f32.mrf.mxu0  ;;  %v4606_v13 = vpop.f32.mrf.mxu1 }
0x1626   :  { %7683 = vpow2.f32 %v6737_v48  ;;  %v6738_v35 = vmul.f32 -1.442695, %v4610_v54  ;;  %v6739_v2 = vmul.f32 -1.442695, %v4612_v28 }
0x1627   :  { %v4566_v40 = vpop.f32.mrf.mxu0  ;;  %v4607_v0 = vpop.f32.mrf.mxu1 }
0x1628   :  { %7685 = vpow2.f32 %v6738_v35 }
0x1629   :  { %7687 = vtanh.f32 %v4611_v53  ;;  %v7507_v53 = vld [vmem:[#allocation6 + $0x1e0] ss:$16 sps:$4 sm:$0xff]  }
0x162a   :  { %7689 = vpow2.f32 %v6739_v2  ;;  %v7510_v2 = vld [vmem:[#allocation6 + $0x1e8] ss:$16 sps:$4 sm:$0xff]  }
0x1633   :  { %v7684_v11 = vpop.eup %7683 }
0x1634   :  { %v4616_v26 = vadd.f32 1.0, %v7684_v11 }
0x1635   :  { %v7686_v21 = vpop.eup %7685 }
0x1636   :  { %7691 = vrcp.f32 %v4616_v26  ;;  %v4622_v34 = vadd.f32 1.0, %v7686_v21  ;;  %v7688_v50 = vpop.eup %7687  ;;  %v7515_v26 = vld [vmem:[#allocation6 + $0x1c4] ss:$16 sps:$4 sm:$0xff]   ;;  %v7518_v21 = vld [vmem:[#allocation6 + $0x1cc] ss:$16 sps:$4 sm:$0xff]  }
0x1637   :  { %v7690_v16 = vpop.eup %7689 }
0x1638   :  { %7693 = vrcp.f32 %v4622_v34  ;;  %v4629_v63 = vadd.f32 1.0, %v7690_v16  ;;  %v7513_v34 = vld [vmem:[#allocation6 + $0x1c0] ss:$16 sps:$4 sm:$0xff]   ;;  %v7521_v16 = vld [vmem:[#allocation6 + $0x1a4] ss:$16 sps:$4 sm:$0xff]  }
0x163a   :  { %7695 = vrcp.f32 %v4629_v63  ;;  %v7527_v63 = vld [vmem:[#allocation6 + $0x184] ss:$16 sps:$4 sm:$0xff]  }
0x1643   :  { %v7692_v22 = vpop.eup %7691 }
0x1644   :  { %v4633_v17 = vmul.f32 %v7692_v22, %v7688_v50  ;;  %v7516_v50 = vld [vmem:[#allocation6 + $0x1c8] ss:$16 sps:$4 sm:$0xff]   ;;  %v7524_v22 = vld [vmem:[#allocation6 + $0x1ac] ss:$16 sps:$4 sm:$0xff]  }
0x1645   :  { %v7694_v42 = vpop.eup %7693 }
0x1646   :  { %v4632_v14 = vmul.f32 %v7694_v42, %v9931_v4  ;;  %v7522_v42 = vld [vmem:[#allocation6 + $0x1a8] ss:$16 sps:$4 sm:$0xff]  }
0x1647   :  { %v7696_v27 = vpop.eup %7695 }
0x1648   :  { %v10013_v1 = vadd.f32 %v4633_v17, %v4632_v14  ;;  %v7519_v17 = vld [vmem:[#allocation6 + $0x1a0] ss:$16 sps:$4 sm:$0xff]   ;;  %v7530_v14 = vld [vmem:[#allocation6 + $0x18c] ss:$16 sps:$4 sm:$0xff]  }
0x164a   :  { %7697 = vtanh.f32 %v10013_v1 }
0x1657   :  { %v7698_v3 = vpop.eup %7697 }
0x1658   :  { %v10016_v48 = vmul.f32 %v7698_v3, %v7696_v27  ;;  %v7528_v27 = vld [vmem:[#allocation6 + $0x188] ss:$16 sps:$4 sm:$0xff]   ;;  %v7533_v3 = vld [vmem:[#allocation6 + $0x164] ss:$16 sps:$4 sm:$0xff]  }
0x165a   :  { %v4642_v19 = vpack.c.bf16 %v10016_v48, %v10016_v48 }
0x165c   :  { %4676 = vmatmul.mubr.bf16.vlgmr.msra.gmra.mxu0 %v4642_v19  ;;  %4717 = vmatmul.mubr.bf16.vlgmr.msra.gmra.mxu1 %v4642_v19  ;;  %v7536_v19 = vld [vmem:[#allocation6 + $0x16c] ss:$16 sps:$4 sm:$0xff]  }
0x165d   :  { %4760 = vmatpush1.bf16.msra.mxu0 %v9868_v46  ;;  %4801 = vmatpush1.bf16.msra.mxu1 %v9871_v9  ;;  %v7889_v46 = vld [vmem:[#allocation7] ss:$16 sps:$4 sm:$0xff]   ;;  %v7890_v9 = vld [vmem:[#allocation7 + $0x8] ss:$16 sps:$4 sm:$0xff]  }
0x165e   :  { %4761 = vmatprep.subr.bf16.mxu0 %v9874_v5  ;;  %4802 = vmatprep.subr.bf16.mxu1 %v9877_v36  ;;  %v7509_v5 = vld [vmem:[#allocation6 + $0x1e4] ss:$16 sps:$4 sm:$0xff]   ;;  %v7512_v36 = vld [vmem:[#allocation6 + $0x1ec] ss:$16 sps:$4 sm:$0xff]  }
0x165f   :  { %4791 = vmatprep.mubr.bf16.mxu0 %v10706_v18  ;;  %4832 = vmatprep.mubr.bf16.mxu1 %v10706_v18 }
0x1661   :  { %4762 = vmatpush1.bf16.msra.mxu0 %v9882_v6  ;;  %4803 = vmatpush1.bf16.msra.mxu1 %v9885_v29 }
0x1662   :  { %4763 = vmatprep.subr.bf16.mxu0 %v9888_v51  ;;  %4804 = vmatprep.subr.bf16.mxu1 %v9891_v57  ;;  %v10832_v51 = vld [vmem:[#allocation49_spill] sm:$0xff] }
0x1665   :  { %4764 = vmatpush1.bf16.msra.mxu0 %v9894_v39  ;;  %4805 = vmatpush1.bf16.msra.mxu1 %v9897_v55 }
0x1666   :  { %4765 = vmatprep.subr.bf16.mxu0 %v9950_v25  ;;  %4806 = vmatprep.subr.bf16.mxu1 %v9953_v30  ;;  %v10833_v25 = vld [vmem:[#allocation50_spill] sm:$0xff] }
0x1669   :  { %4766 = vmatpush1.bf16.msra.mxu0 %v9956_v59  ;;  %4807 = vmatpush1.bf16.msra.mxu1 %v9959_v45 }
0x166a   :  { %4767 = vmatprep.subr.bf16.mxu0 %v9962_v60  ;;  %4808 = vmatprep.subr.bf16.mxu1 %v9965_v32 }
0x166d   :  { %4768 = vmatpush1.bf16.msra.mxu0 %v9968_v37  ;;  %4809 = vmatpush1.bf16.msra.mxu1 %v9971_v38  ;;  %v10834_v38 = vld [vmem:[#allocation52_spill] sm:$0xff] }
0x166e   :  { %4769 = vmatprep.subr.bf16.mxu0 %v9974_v8  ;;  %4810 = vmatprep.subr.bf16.mxu1 %v9977_v62  ;;  %v10835_v62 = vld [vmem:[#allocation47_spill] sm:$0xff] }
0x1671   :  { %4770 = vmatpush1.bf16.msra.mxu0 %v9980_v43  ;;  %4811 = vmatpush1.bf16.msra.mxu1 %v9983_v7 }
0x1672   :  { %4771 = vmatprep.subr.bf16.mxu0 %v9986_v58  ;;  %4812 = vmatprep.subr.bf16.mxu1 %v9989_v56 }
0x1675   :  { %4772 = vmatpush1.bf16.msra.mxu0 %v9992_v52  ;;  %4813 = vmatpush1.bf16.msra.mxu1 %v9995_v10 }
0x1676   :  { %4773 = vmatprep.subr.bf16.mxu0 %v9998_v12  ;;  %4814 = vmatprep.subr.bf16.mxu1 %v10001_v61 }
0x1679   :  { %4774 = vmatpush1.bf16.msra.mxu0 %v7889_v46  ;;  %4815 = vmatpush1.bf16.msra.mxu1 %v7890_v9  ;;  %v7531_v46 = vld [vmem:[#allocation6 + $0x160] ss:$16 sps:$4 sm:$0xff]   ;;  %v7534_v9 = vld [vmem:[#allocation6 + $0x168] ss:$16 sps:$4 sm:$0xff]  }
0x167a   :  { %5110 = vmatprep.subr.bf16.mxu0 %v7509_v5  ;;  %5183 = vmatprep.subr.bf16.mxu1 %v7512_v36  ;;  %v7539_v5 = vld [vmem:[#allocation6 + $0x144] ss:$16 sps:$4 sm:$0xff]   ;;  %v7542_v36 = vld [vmem:[#allocation6 + $0x14c] ss:$16 sps:$4 sm:$0xff]  }
0x171c   :  { %v4677_v6 = vpop.f32.mrf.mxu0  ;;  %v4718_v29 = vpop.f32.mrf.mxu1 }
0x171d   :  { %v4725_v57 = vadd.f32 %v4677_v6, %v10832_v51  ;;  %v4727_v43 = vadd.f32 %v4718_v29, %v10835_v62  ;;  %v7537_v6 = vld [vmem:[#allocation6 + $0x140] ss:$16 sps:$4 sm:$0xff]   ;;  %v7540_v29 = vld [vmem:[#allocation6 + $0x148] ss:$16 sps:$4 sm:$0xff]   ;;  %v7545_v51 = vld [vmem:[#allocation6 + $0x124] ss:$16 sps:$4 sm:$0xff]  }
0x171e   :  { %v4679_v39 = vpop.f32.mrf.mxu0  ;;  %v4720_v55 = vpop.f32.mrf.mxu1  ;;  %v10102_v62 = vld [vmem:[#allocation7 + $0x1ac] ss:$16 sps:$4 sm:$0xff]  }
0x171f   :  { %v6740_v4 = vmul.f32 -1.442695, %v4725_v57  ;;  %v4726_v30 = vadd.f32 %v4679_v39, %v10833_v25  ;;  %v4728_v8 = vadd.f32 %v4720_v55, %v10834_v38  ;;  %v7548_v57 = vld [vmem:[#allocation6 + $0x12c] ss:$16 sps:$4 sm:$0xff]   ;;  %v7543_v39 = vld [vmem:[#allocation6 + $0x120] ss:$16 sps:$4 sm:$0xff]  }
0x1720   :  { %v4681_v59 = vpop.f32.mrf.mxu0  ;;  %v4722_v45 = vpop.f32.mrf.mxu1  ;;  %v7546_v55 = vld [vmem:[#allocation6 + $0x128] ss:$16 sps:$4 sm:$0xff]   ;;  %v7554_v25 = vld [vmem:[#allocation6 + $0x10c] ss:$16 sps:$4 sm:$0xff]  }
0x1721   :  { %7699 = vpow2.f32 %v6740_v4  ;;  %v6741_v60 = vmul.f32 -1.442695, %v4726_v30  ;;  %v6742_v7 = vmul.f32 -1.442695, %v4728_v8  ;;  %v7551_v4 = vld [vmem:[#allocation6 + $0x104] ss:$16 sps:$4 sm:$0xff]   ;;  %v4946_v45 = vpack.c.bf16 %v9772_v44, %v9726_v15 }
0x1722   :  { %v4682_v32 = vpop.f32.mrf.mxu0  ;;  %v4723_v37 = vpop.f32.mrf.mxu1  ;;  %v7549_v30 = vld [vmem:[#allocation6 + $0x100] ss:$16 sps:$4 sm:$0xff]   ;;  %v7552_v59 = vld [vmem:[#allocation6 + $0x108] ss:$16 sps:$4 sm:$0xff]   ;;  %v10076_v15 = vld [vmem:[#allocation7 + $0x1e4] ss:$16 sps:$4 sm:$0xff]  }
0x1723   :  { %7701 = vpow2.f32 %v6741_v60  ;;  %v4947_v60 = vpack.c.bf16 %v9864_v24, %v9818_v33  ;;  %v4948_v32 = vpack.c.bf16 %v10016_v48, %v9934_v23  ;;  %v10078_v44 = vld [vmem:[#allocation7 + $0x1ec] ss:$16 sps:$4 sm:$0xff]   ;;  %v10080_v33 = vld [vmem:[#allocation7 + $0x1e0] ss:$16 sps:$4 sm:$0xff]   ;;  %v10082_v24 = vld [vmem:[#allocation7 + $0x1e8] ss:$16 sps:$4 sm:$0xff]  }
0x1724   :  { %7703 = vtanh.f32 %v4727_v43  ;;  %v10088_v23 = vld [vmem:[#allocation7 + $0x1c4] ss:$16 sps:$4 sm:$0xff]   ;;  %v10090_v48 = vld [vmem:[#allocation7 + $0x1cc] ss:$16 sps:$4 sm:$0xff]   ;;  %v10092_v37 = vld [vmem:[#allocation7 + $0x1c0] ss:$16 sps:$4 sm:$0xff]  }
0x1725   :  { %7705 = vpow2.f32 %v6742_v7  ;;  %v10094_v38 = vld [vmem:[#allocation7 + $0x1c8] ss:$16 sps:$4 sm:$0xff]   ;;  %v10100_v8 = vld [vmem:[#allocation7 + $0x1a4] ss:$16 sps:$4 sm:$0xff]   ;;  %v10104_v43 = vld [vmem:[#allocation7 + $0x1a0] ss:$16 sps:$4 sm:$0xff]  }
0x1726   :  { %v10106_v7 = vld [vmem:[#allocation7 + $0x1a8] ss:$16 sps:$4 sm:$0xff]  }
0x172e   :  { %v7700_v58 = vpop.eup %7699 }
0x172f   :  { %v4732_v56 = vadd.f32 1.0, %v7700_v58  ;;  %v10112_v58 = vld [vmem:[#allocation7 + $0x184] ss:$16 sps:$4 sm:$0xff]  }
0x1730   :  { %v7702_v52 = vpop.eup %7701 }
0x1731   :  { %7707 = vrcp.f32 %v4732_v56  ;;  %v4738_v10 = vadd.f32 1.0, %v7702_v52  ;;  %v7704_v12 = vpop.eup %7703  ;;  %v10114_v56 = vld [vmem:[#allocation7 + $0x18c] ss:$16 sps:$4 sm:$0xff]   ;;  %v10116_v52 = vld [vmem:[#allocation7 + $0x180] ss:$16 sps:$4 sm:$0xff]  }
0x1732   :  { %v7706_v61 = vpop.eup %7705 }
0x1733   :  { %7709 = vrcp.f32 %v4738_v10  ;;  %v4745_v35 = vadd.f32 1.0, %v7706_v61  ;;  %v10118_v10 = vld [vmem:[#allocation7 + $0x188] ss:$16 sps:$4 sm:$0xff]   ;;  %v10126_v61 = vld [vmem:[#allocation7 + $0x16c] ss:$16 sps:$4 sm:$0xff]  }
0x1735   :  { %7711 = vrcp.f32 %v4745_v35  ;;  %v10138_v35 = vld [vmem:[#allocation7 + $0x14c] ss:$16 sps:$4 sm:$0xff]  }
0x173e   :  { %v7708_v54 = vpop.eup %7707 }
0x173f   :  { %v4749_v49 = vmul.f32 %v7708_v54, %v7704_v12  ;;  %v10124_v12 = vld [vmem:[#allocation7 + $0x164] ss:$16 sps:$4 sm:$0xff]   ;;  %v10128_v54 = vld [vmem:[#allocation7 + $0x160] ss:$16 sps:$4 sm:$0xff]  }
0x1740   :  { %v7710_v13 = vpop.eup %7709 }
0x1741   :  { %v4748_v40 = vmul.f32 %v7710_v13, %v10013_v1  ;;  %v7525_v1 = vld [vmem:[#allocation6 + $0x180] ss:$16 sps:$4 sm:$0xff]   ;;  %v10136_v13 = vld [vmem:[#allocation7 + $0x144] ss:$16 sps:$4 sm:$0xff]  }
0x1742   :  { %v7712_v20 = vpop.eup %7711 }
0x1743   :  { %v10055_v0 = vadd.f32 %v4749_v49, %v4748_v40  ;;  %v10130_v49 = vld [vmem:[#allocation7 + $0x168] ss:$16 sps:$4 sm:$0xff]   ;;  %v10140_v40 = vld [vmem:[#allocation7 + $0x140] ss:$16 sps:$4 sm:$0xff]  }
0x1745   :  { %7713 = vtanh.f32 %v10055_v0 }
0x1752   :  { %v7714_v28 = vpop.eup %7713 }
0x1753   :  { %v10058_v47 = vmul.f32 %v7714_v28, %v7712_v20  ;;  %v10142_v20 = vld [vmem:[#allocation7 + $0x148] ss:$16 sps:$4 sm:$0xff]   ;;  %v10148_v28 = vld [vmem:[#allocation7 + $0x124] ss:$16 sps:$4 sm:$0xff]  }
0x1755   :  { %v4758_v11 = vpack.c.bf16 %v10058_v47, %v10058_v47 }
0x1757   :  { %4792 = vmatmul.mubr.bf16.vlgmr.msra.gmra.mxu0 %v4758_v11  ;;  %4833 = vmatmul.mubr.bf16.vlgmr.msra.gmra.mxu1 %v4758_v11  ;;  %v10154_v11 = vld [vmem:[#allocation7 + $0x128] ss:$16 sps:$4 sm:$0xff]  }
0x1758   :  { %5111 = vmatpush1.bf16.msra.mxu0 %v7507_v53  ;;  %5184 = vmatpush1.bf16.msra.mxu1 %v7510_v2  ;;  %v10150_v53 = vld [vmem:[#allocation7 + $0x12c] ss:$16 sps:$4 sm:$0xff]   ;;  %v10152_v2 = vld [vmem:[#allocation7 + $0x120] ss:$16 sps:$4 sm:$0xff]  }
0x1759   :  { %5112 = vmatprep.subr.bf16.mxu0 %v7515_v26  ;;  %5185 = vmatprep.subr.bf16.mxu1 %v7518_v21  ;;  %v10156_v26 = vld [vmem:[#allocation7 + $0x104] ss:$16 sps:$4 sm:$0xff]   ;;  %v10160_v21 = vld [vmem:[#allocation7 + $0x10c] ss:$16 sps:$4 sm:$0xff]  }
0x175a   :  { %5142 = vmatprep.mubr.bf16.mxu0 %v10706_v18  ;;  %5215 = vmatprep.mubr.bf16.mxu1 %v10706_v18 }
0x175c   :  { %5113 = vmatpush1.bf16.msra.mxu0 %v7513_v34  ;;  %5186 = vmatpush1.bf16.msra.mxu1 %v7516_v50  ;;  %v10164_v34 = vld [vmem:[#allocation7 + $0x100] ss:$16 sps:$4 sm:$0xff]   ;;  %v10166_v50 = vld [vmem:[#allocation7 + $0x108] ss:$16 sps:$4 sm:$0xff]  }
0x175d   :  { %5114 = vmatprep.subr.bf16.mxu0 %v7521_v16  ;;  %5187 = vmatprep.subr.bf16.mxu1 %v7524_v22 }
0x1760   :  { %5115 = vmatpush1.bf16.msra.mxu0 %v7519_v17  ;;  %5188 = vmatpush1.bf16.msra.mxu1 %v7522_v42  ;;  %v10836_v17 = vld [vmem:[#allocation53_spill] sm:$0xff] }
0x1761   :  { %5116 = vmatprep.subr.bf16.mxu0 %v7527_v63  ;;  %5189 = vmatprep.subr.bf16.mxu1 %v7530_v14 }
0x1764   :  { %5117 = vmatpush1.bf16.msra.mxu0 %v7525_v1  ;;  %5190 = vmatpush1.bf16.msra.mxu1 %v7528_v27 }
0x1765   :  { %5118 = vmatprep.subr.bf16.mxu0 %v7533_v3  ;;  %5191 = vmatprep.subr.bf16.mxu1 %v7536_v19 }
0x1768   :  { %5119 = vmatpush1.bf16.msra.mxu0 %v7531_v46  ;;  %5192 = vmatpush1.bf16.msra.mxu1 %v7534_v9 }
0x1769   :  { %5120 = vmatprep.subr.bf16.mxu0 %v7539_v5  ;;  %5193 = vmatprep.subr.bf16.mxu1 %v7542_v36 }
0x176c   :  { %5121 = vmatpush1.bf16.msra.mxu0 %v7537_v6  ;;  %5194 = vmatpush1.bf16.msra.mxu1 %v7540_v29  ;;  %v10837_v6 = vld [vmem:[#allocation51_spill] sm:$0xff] }
0x176d   :  { %5122 = vmatprep.subr.bf16.mxu0 %v7545_v51  ;;  %5195 = vmatprep.subr.bf16.mxu1 %v7548_v57 }
0x1770   :  { %5123 = vmatpush1.bf16.msra.mxu0 %v7543_v39  ;;  %5196 = vmatpush1.bf16.msra.mxu1 %v7546_v55 }
0x1771   :  { %5124 = vmatprep.subr.bf16.mxu0 %v7551_v4  ;;  %5197 = vmatprep.subr.bf16.mxu1 %v7554_v25 }
0x1774   :  { %5125 = vmatpush1.bf16.msra.mxu0 %v7549_v30  ;;  %5198 = vmatpush1.bf16.msra.mxu1 %v7552_v59 }
0x1775   :  { %5505 = vmatprep.subr.bf16.mxu0 %v10076_v15  ;;  %5546 = vmatprep.subr.bf16.mxu1 %v10078_v44 }
0x1777   :  { %5143 = vmatmul.mubr.bf16.vlgmr.msra.gmra.mxu0 %v4946_v45  ;;  %5216 = vmatmul.mubr.bf16.vlgmr.msra.gmra.mxu1 %v4946_v45 }
0x1778   :  { %5152 = vmatprep.mubr.bf16.mxu0 %v10706_v18  ;;  %5225 = vmatprep.mubr.bf16.mxu1 %v10706_v18 }
0x1779   :  { %5506 = vmatpush1.bf16.msra.mxu0 %v10080_v33  ;;  %5547 = vmatpush1.bf16.msra.mxu1 %v10082_v24 }
0x177a   :  { %5507 = vmatprep.subr.bf16.mxu0 %v10088_v23  ;;  %5548 = vmatprep.subr.bf16.mxu1 %v10090_v48 }
0x177d   :  { %5508 = vmatpush1.bf16.msra.mxu0 %v10092_v37  ;;  %5549 = vmatpush1.bf16.msra.mxu1 %v10094_v38 }
0x177e   :  { %5509 = vmatprep.subr.bf16.mxu0 %v10100_v8  ;;  %5550 = vmatprep.subr.bf16.mxu1 %v10102_v62 }
0x177f   :  { %5153 = vmatmul.mubr.bf16.gmra.mxu0 %v4947_v60  ;;  %5226 = vmatmul.mubr.bf16.gmra.mxu1 %v4947_v60 }
0x1780   :  { %5162 = vmatprep.mubr.bf16.mxu0 %v10706_v18  ;;  %5235 = vmatprep.mubr.bf16.mxu1 %v10706_v18 }
0x1781   :  { %5510 = vmatpush1.bf16.msra.mxu0 %v10104_v43  ;;  %5551 = vmatpush1.bf16.msra.mxu1 %v10106_v7 }
0x1782   :  { %5511 = vmatprep.subr.bf16.mxu0 %v10112_v58  ;;  %5552 = vmatprep.subr.bf16.mxu1 %v10114_v56 }
0x1785   :  { %5512 = vmatpush1.bf16.msra.mxu0 %v10116_v52  ;;  %5553 = vmatpush1.bf16.msra.mxu1 %v10118_v10 }
0x1786   :  { %5513 = vmatprep.subr.bf16.mxu0 %v10124_v12  ;;  %5554 = vmatprep.subr.bf16.mxu1 %v10126_v61 }
0x1787   :  { %5163 = vmatmul.mubr.bf16.gmra.mxu0 %v4948_v32  ;;  %5236 = vmatmul.mubr.bf16.gmra.mxu1 %v4948_v32 }
0x1788   :  { %5172 = vmatprep.mubr.bf16.mxu0 %v10706_v18  ;;  %5245 = vmatprep.mubr.bf16.mxu1 %v10706_v18 }
0x1789   :  { %5514 = vmatpush1.bf16.msra.mxu0 %v10128_v54  ;;  %5555 = vmatpush1.bf16.msra.mxu1 %v10130_v49 }
0x178a   :  { %5515 = vmatprep.subr.bf16.mxu0 %v10136_v13  ;;  %5556 = vmatprep.subr.bf16.mxu1 %v10138_v35 }
0x178d   :  { %5516 = vmatpush1.bf16.msra.mxu0 %v10140_v40  ;;  %5557 = vmatpush1.bf16.msra.mxu1 %v10142_v20 }
0x178e   :  { %5517 = vmatprep.subr.bf16.mxu0 %v10148_v28  ;;  %5558 = vmatprep.subr.bf16.mxu1 %v10150_v53 }
0x1791   :  { %5518 = vmatpush1.bf16.msra.mxu0 %v10152_v2  ;;  %5559 = vmatpush1.bf16.msra.mxu1 %v10154_v11 }
0x1792   :  { %5519 = vmatprep.subr.bf16.mxu0 %v10156_v26  ;;  %5560 = vmatprep.subr.bf16.mxu1 %v10160_v21 }
0x1795   :  { %5520 = vmatpush1.bf16.msra.mxu0 %v10164_v34  ;;  %5561 = vmatpush1.bf16.msra.mxu1 %v10166_v50 }
0x1796   :  { %5621 = vmatprep.subr.bf16.mxu0 %v10076_v15  ;;  %5662 = vmatprep.subr.bf16.mxu1 %v10078_v44 }
0x1817   :  { %v4793_v16 = vpop.f32.mrf.mxu0  ;;  %v4834_v22 = vpop.f32.mrf.mxu1 }
0x1818   :  { %v4841_v42 = vadd.f32 %v4793_v16, %v10836_v17  ;;  %v4843_v29 = vadd.f32 %v4834_v22, %v10837_v6 }
0x1819   :  { %v4795_v63 = vpop.f32.mrf.mxu0  ;;  %v4836_v14 = vpop.f32.mrf.mxu1 }
0x181a   :  { %v6743_v1 = vmul.f32 -1.442695, %v4841_v42  ;;  %v4842_v27 = vadd.f32 %v4795_v63, %v9713_v41  ;;  %v4844_v36 = vadd.f32 %v4836_v14, %v9716_v31 }
0x181b   :  { %v4797_v3 = vpop.f32.mrf.mxu0  ;;  %v4838_v19 = vpop.f32.mrf.mxu1 }
0x181c   :  { %7715 = vpow2.f32 %v6743_v1  ;;  %v6744_v46 = vmul.f32 -1.442695, %v4842_v27  ;;  %v6745_v51 = vmul.f32 -1.442695, %v4844_v36 }
0x181d   :  { %v4798_v9 = vpop.f32.mrf.mxu0  ;;  %v4839_v5 = vpop.f32.mrf.mxu1 }
0x181e   :  { %7717 = vpow2.f32 %v6744_v46 }
0x181f   :  { %7719 = vtanh.f32 %v4843_v29 }
0x1820   :  { %7721 = vpow2.f32 %v6745_v51 }
0x1829   :  { %v7716_v57 = vpop.eup %7715 }
0x182a   :  { %v4848_v39 = vadd.f32 1.0, %v7716_v57 }
0x182b   :  { %v7718_v55 = vpop.eup %7717 }
0x182c   :  { %7723 = vrcp.f32 %v4848_v39  ;;  %v4854_v4 = vadd.f32 1.0, %v7718_v55  ;;  %v7720_v41 = vpop.eup %7719 }
0x182d   :  { %v7722_v25 = vpop.eup %7721 }
0x182e   :  { %7725 = vrcp.f32 %v4854_v4  ;;  %v4861_v60 = vadd.f32 1.0, %v7722_v25 }
0x1830   :  { %7727 = vrcp.f32 %v4861_v60  ;;  %v4937_v60 = vld [vmem:[#allocation8 + $0x4] sm:$0xf] }
0x1839   :  { %v7724_v30 = vpop.eup %7723 }
0x183a   :  { %v4865_v59 = vmul.f32 %v7724_v30, %v7720_v41 }
0x183b   :  { %v7726_v45 = vpop.eup %7725 }
0x183c   :  { %v4864_v32 = vmul.f32 %v7726_v45, %v10055_v0  ;;  %v5144_v0 = vpop.f32.mrf.mxu0 }
0x183d   :  { %v7728_v16 = vpop.eup %7727 }
0x183e   :  { %v4866_v31 = vadd.f32 %v4865_v59, %v4864_v32  ;;  %v5146_v63 = vpop.f32.mrf.mxu0 }
0x1840   :  { %7729 = vtanh.f32 %v4866_v31  ;;  %v10218_v1 = vpop.f32.mrf.mxu0 }
0x1842   :  { %v10222_v3 = vpop.f32.mrf.mxu0 }
0x1844   :  { %v10226_v46 = vpop.f32.mrf.mxu0 }
0x1846   :  { %v10230_v5 = vpop.f32.mrf.mxu0 }
0x1848   :  { %v10234_v6 = vpop.f32.mrf.mxu0 }
0x1849   :  { %10840 = vst [vmem:[#allocation57_spill] sm:$0xff] %v10234_v6 }
0x184a   :  { %v10238_v51 = vpop.f32.mrf.mxu0 }
0x184b   :  { %10842 = vst [vmem:[#allocation30_spill] sm:$0xff] %v10238_v51  ;;  %v10862_v51 = vld [vmem:[#allocation28_spill] sm:$0xff] }
0x184c   :  { %v10242_v39 = vpop.f32.mrf.mxu0  ;;  %v10283_v6 = vrot.slane %v4937_v60, %v10862_v51 }
0x184d   :  { %v7730_v22 = vpop.eup %7729  ;;  %10844 = vst [vmem:[#allocation33_spill] sm:$0xff] %v10242_v39 }
0x184e   :  { %v4868_v17 = vmul.f32 %v7730_v22, %v7728_v16  ;;  %v10246_v4 = vpop.f32.mrf.mxu0 }
0x184f   :  { %10846 = vst [vmem:[#allocation37_spill] sm:$0xff] %v10246_v4 }
0x1850   :  { %v4949_v42 = vpack.c.bf16 %v4868_v17, %v10058_v47  ;;  %v5217_v47 = vpop.f32.mrf.mxu1  ;;  %v10250_v25 = vpop.f32.mrf.mxu0  ;;  %v10856_v17 = vld [vmem:[#allocation27_spill] sm:$0xff] }
0x1851   :  { %10848 = vst [vmem:[#allocation38_spill] sm:$0xff] %v10250_v25 }
0x1852   :  { %5173 = vmatmul.mubr.bf16.gmra.mxu0 %v4949_v42  ;;  %5246 = vmatmul.mubr.bf16.gmra.mxu1 %v4949_v42  ;;  %v5219_v14 = vpop.f32.mrf.mxu1  ;;  %v10254_v59 = vpop.f32.mrf.mxu0  ;;  %v10267_v42 = vrot.slane %v4937_v60, %v10856_v17 }
0x1853   :  { %5537 = vmatprep.mubr.bf16.mxu0 %v10706_v18  ;;  %5578 = vmatprep.mubr.bf16.mxu1 %v10706_v18  ;;  %10850 = vst [vmem:[#allocation41_spill] sm:$0xff] %v10254_v59 }
0x1854   :  { %v10220_v27 = vpop.f32.mrf.mxu1 }
0x1856   :  { %v10224_v19 = vpop.f32.mrf.mxu1 }
0x1858   :  { %v10228_v9 = vpop.f32.mrf.mxu1 }
0x1859   :  { %10838 = vst [vmem:[#allocation54_spill] sm:$0xff] %v10228_v9  ;;  %v10863_v9 = vld [vmem:[#allocation26_spill] sm:$0xff] }
0x185a   :  { %5538 = vmatmul.mubr.bf16.vlgmr.msra.gmra.mxu0 %v10706_v18  ;;  %5579 = vmatmul.mubr.bf16.vlgmr.msra.gmra.mxu1 %v10706_v18  ;;  %v10232_v36 = vpop.f32.mrf.mxu1 }
0x185b   :  { %5622 = vmatpush1.bf16.msra.mxu0 %v10080_v33  ;;  %5663 = vmatpush1.bf16.msra.mxu1 %v10082_v24  ;;  %10839 = vst [vmem:[#allocation56_spill] sm:$0xff] %v10232_v36  ;;  %v10287_v36 = vrot.slane %v4937_v60, %v10863_v9 }
0x185c   :  { %5623 = vmatprep.subr.bf16.mxu0 %v10088_v23  ;;  %5664 = vmatprep.subr.bf16.mxu1 %v10090_v48  ;;  %v10236_v29 = vpop.f32.mrf.mxu1 }
0x185d   :  { %5653 = vmatprep.mubr.bf16.mxu0 %v10706_v18  ;;  %5694 = vmatprep.mubr.bf16.mxu1 %v10706_v18  ;;  %10841 = vst [vmem:[#allocation55_spill] sm:$0xff] %v10236_v29 }
0x185e   :  { %v10240_v57 = vpop.f32.mrf.mxu1 }
0x185f   :  { %5624 = vmatpush1.bf16.msra.mxu0 %v10092_v37  ;;  %5665 = vmatpush1.bf16.msra.mxu1 %v10094_v38  ;;  %10843 = vst [vmem:[#allocation31_spill] sm:$0xff] %v10240_v57 }
0x1860   :  { %5625 = vmatprep.subr.bf16.mxu0 %v10100_v8  ;;  %5666 = vmatprep.subr.bf16.mxu1 %v10102_v62  ;;  %v10244_v55 = vpop.f32.mrf.mxu1 }
0x1861   :  { %10845 = vst [vmem:[#allocation34_spill] sm:$0xff] %v10244_v55 }
0x1862   :  { %v10248_v41 = vpop.f32.mrf.mxu1 }
0x1863   :  { %5626 = vmatpush1.bf16.msra.mxu0 %v10104_v43  ;;  %5667 = vmatpush1.bf16.msra.mxu1 %v10106_v7  ;;  %10847 = vst [vmem:[#allocation32_spill] sm:$0xff] %v10248_v41 }
0x1864   :  { %5627 = vmatprep.subr.bf16.mxu0 %v10112_v58  ;;  %5668 = vmatprep.subr.bf16.mxu1 %v10114_v56  ;;  %v10252_v30 = vpop.f32.mrf.mxu1 }
0x1865   :  { %10849 = vst [vmem:[#allocation36_spill] sm:$0xff] %v10252_v30  ;;  %v10859_v30 = vld [vmem:[#allocation29_spill] sm:$0xff] }
0x1866   :  { %v10256_v45 = vpop.f32.mrf.mxu1  ;;  %v10274_v59 = vrot.slane %v4937_v60, %v10859_v30 }
0x1867   :  { %5628 = vmatpush1.bf16.msra.mxu0 %v10116_v52  ;;  %5669 = vmatpush1.bf16.msra.mxu1 %v10118_v10  ;;  %10851 = vst [vmem:[#allocation35_spill] sm:$0xff] %v10256_v45 }
0x1868   :  { %5629 = vmatprep.subr.bf16.mxu0 %v10124_v12  ;;  %5670 = vmatprep.subr.bf16.mxu1 %v10126_v61 }
0x186b   :  { %5630 = vmatpush1.bf16.msra.mxu0 %v10128_v54  ;;  %5671 = vmatpush1.bf16.msra.mxu1 %v10130_v49 }
0x186c   :  { %5631 = vmatprep.subr.bf16.mxu0 %v10136_v13  ;;  %5672 = vmatprep.subr.bf16.mxu1 %v10138_v35 }
0x186f   :  { %5632 = vmatpush1.bf16.msra.mxu0 %v10140_v40  ;;  %5673 = vmatpush1.bf16.msra.mxu1 %v10142_v20 }
0x1870   :  { %5633 = vmatprep.subr.bf16.mxu0 %v10148_v28  ;;  %5674 = vmatprep.subr.bf16.mxu1 %v10150_v53 }
0x1873   :  { %5634 = vmatpush1.bf16.msra.mxu0 %v10152_v2  ;;  %5675 = vmatpush1.bf16.msra.mxu1 %v10154_v11 }
0x1874   :  { %5635 = vmatprep.subr.bf16.mxu0 %v10156_v26  ;;  %5676 = vmatprep.subr.bf16.mxu1 %v10160_v21 }
0x1877   :  { %5636 = vmatpush1.bf16.msra.mxu0 %v10164_v34  ;;  %5677 = vmatpush1.bf16.msra.mxu1 %v10166_v50 }
0x1878   :  { %5738 = vmatprep.subr.bf16.mxu0 %v10076_v15  ;;  %5779 = vmatprep.subr.bf16.mxu1 %v10078_v44 }
0x1912   :  { %v10258_v32 = vpop.f32.mrf.mxu0  ;;  %v10260_v31 = vpop.f32.mrf.mxu1 }
0x1913   :  { %10852 = vst [vmem:[#allocation42_spill] sm:$0xff] %v10258_v32  ;;  %10853 = vst [vmem:[#allocation40_spill] sm:$0xff] %v10260_v31  ;;  %v5277_v31 = vadd.f32 %v10267_v42, %v5144_v0  ;;  %v5280_v0 = vadd.f32 %v10283_v6, %v5219_v14 }
0x1914   :  { %v10262_v16 = vpop.f32.mrf.mxu0  ;;  %v10264_v22 = vpop.f32.mrf.mxu1 }
0x1915   :  { %10854 = vst [vmem:[#allocation45_spill] sm:$0xff] %v10262_v16  ;;  %10855 = vst [vmem:[#allocation39_spill] sm:$0xff] %v10264_v22  ;;  %v5278_v22 = vadd.f32 %v10274_v59, %v5146_v63 }
0x1916   :  { %v10269_v55 = vpop.f32.mrf.mxu0  ;;  %v10271_v25 = vpop.f32.mrf.mxu1 }
0x1917   :  { %10857 = vst [vmem:[#allocation46_spill] sm:$0xff] %v10269_v55  ;;  %10858 = vst [vmem:[#allocation44_spill] sm:$0xff] %v10271_v25 }
0x1918   :  { %v10276_v45 = vpop.f32.mrf.mxu0  ;;  %v10278_v41 = vpop.f32.mrf.mxu1 }
0x1919   :  { %10860 = vst [vmem:[#allocation48_spill] sm:$0xff] %v10276_v45  ;;  %10861 = vst [vmem:[#allocation43_spill] sm:$0xff] %v10278_v41 }
0x191a   :  { %v5539_v32 = vpop.f32.mrf.mxu0  ;;  %v5580_v16 = vpop.f32.mrf.mxu1 }
0x191b   :  { %v5587_v4 = vadd.f32 %v5539_v32, %v5277_v31  ;;  %v5279_v32 = vadd.f32 %v10287_v36, %v5217_v47 }
0x191c   :  { %v5541_v17 = vpop.f32.mrf.mxu0  ;;  %v5582_v39 = vpop.f32.mrf.mxu1 }
0x191d   :  { %v6810_v29 = vmul.f32 -1.442695, %v5587_v4  ;;  %v5588_v55 = vadd.f32 %v5541_v17, %v5278_v22  ;;  %v5590_v63 = vadd.f32 %v5582_v39, %v5280_v0  ;;  %v5281_v0 = vadd.f32 %v10267_v42, %v10218_v1 }
0x191e   :  { %v5543_v57 = vpop.f32.mrf.mxu0  ;;  %v5584_v25 = vpop.f32.mrf.mxu1  ;;  %v5284_v1 = vadd.f32 %v10283_v6, %v10224_v19 }
0x191f   :  { %7731 = vpow2.f32 %v6810_v29  ;;  %v6811_v30 = vmul.f32 -1.442695, %v5588_v55  ;;  %v6812_v4 = vmul.f32 -1.442695, %v5590_v63  ;;  %v5589_v57 = vadd.f32 %v5580_v16, %v5279_v32 }
0x1920   :  { %v5544_v45 = vpop.f32.mrf.mxu0  ;;  %v5585_v41 = vpop.f32.mrf.mxu1 }
0x1921   :  { %7733 = vpow2.f32 %v6811_v30 }
0x1922   :  { %7735 = vpow2.f32 %v6812_v4  ;;  %v5282_v4 = vadd.f32 %v10274_v59, %v10222_v3 }
0x192c   :  { %v7732_v31 = vpop.eup %7731 }
0x192d   :  { %v5594_v25 = vadd.f32 1.0, %v7732_v31 }
0x192e   :  { %v7734_v29 = vpop.eup %7733 }
0x192f   :  { %7737 = vrcp.f32 %v5594_v25  ;;  %v5600_v51 = vadd.f32 1.0, %v7734_v29  ;;  %v7736_v55 = vpop.eup %7735 }
0x1930   :  { %7739 = vtanh.f32 %v5589_v57  ;;  %v5607_v22 = vadd.f32 1.0, %v7736_v55 }
0x1931   :  { %7741 = vrcp.f32 %v5600_v51 }
0x1932   :  { %7743 = vrcp.f32 %v5607_v22 }
0x193c   :  { %v7738_v41 = vpop.eup %7737 }
0x193d   :  { %v7740_v45 = vpop.eup %7739 }
0x193e   :  { %v7742_v14 = vpop.eup %7741  ;;  %v5611_v60 = vmul.f32 %v7740_v45, %v7738_v41 }
0x193f   :  { %v5610_v9 = vmul.f32 0.0, %v7742_v14  ;;  %v7744_v47 = vpop.eup %7743 }
0x1941   :  { %v10290_v39 = vadd.f32 %v5611_v60, %v5610_v9  ;;  %v5283_v60 = vadd.f32 %v10287_v36, %v10220_v27 }
0x1943   :  { %7745 = vtanh.f32 %v10290_v39 }
0x1950   :  { %v7746_v16 = vpop.eup %7745 }
0x1951   :  { %v5614_v17 = vmul.f32 %v7746_v16, %v7744_v47 }
0x1953   :  { %5615 = vst [vmem:[%s10662_s8] sm:$0xff] %v5614_v17  ;;  %v5620_v30 = vpack.c.bf16 %v5614_v17, %v5614_v17 }
0x1955   :  { %5654 = vmatmul.mubr.bf16.vlgmr.msra.gmra.mxu0 %v5620_v30  ;;  %5695 = vmatmul.mubr.bf16.vlgmr.msra.gmra.mxu1 %v5620_v30 }
0x1956   :  { %5739 = vmatpush1.bf16.msra.mxu0 %v10080_v33  ;;  %5780 = vmatpush1.bf16.msra.mxu1 %v10082_v24 }
0x1957   :  { %5740 = vmatprep.subr.bf16.mxu0 %v10088_v23  ;;  %5781 = vmatprep.subr.bf16.mxu1 %v10090_v48 }
0x1958   :  { %5770 = vmatprep.mubr.bf16.mxu0 %v10706_v18  ;;  %5811 = vmatprep.mubr.bf16.mxu1 %v10706_v18 }
0x195a   :  { %5741 = vmatpush1.bf16.msra.mxu0 %v10092_v37  ;;  %5782 = vmatpush1.bf16.msra.mxu1 %v10094_v38 }
0x195b   :  { %5742 = vmatprep.subr.bf16.mxu0 %v10100_v8  ;;  %5783 = vmatprep.subr.bf16.mxu1 %v10102_v62 }
0x195e   :  { %5743 = vmatpush1.bf16.msra.mxu0 %v10104_v43  ;;  %5784 = vmatpush1.bf16.msra.mxu1 %v10106_v7 }
0x195f   :  { %5744 = vmatprep.subr.bf16.mxu0 %v10112_v58  ;;  %5785 = vmatprep.subr.bf16.mxu1 %v10114_v56 }
0x1962   :  { %5745 = vmatpush1.bf16.msra.mxu0 %v10116_v52  ;;  %5786 = vmatpush1.bf16.msra.mxu1 %v10118_v10 }
0x1963   :  { %5746 = vmatprep.subr.bf16.mxu0 %v10124_v12  ;;  %5787 = vmatprep.subr.bf16.mxu1 %v10126_v61 }
0x1966   :  { %5747 = vmatpush1.bf16.msra.mxu0 %v10128_v54  ;;  %5788 = vmatpush1.bf16.msra.mxu1 %v10130_v49 }
0x1967   :  { %5748 = vmatprep.subr.bf16.mxu0 %v10136_v13  ;;  %5789 = vmatprep.subr.bf16.mxu1 %v10138_v35 }
0x196a   :  { %5749 = vmatpush1.bf16.msra.mxu0 %v10140_v40  ;;  %5790 = vmatpush1.bf16.msra.mxu1 %v10142_v20 }
0x196b   :  { %5750 = vmatprep.subr.bf16.mxu0 %v10148_v28  ;;  %5791 = vmatprep.subr.bf16.mxu1 %v10150_v53 }
0x196e   :  { %5751 = vmatpush1.bf16.msra.mxu0 %v10152_v2  ;;  %5792 = vmatpush1.bf16.msra.mxu1 %v10154_v11 }
0x196f   :  { %5752 = vmatprep.subr.bf16.mxu0 %v10156_v26  ;;  %5793 = vmatprep.subr.bf16.mxu1 %v10160_v21 }
0x1972   :  { %5753 = vmatpush1.bf16.msra.mxu0 %v10164_v34  ;;  %5794 = vmatpush1.bf16.msra.mxu1 %v10166_v50 }
0x1973   :  { %5855 = vmatprep.subr.bf16.mxu0 %v10076_v15  ;;  %5896 = vmatprep.subr.bf16.mxu1 %v10078_v44 }
0x1a15   :  { %v5655_v63 = vpop.f32.mrf.mxu0  ;;  %v5696_v32 = vpop.f32.mrf.mxu1 }
0x1a16   :  { %v5703_v31 = vadd.f32 %v5655_v63, %v5281_v0  ;;  %v5705_v3 = vadd.f32 %v5696_v32, %v5283_v60 }
0x1a17   :  { %v5657_v57 = vpop.f32.mrf.mxu0  ;;  %v5698_v25 = vpop.f32.mrf.mxu1 }
0x1a18   :  { %v6813_v29 = vmul.f32 -1.442695, %v5703_v31  ;;  %v5704_v51 = vadd.f32 %v5657_v57, %v5282_v4  ;;  %v5706_v9 = vadd.f32 %v5698_v25, %v5284_v1 }
0x1a19   :  { %v5659_v55 = vpop.f32.mrf.mxu0  ;;  %v5700_v41 = vpop.f32.mrf.mxu1 }
0x1a1a   :  { %7747 = vpow2.f32 %v6813_v29  ;;  %v6814_v45 = vmul.f32 -1.442695, %v5704_v51  ;;  %v6815_v47 = vmul.f32 -1.442695, %v5706_v9 }
0x1a1b   :  { %v5660_v14 = vpop.f32.mrf.mxu0  ;;  %v5701_v22 = vpop.f32.mrf.mxu1 }
0x1a1c   :  { %7749 = vpow2.f32 %v6814_v45  ;;  %v5286_v22 = vadd.f32 %v10274_v59, %v10230_v5 }
0x1a1d   :  { %7751 = vtanh.f32 %v5705_v3 }
0x1a1e   :  { %7753 = vpow2.f32 %v6815_v47 }
0x1a27   :  { %v7748_v16 = vpop.eup %7747 }
0x1a28   :  { %v5710_v17 = vadd.f32 1.0, %v7748_v16 }
0x1a29   :  { %v7750_v30 = vpop.eup %7749 }
0x1a2a   :  { %7755 = vrcp.f32 %v5710_v17  ;;  %v5716_v0 = vadd.f32 1.0, %v7750_v30  ;;  %v7752_v63 = vpop.eup %7751 }
0x1a2b   :  { %v7754_v4 = vpop.eup %7753 }
0x1a2c   :  { %7757 = vrcp.f32 %v5716_v0  ;;  %v5723_v19 = vadd.f32 1.0, %v7754_v4  ;;  %v10864_v4 = vld [vmem:[#allocation56_spill] sm:$0xff] }
0x1a2e   :  { %7759 = vrcp.f32 %v5723_v19 }
0x1a37   :  { %v7756_v31 = vpop.eup %7755 }
0x1a38   :  { %v5727_v57 = vmul.f32 %v7756_v31, %v7752_v63 }
0x1a39   :  { %v7758_v29 = vpop.eup %7757 }
0x1a3a   :  { %v5726_v25 = vmul.f32 %v7758_v29, %v10290_v39  ;;  %v5285_v39 = vadd.f32 %v10267_v42, %v10226_v46  ;;  %v5288_v46 = vadd.f32 %v10283_v6, %v10864_v4  ;;  %v10867_v4 = vld [vmem:[#allocation30_spill] sm:$0xff] }
0x1a3b   :  { %v7760_v27 = vpop.eup %7759 }
0x1a3c   :  { %v10339_v51 = vadd.f32 %v5727_v57, %v5726_v25  ;;  %v10865_v57 = vld [vmem:[#allocation54_spill] sm:$0xff] }
0x1a3d   :  { %v5287_v29 = vadd.f32 %v10287_v36, %v10865_v57 }
0x1a3e   :  { %7761 = vtanh.f32 %v10339_v51 }
0x1a4b   :  { %v7762_v32 = vpop.eup %7761 }
0x1a4c   :  { %v5730_v55 = vmul.f32 %v7762_v32, %v7760_v27 }
0x1a4e   :  { %6816 = vst [vmem:[%s10662_s8 + $0x8] sm:$0xff] %v5730_v55  ;;  %v5737_v41 = vpack.c.bf16 %v5730_v55, %v5730_v55 }
0x1a50   :  { %5771 = vmatmul.mubr.bf16.vlgmr.msra.gmra.mxu0 %v5737_v41  ;;  %5812 = vmatmul.mubr.bf16.vlgmr.msra.gmra.mxu1 %v5737_v41 }
0x1a51   :  { %5856 = vmatpush1.bf16.msra.mxu0 %v10080_v33  ;;  %5897 = vmatpush1.bf16.msra.mxu1 %v10082_v24 }
0x1a52   :  { %5857 = vmatprep.subr.bf16.mxu0 %v10088_v23  ;;  %5898 = vmatprep.subr.bf16.mxu1 %v10090_v48 }
0x1a53   :  { %5887 = vmatprep.mubr.bf16.mxu0 %v10706_v18  ;;  %5928 = vmatprep.mubr.bf16.mxu1 %v10706_v18 }
0x1a55   :  { %5858 = vmatpush1.bf16.msra.mxu0 %v10092_v37  ;;  %5899 = vmatpush1.bf16.msra.mxu1 %v10094_v38 }
0x1a56   :  { %5859 = vmatprep.subr.bf16.mxu0 %v10100_v8  ;;  %5900 = vmatprep.subr.bf16.mxu1 %v10102_v62 }
0x1a59   :  { %5860 = vmatpush1.bf16.msra.mxu0 %v10104_v43  ;;  %5901 = vmatpush1.bf16.msra.mxu1 %v10106_v7 }
0x1a5a   :  { %5861 = vmatprep.subr.bf16.mxu0 %v10112_v58  ;;  %5902 = vmatprep.subr.bf16.mxu1 %v10114_v56 }
0x1a5d   :  { %5862 = vmatpush1.bf16.msra.mxu0 %v10116_v52  ;;  %5903 = vmatpush1.bf16.msra.mxu1 %v10118_v10 }
0x1a5e   :  { %5863 = vmatprep.subr.bf16.mxu0 %v10124_v12  ;;  %5904 = vmatprep.subr.bf16.mxu1 %v10126_v61 }
0x1a61   :  { %5864 = vmatpush1.bf16.msra.mxu0 %v10128_v54  ;;  %5905 = vmatpush1.bf16.msra.mxu1 %v10130_v49 }
0x1a62   :  { %5865 = vmatprep.subr.bf16.mxu0 %v10136_v13  ;;  %5906 = vmatprep.subr.bf16.mxu1 %v10138_v35 }
0x1a65   :  { %5866 = vmatpush1.bf16.msra.mxu0 %v10140_v40  ;;  %5907 = vmatpush1.bf16.msra.mxu1 %v10142_v20 }
0x1a66   :  { %5867 = vmatprep.subr.bf16.mxu0 %v10148_v28  ;;  %5908 = vmatprep.subr.bf16.mxu1 %v10150_v53 }
0x1a69   :  { %5868 = vmatpush1.bf16.msra.mxu0 %v10152_v2  ;;  %5909 = vmatpush1.bf16.msra.mxu1 %v10154_v11 }
0x1a6a   :  { %5869 = vmatprep.subr.bf16.mxu0 %v10156_v26  ;;  %5910 = vmatprep.subr.bf16.mxu1 %v10160_v21 }
0x1a6d   :  { %5870 = vmatpush1.bf16.msra.mxu0 %v10164_v34  ;;  %5911 = vmatpush1.bf16.msra.mxu1 %v10166_v50 }
0x1a6e   :  { %5972 = vmatprep.subr.bf16.mxu0 %v10076_v15  ;;  %6013 = vmatprep.subr.bf16.mxu1 %v10078_v44 }
0x1b10   :  { %v5772_v45 = vpop.f32.mrf.mxu0  ;;  %v5813_v14 = vpop.f32.mrf.mxu1 }
0x1b11   :  { %v5820_v1 = vadd.f32 %v5772_v45, %v5285_v39  ;;  %v5822_v5 = vadd.f32 %v5813_v14, %v5287_v29 }
0x1b12   :  { %v5774_v9 = vpop.f32.mrf.mxu0  ;;  %v5815_v60 = vpop.f32.mrf.mxu1 }
0x1b13   :  { %v6817_v3 = vmul.f32 -1.442695, %v5820_v1  ;;  %v5821_v47 = vadd.f32 %v5774_v9, %v5286_v22  ;;  %v5823_v31 = vadd.f32 %v5815_v60, %v5288_v46  ;;  %v5290_v46 = vadd.f32 %v10274_v59, %v10867_v4 }
0x1b14   :  { %v5776_v16 = vpop.f32.mrf.mxu0  ;;  %v5817_v17 = vpop.f32.mrf.mxu1 }
0x1b15   :  { %7763 = vpow2.f32 %v6817_v3  ;;  %v6818_v30 = vmul.f32 -1.442695, %v5821_v47  ;;  %v6819_v19 = vmul.f32 -1.442695, %v5823_v31 }
0x1b16   :  { %v5777_v0 = vpop.f32.mrf.mxu0  ;;  %v5818_v63 = vpop.f32.mrf.mxu1 }
0x1b17   :  { %7765 = vpow2.f32 %v6818_v30 }
0x1b18   :  { %7767 = vtanh.f32 %v5822_v5 }
0x1b19   :  { %7769 = vpow2.f32 %v6819_v19 }
0x1b22   :  { %v7764_v25 = vpop.eup %7763 }
0x1b23   :  { %v5827_v27 = vadd.f32 1.0, %v7764_v25 }
0x1b24   :  { %v7766_v32 = vpop.eup %7765 }
0x1b25   :  { %7771 = vrcp.f32 %v5827_v27  ;;  %v5833_v55 = vadd.f32 1.0, %v7766_v32  ;;  %v7768_v41 = vpop.eup %7767 }
0x1b26   :  { %v7770_v39 = vpop.eup %7769 }
0x1b27   :  { %7773 = vrcp.f32 %v5833_v55  ;;  %v5840_v9 = vadd.f32 1.0, %v7770_v39  ;;  %v10868_v39 = vld [vmem:[#allocation31_spill] sm:$0xff] }
0x1b29   :  { %7775 = vrcp.f32 %v5840_v9 }
0x1b32   :  { %v7772_v45 = vpop.eup %7771 }
0x1b33   :  { %v5844_v22 = vmul.f32 %v7772_v45, %v7768_v41  ;;  %v5292_v45 = vadd.f32 %v10283_v6, %v10868_v39 }
0x1b34   :  { %v7774_v1 = vpop.eup %7773 }
0x1b35   :  { %v5843_v60 = vmul.f32 %v7774_v1, %v10339_v51  ;;  %v10866_v51 = vld [vmem:[#allocation57_spill] sm:$0xff]  ;;  %v10869_v1 = vld [vmem:[#allocation55_spill] sm:$0xff] }
0x1b36   :  { %v7776_v14 = vpop.eup %7775  ;;  %v5289_v30 = vadd.f32 %v10267_v42, %v10866_v51  ;;  %v5291_v9 = vadd.f32 %v10287_v36, %v10869_v1  ;;  %v10492_v1 = vld [vmem:[#allocation7 + $0x1e0] ss:$16 sps:$4 sm:$0xff]  }
0x1b37   :  { %v10388_v3 = vadd.f32 %v5844_v22, %v5843_v60 }
0x1b39   :  { %7777 = vtanh.f32 %v10388_v3 }
0x1b46   :  { %v7778_v47 = vpop.eup %7777 }
0x1b47   :  { %v5847_v16 = vmul.f32 %v7778_v47, %v7776_v14 }
0x1b49   :  { %6820 = vst [vmem:[%s10662_s8 + $0x10] sm:$0xff] %v5847_v16  ;;  %v5854_v17 = vpack.c.bf16 %v5847_v16, %v5847_v16 }
0x1b4b   :  { %5888 = vmatmul.mubr.bf16.vlgmr.msra.gmra.mxu0 %v5854_v17  ;;  %5929 = vmatmul.mubr.bf16.vlgmr.msra.gmra.mxu1 %v5854_v17 }
0x1b4c   :  { %5973 = vmatpush1.bf16.msra.mxu0 %v10080_v33  ;;  %6014 = vmatpush1.bf16.msra.mxu1 %v10082_v24 }
0x1b4d   :  { %5974 = vmatprep.subr.bf16.mxu0 %v10088_v23  ;;  %6015 = vmatprep.subr.bf16.mxu1 %v10090_v48 }
0x1b4e   :  { %6004 = vmatprep.mubr.bf16.mxu0 %v10706_v18  ;;  %6045 = vmatprep.mubr.bf16.mxu1 %v10706_v18 }
0x1b50   :  { %5975 = vmatpush1.bf16.msra.mxu0 %v10092_v37  ;;  %6016 = vmatpush1.bf16.msra.mxu1 %v10094_v38 }
0x1b51   :  { %5976 = vmatprep.subr.bf16.mxu0 %v10100_v8  ;;  %6017 = vmatprep.subr.bf16.mxu1 %v10102_v62 }
0x1b54   :  { %5977 = vmatpush1.bf16.msra.mxu0 %v10104_v43  ;;  %6018 = vmatpush1.bf16.msra.mxu1 %v10106_v7 }
0x1b55   :  { %5978 = vmatprep.subr.bf16.mxu0 %v10112_v58  ;;  %6019 = vmatprep.subr.bf16.mxu1 %v10114_v56 }
0x1b58   :  { %5979 = vmatpush1.bf16.msra.mxu0 %v10116_v52  ;;  %6020 = vmatpush1.bf16.msra.mxu1 %v10118_v10 }
0x1b59   :  { %5980 = vmatprep.subr.bf16.mxu0 %v10124_v12  ;;  %6021 = vmatprep.subr.bf16.mxu1 %v10126_v61 }
0x1b5c   :  { %5981 = vmatpush1.bf16.msra.mxu0 %v10128_v54  ;;  %6022 = vmatpush1.bf16.msra.mxu1 %v10130_v49 }
0x1b5d   :  { %5982 = vmatprep.subr.bf16.mxu0 %v10136_v13  ;;  %6023 = vmatprep.subr.bf16.mxu1 %v10138_v35 }
0x1b60   :  { %5983 = vmatpush1.bf16.msra.mxu0 %v10140_v40  ;;  %6024 = vmatpush1.bf16.msra.mxu1 %v10142_v20 }
0x1b61   :  { %5984 = vmatprep.subr.bf16.mxu0 %v10148_v28  ;;  %6025 = vmatprep.subr.bf16.mxu1 %v10150_v53 }
0x1b64   :  { %5985 = vmatpush1.bf16.msra.mxu0 %v10152_v2  ;;  %6026 = vmatpush1.bf16.msra.mxu1 %v10154_v11 }
0x1b65   :  { %5986 = vmatprep.subr.bf16.mxu0 %v10156_v26  ;;  %6027 = vmatprep.subr.bf16.mxu1 %v10160_v21 }
0x1b68   :  { %5987 = vmatpush1.bf16.msra.mxu0 %v10164_v34  ;;  %6028 = vmatpush1.bf16.msra.mxu1 %v10166_v50 }
0x1b69   :  { %6089 = vmatprep.subr.bf16.mxu0 %v10076_v15  ;;  %6130 = vmatprep.subr.bf16.mxu1 %v10078_v44 }
0x1c0b   :  { %v5889_v0 = vpop.f32.mrf.mxu0  ;;  %v5930_v63 = vpop.f32.mrf.mxu1 }
0x1c0c   :  { %v5937_v31 = vadd.f32 %v5889_v0, %v5289_v30  ;;  %v5939_v60 = vadd.f32 %v5930_v63, %v5291_v9  ;;  %v10495_v9 = vld [vmem:[#allocation7 + $0x1e8] ss:$16 sps:$4 sm:$0xff]  }
0x1c0d   :  { %v5891_v57 = vpop.f32.mrf.mxu0  ;;  %v5932_v29 = vpop.f32.mrf.mxu1 }
0x1c0e   :  { %v6821_v5 = vmul.f32 -1.442695, %v5937_v31  ;;  %v5938_v19 = vadd.f32 %v5891_v57, %v5290_v46  ;;  %v5940_v22 = vadd.f32 %v5932_v29, %v5292_v45 }
0x1c0f   :  { %v5893_v25 = vpop.f32.mrf.mxu0  ;;  %v5934_v27 = vpop.f32.mrf.mxu1 }
0x1c10   :  { %7779 = vpow2.f32 %v6821_v5  ;;  %v6822_v32 = vmul.f32 -1.442695, %v5938_v19  ;;  %v6823_v14 = vmul.f32 -1.442695, %v5940_v22 }
0x1c11   :  { %v5894_v55 = vpop.f32.mrf.mxu0  ;;  %v5935_v41 = vpop.f32.mrf.mxu1 }
0x1c12   :  { %7781 = vpow2.f32 %v6822_v32 }
0x1c13   :  { %7783 = vtanh.f32 %v5939_v60  ;;  %v10498_v60 = vld [vmem:[#allocation7 + $0x1c4] ss:$16 sps:$4 sm:$0xff]  }
0x1c14   :  { %7785 = vpow2.f32 %v6823_v14  ;;  %v10501_v14 = vld [vmem:[#allocation7 + $0x1cc] ss:$16 sps:$4 sm:$0xff]  }
0x1c1d   :  { %v7780_v47 = vpop.eup %7779 }
0x1c1e   :  { %v5944_v16 = vadd.f32 1.0, %v7780_v47  ;;  %v10506_v47 = vld [vmem:[#allocation7 + $0x1c0] ss:$16 sps:$4 sm:$0xff]  }
0x1c1f   :  { %v7782_v17 = vpop.eup %7781 }
0x1c20   :  { %7787 = vrcp.f32 %v5944_v16  ;;  %v5950_v51 = vadd.f32 1.0, %v7782_v17  ;;  %v7784_v30 = vpop.eup %7783  ;;  %v10509_v16 = vld [vmem:[#allocation7 + $0x1c8] ss:$16 sps:$4 sm:$0xff]   ;;  %v10512_v17 = vld [vmem:[#allocation7 + $0x1a4] ss:$16 sps:$4 sm:$0xff]  }
0x1c21   :  { %v7786_v0 = vpop.eup %7785 }
0x1c22   :  { %7789 = vrcp.f32 %v5950_v51  ;;  %v5957_v57 = vadd.f32 1.0, %v7786_v0  ;;  %v10515_v51 = vld [vmem:[#allocation7 + $0x1ac] ss:$16 sps:$4 sm:$0xff]   ;;  %v10521_v0 = vld [vmem:[#allocation7 + $0x1a8] ss:$16 sps:$4 sm:$0xff]  }
0x1c24   :  { %7791 = vrcp.f32 %v5957_v57  ;;  %v10533_v57 = vld [vmem:[#allocation7 + $0x188] ss:$16 sps:$4 sm:$0xff]  }
0x1c2d   :  { %v7788_v4 = vpop.eup %7787 }
0x1c2e   :  { %v5961_v46 = vmul.f32 %v7788_v4, %v7784_v30  ;;  %v10518_v30 = vld [vmem:[#allocation7 + $0x1a0] ss:$16 sps:$4 sm:$0xff]   ;;  %v10524_v4 = vld [vmem:[#allocation7 + $0x184] ss:$16 sps:$4 sm:$0xff]  }
0x1c2f   :  { %v7790_v31 = vpop.eup %7789 }
0x1c30   :  { %v5960_v29 = vmul.f32 %v7790_v31, %v10388_v3  ;;  %v10530_v31 = vld [vmem:[#allocation7 + $0x180] ss:$16 sps:$4 sm:$0xff]  }
0x1c31   :  { %v7792_v63 = vpop.eup %7791 }
0x1c32   :  { %v10437_v5 = vadd.f32 %v5961_v46, %v5960_v29  ;;  %v10527_v46 = vld [vmem:[#allocation7 + $0x18c] ss:$16 sps:$4 sm:$0xff]   ;;  %v10536_v29 = vld [vmem:[#allocation7 + $0x164] ss:$16 sps:$4 sm:$0xff]  }
0x1c34   :  { %7793 = vtanh.f32 %v10437_v5 }
0x1c41   :  { %v7794_v19 = vpop.eup %7793 }
0x1c42   :  { %v5964_v25 = vmul.f32 %v7794_v19, %v7792_v63  ;;  %v10542_v63 = vld [vmem:[#allocation7 + $0x160] ss:$16 sps:$4 sm:$0xff]   ;;  %v10545_v19 = vld [vmem:[#allocation7 + $0x168] ss:$16 sps:$4 sm:$0xff]  }
0x1c44   :  { %6824 = vst [vmem:[%s10662_s8 + $0x18] sm:$0xff] %v5964_v25  ;;  %v5971_v27 = vpack.c.bf16 %v5964_v25, %v5964_v25  ;;  %v10548_v25 = vld [vmem:[#allocation7 + $0x144] ss:$16 sps:$4 sm:$0xff]  }
0x1c46   :  { %6005 = vmatmul.mubr.bf16.vlgmr.msra.gmra.mxu0 %v5971_v27  ;;  %6046 = vmatmul.mubr.bf16.vlgmr.msra.gmra.mxu1 %v5971_v27  ;;  %v10551_v27 = vld [vmem:[#allocation7 + $0x14c] ss:$16 sps:$4 sm:$0xff]  }
0x1c47   :  { %6090 = vmatpush1.bf16.msra.mxu0 %v10080_v33  ;;  %6131 = vmatpush1.bf16.msra.mxu1 %v10082_v24  ;;  %v10870_v33 = vld [vmem:[#allocation33_spill] sm:$0xff] }
0x1c48   :  { %6091 = vmatprep.subr.bf16.mxu0 %v10088_v23  ;;  %6132 = vmatprep.subr.bf16.mxu1 %v10090_v48  ;;  %v5293_v24 = vadd.f32 %v10267_v42, %v10870_v33  ;;  %v10554_v33 = vld [vmem:[#allocation7 + $0x140] ss:$16 sps:$4 sm:$0xff]  }
0x1c49   :  { %6121 = vmatprep.mubr.bf16.mxu0 %v10706_v18  ;;  %6162 = vmatprep.mubr.bf16.mxu1 %v10706_v18 }
0x1c4b   :  { %6092 = vmatpush1.bf16.msra.mxu0 %v10092_v37  ;;  %6133 = vmatpush1.bf16.msra.mxu1 %v10094_v38  ;;  %v10871_v37 = vld [vmem:[#allocation37_spill] sm:$0xff] }
0x1c4c   :  { %6093 = vmatprep.subr.bf16.mxu0 %v10100_v8  ;;  %6134 = vmatprep.subr.bf16.mxu1 %v10102_v62  ;;  %v5294_v38 = vadd.f32 %v10274_v59, %v10871_v37  ;;  %v10566_v37 = vld [vmem:[#allocation7 + $0x120] ss:$16 sps:$4 sm:$0xff]  }
0x1c4f   :  { %6094 = vmatpush1.bf16.msra.mxu0 %v10104_v43  ;;  %6135 = vmatpush1.bf16.msra.mxu1 %v10106_v7 }
0x1c50   :  { %6095 = vmatprep.subr.bf16.mxu0 %v10112_v58  ;;  %6136 = vmatprep.subr.bf16.mxu1 %v10114_v56 }
0x1c53   :  { %6096 = vmatpush1.bf16.msra.mxu0 %v10116_v52  ;;  %6137 = vmatpush1.bf16.msra.mxu1 %v10118_v10 }
0x1c54   :  { %6097 = vmatprep.subr.bf16.mxu0 %v10124_v12  ;;  %6138 = vmatprep.subr.bf16.mxu1 %v10126_v61 }
0x1c57   :  { %6098 = vmatpush1.bf16.msra.mxu0 %v10128_v54  ;;  %6139 = vmatpush1.bf16.msra.mxu1 %v10130_v49  ;;  %v10873_v49 = vld [vmem:[#allocation34_spill] sm:$0xff] }
0x1c58   :  { %6099 = vmatprep.subr.bf16.mxu0 %v10136_v13  ;;  %6140 = vmatprep.subr.bf16.mxu1 %v10138_v35  ;;  %v5295_v13 = vadd.f32 %v10287_v36, %v10873_v49 }
0x1c5b   :  { %6100 = vmatpush1.bf16.msra.mxu0 %v10140_v40  ;;  %6141 = vmatpush1.bf16.msra.mxu1 %v10142_v20 }
0x1c5c   :  { %6101 = vmatprep.subr.bf16.mxu0 %v10148_v28  ;;  %6142 = vmatprep.subr.bf16.mxu1 %v10150_v53 }
0x1c5f   :  { %6102 = vmatpush1.bf16.msra.mxu0 %v10152_v2  ;;  %6143 = vmatpush1.bf16.msra.mxu1 %v10154_v11 }
0x1c60   :  { %6103 = vmatprep.subr.bf16.mxu0 %v10156_v26  ;;  %6144 = vmatprep.subr.bf16.mxu1 %v10160_v21 }
0x1c63   :  { %6104 = vmatpush1.bf16.msra.mxu0 %v10164_v34  ;;  %6145 = vmatpush1.bf16.msra.mxu1 %v10166_v50 }
0x1c64   :  { %6206 = vmatprep.subr.bf16.mxu0 %v10076_v15  ;;  %6247 = vmatprep.subr.bf16.mxu1 %v10078_v44  ;;  %v10872_v44 = vld [vmem:[#allocation32_spill] sm:$0xff] }
0x1c65   :  { %v5296_v61 = vadd.f32 %v10283_v6, %v10872_v44  ;;  %v10875_v44 = vld [vmem:[#allocation41_spill] sm:$0xff] }
0x1d06   :  { %v6006_v23 = vpop.f32.mrf.mxu0  ;;  %v6047_v48 = vpop.f32.mrf.mxu1 }
0x1d07   :  { %v6054_v8 = vadd.f32 %v6006_v23, %v5293_v24  ;;  %v6056_v35 = vadd.f32 %v6047_v48, %v5295_v13  ;;  %v10557_v24 = vld [vmem:[#allocation7 + $0x148] ss:$16 sps:$4 sm:$0xff]   ;;  %v10560_v23 = vld [vmem:[#allocation7 + $0x124] ss:$16 sps:$4 sm:$0xff]   ;;  %v10563_v48 = vld [vmem:[#allocation7 + $0x12c] ss:$16 sps:$4 sm:$0xff]  }
0x1d08   :  { %v6008_v62 = vpop.f32.mrf.mxu0  ;;  %v6049_v43 = vpop.f32.mrf.mxu1 }
0x1d09   :  { %v6825_v7 = vmul.f32 -1.442695, %v6054_v8  ;;  %v6055_v58 = vadd.f32 %v6008_v62, %v5294_v38  ;;  %v6057_v54 = vadd.f32 %v6049_v43, %v5296_v61  ;;  %v10569_v38 = vld [vmem:[#allocation7 + $0x128] ss:$16 sps:$4 sm:$0xff]   ;;  %v10572_v8 = vld [vmem:[#allocation7 + $0x104] ss:$16 sps:$4 sm:$0xff]   ;;  %v5298_v61 = vadd.f32 %v10274_v59, %v10875_v44 }
0x1d0a   :  { %v6010_v56 = vpop.f32.mrf.mxu0  ;;  %v6051_v52 = vpop.f32.mrf.mxu1  ;;  %v10575_v62 = vld [vmem:[#allocation7 + $0x10c] ss:$16 sps:$4 sm:$0xff]   ;;  %v10578_v43 = vld [vmem:[#allocation7 + $0x100] ss:$16 sps:$4 sm:$0xff]  }
0x1d0b   :  { %7795 = vpow2.f32 %v6825_v7  ;;  %v6826_v10 = vmul.f32 -1.442695, %v6055_v58  ;;  %v6827_v40 = vmul.f32 -1.442695, %v6057_v54  ;;  %v10581_v7 = vld [vmem:[#allocation7 + $0x108] ss:$16 sps:$4 sm:$0xff]  }
0x1d0c   :  { %v6011_v15 = vpop.f32.mrf.mxu0  ;;  %v6052_v12 = vpop.f32.mrf.mxu1  ;;  %v7921_v58 = vld [vmem:[#allocation7 + $0x1e4] ss:$16 sps:$4 sm:$0xff]   ;;  %v7922_v56 = vld [vmem:[#allocation7 + $0x1ec] ss:$16 sps:$4 sm:$0xff]  }
0x1d0d   :  { %7797 = vpow2.f32 %v6826_v10  ;;  %v10874_v52 = vld [vmem:[#allocation38_spill] sm:$0xff] }
0x1d0e   :  { %7799 = vtanh.f32 %v6056_v35  ;;  %v5297_v10 = vadd.f32 %v10267_v42, %v10874_v52 }
0x1d0f   :  { %7801 = vpow2.f32 %v6827_v40 }
0x1d18   :  { %v7796_v20 = vpop.eup %7795 }
0x1d19   :  { %v6061_v28 = vadd.f32 1.0, %v7796_v20 }
0x1d1a   :  { %v7798_v53 = vpop.eup %7797 }
0x1d1b   :  { %7803 = vrcp.f32 %v6061_v28  ;;  %v6067_v2 = vadd.f32 1.0, %v7798_v53  ;;  %v7800_v11 = vpop.eup %7799 }
0x1d1c   :  { %v7802_v26 = vpop.eup %7801 }
0x1d1d   :  { %7805 = vrcp.f32 %v6067_v2  ;;  %v6074_v3 = vadd.f32 1.0, %v7802_v26  ;;  %v10876_v26 = vld [vmem:[#allocation35_spill] sm:$0xff] }
0x1d1f   :  { %7807 = vrcp.f32 %v6074_v3 }
0x1d28   :  { %v7804_v21 = vpop.eup %7803 }
0x1d29   :  { %v6078_v34 = vmul.f32 %v7804_v21, %v7800_v11  ;;  %v5300_v21 = vadd.f32 %v10283_v6, %v10876_v26 }
0x1d2a   :  { %v7806_v50 = vpop.eup %7805 }
0x1d2b   :  { %v6077_v32 = vmul.f32 %v7806_v50, %v10437_v5  ;;  %v10539_v5 = vld [vmem:[#allocation7 + $0x16c] ss:$16 sps:$4 sm:$0xff]  }
0x1d2c   :  { %v7808_v41 = vpop.eup %7807  ;;  %v10877_v50 = vld [vmem:[#allocation36_spill] sm:$0xff] }
0x1d2d   :  { %v10486_v55 = vadd.f32 %v6078_v34, %v6077_v32  ;;  %v5299_v3 = vadd.f32 %v10287_v36, %v10877_v50 }
0x1d2f   :  { %7809 = vtanh.f32 %v10486_v55 }
0x1d3c   :  { %v7810_v39 = vpop.eup %7809 }
0x1d3d   :  { %v6081_v45 = vmul.f32 %v7810_v39, %v7808_v41 }
0x1d3f   :  { %6828 = vst [vmem:[%s10662_s8 + $0x20] sm:$0xff] %v6081_v45  ;;  %v6088_v22 = vpack.c.bf16 %v6081_v45, %v6081_v45 }
0x1d41   :  { %6122 = vmatmul.mubr.bf16.vlgmr.msra.gmra.mxu0 %v6088_v22  ;;  %6163 = vmatmul.mubr.bf16.vlgmr.msra.gmra.mxu1 %v6088_v22 }
0x1d42   :  { %6207 = vmatpush1.bf16.msra.mxu0 %v10492_v1  ;;  %6248 = vmatpush1.bf16.msra.mxu1 %v10495_v9 }
0x1d43   :  { %6208 = vmatprep.subr.bf16.mxu0 %v10498_v60  ;;  %6249 = vmatprep.subr.bf16.mxu1 %v10501_v14 }
0x1d44   :  { %6238 = vmatprep.mubr.bf16.mxu0 %v10706_v18  ;;  %6279 = vmatprep.mubr.bf16.mxu1 %v10706_v18 }
0x1d46   :  { %6209 = vmatpush1.bf16.msra.mxu0 %v10506_v47  ;;  %6250 = vmatpush1.bf16.msra.mxu1 %v10509_v16 }
0x1d47   :  { %6210 = vmatprep.subr.bf16.mxu0 %v10512_v17  ;;  %6251 = vmatprep.subr.bf16.mxu1 %v10515_v51 }
0x1d4a   :  { %6211 = vmatpush1.bf16.msra.mxu0 %v10518_v30  ;;  %6252 = vmatpush1.bf16.msra.mxu1 %v10521_v0 }
0x1d4b   :  { %6212 = vmatprep.subr.bf16.mxu0 %v10524_v4  ;;  %6253 = vmatprep.subr.bf16.mxu1 %v10527_v46 }
0x1d4e   :  { %6213 = vmatpush1.bf16.msra.mxu0 %v10530_v31  ;;  %6254 = vmatpush1.bf16.msra.mxu1 %v10533_v57 }
0x1d4f   :  { %6214 = vmatprep.subr.bf16.mxu0 %v10536_v29  ;;  %6255 = vmatprep.subr.bf16.mxu1 %v10539_v5 }
0x1d52   :  { %6215 = vmatpush1.bf16.msra.mxu0 %v10542_v63  ;;  %6256 = vmatpush1.bf16.msra.mxu1 %v10545_v19 }
0x1d53   :  { %6216 = vmatprep.subr.bf16.mxu0 %v10548_v25  ;;  %6257 = vmatprep.subr.bf16.mxu1 %v10551_v27 }
0x1d56   :  { %6217 = vmatpush1.bf16.msra.mxu0 %v10554_v33  ;;  %6258 = vmatpush1.bf16.msra.mxu1 %v10557_v24 }
0x1d57   :  { %6218 = vmatprep.subr.bf16.mxu0 %v10560_v23  ;;  %6259 = vmatprep.subr.bf16.mxu1 %v10563_v48 }
0x1d5a   :  { %6219 = vmatpush1.bf16.msra.mxu0 %v10566_v37  ;;  %6260 = vmatpush1.bf16.msra.mxu1 %v10569_v38 }
0x1d5b   :  { %6220 = vmatprep.subr.bf16.mxu0 %v10572_v8  ;;  %6261 = vmatprep.subr.bf16.mxu1 %v10575_v62 }
0x1d5e   :  { %6221 = vmatpush1.bf16.msra.mxu0 %v10578_v43  ;;  %6262 = vmatpush1.bf16.msra.mxu1 %v10581_v7 }
0x1d5f   :  { %6323 = vmatprep.subr.bf16.mxu0 %v7921_v58  ;;  %6364 = vmatprep.subr.bf16.mxu1 %v7922_v56 }
0x1e01   :  { %v6123_v15 = vpop.f32.mrf.mxu0  ;;  %v6164_v12 = vpop.f32.mrf.mxu1 }
0x1e02   :  { %v6171_v54 = vadd.f32 %v6123_v15, %v5297_v10  ;;  %v6173_v32 = vadd.f32 %v6164_v12, %v5299_v3 }
0x1e03   :  { %v6125_v49 = vpop.f32.mrf.mxu0  ;;  %v6166_v13 = vpop.f32.mrf.mxu1 }
0x1e04   :  { %v6829_v35 = vmul.f32 -1.442695, %v6171_v54  ;;  %v6172_v40 = vadd.f32 %v6125_v49, %v5298_v61  ;;  %v6174_v34 = vadd.f32 %v6166_v13, %v5300_v21 }
0x1e05   :  { %v6127_v20 = vpop.f32.mrf.mxu0  ;;  %v6168_v28 = vpop.f32.mrf.mxu1 }
0x1e06   :  { %7811 = vpow2.f32 %v6829_v35  ;;  %v6830_v53 = vmul.f32 -1.442695, %v6172_v40  ;;  %v6831_v41 = vmul.f32 -1.442695, %v6174_v34  ;;  %v10882_v34 = vld [vmem:[#allocation46_spill] sm:$0xff] }
0x1e07   :  { %v6128_v2 = vpop.f32.mrf.mxu0  ;;  %v6169_v11 = vpop.f32.mrf.mxu1  ;;  %v5305_v50 = vadd.f32 %v10267_v42, %v10882_v34 }
0x1e08   :  { %7813 = vpow2.f32 %v6830_v53 }
0x1e09   :  { %7815 = vtanh.f32 %v6173_v32 }
0x1e0a   :  { %7817 = vpow2.f32 %v6831_v41  ;;  %v10883_v41 = vld [vmem:[#allocation48_spill] sm:$0xff] }
0x1e13   :  { %v7812_v39 = vpop.eup %7811 }
0x1e14   :  { %v6178_v45 = vadd.f32 1.0, %v7812_v39  ;;  %v5306_v39 = vadd.f32 %v10274_v59, %v10883_v41 }
0x1e15   :  { %v7814_v22 = vpop.eup %7813 }
0x1e16   :  { %7819 = vrcp.f32 %v6178_v45  ;;  %v6184_v58 = vadd.f32 1.0, %v7814_v22  ;;  %v7816_v56 = vpop.eup %7815 }
0x1e17   :  { %v7818_v52 = vpop.eup %7817 }
0x1e18   :  { %7821 = vrcp.f32 %v6184_v58  ;;  %v6191_v61 = vadd.f32 1.0, %v7818_v52 }
0x1e1a   :  { %7823 = vrcp.f32 %v6191_v61 }
0x1e23   :  { %v7820_v10 = vpop.eup %7819 }
0x1e24   :  { %v6195_v15 = vmul.f32 %v7820_v10, %v7816_v56 }
0x1e25   :  { %v7822_v44 = vpop.eup %7821 }
0x1e26   :  { %v6194_v54 = vmul.f32 %v7822_v44, %v10486_v55 }
0x1e27   :  { %v7824_v12 = vpop.eup %7823 }
0x1e28   :  { %v10593_v49 = vadd.f32 %v6195_v15, %v6194_v54 }
0x1e2a   :  { %7825 = vtanh.f32 %v10593_v49 }
0x1e37   :  { %v7826_v13 = vpop.eup %7825 }
0x1e38   :  { %v6198_v35 = vmul.f32 %v7826_v13, %v7824_v12  ;;  %v10885_v13 = vld [vmem:[#allocation44_spill] sm:$0xff] }
0x1e3a   :  { %6832 = vst [vmem:[%s10662_s8 + $0x28] sm:$0xff] %v6198_v35  ;;  %v6205_v40 = vpack.c.bf16 %v6198_v35, %v6198_v35  ;;  %v5307_v35 = vadd.f32 %v10287_v36, %v10885_v13 }
0x1e3c   :  { %6239 = vmatmul.mubr.bf16.vlgmr.msra.gmra.mxu0 %v6205_v40  ;;  %6280 = vmatmul.mubr.bf16.vlgmr.msra.gmra.mxu1 %v6205_v40 }
0x1e3d   :  { %6324 = vmatpush1.bf16.msra.mxu0 %v10492_v1  ;;  %6365 = vmatpush1.bf16.msra.mxu1 %v10495_v9 }
0x1e3e   :  { %6325 = vmatprep.subr.bf16.mxu0 %v10498_v60  ;;  %6366 = vmatprep.subr.bf16.mxu1 %v10501_v14  ;;  %v10879_v60 = vld [vmem:[#allocation45_spill] sm:$0xff] }
0x1e3f   :  { %6355 = vmatprep.mubr.bf16.mxu0 %v10706_v18  ;;  %6396 = vmatprep.mubr.bf16.mxu1 %v10706_v18  ;;  %v10878_v18 = vld [vmem:[#allocation42_spill] sm:$0xff]  ;;  %v5302_v14 = vadd.f32 %v10274_v59, %v10879_v60 }
0x1e40   :  { %v5301_v55 = vadd.f32 %v10267_v42, %v10878_v18 }
0x1e41   :  { %6326 = vmatpush1.bf16.msra.mxu0 %v10506_v47  ;;  %6367 = vmatpush1.bf16.msra.mxu1 %v10509_v16 }
0x1e42   :  { %6327 = vmatprep.subr.bf16.mxu0 %v10512_v17  ;;  %6368 = vmatprep.subr.bf16.mxu1 %v10515_v51 }
0x1e45   :  { %6328 = vmatpush1.bf16.msra.mxu0 %v10518_v30  ;;  %6369 = vmatpush1.bf16.msra.mxu1 %v10521_v0 }
0x1e46   :  { %6329 = vmatprep.subr.bf16.mxu0 %v10524_v4  ;;  %6370 = vmatprep.subr.bf16.mxu1 %v10527_v46 }
0x1e49   :  { %6330 = vmatpush1.bf16.msra.mxu0 %v10530_v31  ;;  %6371 = vmatpush1.bf16.msra.mxu1 %v10533_v57 }
0x1e4a   :  { %6331 = vmatprep.subr.bf16.mxu0 %v10536_v29  ;;  %6372 = vmatprep.subr.bf16.mxu1 %v10539_v5  ;;  %v10880_v29 = vld [vmem:[#allocation39_spill] sm:$0xff] }
0x1e4b   :  { %v5304_v5 = vadd.f32 %v10283_v6, %v10880_v29 }
0x1e4d   :  { %6332 = vmatpush1.bf16.msra.mxu0 %v10542_v63  ;;  %6373 = vmatpush1.bf16.msra.mxu1 %v10545_v19  ;;  %v10881_v19 = vld [vmem:[#allocation40_spill] sm:$0xff] }
0x1e4e   :  { %6333 = vmatprep.subr.bf16.mxu0 %v10548_v25  ;;  %6374 = vmatprep.subr.bf16.mxu1 %v10551_v27  ;;  %v5303_v25 = vadd.f32 %v10287_v36, %v10881_v19 }
0x1e51   :  { %6334 = vmatpush1.bf16.msra.mxu0 %v10554_v33  ;;  %6375 = vmatpush1.bf16.msra.mxu1 %v10557_v24 }
0x1e52   :  { %6335 = vmatprep.subr.bf16.mxu0 %v10560_v23  ;;  %6376 = vmatprep.subr.bf16.mxu1 %v10563_v48 }
0x1e55   :  { %6336 = vmatpush1.bf16.msra.mxu0 %v10566_v37  ;;  %6377 = vmatpush1.bf16.msra.mxu1 %v10569_v38 }
0x1e56   :  { %6337 = vmatprep.subr.bf16.mxu0 %v10572_v8  ;;  %6378 = vmatprep.subr.bf16.mxu1 %v10575_v62 }
0x1e59   :  { %6338 = vmatpush1.bf16.msra.mxu0 %v10578_v43  ;;  %6379 = vmatpush1.bf16.msra.mxu1 %v10581_v7 }
0x1efc   :  { %v6240_v1 = vpop.f32.mrf.mxu0  ;;  %v6281_v9 = vpop.f32.mrf.mxu1 }
0x1efd   :  { %v6288_v47 = vadd.f32 %v6240_v1, %v5301_v55  ;;  %v6290_v27 = vadd.f32 %v6281_v9, %v5303_v25 }
0x1efe   :  { %v6242_v16 = vpop.f32.mrf.mxu0  ;;  %v6283_v17 = vpop.f32.mrf.mxu1 }
0x1eff   :  { %v6833_v51 = vmul.f32 -1.442695, %v6288_v47  ;;  %v6289_v30 = vadd.f32 %v6242_v16, %v5302_v14  ;;  %v6291_v63 = vadd.f32 %v6283_v17, %v5304_v5 }
0x1f00   :  { %v6244_v0 = vpop.f32.mrf.mxu0  ;;  %v6285_v4 = vpop.f32.mrf.mxu1 }
0x1f01   :  { %7827 = vpow2.f32 %v6833_v51  ;;  %v6834_v46 = vmul.f32 -1.442695, %v6289_v30  ;;  %v6835_v33 = vmul.f32 -1.442695, %v6291_v63 }
0x1f02   :  { %v6245_v31 = vpop.f32.mrf.mxu0  ;;  %v6286_v57 = vpop.f32.mrf.mxu1 }
0x1f03   :  { %7829 = vpow2.f32 %v6834_v46 }
0x1f04   :  { %7831 = vtanh.f32 %v6290_v27 }
0x1f05   :  { %7833 = vpow2.f32 %v6835_v33 }
0x1f0e   :  { %v7828_v24 = vpop.eup %7827 }
0x1f0f   :  { %v6295_v23 = vadd.f32 1.0, %v7828_v24 }
0x1f10   :  { %v7830_v48 = vpop.eup %7829 }
0x1f11   :  { %7835 = vrcp.f32 %v6295_v23  ;;  %v6301_v37 = vadd.f32 1.0, %v7830_v48  ;;  %v7832_v38 = vpop.eup %7831 }
0x1f12   :  { %v7834_v8 = vpop.eup %7833 }
0x1f13   :  { %7837 = vrcp.f32 %v6301_v37  ;;  %v6308_v20 = vadd.f32 1.0, %v7834_v8 }
0x1f15   :  { %7839 = vrcp.f32 %v6308_v20 }
0x1f1e   :  { %v7836_v62 = vpop.eup %7835 }
0x1f1f   :  { %v6312_v43 = vmul.f32 %v7836_v62, %v7832_v38 }
0x1f20   :  { %v7838_v7 = vpop.eup %7837 }
0x1f21   :  { %v6311_v28 = vmul.f32 %v7838_v7, %v10593_v49  ;;  %v10884_v49 = vld [vmem:[#allocation43_spill] sm:$0xff] }
0x1f22   :  { %v7840_v2 = vpop.eup %7839  ;;  %v5308_v42 = vadd.f32 %v10283_v6, %v10884_v49 }
0x1f23   :  { %v6313_v53 = vadd.f32 %v6312_v43, %v6311_v28 }
0x1f25   :  { %7841 = vtanh.f32 %v6313_v53 }
0x1f32   :  { %v7842_v11 = vpop.eup %7841 }
0x1f33   :  { %v6315_v26 = vmul.f32 %v7842_v11, %v7840_v2 }
0x1f35   :  { %6836 = vst [vmem:[%s10662_s8 + $0x30] sm:$0xff] %v6315_v26  ;;  %v6322_v21 = vpack.c.bf16 %v6315_v26, %v6315_v26 }
0x1f37   :  { %6356 = vmatmul.mubr.bf16.vlgmr.msra.gmra.mxu0 %v6322_v21  ;;  %6397 = vmatmul.mubr.bf16.vlgmr.msra.gmra.mxu1 %v6322_v21 }
0x1ff7   :  { %v6357_v3 = vpop.f32.mrf.mxu0  ;;  %v6398_v32 = vpop.f32.mrf.mxu1 }
0x1ff8   :  { %v6405_v45 = vadd.f32 %v6357_v3, %v5305_v50  ;;  %v6407_v59 = vadd.f32 %v6398_v32, %v5307_v35 }
0x1ff9   :  { %v6359_v22 = vpop.f32.mrf.mxu0  ;;  %v6400_v58 = vpop.f32.mrf.mxu1 }
0x1ffa   :  { %v6837_v56 = vmul.f32 -1.442695, %v6405_v45  ;;  %v6406_v52 = vadd.f32 %v6359_v22, %v5306_v39  ;;  %v6408_v12 = vadd.f32 %v6400_v58, %v5308_v42 }
0x1ffb   :  { %v6361_v10 = vpop.f32.mrf.mxu0  ;;  %v6402_v15 = vpop.f32.mrf.mxu1 }
0x1ffc   :  { %7843 = vpow2.f32 %v6837_v56  ;;  %v6838_v44 = vmul.f32 -1.442695, %v6406_v52  ;;  %v6839_v40 = vmul.f32 -1.442695, %v6408_v12 }
0x1ffd   :  { %v6362_v61 = vpop.f32.mrf.mxu0  ;;  %v6403_v54 = vpop.f32.mrf.mxu1 }
0x1ffe   :  { %7845 = vpow2.f32 %v6838_v44 }
0x1fff   :  { %7847 = vtanh.f32 %v6407_v59 }
0x2000   :  { %7849 = vpow2.f32 %v6839_v40 }
0x2009   :  { %v7844_v18 = vpop.eup %7843 }
0x200a   :  { %v6412_v55 = vadd.f32 1.0, %v7844_v18 }
0x200b   :  { %v7846_v1 = vpop.eup %7845 }
0x200c   :  { %7851 = vrcp.f32 %v6412_v55  ;;  %v6418_v9 = vadd.f32 1.0, %v7846_v1  ;;  %v7848_v60 = vpop.eup %7847 }
0x200d   :  { %v7850_v14 = vpop.eup %7849 }
0x200e   :  { %7853 = vrcp.f32 %v6418_v9  ;;  %v6425_v6 = vadd.f32 1.0, %v7850_v14 }
0x2010   :  { %7855 = vrcp.f32 %v6425_v6 }
0x2019   :  { %v7852_v47 = vpop.eup %7851 }
0x201a   :  { %v6429_v16 = vmul.f32 %v7852_v47, %v7848_v60 }
0x201b   :  { %v7854_v17 = vpop.eup %7853 }
0x201c   :  { %v6428_v51 = vmul.f32 %v7854_v17, %v6313_v53 }
0x201d   :  { %v7856_v36 = vpop.eup %7855 }
0x201e   :  { %v6430_v30 = vadd.f32 %v6429_v16, %v6428_v51 }
0x2020   :  { %7857 = vtanh.f32 %v6430_v30 }
0x202d   :  { %v7858_v0 = vpop.eup %7857 }
0x202e   :  { %v6432_v4 = vmul.f32 %v7858_v0, %v7856_v36 }
0x2030   :  { %6840 = vst [vmem:[%s10662_s8 + $0x38] sm:$0xff] %v6432_v4 }
0x2031   :  { %6439 = vsyncpa [#allocation11], 1 }
0x2032   :  { %6440 = vsyncpa [#allocation13], 1 }
0x2033   :  { %6441 = vsyncmov [#allocation9] }
0x2036   :  { %s6442_s9 = vpop.sfrf %6441 }
0x2037   :  { %p6841_p6 = scmp.ne.s32.totalorder %s6442_s9, 0 }
0x2039   :  { %6446 = shalt.err (%p6841_p6)  }
0x203a   :  { %6448 = vsyncmov [#allocation9 + $0x1] }
0x203d   :  { %s6449_s10 = vpop.sfrf %6448 }
0x203e   :  { %p6842_p7 = scmp.ne.s32.totalorder %s6449_s10, 0 }
0x2040   :  { %6453 = shalt.err (%p6842_p7)  }
0x2041   :  { %6455 = vsyncmov [#allocation9 + $0x2] }
0x2044   :  { %s6456_s11 = vpop.sfrf %6455 }
0x2045   :  { %p6843_p8 = scmp.ne.s32.totalorder %s6456_s11, 0 }
0x2047   :  { %6460 = shalt.err (%p6843_p8)  }

</bundles_post_ra>
